<compile_context>
chip_gen: v7x
topology: tpu7x:2x2x1
jax: 0.10.0
libtpu: 0.0.40
codegen_flags: <defaults>
</compile_context>

<pallas_src>
import jax
import jax.numpy as jnp
from jax.experimental import pallas as pl
from jax.experimental.pallas import tpu as pltpu

# ---------------------------------------------------------------------------
# Static model / problem configuration (compile-time constants).
# ---------------------------------------------------------------------------
D_MODEL = 32
N_HEADS = 4
N_LEVELS = 2
N_POINTS = 2
D_FFN = 64
NUM_LAYERS = 2
LN_EPS = 1e-5

BATCH = 2
NUM_QUERIES = 8
SPATIAL_SHAPES = ((8, 8), (4, 4))                          # (H, W) per level, static
LEVEL_START = (0, SPATIAL_SHAPES[0][0] * SPATIAL_SHAPES[0][1])
S_TOTAL = sum(h * w for h, w in SPATIAL_SHAPES)            # 80

DH = D_MODEL // N_HEADS          # 8
NLP = N_LEVELS * N_POINTS        # 4  (points per head)
NHLP = N_HEADS * NLP             # 16 (total sampling points per query)
M_ROWS = BATCH * NUM_QUERIES     # 16 (flattened batch*query rows)


# ---------------------------------------------------------------------------
# Fused decoder kernel: one grid step == one decoder layer.
# ---------------------------------------------------------------------------
def _decoder_kernel(tgt_ref, pos_ref, ref_ref, src_ref, mask_ref,
                    sa_qkv_ref, sa_out_ref, qmix_ref, vproj_ref, mout_ref,
                    ffn1_ref, ffn2_ref, ln_ref,
                    hs_ref, state_ref):
    lid = pl.program_id(0)

    @pl.when(lid == 0)
    def _():
        state_ref[...] = tgt_ref[...]

    x = state_ref[...]                         # (M, C) running tgt (carried in VMEM)
    pos = pos_ref[...]                         # (M, C)
    ln = ln_ref[0]                             # (6, C): [g2,b2,g1,b1,g3,b3]

    def linear(inp, wb_ref):
        wb = wb_ref[0]                         # (K+1, Nout): last row is the bias
        k = wb.shape[0] - 1
        return jnp.dot(inp, wb[:k, :], preferred_element_type=jnp.float32) + wb[k:, :]

    def layer_norm(y, g_row, b_row):
        mu = jnp.mean(y, axis=-1, keepdims=True)
        var = jnp.mean(jnp.square(y - mu), axis=-1, keepdims=True)
        return (y - mu) * jax.lax.rsqrt(var + LN_EPS) * g_row + b_row

    # ------------------------- self attention -------------------------
    sa_wb = sa_qkv_ref[0]                      # (C+1, 3C): [Wq|Wk|Wv] + bias row
    xp = x + pos
    qk = (jnp.dot(xp, sa_wb[:D_MODEL, :2 * D_MODEL],
                  preferred_element_type=jnp.float32)
          + sa_wb[D_MODEL:, :2 * D_MODEL])                 # (M, 2C)
    v = (jnp.dot(x, sa_wb[:D_MODEL, 2 * D_MODEL:],
                 preferred_element_type=jnp.float32)
         + sa_wb[D_MODEL:, 2 * D_MODEL:])                  # (M, C)
    q = qk[:, :D_MODEL]
    k = qk[:, D_MODEL:]

    scale = 1.0 / (DH ** 0.5)
    sa_rows = []
    for n in range(BATCH):
        r0 = n * NUM_QUERIES
        head_outs = []
        for h in range(N_HEADS):
            c0 = h * DH
            qh = q[r0:r0 + NUM_QUERIES, c0:c0 + DH]
            kh = k[r0:r0 + NUM_QUERIES, c0:c0 + DH]
            vh = v[r0:r0 + NUM_QUERIES, c0:c0 + DH]
            s = jax.lax.dot_general(qh, kh, (((1,), (1,)), ((), ())),
                                    preferred_element_type=jnp.float32) * scale
            s = s - jnp.max(s, axis=-1, keepdims=True)
            p_ = jnp.exp(s)
            p_ = p_ / jnp.sum(p_, axis=-1, keepdims=True)
            head_outs.append(jnp.dot(p_, vh, preferred_element_type=jnp.float32))
        sa_rows.append(jnp.concatenate(head_outs, axis=1))
    attn_out = jnp.concatenate(sa_rows, axis=0)            # (M, C)

    tgt2 = linear(attn_out, sa_out_ref)
    x = layer_norm(x + tgt2, ln[0:1, :], ln[1:2, :])       # norm2

    # -------------- multi-scale deformable cross attention --------------
    # value projection over the whole flattened src, padding mask applied in-kernel
    value = linear(src_ref[...], vproj_ref)                # (N*S, C), VMEM resident
    value = value * (1.0 - mask_ref[...])

    # fused query-side projection: columns = [off_x (16) | off_y (16) | logits (16)],
    # each group in (head, level, point)-major order
    qmix = linear(x + pos, qmix_ref)                       # (M, 48)
    off_x = qmix[:, 0:NHLP]
    off_y = qmix[:, NHLP:2 * NHLP]
    logits = qmix[:, 2 * NHLP:3 * NHLP]

    # per-head softmax over the (level, point) group
    attn_groups = []
    for h in range(N_HEADS):
        g = logits[:, h * NLP:(h + 1) * NLP]
        g = g - jnp.max(g, axis=-1, keepdims=True)
        e = jnp.exp(g)
        attn_groups.append(e / jnp.sum(e, axis=-1, keepdims=True))
    attn = jnp.concatenate(attn_groups, axis=1)            # (M, 16)

    # broadcast reference points / level sizes to the (h, l, p) column layout
    ref = ref_ref[...]                                     # (M, 4): [x_l0, y_l0, x_l1, y_l1]
    blk_x = jnp.concatenate(
        [jnp.concatenate([ref[:, 2 * l:2 * l + 1]] * N_POINTS, axis=1)
         for l in range(N_LEVELS)], axis=1)                # (M, NLP)
    blk_y = jnp.concatenate(
        [jnp.concatenate([ref[:, 2 * l + 1:2 * l + 2]] * N_POINTS, axis=1)
         for l in range(N_LEVELS)], axis=1)
    ref_x = jnp.concatenate([blk_x] * N_HEADS, axis=1)     # (M, 16)
    ref_y = jnp.concatenate([blk_y] * N_HEADS, axis=1)

    w_lane = jnp.concatenate(
        [jnp.full((1, N_POINTS), float(SPATIAL_SHAPES[l][1]), jnp.float32)
         for l in range(N_LEVELS)], axis=1)
    h_lane = jnp.concatenate(
        [jnp.full((1, N_POINTS), float(SPATIAL_SHAPES[l][0]), jnp.float32)
         for l in range(N_LEVELS)], axis=1)
    w_col = jnp.concatenate([w_lane] * N_HEADS, axis=1)    # (1, 16): W_l per column
    h_col = jnp.concatenate([h_lane] * N_HEADS, axis=1)    # (1, 16): H_l per column
    wi = w_col.astype(jnp.int32)
    hi = h_col.astype(jnp.int32)

    # sampling pixel coordinates (grid_sample, align_corners=False, zero padding)
    loc_x = ref_x + off_x / w_col
    loc_y = ref_y + off_y / h_col
    ix = loc_x * w_col - 0.5
    iy = loc_y * h_col - 0.5
    x0f = jnp.floor(ix)
    y0f = jnp.floor(iy)
    lx = ix - x0f
    ly = iy - y0f
    x0 = x0f.astype(jnp.int32)
    y0 = y0f.astype(jnp.int32)
    x1 = x0 + 1
    y1 = y0 + 1

    def corner(xi, yi, wbil):
        valid = (xi >= 0) & (xi <= wi - 1) & (yi >= 0) & (yi <= hi - 1)
        xc = jnp.clip(xi, 0, wi - 1)
        yc = jnp.clip(yi, 0, hi - 1)
        idx = yc * wi + xc                                 # flat index inside the level
        wgt = attn * wbil * valid.astype(jnp.float32)      # attention weight folded in
        return idx, wgt

    corners = [corner(x0, y0, (1.0 - lx) * (1.0 - ly)),
               corner(x1, y0, lx * (1.0 - ly)),
               corner(x0, y1, (1.0 - lx) * ly),
               corner(x1, y1, lx * ly)]

    # bilinear gather + weighted aggregation as tiny one-hot matmuls on VMEM values
    msda_rows = []
    for n in range(BATCH):
        r0 = n * NUM_QUERIES
        head_outs = []
        for h in range(N_HEADS):
            acc = jnp.zeros((NUM_QUERIES, DH), jnp.float32)
            for l in range(N_LEVELS):
                hl, wl = SPATIAL_SHAPES[l]
                sl = hl * wl
                iota_s = jax.lax.broadcasted_iota(jnp.int32, (NUM_QUERIES, sl), 1)
                a_mat = jnp.zeros((NUM_QUERIES, sl), jnp.float32)
                for idx_c, w_c in corners:
                    for p in range(N_POINTS):
                        col = h * NLP + l * N_POINTS + p
                        icol = idx_c[r0:r0 + NUM_QUERIES, col:col + 1]
                        wcol = w_c[r0:r0 + NUM_QUERIES, col:col + 1]
                        a_mat = a_mat + jnp.where(iota_s == icol, wcol, 0.0)
                v_nl = value[n * S_TOTAL + LEVEL_START[l]:
                             n * S_TOTAL + LEVEL_START[l] + sl,
                             h * DH:(h + 1) * DH]
                acc = acc + jnp.dot(a_mat, v_nl, preferred_element_type=jnp.float32)
            head_outs.append(acc)
        msda_rows.append(jnp.concatenate(head_outs, axis=1))
    msda_out = jnp.concatenate(msda_rows, axis=0)          # (M, C)

    tgt2 = linear(msda_out, mout_ref)
    x = layer_norm(x + tgt2, ln[2:3, :], ln[3:4, :])       # norm1

    # ------------------------------ FFN ------------------------------
    hmid = jnp.maximum(linear(x, ffn1_ref), 0.0)
    tgt2 = linear(hmid, ffn2_ref)
    x = layer_norm(x + tgt2, ln[4:5, :], ln[5:6, :])       # norm3

    hs_ref[0] = x
    state_ref[...] = x


# ---------------------------------------------------------------------------
# Parameter packing: PyTorch-style per-layer params -> fused kernel weights.
# ---------------------------------------------------------------------------
def pack_layer_params(p):
    def with_bias(w, b):
        return jnp.concatenate([w, b[None, :]], axis=0)    # bias as last row

    sa_qkv = with_bias(
        jnp.concatenate([p["sa_q_w"], p["sa_k_w"], p["sa_v_w"]], axis=1),
        jnp.concatenate([p["sa_q_b"], p["sa_k_b"], p["sa_v_b"]], axis=0))
    sa_out = with_bias(p["sa_out_w"], p["sa_out_b"])
    # permute sampling-offset output columns into [all x | all y] (each in
    # (head, level, point)-major order) and append attention-weight columns
    # -> one fused (C, 48) query projection (pure column permutation, same math)
    qmix = with_bias(
        jnp.concatenate([p["samp_off_w"][:, 0::2], p["samp_off_w"][:, 1::2],
                         p["attn_w_w"]], axis=1),
        jnp.concatenate([p["samp_off_b"][0::2], p["samp_off_b"][1::2],
                         p["attn_w_b"]], axis=0))
    vproj = with_bias(p["value_proj_w"], p["value_proj_b"])
    mout = with_bias(p["out_proj_w"], p["out_proj_b"])
    ffn1 = with_bias(p["ffn_w1"], p["ffn_b1"])
    ffn2 = with_bias(p["ffn_w2"], p["ffn_b2"])
    ln = jnp.stack([p["norm2_g"], p["norm2_b"], p["norm1_g"], p["norm1_b"],
                    p["norm3_g"], p["norm3_b"]], axis=0)
    return [sa_qkv, sa_out, qmix, vproj, mout, ffn1, ffn2, ln]


# ---------------------------------------------------------------------------
# DeformableTransformerDecoder.forward (single pallas_call for all layers)
# ---------------------------------------------------------------------------
def deformable_transformer_decoder_forward(params_list, tgt, reference_points, src,
                                           src_spatial_shapes, src_level_start_index,
                                           src_valid_ratios, query_pos=None,
                                           src_padding_mask=None):
    # NOTE: src_spatial_shapes / src_level_start_index must match the static
    # SPATIAL_SHAPES / LEVEL_START constants (the gather is specialized on them).
    assert reference_points.shape[-1] == 2
    n_, lq_, c_ = tgt.shape
    s_ = src.shape[1]

    ref_input = (reference_points[:, :, None, :] *
                 src_valid_ratios[:, None, :, :]).reshape(n_ * lq_, N_LEVELS * 2)
    pos2 = (query_pos if query_pos is not None
            else jnp.zeros_like(tgt)).reshape(n_ * lq_, c_)
    mask2 = (src_padding_mask.astype(jnp.float32) if src_padding_mask is not None
             else jnp.zeros((n_, s_), jnp.float32)).reshape(n_ * s_, 1)

    per_layer = [pack_layer_params(p) for p in params_list]
    packed = [jnp.stack([per_layer[l][i] for l in range(NUM_LAYERS)], axis=0)
              for i in range(len(per_layer[0]))]

    data_inputs = [tgt.reshape(n_ * lq_, c_).astype(jnp.float32),
                   pos2.astype(jnp.float32),
                   ref_input.astype(jnp.float32),
                   src.reshape(n_ * s_, c_).astype(jnp.float32),
                   mask2]

    data_specs = [pl.BlockSpec(a.shape, lambda l: (0, 0)) for a in data_inputs]
    weight_specs = [pl.BlockSpec((1,) + w.shape[1:], lambda l: (l, 0, 0))
                    for w in packed]

    hs2 = pl.pallas_call(
        _decoder_kernel,
        grid=(NUM_LAYERS,),
        in_specs=data_specs + weight_specs,
        out_specs=pl.BlockSpec((1, n_ * lq_, c_), lambda l: (l, 0, 0)),
        out_shape=jax.ShapeDtypeStruct((NUM_LAYERS, n_ * lq_, c_), jnp.float32),
        scratch_shapes=[pltpu.VMEM((n_ * lq_, c_), jnp.float32)],
        compiler_params=pltpu.CompilerParams(dimension_semantics=("arbitrary",)),
    )(*data_inputs, *packed)

    hs = hs2.reshape(NUM_LAYERS, n_, lq_, c_)
    # bbox_embed / class_embed / ref_point_embed are None -> reference points are
    # never refined; refine_reference_point just appends them every layer.
    inter_refs = jnp.broadcast_to(reference_points[None],
                                  (NUM_LAYERS,) + reference_points.shape)
    return hs, inter_refs


# ---------------------------------------------------------------------------
# Deterministic synthetic parameters (shapes follow the module's __init__).
# ---------------------------------------------------------------------------
def init_layer_params(key):
    ks = jax.random.split(key, 12)
    d, f = D_MODEL, D_FFN
    nh, nl, npnt = N_HEADS, N_LEVELS, N_POINTS

    def w(k, shape):
        return jax.random.normal(k, shape, jnp.float32) * 0.02

    zeros = lambda n: jnp.zeros((n,), jnp.float32)
    ones = lambda n: jnp.ones((n,), jnp.float32)
    return {
        "sa_q_w": w(ks[0], (d, d)), "sa_q_b": zeros(d),
        "sa_k_w": w(ks[1], (d, d)), "sa_k_b": zeros(d),
        "sa_v_w": w(ks[2], (d, d)), "sa_v_b": zeros(d),
        "sa_out_w": w(ks[3], (d, d)), "sa_out_b": zeros(d),
        "norm1_g": ones(d), "norm1_b": zeros(d),
        "norm2_g": ones(d), "norm2_b": zeros(d),
        "norm3_g": ones(d), "norm3_b": zeros(d),
        "samp_off_w": w(ks[4], (d, nh * nl * npnt * 2)),
        "samp_off_b": w(ks[5], (nh * nl * npnt * 2,)),
        "attn_w_w": w(ks[6], (d, nh * nl * npnt)), "attn_w_b": zeros(nh * nl * npnt),
        "value_proj_w": w(ks[7], (d, d)), "value_proj_b": zeros(d),
        "out_proj_w": w(ks[8], (d, d)), "out_proj_b": zeros(d),
        "ffn_w1": w(ks[9], (d, f)), "ffn_b1": zeros(f),
        "ffn_w2": w(ks[10], (f, d)), "ffn_b2": zeros(d),
    }


# ---------------------------------------------------------------------------
# Main
# ---------------------------------------------------------------------------
if __name__ == "__main__":
    key = jax.random.PRNGKey(0)
    k_params, k_tgt, k_ref, k_src, k_qpos = jax.random.split(key, 5)

    n, lq = BATCH, NUM_QUERIES
    src_spatial_shapes = jnp.array(SPATIAL_SHAPES, dtype=jnp.int32)
    src_level_start_index = jnp.array(LEVEL_START, dtype=jnp.int32)

    tgt = jax.random.normal(k_tgt, (n, lq, D_MODEL), jnp.float32)
    query_pos = jax.random.normal(k_qpos, (n, lq, D_MODEL), jnp.float32)
    reference_points = jax.nn.sigmoid(jax.random.normal(k_ref, (n, lq, 2), jnp.float32))
    src = jax.random.normal(k_src, (n, S_TOTAL, D_MODEL), jnp.float32)
    src_valid_ratios = jnp.ones((n, N_LEVELS, 2), jnp.float32)
    src_padding_mask = jnp.zeros((n, S_TOTAL), jnp.bool_)

    layer_keys = jax.random.split(k_params, NUM_LAYERS)
    params_list = [init_layer_params(k) for k in layer_keys]

    # TODO(synk): dropout layers are identity here (eval-mode forward only).
    hs, inter_refs = deformable_transformer_decoder_forward(
        params_list, tgt, reference_points, src, src_spatial_shapes,
        src_level_start_index, src_valid_ratios, query_pos, src_padding_mask)

    jax.block_until_ready((hs, inter_refs))
    assert hs.shape == (NUM_LAYERS, n, lq, D_MODEL)
    assert inter_refs.shape == (NUM_LAYERS, n, lq, 2)
    assert bool(jnp.all(jnp.isfinite(hs))) and bool(jnp.all(jnp.isfinite(inter_refs)))
    print("KERNEL_OK")
</pallas_src>

<mosaic_0001>
module attributes {stable_mosaic.version = 11 : i64} {
  func.func @_decoder_kernel(%arg0: i32, %arg1: memref<16x32xf32, #tpu.memory_space<vmem>>, %arg2: memref<16x32xf32, #tpu.memory_space<vmem>>, %arg3: memref<16x4xf32, #tpu.memory_space<vmem>>, %arg4: memref<160x32xf32, #tpu.memory_space<vmem>>, %arg5: memref<160x1xf32, #tpu.memory_space<vmem>>, %arg6: memref<1x33x96xf32, #tpu.memory_space<vmem>>, %arg7: memref<1x33x32xf32, #tpu.memory_space<vmem>>, %arg8: memref<1x33x48xf32, #tpu.memory_space<vmem>>, %arg9: memref<1x33x32xf32, #tpu.memory_space<vmem>>, %arg10: memref<1x33x32xf32, #tpu.memory_space<vmem>>, %arg11: memref<1x33x64xf32, #tpu.memory_space<vmem>>, %arg12: memref<1x65x32xf32, #tpu.memory_space<vmem>>, %arg13: memref<1x6x32xf32, #tpu.memory_space<vmem>>, %arg14: memref<1x16x32xf32, #tpu.memory_space<vmem>>, %arg15: memref<16x32xf32, #tpu.memory_space<vmem>>) attributes {dimension_semantics = [#tpu.dimension_semantics<arbitrary>], iteration_bounds = array<i64: 2>, scalar_prefetch = 0 : i64, scratch_operands = 1 : i64, tpu.core_type = #tpu.core_type<tc>, window_params = [{pipeline_mode = #tpu.pipeline_mode<synchronous>, transform_indices = @transform_0, window_bounds = array<i64: 16, 32>}, {pipeline_mode = #tpu.pipeline_mode<synchronous>, transform_indices = @transform_1, window_bounds = array<i64: 16, 32>}, {pipeline_mode = #tpu.pipeline_mode<synchronous>, transform_indices = @transform_2, window_bounds = array<i64: 16, 4>}, {pipeline_mode = #tpu.pipeline_mode<synchronous>, transform_indices = @transform_3, window_bounds = array<i64: 160, 32>}, {pipeline_mode = #tpu.pipeline_mode<synchronous>, transform_indices = @transform_4, window_bounds = array<i64: 160, 1>}, {transform_indices = @transform_5, window_bounds = array<i64: 1, 33, 96>}, {transform_indices = @transform_6, window_bounds = array<i64: 1, 33, 32>}, {transform_indices = @transform_7, window_bounds = array<i64: 1, 33, 48>}, {transform_indices = @transform_8, window_bounds = array<i64: 1, 33, 32>}, {transform_indices = @transform_9, window_bounds = array<i64: 1, 33, 32>}, {transform_indices = @transform_10, window_bounds = array<i64: 1, 33, 64>}, {transform_indices = @transform_11, window_bounds = array<i64: 1, 65, 32>}, {transform_indices = @transform_12, window_bounds = array<i64: 1, 6, 32>}, {transform_indices = @transform_13, window_bounds = array<i64: 1, 16, 32>}]} {
    %c0_i32 = arith.constant 0 : i32
    %0 = arith.cmpi eq, %arg0, %c0_i32 : i32
    %1 = arith.extui %0 : i1 to i32
    %c0_i32_0 = arith.constant 0 : i32
    %2 = arith.cmpi ne, %1, %c0_i32_0 : i32
    scf.if %2 {
      %c0_322 = arith.constant 0 : index
      %c0_323 = arith.constant 0 : index
      %1765 = vector.load %arg1[%c0_322, %c0_323] : memref<16x32xf32, #tpu.memory_space<vmem>>, vector<16x32xf32>
      %c0_324 = arith.constant 0 : index
      %c0_325 = arith.constant 0 : index
      %1766 = vector.load %arg15[%c0_324, %c0_325] : memref<16x32xf32, #tpu.memory_space<vmem>>, vector<16x32xf32>
      tpu.vector_store %arg15[%c0_324, %c0_325], %1765 {strides = array<i32>} : memref<16x32xf32, #tpu.memory_space<vmem>>, vector<16x32xf32>,
    } else {
    }
    %c0 = arith.constant 0 : index
    %c0_1 = arith.constant 0 : index
    %3 = vector.load %arg15[%c0, %c0_1] : memref<16x32xf32, #tpu.memory_space<vmem>>, vector<16x32xf32>
    %c0_2 = arith.constant 0 : index
    %c0_3 = arith.constant 0 : index
    %4 = vector.load %arg2[%c0_2, %c0_3] : memref<16x32xf32, #tpu.memory_space<vmem>>, vector<16x32xf32>
    %c0_4 = arith.constant 0 : index
    %c0_5 = arith.constant 0 : index
    %c0_6 = arith.constant 0 : index
    %5 = vector.load %arg13[%c0_4, %c0_5, %c0_6] : memref<1x6x32xf32, #tpu.memory_space<vmem>>, vector<1x6x32xf32>
    %6 = vector.shape_cast %5 : vector<1x6x32xf32> to vector<6x32xf32>
    %c0_7 = arith.constant 0 : index
    %c0_8 = arith.constant 0 : index
    %c0_9 = arith.constant 0 : index
    %7 = vector.load %arg6[%c0_7, %c0_8, %c0_9] : memref<1x33x96xf32, #tpu.memory_space<vmem>>, vector<1x33x96xf32>
    %8 = vector.shape_cast %7 : vector<1x33x96xf32> to vector<33x96xf32>
    %9 = arith.addf %3, %4 : vector<16x32xf32>
    %10 = vector.extract_strided_slice %8 {offsets = [0, 0], sizes = [32, 64], strides = [1, 1]} : vector<33x96xf32> to vector<32x64xf32>
    %cst = arith.constant dense<0.000000e+00> : vector<16x64xf32>
    %11 = tpu.matmul %9, %10, %cst {dimension_numbers = #tpu.dot_dimension_numbers<[1], [0], [0], [1], [0, 0, 1, 1], [], []>} : vector<16x32xf32>, vector<32x64xf32>, vector<16x64xf32> -> vector<16x64xf32>
    %12 = vector.extract_strided_slice %8 {offsets = [32, 0], sizes = [1, 64], strides = [1, 1]} : vector<33x96xf32> to vector<1x64xf32>
    %13 = vector.broadcast %12 : vector<1x64xf32> to vector<16x64xf32>
    %14 = arith.addf %11, %13 : vector<16x64xf32>
    %15 = vector.extract_strided_slice %8 {offsets = [0, 64], sizes = [32, 32], strides = [1, 1]} : vector<33x96xf32> to vector<32x32xf32>
    %cst_10 = arith.constant dense<0.000000e+00> : vector<16x32xf32>
    %16 = tpu.matmul %3, %15, %cst_10 {dimension_numbers = #tpu.dot_dimension_numbers<[1], [0], [0], [1], [0, 0, 1, 1], [], []>} : vector<16x32xf32>, vector<32x32xf32>, vector<16x32xf32> -> vector<16x32xf32>
    %17 = vector.extract_strided_slice %8 {offsets = [32, 64], sizes = [1, 32], strides = [1, 1]} : vector<33x96xf32> to vector<1x32xf32>
    %18 = vector.broadcast %17 : vector<1x32xf32> to vector<16x32xf32>
    %19 = arith.addf %16, %18 : vector<16x32xf32>
    %20 = vector.extract_strided_slice %14 {offsets = [0, 0], sizes = [16, 32], strides = [1, 1]} : vector<16x64xf32> to vector<16x32xf32>
    %21 = vector.extract_strided_slice %14 {offsets = [0, 32], sizes = [16, 32], strides = [1, 1]} : vector<16x64xf32> to vector<16x32xf32>
    %22 = vector.extract_strided_slice %20 {offsets = [0, 0], sizes = [8, 8], strides = [1, 1]} : vector<16x32xf32> to vector<8x8xf32>
    %23 = vector.extract_strided_slice %21 {offsets = [0, 0], sizes = [8, 8], strides = [1, 1]} : vector<16x32xf32> to vector<8x8xf32>
    %24 = vector.extract_strided_slice %19 {offsets = [0, 0], sizes = [8, 8], strides = [1, 1]} : vector<16x32xf32> to vector<8x8xf32>
    %cst_11 = arith.constant dense<0.000000e+00> : vector<8x8xf32>
    %25 = tpu.matmul %22, %23, %cst_11 {dimension_numbers = #tpu.dot_dimension_numbers<[1], [1], [0], [0], [0, 0, 1, 0], [], []>} : vector<8x8xf32>, vector<8x8xf32>, vector<8x8xf32> -> vector<8x8xf32>
    %cst_12 = arith.constant 0.353553385 : f32
    %26 = vector.broadcast %cst_12 : f32 to vector<8x8xf32>
    %27 = arith.mulf %25, %26 : vector<8x8xf32>
    %cst_13 = arith.constant dense<0xFF800000> : vector<8xf32>
    %28 = vector.multi_reduction <maximumf>, %27, %cst_13 [1] : vector<8x8xf32> to vector<8xf32>
    %29 = vector.shape_cast %28 : vector<8xf32> to vector<8x1xf32>
    %30 = vector.broadcast %29 : vector<8x1xf32> to vector<8x8xf32>
    %31 = arith.subf %27, %30 : vector<8x8xf32>
    %32 = math.exp %31 : vector<8x8xf32>
    %cst_14 = arith.constant dense<0.000000e+00> : vector<8xf32>
    %33 = vector.multi_reduction <add>, %32, %cst_14 [1] : vector<8x8xf32> to vector<8xf32>
    %34 = vector.shape_cast %33 : vector<8xf32> to vector<8x1xf32>
    %35 = vector.broadcast %34 : vector<8x1xf32> to vector<8x8xf32>
    %36 = arith.divf %32, %35 : vector<8x8xf32>
    %cst_15 = arith.constant dense<0.000000e+00> : vector<8x8xf32>
    %37 = tpu.matmul %36, %24, %cst_15 {dimension_numbers = #tpu.dot_dimension_numbers<[1], [0], [0], [1], [0, 0, 1, 1], [], []>} : vector<8x8xf32>, vector<8x8xf32>, vector<8x8xf32> -> vector<8x8xf32>
    %38 = vector.extract_strided_slice %20 {offsets = [0, 8], sizes = [8, 8], strides = [1, 1]} : vector<16x32xf32> to vector<8x8xf32>
    %39 = vector.extract_strided_slice %21 {offsets = [0, 8], sizes = [8, 8], strides = [1, 1]} : vector<16x32xf32> to vector<8x8xf32>
    %40 = vector.extract_strided_slice %19 {offsets = [0, 8], sizes = [8, 8], strides = [1, 1]} : vector<16x32xf32> to vector<8x8xf32>
    %cst_16 = arith.constant dense<0.000000e+00> : vector<8x8xf32>
    %41 = tpu.matmul %38, %39, %cst_16 {dimension_numbers = #tpu.dot_dimension_numbers<[1], [1], [0], [0], [0, 0, 1, 0], [], []>} : vector<8x8xf32>, vector<8x8xf32>, vector<8x8xf32> -> vector<8x8xf32>
    %cst_17 = arith.constant 0.353553385 : f32
    %42 = vector.broadcast %cst_17 : f32 to vector<8x8xf32>
    %43 = arith.mulf %41, %42 : vector<8x8xf32>
    %cst_18 = arith.constant dense<0xFF800000> : vector<8xf32>
    %44 = vector.multi_reduction <maximumf>, %43, %cst_18 [1] : vector<8x8xf32> to vector<8xf32>
    %45 = vector.shape_cast %44 : vector<8xf32> to vector<8x1xf32>
    %46 = vector.broadcast %45 : vector<8x1xf32> to vector<8x8xf32>
    %47 = arith.subf %43, %46 : vector<8x8xf32>
    %48 = math.exp %47 : vector<8x8xf32>
    %cst_19 = arith.constant dense<0.000000e+00> : vector<8xf32>
    %49 = vector.multi_reduction <add>, %48, %cst_19 [1] : vector<8x8xf32> to vector<8xf32>
    %50 = vector.shape_cast %49 : vector<8xf32> to vector<8x1xf32>
    %51 = vector.broadcast %50 : vector<8x1xf32> to vector<8x8xf32>
    %52 = arith.divf %48, %51 : vector<8x8xf32>
    %cst_20 = arith.constant dense<0.000000e+00> : vector<8x8xf32>
    %53 = tpu.matmul %52, %40, %cst_20 {dimension_numbers = #tpu.dot_dimension_numbers<[1], [0], [0], [1], [0, 0, 1, 1], [], []>} : vector<8x8xf32>, vector<8x8xf32>, vector<8x8xf32> -> vector<8x8xf32>
    %54 = vector.extract_strided_slice %20 {offsets = [0, 16], sizes = [8, 8], strides = [1, 1]} : vector<16x32xf32> to vector<8x8xf32>
    %55 = vector.extract_strided_slice %21 {offsets = [0, 16], sizes = [8, 8], strides = [1, 1]} : vector<16x32xf32> to vector<8x8xf32>
    %56 = vector.extract_strided_slice %19 {offsets = [0, 16], sizes = [8, 8], strides = [1, 1]} : vector<16x32xf32> to vector<8x8xf32>
    %cst_21 = arith.constant dense<0.000000e+00> : vector<8x8xf32>
    %57 = tpu.matmul %54, %55, %cst_21 {dimension_numbers = #tpu.dot_dimension_numbers<[1], [1], [0], [0], [0, 0, 1, 0], [], []>} : vector<8x8xf32>, vector<8x8xf32>, vector<8x8xf32> -> vector<8x8xf32>
    %cst_22 = arith.constant 0.353553385 : f32
    %58 = vector.broadcast %cst_22 : f32 to vector<8x8xf32>
    %59 = arith.mulf %57, %58 : vector<8x8xf32>
    %cst_23 = arith.constant dense<0xFF800000> : vector<8xf32>
    %60 = vector.multi_reduction <maximumf>, %59, %cst_23 [1] : vector<8x8xf32> to vector<8xf32>
    %61 = vector.shape_cast %60 : vector<8xf32> to vector<8x1xf32>
    %62 = vector.broadcast %61 : vector<8x1xf32> to vector<8x8xf32>
    %63 = arith.subf %59, %62 : vector<8x8xf32>
    %64 = math.exp %63 : vector<8x8xf32>
    %cst_24 = arith.constant dense<0.000000e+00> : vector<8xf32>
    %65 = vector.multi_reduction <add>, %64, %cst_24 [1] : vector<8x8xf32> to vector<8xf32>
    %66 = vector.shape_cast %65 : vector<8xf32> to vector<8x1xf32>
    %67 = vector.broadcast %66 : vector<8x1xf32> to vector<8x8xf32>
    %68 = arith.divf %64, %67 : vector<8x8xf32>
    %cst_25 = arith.constant dense<0.000000e+00> : vector<8x8xf32>
    %69 = tpu.matmul %68, %56, %cst_25 {dimension_numbers = #tpu.dot_dimension_numbers<[1], [0], [0], [1], [0, 0, 1, 1], [], []>} : vector<8x8xf32>, vector<8x8xf32>, vector<8x8xf32> -> vector<8x8xf32>
    %70 = vector.extract_strided_slice %20 {offsets = [0, 24], sizes = [8, 8], strides = [1, 1]} : vector<16x32xf32> to vector<8x8xf32>
    %71 = vector.extract_strided_slice %21 {offsets = [0, 24], sizes = [8, 8], strides = [1, 1]} : vector<16x32xf32> to vector<8x8xf32>
    %72 = vector.extract_strided_slice %19 {offsets = [0, 24], sizes = [8, 8], strides = [1, 1]} : vector<16x32xf32> to vector<8x8xf32>
    %cst_26 = arith.constant dense<0.000000e+00> : vector<8x8xf32>
    %73 = tpu.matmul %70, %71, %cst_26 {dimension_numbers = #tpu.dot_dimension_numbers<[1], [1], [0], [0], [0, 0, 1, 0], [], []>} : vector<8x8xf32>, vector<8x8xf32>, vector<8x8xf32> -> vector<8x8xf32>
    %cst_27 = arith.constant 0.353553385 : f32
    %74 = vector.broadcast %cst_27 : f32 to vector<8x8xf32>
    %75 = arith.mulf %73, %74 : vector<8x8xf32>
    %cst_28 = arith.constant dense<0xFF800000> : vector<8xf32>
    %76 = vector.multi_reduction <maximumf>, %75, %cst_28 [1] : vector<8x8xf32> to vector<8xf32>
    %77 = vector.shape_cast %76 : vector<8xf32> to vector<8x1xf32>
    %78 = vector.broadcast %77 : vector<8x1xf32> to vector<8x8xf32>
    %79 = arith.subf %75, %78 : vector<8x8xf32>
    %80 = math.exp %79 : vector<8x8xf32>
    %cst_29 = arith.constant dense<0.000000e+00> : vector<8xf32>
    %81 = vector.multi_reduction <add>, %80, %cst_29 [1] : vector<8x8xf32> to vector<8xf32>
    %82 = vector.shape_cast %81 : vector<8xf32> to vector<8x1xf32>
    %83 = vector.broadcast %82 : vector<8x1xf32> to vector<8x8xf32>
    %84 = arith.divf %80, %83 : vector<8x8xf32>
    %cst_30 = arith.constant dense<0.000000e+00> : vector<8x8xf32>
    %85 = tpu.matmul %84, %72, %cst_30 {dimension_numbers = #tpu.dot_dimension_numbers<[1], [0], [0], [1], [0, 0, 1, 1], [], []>} : vector<8x8xf32>, vector<8x8xf32>, vector<8x8xf32> -> vector<8x8xf32>
    %86 = tpu.concatenate %37, %53, %69, %85 in 1 : vector<8x8xf32>, vector<8x8xf32>, vector<8x8xf32>, vector<8x8xf32> -> vector<8x32xf32>
    %87 = vector.extract_strided_slice %20 {offsets = [8, 0], sizes = [8, 8], strides = [1, 1]} : vector<16x32xf32> to vector<8x8xf32>
    %88 = vector.extract_strided_slice %21 {offsets = [8, 0], sizes = [8, 8], strides = [1, 1]} : vector<16x32xf32> to vector<8x8xf32>
    %89 = vector.extract_strided_slice %19 {offsets = [8, 0], sizes = [8, 8], strides = [1, 1]} : vector<16x32xf32> to vector<8x8xf32>
    %cst_31 = arith.constant dense<0.000000e+00> : vector<8x8xf32>
    %90 = tpu.matmul %87, %88, %cst_31 {dimension_numbers = #tpu.dot_dimension_numbers<[1], [1], [0], [0], [0, 0, 1, 0], [], []>} : vector<8x8xf32>, vector<8x8xf32>, vector<8x8xf32> -> vector<8x8xf32>
    %cst_32 = arith.constant 0.353553385 : f32
    %91 = vector.broadcast %cst_32 : f32 to vector<8x8xf32>
    %92 = arith.mulf %90, %91 : vector<8x8xf32>
    %cst_33 = arith.constant dense<0xFF800000> : vector<8xf32>
    %93 = vector.multi_reduction <maximumf>, %92, %cst_33 [1] : vector<8x8xf32> to vector<8xf32>
    %94 = vector.shape_cast %93 : vector<8xf32> to vector<8x1xf32>
    %95 = vector.broadcast %94 : vector<8x1xf32> to vector<8x8xf32>
    %96 = arith.subf %92, %95 : vector<8x8xf32>
    %97 = math.exp %96 : vector<8x8xf32>
    %cst_34 = arith.constant dense<0.000000e+00> : vector<8xf32>
    %98 = vector.multi_reduction <add>, %97, %cst_34 [1] : vector<8x8xf32> to vector<8xf32>
    %99 = vector.shape_cast %98 : vector<8xf32> to vector<8x1xf32>
    %100 = vector.broadcast %99 : vector<8x1xf32> to vector<8x8xf32>
    %101 = arith.divf %97, %100 : vector<8x8xf32>
    %cst_35 = arith.constant dense<0.000000e+00> : vector<8x8xf32>
    %102 = tpu.matmul %101, %89, %cst_35 {dimension_numbers = #tpu.dot_dimension_numbers<[1], [0], [0], [1], [0, 0, 1, 1], [], []>} : vector<8x8xf32>, vector<8x8xf32>, vector<8x8xf32> -> vector<8x8xf32>
    %103 = vector.extract_strided_slice %20 {offsets = [8, 8], sizes = [8, 8], strides = [1, 1]} : vector<16x32xf32> to vector<8x8xf32>
    %104 = vector.extract_strided_slice %21 {offsets = [8, 8], sizes = [8, 8], strides = [1, 1]} : vector<16x32xf32> to vector<8x8xf32>
    %105 = vector.extract_strided_slice %19 {offsets = [8, 8], sizes = [8, 8], strides = [1, 1]} : vector<16x32xf32> to vector<8x8xf32>
    %cst_36 = arith.constant dense<0.000000e+00> : vector<8x8xf32>
    %106 = tpu.matmul %103, %104, %cst_36 {dimension_numbers = #tpu.dot_dimension_numbers<[1], [1], [0], [0], [0, 0, 1, 0], [], []>} : vector<8x8xf32>, vector<8x8xf32>, vector<8x8xf32> -> vector<8x8xf32>
    %cst_37 = arith.constant 0.353553385 : f32
    %107 = vector.broadcast %cst_37 : f32 to vector<8x8xf32>
    %108 = arith.mulf %106, %107 : vector<8x8xf32>
    %cst_38 = arith.constant dense<0xFF800000> : vector<8xf32>
    %109 = vector.multi_reduction <maximumf>, %108, %cst_38 [1] : vector<8x8xf32> to vector<8xf32>
    %110 = vector.shape_cast %109 : vector<8xf32> to vector<8x1xf32>
    %111 = vector.broadcast %110 : vector<8x1xf32> to vector<8x8xf32>
    %112 = arith.subf %108, %111 : vector<8x8xf32>
    %113 = math.exp %112 : vector<8x8xf32>
    %cst_39 = arith.constant dense<0.000000e+00> : vector<8xf32>
    %114 = vector.multi_reduction <add>, %113, %cst_39 [1] : vector<8x8xf32> to vector<8xf32>
    %115 = vector.shape_cast %114 : vector<8xf32> to vector<8x1xf32>
    %116 = vector.broadcast %115 : vector<8x1xf32> to vector<8x8xf32>
    %117 = arith.divf %113, %116 : vector<8x8xf32>
    %cst_40 = arith.constant dense<0.000000e+00> : vector<8x8xf32>
    %118 = tpu.matmul %117, %105, %cst_40 {dimension_numbers = #tpu.dot_dimension_numbers<[1], [0], [0], [1], [0, 0, 1, 1], [], []>} : vector<8x8xf32>, vector<8x8xf32>, vector<8x8xf32> -> vector<8x8xf32>
    %119 = vector.extract_strided_slice %20 {offsets = [8, 16], sizes = [8, 8], strides = [1, 1]} : vector<16x32xf32> to vector<8x8xf32>
    %120 = vector.extract_strided_slice %21 {offsets = [8, 16], sizes = [8, 8], strides = [1, 1]} : vector<16x32xf32> to vector<8x8xf32>
    %121 = vector.extract_strided_slice %19 {offsets = [8, 16], sizes = [8, 8], strides = [1, 1]} : vector<16x32xf32> to vector<8x8xf32>
    %cst_41 = arith.constant dense<0.000000e+00> : vector<8x8xf32>
    %122 = tpu.matmul %119, %120, %cst_41 {dimension_numbers = #tpu.dot_dimension_numbers<[1], [1], [0], [0], [0, 0, 1, 0], [], []>} : vector<8x8xf32>, vector<8x8xf32>, vector<8x8xf32> -> vector<8x8xf32>
    %cst_42 = arith.constant 0.353553385 : f32
    %123 = vector.broadcast %cst_42 : f32 to vector<8x8xf32>
    %124 = arith.mulf %122, %123 : vector<8x8xf32>
    %cst_43 = arith.constant dense<0xFF800000> : vector<8xf32>
    %125 = vector.multi_reduction <maximumf>, %124, %cst_43 [1] : vector<8x8xf32> to vector<8xf32>
    %126 = vector.shape_cast %125 : vector<8xf32> to vector<8x1xf32>
    %127 = vector.broadcast %126 : vector<8x1xf32> to vector<8x8xf32>
    %128 = arith.subf %124, %127 : vector<8x8xf32>
    %129 = math.exp %128 : vector<8x8xf32>
    %cst_44 = arith.constant dense<0.000000e+00> : vector<8xf32>
    %130 = vector.multi_reduction <add>, %129, %cst_44 [1] : vector<8x8xf32> to vector<8xf32>
    %131 = vector.shape_cast %130 : vector<8xf32> to vector<8x1xf32>
    %132 = vector.broadcast %131 : vector<8x1xf32> to vector<8x8xf32>
    %133 = arith.divf %129, %132 : vector<8x8xf32>
    %cst_45 = arith.constant dense<0.000000e+00> : vector<8x8xf32>
    %134 = tpu.matmul %133, %121, %cst_45 {dimension_numbers = #tpu.dot_dimension_numbers<[1], [0], [0], [1], [0, 0, 1, 1], [], []>} : vector<8x8xf32>, vector<8x8xf32>, vector<8x8xf32> -> vector<8x8xf32>
    %135 = vector.extract_strided_slice %20 {offsets = [8, 24], sizes = [8, 8], strides = [1, 1]} : vector<16x32xf32> to vector<8x8xf32>
    %136 = vector.extract_strided_slice %21 {offsets = [8, 24], sizes = [8, 8], strides = [1, 1]} : vector<16x32xf32> to vector<8x8xf32>
    %137 = vector.extract_strided_slice %19 {offsets = [8, 24], sizes = [8, 8], strides = [1, 1]} : vector<16x32xf32> to vector<8x8xf32>
    %cst_46 = arith.constant dense<0.000000e+00> : vector<8x8xf32>
    %138 = tpu.matmul %135, %136, %cst_46 {dimension_numbers = #tpu.dot_dimension_numbers<[1], [1], [0], [0], [0, 0, 1, 0], [], []>} : vector<8x8xf32>, vector<8x8xf32>, vector<8x8xf32> -> vector<8x8xf32>
    %cst_47 = arith.constant 0.353553385 : f32
    %139 = vector.broadcast %cst_47 : f32 to vector<8x8xf32>
    %140 = arith.mulf %138, %139 : vector<8x8xf32>
    %cst_48 = arith.constant dense<0xFF800000> : vector<8xf32>
    %141 = vector.multi_reduction <maximumf>, %140, %cst_48 [1] : vector<8x8xf32> to vector<8xf32>
    %142 = vector.shape_cast %141 : vector<8xf32> to vector<8x1xf32>
    %143 = vector.broadcast %142 : vector<8x1xf32> to vector<8x8xf32>
    %144 = arith.subf %140, %143 : vector<8x8xf32>
    %145 = math.exp %144 : vector<8x8xf32>
    %cst_49 = arith.constant dense<0.000000e+00> : vector<8xf32>
    %146 = vector.multi_reduction <add>, %145, %cst_49 [1] : vector<8x8xf32> to vector<8xf32>
    %147 = vector.shape_cast %146 : vector<8xf32> to vector<8x1xf32>
    %148 = vector.broadcast %147 : vector<8x1xf32> to vector<8x8xf32>
    %149 = arith.divf %145, %148 : vector<8x8xf32>
    %cst_50 = arith.constant dense<0.000000e+00> : vector<8x8xf32>
    %150 = tpu.matmul %149, %137, %cst_50 {dimension_numbers = #tpu.dot_dimension_numbers<[1], [0], [0], [1], [0, 0, 1, 1], [], []>} : vector<8x8xf32>, vector<8x8xf32>, vector<8x8xf32> -> vector<8x8xf32>
    %151 = tpu.concatenate %102, %118, %134, %150 in 1 : vector<8x8xf32>, vector<8x8xf32>, vector<8x8xf32>, vector<8x8xf32> -> vector<8x32xf32>
    %152 = tpu.concatenate %86, %151 in 0 : vector<8x32xf32>, vector<8x32xf32> -> vector<16x32xf32>
    %c0_51 = arith.constant 0 : index
    %c0_52 = arith.constant 0 : index
    %c0_53 = arith.constant 0 : index
    %153 = vector.load %arg7[%c0_51, %c0_52, %c0_53] : memref<1x33x32xf32, #tpu.memory_space<vmem>>, vector<1x33x32xf32>
    %154 = vector.shape_cast %153 : vector<1x33x32xf32> to vector<33x32xf32>
    %155 = vector.extract_strided_slice %154 {offsets = [0, 0], sizes = [32, 32], strides = [1, 1]} : vector<33x32xf32> to vector<32x32xf32>
    %cst_54 = arith.constant dense<0.000000e+00> : vector<16x32xf32>
    %156 = tpu.matmul %152, %155, %cst_54 {dimension_numbers = #tpu.dot_dimension_numbers<[1], [0], [0], [1], [0, 0, 1, 1], [], []>} : vector<16x32xf32>, vector<32x32xf32>, vector<16x32xf32> -> vector<16x32xf32>
    %157 = vector.extract_strided_slice %154 {offsets = [32, 0], sizes = [1, 32], strides = [1, 1]} : vector<33x32xf32> to vector<1x32xf32>
    %158 = vector.broadcast %157 : vector<1x32xf32> to vector<16x32xf32>
    %159 = arith.addf %156, %158 : vector<16x32xf32>
    %160 = arith.addf %3, %159 : vector<16x32xf32>
    %161 = vector.extract_strided_slice %6 {offsets = [0, 0], sizes = [1, 32], strides = [1, 1]} : vector<6x32xf32> to vector<1x32xf32>
    %162 = vector.extract_strided_slice %6 {offsets = [1, 0], sizes = [1, 32], strides = [1, 1]} : vector<6x32xf32> to vector<1x32xf32>
    %cst_55 = arith.constant dense<0.000000e+00> : vector<16xf32>
    %163 = vector.multi_reduction <add>, %160, %cst_55 [1] : vector<16x32xf32> to vector<16xf32>
    %164 = vector.shape_cast %163 : vector<16xf32> to vector<16x1xf32>
    %cst_56 = arith.constant 3.200000e+01 : f32
    %165 = vector.broadcast %cst_56 : f32 to vector<16x1xf32>
    %166 = arith.divf %164, %165 : vector<16x1xf32>
    %167 = vector.broadcast %166 : vector<16x1xf32> to vector<16x32xf32>
    %168 = arith.subf %160, %167 : vector<16x32xf32>
    %169 = arith.mulf %168, %168 : vector<16x32xf32>
    %cst_57 = arith.constant dense<0.000000e+00> : vector<16xf32>
    %170 = vector.multi_reduction <add>, %169, %cst_57 [1] : vector<16x32xf32> to vector<16xf32>
    %171 = vector.shape_cast %170 : vector<16xf32> to vector<16x1xf32>
    %cst_58 = arith.constant 3.200000e+01 : f32
    %172 = vector.broadcast %cst_58 : f32 to vector<16x1xf32>
    %173 = arith.divf %171, %172 : vector<16x1xf32>
    %174 = vector.broadcast %166 : vector<16x1xf32> to vector<16x32xf32>
    %175 = arith.subf %160, %174 : vector<16x32xf32>
    %cst_59 = arith.constant 9.99999974E-6 : f32
    %176 = vector.broadcast %cst_59 : f32 to vector<16x1xf32>
    %177 = arith.addf %173, %176 : vector<16x1xf32>
    %178 = math.rsqrt %177 : vector<16x1xf32>
    %179 = vector.broadcast %178 : vector<16x1xf32> to vector<16x32xf32>
    %180 = arith.mulf %175, %179 : vector<16x32xf32>
    %181 = vector.broadcast %161 : vector<1x32xf32> to vector<16x32xf32>
    %182 = arith.mulf %180, %181 : vector<16x32xf32>
    %183 = vector.broadcast %162 : vector<1x32xf32> to vector<16x32xf32>
    %184 = arith.addf %182, %183 : vector<16x32xf32>
    %c0_60 = arith.constant 0 : index
    %c0_61 = arith.constant 0 : index
    %185 = vector.load %arg4[%c0_60, %c0_61] : memref<160x32xf32, #tpu.memory_space<vmem>>, vector<160x32xf32>
    %c0_62 = arith.constant 0 : index
    %c0_63 = arith.constant 0 : index
    %c0_64 = arith.constant 0 : index
    %186 = vector.load %arg9[%c0_62, %c0_63, %c0_64] : memref<1x33x32xf32, #tpu.memory_space<vmem>>, vector<1x33x32xf32>
    %187 = vector.shape_cast %186 : vector<1x33x32xf32> to vector<33x32xf32>
    %188 = vector.extract_strided_slice %187 {offsets = [0, 0], sizes = [32, 32], strides = [1, 1]} : vector<33x32xf32> to vector<32x32xf32>
    %cst_65 = arith.constant dense<0.000000e+00> : vector<160x32xf32>
    %189 = tpu.matmul %185, %188, %cst_65 {dimension_numbers = #tpu.dot_dimension_numbers<[1], [0], [0], [1], [0, 0, 1, 1], [], []>} : vector<160x32xf32>, vector<32x32xf32>, vector<160x32xf32> -> vector<160x32xf32>
    %190 = vector.extract_strided_slice %187 {offsets = [32, 0], sizes = [1, 32], strides = [1, 1]} : vector<33x32xf32> to vector<1x32xf32>
    %191 = vector.broadcast %190 : vector<1x32xf32> to vector<160x32xf32>
    %192 = arith.addf %189, %191 : vector<160x32xf32>
    %c0_66 = arith.constant 0 : index
    %c0_67 = arith.constant 0 : index
    %193 = vector.load %arg5[%c0_66, %c0_67] : memref<160x1xf32, #tpu.memory_space<vmem>>, vector<160x1xf32>
    %cst_68 = arith.constant 1.000000e+00 : f32
    %194 = vector.broadcast %cst_68 : f32 to vector<160x1xf32>
    %195 = arith.subf %194, %193 : vector<160x1xf32>
    %196 = vector.broadcast %195 : vector<160x1xf32> to vector<160x32xf32>
    %197 = arith.mulf %192, %196 : vector<160x32xf32>
    %198 = arith.addf %184, %4 : vector<16x32xf32>
    %c0_69 = arith.constant 0 : index
    %c0_70 = arith.constant 0 : index
    %c0_71 = arith.constant 0 : index
    %199 = vector.load %arg8[%c0_69, %c0_70, %c0_71] : memref<1x33x48xf32, #tpu.memory_space<vmem>>, vector<1x33x48xf32>
    %200 = vector.shape_cast %199 : vector<1x33x48xf32> to vector<33x48xf32>
    %201 = vector.extract_strided_slice %200 {offsets = [0, 0], sizes = [32, 48], strides = [1, 1]} : vector<33x48xf32> to vector<32x48xf32>
    %cst_72 = arith.constant dense<0.000000e+00> : vector<16x48xf32>
    %202 = tpu.matmul %198, %201, %cst_72 {dimension_numbers = #tpu.dot_dimension_numbers<[1], [0], [0], [1], [0, 0, 1, 1], [], []>} : vector<16x32xf32>, vector<32x48xf32>, vector<16x48xf32> -> vector<16x48xf32>
    %203 = vector.extract_strided_slice %200 {offsets = [32, 0], sizes = [1, 48], strides = [1, 1]} : vector<33x48xf32> to vector<1x48xf32>
    %204 = vector.broadcast %203 : vector<1x48xf32> to vector<16x48xf32>
    %205 = arith.addf %202, %204 : vector<16x48xf32>
    %206 = vector.extract_strided_slice %205 {offsets = [0, 0], sizes = [16, 16], strides = [1, 1]} : vector<16x48xf32> to vector<16x16xf32>
    %207 = vector.extract_strided_slice %205 {offsets = [0, 16], sizes = [16, 16], strides = [1, 1]} : vector<16x48xf32> to vector<16x16xf32>
    %208 = vector.extract_strided_slice %205 {offsets = [0, 32], sizes = [16, 16], strides = [1, 1]} : vector<16x48xf32> to vector<16x16xf32>
    %209 = vector.extract_strided_slice %208 {offsets = [0, 0], sizes = [16, 4], strides = [1, 1]} : vector<16x16xf32> to vector<16x4xf32>
    %cst_73 = arith.constant dense<0xFF800000> : vector<16xf32>
    %210 = vector.multi_reduction <maximumf>, %209, %cst_73 [1] : vector<16x4xf32> to vector<16xf32>
    %211 = vector.shape_cast %210 : vector<16xf32> to vector<16x1xf32>
    %212 = vector.broadcast %211 : vector<16x1xf32> to vector<16x4xf32>
    %213 = arith.subf %209, %212 : vector<16x4xf32>
    %214 = math.exp %213 : vector<16x4xf32>
    %cst_74 = arith.constant dense<0.000000e+00> : vector<16xf32>
    %215 = vector.multi_reduction <add>, %214, %cst_74 [1] : vector<16x4xf32> to vector<16xf32>
    %216 = vector.shape_cast %215 : vector<16xf32> to vector<16x1xf32>
    %217 = vector.broadcast %216 : vector<16x1xf32> to vector<16x4xf32>
    %218 = arith.divf %214, %217 : vector<16x4xf32>
    %219 = vector.extract_strided_slice %208 {offsets = [0, 4], sizes = [16, 4], strides = [1, 1]} : vector<16x16xf32> to vector<16x4xf32>
    %cst_75 = arith.constant dense<0xFF800000> : vector<16xf32>
    %220 = vector.multi_reduction <maximumf>, %219, %cst_75 [1] : vector<16x4xf32> to vector<16xf32>
    %221 = vector.shape_cast %220 : vector<16xf32> to vector<16x1xf32>
    %222 = vector.broadcast %221 : vector<16x1xf32> to vector<16x4xf32>
    %223 = arith.subf %219, %222 : vector<16x4xf32>
    %224 = math.exp %223 : vector<16x4xf32>
    %cst_76 = arith.constant dense<0.000000e+00> : vector<16xf32>
    %225 = vector.multi_reduction <add>, %224, %cst_76 [1] : vector<16x4xf32> to vector<16xf32>
    %226 = vector.shape_cast %225 : vector<16xf32> to vector<16x1xf32>
    %227 = vector.broadcast %226 : vector<16x1xf32> to vector<16x4xf32>
    %228 = arith.divf %224, %227 : vector<16x4xf32>
    %229 = vector.extract_strided_slice %208 {offsets = [0, 8], sizes = [16, 4], strides = [1, 1]} : vector<16x16xf32> to vector<16x4xf32>
    %cst_77 = arith.constant dense<0xFF800000> : vector<16xf32>
    %230 = vector.multi_reduction <maximumf>, %229, %cst_77 [1] : vector<16x4xf32> to vector<16xf32>
    %231 = vector.shape_cast %230 : vector<16xf32> to vector<16x1xf32>
    %232 = vector.broadcast %231 : vector<16x1xf32> to vector<16x4xf32>
    %233 = arith.subf %229, %232 : vector<16x4xf32>
    %234 = math.exp %233 : vector<16x4xf32>
    %cst_78 = arith.constant dense<0.000000e+00> : vector<16xf32>
    %235 = vector.multi_reduction <add>, %234, %cst_78 [1] : vector<16x4xf32> to vector<16xf32>
    %236 = vector.shape_cast %235 : vector<16xf32> to vector<16x1xf32>
    %237 = vector.broadcast %236 : vector<16x1xf32> to vector<16x4xf32>
    %238 = arith.divf %234, %237 : vector<16x4xf32>
    %239 = vector.extract_strided_slice %208 {offsets = [0, 12], sizes = [16, 4], strides = [1, 1]} : vector<16x16xf32> to vector<16x4xf32>
    %cst_79 = arith.constant dense<0xFF800000> : vector<16xf32>
    %240 = vector.multi_reduction <maximumf>, %239, %cst_79 [1] : vector<16x4xf32> to vector<16xf32>
    %241 = vector.shape_cast %240 : vector<16xf32> to vector<16x1xf32>
    %242 = vector.broadcast %241 : vector<16x1xf32> to vector<16x4xf32>
    %243 = arith.subf %239, %242 : vector<16x4xf32>
    %244 = math.exp %243 : vector<16x4xf32>
    %cst_80 = arith.constant dense<0.000000e+00> : vector<16xf32>
    %245 = vector.multi_reduction <add>, %244, %cst_80 [1] : vector<16x4xf32> to vector<16xf32>
    %246 = vector.shape_cast %245 : vector<16xf32> to vector<16x1xf32>
    %247 = vector.broadcast %246 : vector<16x1xf32> to vector<16x4xf32>
    %248 = arith.divf %244, %247 : vector<16x4xf32>
    %249 = tpu.concatenate %218, %228, %238, %248 in 1 : vector<16x4xf32>, vector<16x4xf32>, vector<16x4xf32>, vector<16x4xf32> -> vector<16x16xf32>
    %c0_81 = arith.constant 0 : index
    %c0_82 = arith.constant 0 : index
    %250 = vector.load %arg3[%c0_81, %c0_82] : memref<16x4xf32, #tpu.memory_space<vmem>>, vector<16x4xf32>
    %251 = vector.extract_strided_slice %250 {offsets = [0, 0], sizes = [16, 1], strides = [1, 1]} : vector<16x4xf32> to vector<16x1xf32>
    %252 = tpu.concatenate %251, %251 in 1 : vector<16x1xf32>, vector<16x1xf32> -> vector<16x2xf32>
    %253 = vector.extract_strided_slice %250 {offsets = [0, 2], sizes = [16, 1], strides = [1, 1]} : vector<16x4xf32> to vector<16x1xf32>
    %254 = tpu.concatenate %253, %253 in 1 : vector<16x1xf32>, vector<16x1xf32> -> vector<16x2xf32>
    %255 = tpu.concatenate %252, %254 in 1 : vector<16x2xf32>, vector<16x2xf32> -> vector<16x4xf32>
    %256 = vector.extract_strided_slice %250 {offsets = [0, 1], sizes = [16, 1], strides = [1, 1]} : vector<16x4xf32> to vector<16x1xf32>
    %257 = tpu.concatenate %256, %256 in 1 : vector<16x1xf32>, vector<16x1xf32> -> vector<16x2xf32>
    %258 = vector.extract_strided_slice %250 {offsets = [0, 3], sizes = [16, 1], strides = [1, 1]} : vector<16x4xf32> to vector<16x1xf32>
    %259 = tpu.concatenate %258, %258 in 1 : vector<16x1xf32>, vector<16x1xf32> -> vector<16x2xf32>
    %260 = tpu.concatenate %257, %259 in 1 : vector<16x2xf32>, vector<16x2xf32> -> vector<16x4xf32>
    %261 = tpu.concatenate %255, %255, %255, %255 in 1 : vector<16x4xf32>, vector<16x4xf32>, vector<16x4xf32>, vector<16x4xf32> -> vector<16x16xf32>
    %262 = tpu.concatenate %260, %260, %260, %260 in 1 : vector<16x4xf32>, vector<16x4xf32>, vector<16x4xf32>, vector<16x4xf32> -> vector<16x16xf32>
    %cst_83 = arith.constant 8.000000e+00 : f32
    %263 = vector.broadcast %cst_83 : f32 to vector<1x2xf32>
    %cst_84 = arith.constant 4.000000e+00 : f32
    %264 = vector.broadcast %cst_84 : f32 to vector<1x2xf32>
    %265 = tpu.concatenate %263, %264 in 1 : vector<1x2xf32>, vector<1x2xf32> -> vector<1x4xf32>
    %cst_85 = arith.constant 8.000000e+00 : f32
    %266 = vector.broadcast %cst_85 : f32 to vector<1x2xf32>
    %cst_86 = arith.constant 4.000000e+00 : f32
    %267 = vector.broadcast %cst_86 : f32 to vector<1x2xf32>
    %268 = tpu.concatenate %266, %267 in 1 : vector<1x2xf32>, vector<1x2xf32> -> vector<1x4xf32>
    %269 = tpu.concatenate %265, %265, %265, %265 in 1 : vector<1x4xf32>, vector<1x4xf32>, vector<1x4xf32>, vector<1x4xf32> -> vector<1x16xf32>
    %270 = tpu.concatenate %268, %268, %268, %268 in 1 : vector<1x4xf32>, vector<1x4xf32>, vector<1x4xf32>, vector<1x4xf32> -> vector<1x16xf32>
    %271 = arith.fptosi %269 : vector<1x16xf32> to vector<1x16xi32>
    %272 = arith.fptosi %270 : vector<1x16xf32> to vector<1x16xi32>
    %273 = vector.broadcast %269 : vector<1x16xf32> to vector<16x16xf32>
    %274 = arith.divf %206, %273 : vector<16x16xf32>
    %275 = arith.addf %261, %274 : vector<16x16xf32>
    %276 = vector.broadcast %270 : vector<1x16xf32> to vector<16x16xf32>
    %277 = arith.divf %207, %276 : vector<16x16xf32>
    %278 = arith.addf %262, %277 : vector<16x16xf32>
    %279 = vector.broadcast %269 : vector<1x16xf32> to vector<16x16xf32>
    %280 = arith.mulf %275, %279 : vector<16x16xf32>
    %cst_87 = arith.constant 5.000000e-01 : f32
    %281 = vector.broadcast %cst_87 : f32 to vector<16x16xf32>
    %282 = arith.subf %280, %281 : vector<16x16xf32>
    %283 = vector.broadcast %270 : vector<1x16xf32> to vector<16x16xf32>
    %284 = arith.mulf %278, %283 : vector<16x16xf32>
    %cst_88 = arith.constant 5.000000e-01 : f32
    %285 = vector.broadcast %cst_88 : f32 to vector<16x16xf32>
    %286 = arith.subf %284, %285 : vector<16x16xf32>
    %287 = math.floor %282 : vector<16x16xf32>
    %288 = math.floor %286 : vector<16x16xf32>
    %289 = arith.subf %282, %287 : vector<16x16xf32>
    %290 = arith.subf %286, %288 : vector<16x16xf32>
    %291 = arith.fptosi %287 : vector<16x16xf32> to vector<16x16xi32>
    %292 = arith.fptosi %288 : vector<16x16xf32> to vector<16x16xi32>
    %c1_i32 = arith.constant 1 : i32
    %293 = vector.broadcast %c1_i32 : i32 to vector<16x16xi32>
    %294 = arith.addi %291, %293 : vector<16x16xi32>
    %c1_i32_89 = arith.constant 1 : i32
    %295 = vector.broadcast %c1_i32_89 : i32 to vector<16x16xi32>
    %296 = arith.addi %292, %295 : vector<16x16xi32>
    %cst_90 = arith.constant 1.000000e+00 : f32
    %297 = vector.broadcast %cst_90 : f32 to vector<16x16xf32>
    %298 = arith.subf %297, %289 : vector<16x16xf32>
    %cst_91 = arith.constant 1.000000e+00 : f32
    %299 = vector.broadcast %cst_91 : f32 to vector<16x16xf32>
    %300 = arith.subf %299, %290 : vector<16x16xf32>
    %301 = arith.mulf %298, %300 : vector<16x16xf32>
    %c0_i32_92 = arith.constant 0 : i32
    %302 = vector.broadcast %c0_i32_92 : i32 to vector<16x16xi32>
    %303 = arith.cmpi sge, %291, %302 : vector<16x16xi32>
    %c1_i32_93 = arith.constant 1 : i32
    %304 = vector.broadcast %c1_i32_93 : i32 to vector<1x16xi32>
    %305 = arith.subi %271, %304 : vector<1x16xi32>
    %306 = vector.broadcast %305 : vector<1x16xi32> to vector<16x16xi32>
    %307 = arith.cmpi sle, %291, %306 : vector<16x16xi32>
    %308 = arith.andi %303, %307 : vector<16x16xi1>
    %c0_i32_94 = arith.constant 0 : i32
    %309 = vector.broadcast %c0_i32_94 : i32 to vector<16x16xi32>
    %310 = arith.cmpi sge, %292, %309 : vector<16x16xi32>
    %311 = arith.andi %308, %310 : vector<16x16xi1>
    %c1_i32_95 = arith.constant 1 : i32
    %312 = vector.broadcast %c1_i32_95 : i32 to vector<1x16xi32>
    %313 = arith.subi %272, %312 : vector<1x16xi32>
    %314 = vector.broadcast %313 : vector<1x16xi32> to vector<16x16xi32>
    %315 = arith.cmpi sle, %292, %314 : vector<16x16xi32>
    %316 = arith.andi %311, %315 : vector<16x16xi1>
    %c1_i32_96 = arith.constant 1 : i32
    %317 = vector.broadcast %c1_i32_96 : i32 to vector<1x16xi32>
    %318 = arith.subi %271, %317 : vector<1x16xi32>
    %c0_i32_97 = arith.constant 0 : i32
    %319 = vector.broadcast %c0_i32_97 : i32 to vector<16x16xi32>
    %320 = arith.maxsi %319, %291 : vector<16x16xi32>
    %321 = vector.broadcast %318 : vector<1x16xi32> to vector<16x16xi32>
    %322 = arith.minsi %321, %320 : vector<16x16xi32>
    %c1_i32_98 = arith.constant 1 : i32
    %323 = vector.broadcast %c1_i32_98 : i32 to vector<1x16xi32>
    %324 = arith.subi %272, %323 : vector<1x16xi32>
    %c0_i32_99 = arith.constant 0 : i32
    %325 = vector.broadcast %c0_i32_99 : i32 to vector<16x16xi32>
    %326 = arith.maxsi %325, %292 : vector<16x16xi32>
    %327 = vector.broadcast %324 : vector<1x16xi32> to vector<16x16xi32>
    %328 = arith.minsi %327, %326 : vector<16x16xi32>
    %329 = vector.broadcast %271 : vector<1x16xi32> to vector<16x16xi32>
    %330 = arith.muli %328, %329 : vector<16x16xi32>
    %331 = arith.addi %330, %322 : vector<16x16xi32>
    %332 = arith.mulf %249, %301 : vector<16x16xf32>
    %333 = arith.extui %316 : vector<16x16xi1> to vector<16x16xi32>
    %334 = arith.sitofp %333 : vector<16x16xi32> to vector<16x16xf32>
    %335 = arith.mulf %332, %334 : vector<16x16xf32>
    %cst_100 = arith.constant 1.000000e+00 : f32
    %336 = vector.broadcast %cst_100 : f32 to vector<16x16xf32>
    %337 = arith.subf %336, %290 : vector<16x16xf32>
    %338 = arith.mulf %289, %337 : vector<16x16xf32>
    %c0_i32_101 = arith.constant 0 : i32
    %339 = vector.broadcast %c0_i32_101 : i32 to vector<16x16xi32>
    %340 = arith.cmpi sge, %294, %339 : vector<16x16xi32>
    %c1_i32_102 = arith.constant 1 : i32
    %341 = vector.broadcast %c1_i32_102 : i32 to vector<1x16xi32>
    %342 = arith.subi %271, %341 : vector<1x16xi32>
    %343 = vector.broadcast %342 : vector<1x16xi32> to vector<16x16xi32>
    %344 = arith.cmpi sle, %294, %343 : vector<16x16xi32>
    %345 = arith.andi %340, %344 : vector<16x16xi1>
    %c0_i32_103 = arith.constant 0 : i32
    %346 = vector.broadcast %c0_i32_103 : i32 to vector<16x16xi32>
    %347 = arith.cmpi sge, %292, %346 : vector<16x16xi32>
    %348 = arith.andi %345, %347 : vector<16x16xi1>
    %c1_i32_104 = arith.constant 1 : i32
    %349 = vector.broadcast %c1_i32_104 : i32 to vector<1x16xi32>
    %350 = arith.subi %272, %349 : vector<1x16xi32>
    %351 = vector.broadcast %350 : vector<1x16xi32> to vector<16x16xi32>
    %352 = arith.cmpi sle, %292, %351 : vector<16x16xi32>
    %353 = arith.andi %348, %352 : vector<16x16xi1>
    %c1_i32_105 = arith.constant 1 : i32
    %354 = vector.broadcast %c1_i32_105 : i32 to vector<1x16xi32>
    %355 = arith.subi %271, %354 : vector<1x16xi32>
    %c0_i32_106 = arith.constant 0 : i32
    %356 = vector.broadcast %c0_i32_106 : i32 to vector<16x16xi32>
    %357 = arith.maxsi %356, %294 : vector<16x16xi32>
    %358 = vector.broadcast %355 : vector<1x16xi32> to vector<16x16xi32>
    %359 = arith.minsi %358, %357 : vector<16x16xi32>
    %c1_i32_107 = arith.constant 1 : i32
    %360 = vector.broadcast %c1_i32_107 : i32 to vector<1x16xi32>
    %361 = arith.subi %272, %360 : vector<1x16xi32>
    %c0_i32_108 = arith.constant 0 : i32
    %362 = vector.broadcast %c0_i32_108 : i32 to vector<16x16xi32>
    %363 = arith.maxsi %362, %292 : vector<16x16xi32>
    %364 = vector.broadcast %361 : vector<1x16xi32> to vector<16x16xi32>
    %365 = arith.minsi %364, %363 : vector<16x16xi32>
    %366 = vector.broadcast %271 : vector<1x16xi32> to vector<16x16xi32>
    %367 = arith.muli %365, %366 : vector<16x16xi32>
    %368 = arith.addi %367, %359 : vector<16x16xi32>
    %369 = arith.mulf %249, %338 : vector<16x16xf32>
    %370 = arith.extui %353 : vector<16x16xi1> to vector<16x16xi32>
    %371 = arith.sitofp %370 : vector<16x16xi32> to vector<16x16xf32>
    %372 = arith.mulf %369, %371 : vector<16x16xf32>
    %cst_109 = arith.constant 1.000000e+00 : f32
    %373 = vector.broadcast %cst_109 : f32 to vector<16x16xf32>
    %374 = arith.subf %373, %289 : vector<16x16xf32>
    %375 = arith.mulf %374, %290 : vector<16x16xf32>
    %c0_i32_110 = arith.constant 0 : i32
    %376 = vector.broadcast %c0_i32_110 : i32 to vector<16x16xi32>
    %377 = arith.cmpi sge, %291, %376 : vector<16x16xi32>
    %c1_i32_111 = arith.constant 1 : i32
    %378 = vector.broadcast %c1_i32_111 : i32 to vector<1x16xi32>
    %379 = arith.subi %271, %378 : vector<1x16xi32>
    %380 = vector.broadcast %379 : vector<1x16xi32> to vector<16x16xi32>
    %381 = arith.cmpi sle, %291, %380 : vector<16x16xi32>
    %382 = arith.andi %377, %381 : vector<16x16xi1>
    %c0_i32_112 = arith.constant 0 : i32
    %383 = vector.broadcast %c0_i32_112 : i32 to vector<16x16xi32>
    %384 = arith.cmpi sge, %296, %383 : vector<16x16xi32>
    %385 = arith.andi %382, %384 : vector<16x16xi1>
    %c1_i32_113 = arith.constant 1 : i32
    %386 = vector.broadcast %c1_i32_113 : i32 to vector<1x16xi32>
    %387 = arith.subi %272, %386 : vector<1x16xi32>
    %388 = vector.broadcast %387 : vector<1x16xi32> to vector<16x16xi32>
    %389 = arith.cmpi sle, %296, %388 : vector<16x16xi32>
    %390 = arith.andi %385, %389 : vector<16x16xi1>
    %c1_i32_114 = arith.constant 1 : i32
    %391 = vector.broadcast %c1_i32_114 : i32 to vector<1x16xi32>
    %392 = arith.subi %271, %391 : vector<1x16xi32>
    %c0_i32_115 = arith.constant 0 : i32
    %393 = vector.broadcast %c0_i32_115 : i32 to vector<16x16xi32>
    %394 = arith.maxsi %393, %291 : vector<16x16xi32>
    %395 = vector.broadcast %392 : vector<1x16xi32> to vector<16x16xi32>
    %396 = arith.minsi %395, %394 : vector<16x16xi32>
    %c1_i32_116 = arith.constant 1 : i32
    %397 = vector.broadcast %c1_i32_116 : i32 to vector<1x16xi32>
    %398 = arith.subi %272, %397 : vector<1x16xi32>
    %c0_i32_117 = arith.constant 0 : i32
    %399 = vector.broadcast %c0_i32_117 : i32 to vector<16x16xi32>
    %400 = arith.maxsi %399, %296 : vector<16x16xi32>
    %401 = vector.broadcast %398 : vector<1x16xi32> to vector<16x16xi32>
    %402 = arith.minsi %401, %400 : vector<16x16xi32>
    %403 = vector.broadcast %271 : vector<1x16xi32> to vector<16x16xi32>
    %404 = arith.muli %402, %403 : vector<16x16xi32>
    %405 = arith.addi %404, %396 : vector<16x16xi32>
    %406 = arith.mulf %249, %375 : vector<16x16xf32>
    %407 = arith.extui %390 : vector<16x16xi1> to vector<16x16xi32>
    %408 = arith.sitofp %407 : vector<16x16xi32> to vector<16x16xf32>
    %409 = arith.mulf %406, %408 : vector<16x16xf32>
    %410 = arith.mulf %289, %290 : vector<16x16xf32>
    %c0_i32_118 = arith.constant 0 : i32
    %411 = vector.broadcast %c0_i32_118 : i32 to vector<16x16xi32>
    %412 = arith.cmpi sge, %294, %411 : vector<16x16xi32>
    %c1_i32_119 = arith.constant 1 : i32
    %413 = vector.broadcast %c1_i32_119 : i32 to vector<1x16xi32>
    %414 = arith.subi %271, %413 : vector<1x16xi32>
    %415 = vector.broadcast %414 : vector<1x16xi32> to vector<16x16xi32>
    %416 = arith.cmpi sle, %294, %415 : vector<16x16xi32>
    %417 = arith.andi %412, %416 : vector<16x16xi1>
    %c0_i32_120 = arith.constant 0 : i32
    %418 = vector.broadcast %c0_i32_120 : i32 to vector<16x16xi32>
    %419 = arith.cmpi sge, %296, %418 : vector<16x16xi32>
    %420 = arith.andi %417, %419 : vector<16x16xi1>
    %c1_i32_121 = arith.constant 1 : i32
    %421 = vector.broadcast %c1_i32_121 : i32 to vector<1x16xi32>
    %422 = arith.subi %272, %421 : vector<1x16xi32>
    %423 = vector.broadcast %422 : vector<1x16xi32> to vector<16x16xi32>
    %424 = arith.cmpi sle, %296, %423 : vector<16x16xi32>
    %425 = arith.andi %420, %424 : vector<16x16xi1>
    %c1_i32_122 = arith.constant 1 : i32
    %426 = vector.broadcast %c1_i32_122 : i32 to vector<1x16xi32>
    %427 = arith.subi %271, %426 : vector<1x16xi32>
    %c0_i32_123 = arith.constant 0 : i32
    %428 = vector.broadcast %c0_i32_123 : i32 to vector<16x16xi32>
    %429 = arith.maxsi %428, %294 : vector<16x16xi32>
    %430 = vector.broadcast %427 : vector<1x16xi32> to vector<16x16xi32>
    %431 = arith.minsi %430, %429 : vector<16x16xi32>
    %c1_i32_124 = arith.constant 1 : i32
    %432 = vector.broadcast %c1_i32_124 : i32 to vector<1x16xi32>
    %433 = arith.subi %272, %432 : vector<1x16xi32>
    %c0_i32_125 = arith.constant 0 : i32
    %434 = vector.broadcast %c0_i32_125 : i32 to vector<16x16xi32>
    %435 = arith.maxsi %434, %296 : vector<16x16xi32>
    %436 = vector.broadcast %433 : vector<1x16xi32> to vector<16x16xi32>
    %437 = arith.minsi %436, %435 : vector<16x16xi32>
    %438 = vector.broadcast %271 : vector<1x16xi32> to vector<16x16xi32>
    %439 = arith.muli %437, %438 : vector<16x16xi32>
    %440 = arith.addi %439, %431 : vector<16x16xi32>
    %441 = arith.mulf %249, %410 : vector<16x16xf32>
    %442 = arith.extui %425 : vector<16x16xi1> to vector<16x16xi32>
    %443 = arith.sitofp %442 : vector<16x16xi32> to vector<16x16xf32>
    %444 = arith.mulf %441, %443 : vector<16x16xf32>
    %cst_126 = arith.constant 0.000000e+00 : f32
    %445 = vector.broadcast %cst_126 : f32 to vector<8x8xf32>
    %446 = tpu.iota {dimensions = array<i32: 1>} : vector<8x64xi32>
    %cst_127 = arith.constant 0.000000e+00 : f32
    %447 = vector.broadcast %cst_127 : f32 to vector<8x64xf32>
    %448 = vector.extract_strided_slice %331 {offsets = [0, 0], sizes = [8, 1], strides = [1, 1]} : vector<16x16xi32> to vector<8x1xi32>
    %449 = vector.extract_strided_slice %335 {offsets = [0, 0], sizes = [8, 1], strides = [1, 1]} : vector<16x16xf32> to vector<8x1xf32>
    %450 = vector.broadcast %448 : vector<8x1xi32> to vector<8x64xi32>
    %451 = arith.cmpi eq, %446, %450 : vector<8x64xi32>
    %cst_128 = arith.constant 0.000000e+00 : f32
    %452 = vector.shape_cast %449 : vector<8x1xf32> to vector<8x1xf32>
    %453 = vector.broadcast %452 : vector<8x1xf32> to vector<8x64xf32>
    %454 = vector.broadcast %cst_128 : f32 to vector<8x64xf32>
    %455 = arith.select %451, %453, %454 : vector<8x64xi1>, vector<8x64xf32>
    %456 = arith.addf %447, %455 : vector<8x64xf32>
    %457 = vector.extract_strided_slice %331 {offsets = [0, 1], sizes = [8, 1], strides = [1, 1]} : vector<16x16xi32> to vector<8x1xi32>
    %458 = vector.extract_strided_slice %335 {offsets = [0, 1], sizes = [8, 1], strides = [1, 1]} : vector<16x16xf32> to vector<8x1xf32>
    %459 = vector.broadcast %457 : vector<8x1xi32> to vector<8x64xi32>
    %460 = arith.cmpi eq, %446, %459 : vector<8x64xi32>
    %cst_129 = arith.constant 0.000000e+00 : f32
    %461 = vector.shape_cast %458 : vector<8x1xf32> to vector<8x1xf32>
    %462 = vector.broadcast %461 : vector<8x1xf32> to vector<8x64xf32>
    %463 = vector.broadcast %cst_129 : f32 to vector<8x64xf32>
    %464 = arith.select %460, %462, %463 : vector<8x64xi1>, vector<8x64xf32>
    %465 = arith.addf %456, %464 : vector<8x64xf32>
    %466 = vector.extract_strided_slice %368 {offsets = [0, 0], sizes = [8, 1], strides = [1, 1]} : vector<16x16xi32> to vector<8x1xi32>
    %467 = vector.extract_strided_slice %372 {offsets = [0, 0], sizes = [8, 1], strides = [1, 1]} : vector<16x16xf32> to vector<8x1xf32>
    %468 = vector.broadcast %466 : vector<8x1xi32> to vector<8x64xi32>
    %469 = arith.cmpi eq, %446, %468 : vector<8x64xi32>
    %cst_130 = arith.constant 0.000000e+00 : f32
    %470 = vector.shape_cast %467 : vector<8x1xf32> to vector<8x1xf32>
    %471 = vector.broadcast %470 : vector<8x1xf32> to vector<8x64xf32>
    %472 = vector.broadcast %cst_130 : f32 to vector<8x64xf32>
    %473 = arith.select %469, %471, %472 : vector<8x64xi1>, vector<8x64xf32>
    %474 = arith.addf %465, %473 : vector<8x64xf32>
    %475 = vector.extract_strided_slice %368 {offsets = [0, 1], sizes = [8, 1], strides = [1, 1]} : vector<16x16xi32> to vector<8x1xi32>
    %476 = vector.extract_strided_slice %372 {offsets = [0, 1], sizes = [8, 1], strides = [1, 1]} : vector<16x16xf32> to vector<8x1xf32>
    %477 = vector.broadcast %475 : vector<8x1xi32> to vector<8x64xi32>
    %478 = arith.cmpi eq, %446, %477 : vector<8x64xi32>
    %cst_131 = arith.constant 0.000000e+00 : f32
    %479 = vector.shape_cast %476 : vector<8x1xf32> to vector<8x1xf32>
    %480 = vector.broadcast %479 : vector<8x1xf32> to vector<8x64xf32>
    %481 = vector.broadcast %cst_131 : f32 to vector<8x64xf32>
    %482 = arith.select %478, %480, %481 : vector<8x64xi1>, vector<8x64xf32>
    %483 = arith.addf %474, %482 : vector<8x64xf32>
    %484 = vector.extract_strided_slice %405 {offsets = [0, 0], sizes = [8, 1], strides = [1, 1]} : vector<16x16xi32> to vector<8x1xi32>
    %485 = vector.extract_strided_slice %409 {offsets = [0, 0], sizes = [8, 1], strides = [1, 1]} : vector<16x16xf32> to vector<8x1xf32>
    %486 = vector.broadcast %484 : vector<8x1xi32> to vector<8x64xi32>
    %487 = arith.cmpi eq, %446, %486 : vector<8x64xi32>
    %cst_132 = arith.constant 0.000000e+00 : f32
    %488 = vector.shape_cast %485 : vector<8x1xf32> to vector<8x1xf32>
    %489 = vector.broadcast %488 : vector<8x1xf32> to vector<8x64xf32>
    %490 = vector.broadcast %cst_132 : f32 to vector<8x64xf32>
    %491 = arith.select %487, %489, %490 : vector<8x64xi1>, vector<8x64xf32>
    %492 = arith.addf %483, %491 : vector<8x64xf32>
    %493 = vector.extract_strided_slice %405 {offsets = [0, 1], sizes = [8, 1], strides = [1, 1]} : vector<16x16xi32> to vector<8x1xi32>
    %494 = vector.extract_strided_slice %409 {offsets = [0, 1], sizes = [8, 1], strides = [1, 1]} : vector<16x16xf32> to vector<8x1xf32>
    %495 = vector.broadcast %493 : vector<8x1xi32> to vector<8x64xi32>
    %496 = arith.cmpi eq, %446, %495 : vector<8x64xi32>
    %cst_133 = arith.constant 0.000000e+00 : f32
    %497 = vector.shape_cast %494 : vector<8x1xf32> to vector<8x1xf32>
    %498 = vector.broadcast %497 : vector<8x1xf32> to vector<8x64xf32>
    %499 = vector.broadcast %cst_133 : f32 to vector<8x64xf32>
    %500 = arith.select %496, %498, %499 : vector<8x64xi1>, vector<8x64xf32>
    %501 = arith.addf %492, %500 : vector<8x64xf32>
    %502 = vector.extract_strided_slice %440 {offsets = [0, 0], sizes = [8, 1], strides = [1, 1]} : vector<16x16xi32> to vector<8x1xi32>
    %503 = vector.extract_strided_slice %444 {offsets = [0, 0], sizes = [8, 1], strides = [1, 1]} : vector<16x16xf32> to vector<8x1xf32>
    %504 = vector.broadcast %502 : vector<8x1xi32> to vector<8x64xi32>
    %505 = arith.cmpi eq, %446, %504 : vector<8x64xi32>
    %cst_134 = arith.constant 0.000000e+00 : f32
    %506 = vector.shape_cast %503 : vector<8x1xf32> to vector<8x1xf32>
    %507 = vector.broadcast %506 : vector<8x1xf32> to vector<8x64xf32>
    %508 = vector.broadcast %cst_134 : f32 to vector<8x64xf32>
    %509 = arith.select %505, %507, %508 : vector<8x64xi1>, vector<8x64xf32>
    %510 = arith.addf %501, %509 : vector<8x64xf32>
    %511 = vector.extract_strided_slice %440 {offsets = [0, 1], sizes = [8, 1], strides = [1, 1]} : vector<16x16xi32> to vector<8x1xi32>
    %512 = vector.extract_strided_slice %444 {offsets = [0, 1], sizes = [8, 1], strides = [1, 1]} : vector<16x16xf32> to vector<8x1xf32>
    %513 = vector.broadcast %511 : vector<8x1xi32> to vector<8x64xi32>
    %514 = arith.cmpi eq, %446, %513 : vector<8x64xi32>
    %cst_135 = arith.constant 0.000000e+00 : f32
    %515 = vector.shape_cast %512 : vector<8x1xf32> to vector<8x1xf32>
    %516 = vector.broadcast %515 : vector<8x1xf32> to vector<8x64xf32>
    %517 = vector.broadcast %cst_135 : f32 to vector<8x64xf32>
    %518 = arith.select %514, %516, %517 : vector<8x64xi1>, vector<8x64xf32>
    %519 = arith.addf %510, %518 : vector<8x64xf32>
    %520 = vector.extract_strided_slice %197 {offsets = [0, 0], sizes = [64, 8], strides = [1, 1]} : vector<160x32xf32> to vector<64x8xf32>
    %cst_136 = arith.constant dense<0.000000e+00> : vector<8x8xf32>
    %521 = tpu.matmul %519, %520, %cst_136 {dimension_numbers = #tpu.dot_dimension_numbers<[1], [0], [0], [1], [0, 0, 1, 1], [], []>} : vector<8x64xf32>, vector<64x8xf32>, vector<8x8xf32> -> vector<8x8xf32>
    %522 = arith.addf %445, %521 : vector<8x8xf32>
    %523 = tpu.iota {dimensions = array<i32: 1>} : vector<8x16xi32>
    %cst_137 = arith.constant 0.000000e+00 : f32
    %524 = vector.broadcast %cst_137 : f32 to vector<8x16xf32>
    %525 = vector.extract_strided_slice %331 {offsets = [0, 2], sizes = [8, 1], strides = [1, 1]} : vector<16x16xi32> to vector<8x1xi32>
    %526 = vector.extract_strided_slice %335 {offsets = [0, 2], sizes = [8, 1], strides = [1, 1]} : vector<16x16xf32> to vector<8x1xf32>
    %527 = vector.broadcast %525 : vector<8x1xi32> to vector<8x16xi32>
    %528 = arith.cmpi eq, %523, %527 : vector<8x16xi32>
    %cst_138 = arith.constant 0.000000e+00 : f32
    %529 = vector.shape_cast %526 : vector<8x1xf32> to vector<8x1xf32>
    %530 = vector.broadcast %529 : vector<8x1xf32> to vector<8x16xf32>
    %531 = vector.broadcast %cst_138 : f32 to vector<8x16xf32>
    %532 = arith.select %528, %530, %531 : vector<8x16xi1>, vector<8x16xf32>
    %533 = arith.addf %524, %532 : vector<8x16xf32>
    %534 = vector.extract_strided_slice %331 {offsets = [0, 3], sizes = [8, 1], strides = [1, 1]} : vector<16x16xi32> to vector<8x1xi32>
    %535 = vector.extract_strided_slice %335 {offsets = [0, 3], sizes = [8, 1], strides = [1, 1]} : vector<16x16xf32> to vector<8x1xf32>
    %536 = vector.broadcast %534 : vector<8x1xi32> to vector<8x16xi32>
    %537 = arith.cmpi eq, %523, %536 : vector<8x16xi32>
    %cst_139 = arith.constant 0.000000e+00 : f32
    %538 = vector.shape_cast %535 : vector<8x1xf32> to vector<8x1xf32>
    %539 = vector.broadcast %538 : vector<8x1xf32> to vector<8x16xf32>
    %540 = vector.broadcast %cst_139 : f32 to vector<8x16xf32>
    %541 = arith.select %537, %539, %540 : vector<8x16xi1>, vector<8x16xf32>
    %542 = arith.addf %533, %541 : vector<8x16xf32>
    %543 = vector.extract_strided_slice %368 {offsets = [0, 2], sizes = [8, 1], strides = [1, 1]} : vector<16x16xi32> to vector<8x1xi32>
    %544 = vector.extract_strided_slice %372 {offsets = [0, 2], sizes = [8, 1], strides = [1, 1]} : vector<16x16xf32> to vector<8x1xf32>
    %545 = vector.broadcast %543 : vector<8x1xi32> to vector<8x16xi32>
    %546 = arith.cmpi eq, %523, %545 : vector<8x16xi32>
    %cst_140 = arith.constant 0.000000e+00 : f32
    %547 = vector.shape_cast %544 : vector<8x1xf32> to vector<8x1xf32>
    %548 = vector.broadcast %547 : vector<8x1xf32> to vector<8x16xf32>
    %549 = vector.broadcast %cst_140 : f32 to vector<8x16xf32>
    %550 = arith.select %546, %548, %549 : vector<8x16xi1>, vector<8x16xf32>
    %551 = arith.addf %542, %550 : vector<8x16xf32>
    %552 = vector.extract_strided_slice %368 {offsets = [0, 3], sizes = [8, 1], strides = [1, 1]} : vector<16x16xi32> to vector<8x1xi32>
    %553 = vector.extract_strided_slice %372 {offsets = [0, 3], sizes = [8, 1], strides = [1, 1]} : vector<16x16xf32> to vector<8x1xf32>
    %554 = vector.broadcast %552 : vector<8x1xi32> to vector<8x16xi32>
    %555 = arith.cmpi eq, %523, %554 : vector<8x16xi32>
    %cst_141 = arith.constant 0.000000e+00 : f32
    %556 = vector.shape_cast %553 : vector<8x1xf32> to vector<8x1xf32>
    %557 = vector.broadcast %556 : vector<8x1xf32> to vector<8x16xf32>
    %558 = vector.broadcast %cst_141 : f32 to vector<8x16xf32>
    %559 = arith.select %555, %557, %558 : vector<8x16xi1>, vector<8x16xf32>
    %560 = arith.addf %551, %559 : vector<8x16xf32>
    %561 = vector.extract_strided_slice %405 {offsets = [0, 2], sizes = [8, 1], strides = [1, 1]} : vector<16x16xi32> to vector<8x1xi32>
    %562 = vector.extract_strided_slice %409 {offsets = [0, 2], sizes = [8, 1], strides = [1, 1]} : vector<16x16xf32> to vector<8x1xf32>
    %563 = vector.broadcast %561 : vector<8x1xi32> to vector<8x16xi32>
    %564 = arith.cmpi eq, %523, %563 : vector<8x16xi32>
    %cst_142 = arith.constant 0.000000e+00 : f32
    %565 = vector.shape_cast %562 : vector<8x1xf32> to vector<8x1xf32>
    %566 = vector.broadcast %565 : vector<8x1xf32> to vector<8x16xf32>
    %567 = vector.broadcast %cst_142 : f32 to vector<8x16xf32>
    %568 = arith.select %564, %566, %567 : vector<8x16xi1>, vector<8x16xf32>
    %569 = arith.addf %560, %568 : vector<8x16xf32>
    %570 = vector.extract_strided_slice %405 {offsets = [0, 3], sizes = [8, 1], strides = [1, 1]} : vector<16x16xi32> to vector<8x1xi32>
    %571 = vector.extract_strided_slice %409 {offsets = [0, 3], sizes = [8, 1], strides = [1, 1]} : vector<16x16xf32> to vector<8x1xf32>
    %572 = vector.broadcast %570 : vector<8x1xi32> to vector<8x16xi32>
    %573 = arith.cmpi eq, %523, %572 : vector<8x16xi32>
    %cst_143 = arith.constant 0.000000e+00 : f32
    %574 = vector.shape_cast %571 : vector<8x1xf32> to vector<8x1xf32>
    %575 = vector.broadcast %574 : vector<8x1xf32> to vector<8x16xf32>
    %576 = vector.broadcast %cst_143 : f32 to vector<8x16xf32>
    %577 = arith.select %573, %575, %576 : vector<8x16xi1>, vector<8x16xf32>
    %578 = arith.addf %569, %577 : vector<8x16xf32>
    %579 = vector.extract_strided_slice %440 {offsets = [0, 2], sizes = [8, 1], strides = [1, 1]} : vector<16x16xi32> to vector<8x1xi32>
    %580 = vector.extract_strided_slice %444 {offsets = [0, 2], sizes = [8, 1], strides = [1, 1]} : vector<16x16xf32> to vector<8x1xf32>
    %581 = vector.broadcast %579 : vector<8x1xi32> to vector<8x16xi32>
    %582 = arith.cmpi eq, %523, %581 : vector<8x16xi32>
    %cst_144 = arith.constant 0.000000e+00 : f32
    %583 = vector.shape_cast %580 : vector<8x1xf32> to vector<8x1xf32>
    %584 = vector.broadcast %583 : vector<8x1xf32> to vector<8x16xf32>
    %585 = vector.broadcast %cst_144 : f32 to vector<8x16xf32>
    %586 = arith.select %582, %584, %585 : vector<8x16xi1>, vector<8x16xf32>
    %587 = arith.addf %578, %586 : vector<8x16xf32>
    %588 = vector.extract_strided_slice %440 {offsets = [0, 3], sizes = [8, 1], strides = [1, 1]} : vector<16x16xi32> to vector<8x1xi32>
    %589 = vector.extract_strided_slice %444 {offsets = [0, 3], sizes = [8, 1], strides = [1, 1]} : vector<16x16xf32> to vector<8x1xf32>
    %590 = vector.broadcast %588 : vector<8x1xi32> to vector<8x16xi32>
    %591 = arith.cmpi eq, %523, %590 : vector<8x16xi32>
    %cst_145 = arith.constant 0.000000e+00 : f32
    %592 = vector.shape_cast %589 : vector<8x1xf32> to vector<8x1xf32>
    %593 = vector.broadcast %592 : vector<8x1xf32> to vector<8x16xf32>
    %594 = vector.broadcast %cst_145 : f32 to vector<8x16xf32>
    %595 = arith.select %591, %593, %594 : vector<8x16xi1>, vector<8x16xf32>
    %596 = arith.addf %587, %595 : vector<8x16xf32>
    %597 = vector.extract_strided_slice %197 {offsets = [64, 0], sizes = [16, 8], strides = [1, 1]} : vector<160x32xf32> to vector<16x8xf32>
    %cst_146 = arith.constant dense<0.000000e+00> : vector<8x8xf32>
    %598 = tpu.matmul %596, %597, %cst_146 {dimension_numbers = #tpu.dot_dimension_numbers<[1], [0], [0], [1], [0, 0, 1, 1], [], []>} : vector<8x16xf32>, vector<16x8xf32>, vector<8x8xf32> -> vector<8x8xf32>
    %599 = arith.addf %522, %598 : vector<8x8xf32>
    %cst_147 = arith.constant 0.000000e+00 : f32
    %600 = vector.broadcast %cst_147 : f32 to vector<8x8xf32>
    %601 = tpu.iota {dimensions = array<i32: 1>} : vector<8x64xi32>
    %cst_148 = arith.constant 0.000000e+00 : f32
    %602 = vector.broadcast %cst_148 : f32 to vector<8x64xf32>
    %603 = vector.extract_strided_slice %331 {offsets = [0, 4], sizes = [8, 1], strides = [1, 1]} : vector<16x16xi32> to vector<8x1xi32>
    %604 = vector.extract_strided_slice %335 {offsets = [0, 4], sizes = [8, 1], strides = [1, 1]} : vector<16x16xf32> to vector<8x1xf32>
    %605 = vector.broadcast %603 : vector<8x1xi32> to vector<8x64xi32>
    %606 = arith.cmpi eq, %601, %605 : vector<8x64xi32>
    %cst_149 = arith.constant 0.000000e+00 : f32
    %607 = vector.shape_cast %604 : vector<8x1xf32> to vector<8x1xf32>
    %608 = vector.broadcast %607 : vector<8x1xf32> to vector<8x64xf32>
    %609 = vector.broadcast %cst_149 : f32 to vector<8x64xf32>
    %610 = arith.select %606, %608, %609 : vector<8x64xi1>, vector<8x64xf32>
    %611 = arith.addf %602, %610 : vector<8x64xf32>
    %612 = vector.extract_strided_slice %331 {offsets = [0, 5], sizes = [8, 1], strides = [1, 1]} : vector<16x16xi32> to vector<8x1xi32>
    %613 = vector.extract_strided_slice %335 {offsets = [0, 5], sizes = [8, 1], strides = [1, 1]} : vector<16x16xf32> to vector<8x1xf32>
    %614 = vector.broadcast %612 : vector<8x1xi32> to vector<8x64xi32>
    %615 = arith.cmpi eq, %601, %614 : vector<8x64xi32>
    %cst_150 = arith.constant 0.000000e+00 : f32
    %616 = vector.shape_cast %613 : vector<8x1xf32> to vector<8x1xf32>
    %617 = vector.broadcast %616 : vector<8x1xf32> to vector<8x64xf32>
    %618 = vector.broadcast %cst_150 : f32 to vector<8x64xf32>
    %619 = arith.select %615, %617, %618 : vector<8x64xi1>, vector<8x64xf32>
    %620 = arith.addf %611, %619 : vector<8x64xf32>
    %621 = vector.extract_strided_slice %368 {offsets = [0, 4], sizes = [8, 1], strides = [1, 1]} : vector<16x16xi32> to vector<8x1xi32>
    %622 = vector.extract_strided_slice %372 {offsets = [0, 4], sizes = [8, 1], strides = [1, 1]} : vector<16x16xf32> to vector<8x1xf32>
    %623 = vector.broadcast %621 : vector<8x1xi32> to vector<8x64xi32>
    %624 = arith.cmpi eq, %601, %623 : vector<8x64xi32>
    %cst_151 = arith.constant 0.000000e+00 : f32
    %625 = vector.shape_cast %622 : vector<8x1xf32> to vector<8x1xf32>
    %626 = vector.broadcast %625 : vector<8x1xf32> to vector<8x64xf32>
    %627 = vector.broadcast %cst_151 : f32 to vector<8x64xf32>
    %628 = arith.select %624, %626, %627 : vector<8x64xi1>, vector<8x64xf32>
    %629 = arith.addf %620, %628 : vector<8x64xf32>
    %630 = vector.extract_strided_slice %368 {offsets = [0, 5], sizes = [8, 1], strides = [1, 1]} : vector<16x16xi32> to vector<8x1xi32>
    %631 = vector.extract_strided_slice %372 {offsets = [0, 5], sizes = [8, 1], strides = [1, 1]} : vector<16x16xf32> to vector<8x1xf32>
    %632 = vector.broadcast %630 : vector<8x1xi32> to vector<8x64xi32>
    %633 = arith.cmpi eq, %601, %632 : vector<8x64xi32>
    %cst_152 = arith.constant 0.000000e+00 : f32
    %634 = vector.shape_cast %631 : vector<8x1xf32> to vector<8x1xf32>
    %635 = vector.broadcast %634 : vector<8x1xf32> to vector<8x64xf32>
    %636 = vector.broadcast %cst_152 : f32 to vector<8x64xf32>
    %637 = arith.select %633, %635, %636 : vector<8x64xi1>, vector<8x64xf32>
    %638 = arith.addf %629, %637 : vector<8x64xf32>
    %639 = vector.extract_strided_slice %405 {offsets = [0, 4], sizes = [8, 1], strides = [1, 1]} : vector<16x16xi32> to vector<8x1xi32>
    %640 = vector.extract_strided_slice %409 {offsets = [0, 4], sizes = [8, 1], strides = [1, 1]} : vector<16x16xf32> to vector<8x1xf32>
    %641 = vector.broadcast %639 : vector<8x1xi32> to vector<8x64xi32>
    %642 = arith.cmpi eq, %601, %641 : vector<8x64xi32>
    %cst_153 = arith.constant 0.000000e+00 : f32
    %643 = vector.shape_cast %640 : vector<8x1xf32> to vector<8x1xf32>
    %644 = vector.broadcast %643 : vector<8x1xf32> to vector<8x64xf32>
    %645 = vector.broadcast %cst_153 : f32 to vector<8x64xf32>
    %646 = arith.select %642, %644, %645 : vector<8x64xi1>, vector<8x64xf32>
    %647 = arith.addf %638, %646 : vector<8x64xf32>
    %648 = vector.extract_strided_slice %405 {offsets = [0, 5], sizes = [8, 1], strides = [1, 1]} : vector<16x16xi32> to vector<8x1xi32>
    %649 = vector.extract_strided_slice %409 {offsets = [0, 5], sizes = [8, 1], strides = [1, 1]} : vector<16x16xf32> to vector<8x1xf32>
    %650 = vector.broadcast %648 : vector<8x1xi32> to vector<8x64xi32>
    %651 = arith.cmpi eq, %601, %650 : vector<8x64xi32>
    %cst_154 = arith.constant 0.000000e+00 : f32
    %652 = vector.shape_cast %649 : vector<8x1xf32> to vector<8x1xf32>
    %653 = vector.broadcast %652 : vector<8x1xf32> to vector<8x64xf32>
    %654 = vector.broadcast %cst_154 : f32 to vector<8x64xf32>
    %655 = arith.select %651, %653, %654 : vector<8x64xi1>, vector<8x64xf32>
    %656 = arith.addf %647, %655 : vector<8x64xf32>
    %657 = vector.extract_strided_slice %440 {offsets = [0, 4], sizes = [8, 1], strides = [1, 1]} : vector<16x16xi32> to vector<8x1xi32>
    %658 = vector.extract_strided_slice %444 {offsets = [0, 4], sizes = [8, 1], strides = [1, 1]} : vector<16x16xf32> to vector<8x1xf32>
    %659 = vector.broadcast %657 : vector<8x1xi32> to vector<8x64xi32>
    %660 = arith.cmpi eq, %601, %659 : vector<8x64xi32>
    %cst_155 = arith.constant 0.000000e+00 : f32
    %661 = vector.shape_cast %658 : vector<8x1xf32> to vector<8x1xf32>
    %662 = vector.broadcast %661 : vector<8x1xf32> to vector<8x64xf32>
    %663 = vector.broadcast %cst_155 : f32 to vector<8x64xf32>
    %664 = arith.select %660, %662, %663 : vector<8x64xi1>, vector<8x64xf32>
    %665 = arith.addf %656, %664 : vector<8x64xf32>
    %666 = vector.extract_strided_slice %440 {offsets = [0, 5], sizes = [8, 1], strides = [1, 1]} : vector<16x16xi32> to vector<8x1xi32>
    %667 = vector.extract_strided_slice %444 {offsets = [0, 5], sizes = [8, 1], strides = [1, 1]} : vector<16x16xf32> to vector<8x1xf32>
    %668 = vector.broadcast %666 : vector<8x1xi32> to vector<8x64xi32>
    %669 = arith.cmpi eq, %601, %668 : vector<8x64xi32>
    %cst_156 = arith.constant 0.000000e+00 : f32
    %670 = vector.shape_cast %667 : vector<8x1xf32> to vector<8x1xf32>
    %671 = vector.broadcast %670 : vector<8x1xf32> to vector<8x64xf32>
    %672 = vector.broadcast %cst_156 : f32 to vector<8x64xf32>
    %673 = arith.select %669, %671, %672 : vector<8x64xi1>, vector<8x64xf32>
    %674 = arith.addf %665, %673 : vector<8x64xf32>
    %675 = vector.extract_strided_slice %197 {offsets = [0, 8], sizes = [64, 8], strides = [1, 1]} : vector<160x32xf32> to vector<64x8xf32>
    %cst_157 = arith.constant dense<0.000000e+00> : vector<8x8xf32>
    %676 = tpu.matmul %674, %675, %cst_157 {dimension_numbers = #tpu.dot_dimension_numbers<[1], [0], [0], [1], [0, 0, 1, 1], [], []>} : vector<8x64xf32>, vector<64x8xf32>, vector<8x8xf32> -> vector<8x8xf32>
    %677 = arith.addf %600, %676 : vector<8x8xf32>
    %678 = tpu.iota {dimensions = array<i32: 1>} : vector<8x16xi32>
    %cst_158 = arith.constant 0.000000e+00 : f32
    %679 = vector.broadcast %cst_158 : f32 to vector<8x16xf32>
    %680 = vector.extract_strided_slice %331 {offsets = [0, 6], sizes = [8, 1], strides = [1, 1]} : vector<16x16xi32> to vector<8x1xi32>
    %681 = vector.extract_strided_slice %335 {offsets = [0, 6], sizes = [8, 1], strides = [1, 1]} : vector<16x16xf32> to vector<8x1xf32>
    %682 = vector.broadcast %680 : vector<8x1xi32> to vector<8x16xi32>
    %683 = arith.cmpi eq, %678, %682 : vector<8x16xi32>
    %cst_159 = arith.constant 0.000000e+00 : f32
    %684 = vector.shape_cast %681 : vector<8x1xf32> to vector<8x1xf32>
    %685 = vector.broadcast %684 : vector<8x1xf32> to vector<8x16xf32>
    %686 = vector.broadcast %cst_159 : f32 to vector<8x16xf32>
    %687 = arith.select %683, %685, %686 : vector<8x16xi1>, vector<8x16xf32>
    %688 = arith.addf %679, %687 : vector<8x16xf32>
    %689 = vector.extract_strided_slice %331 {offsets = [0, 7], sizes = [8, 1], strides = [1, 1]} : vector<16x16xi32> to vector<8x1xi32>
    %690 = vector.extract_strided_slice %335 {offsets = [0, 7], sizes = [8, 1], strides = [1, 1]} : vector<16x16xf32> to vector<8x1xf32>
    %691 = vector.broadcast %689 : vector<8x1xi32> to vector<8x16xi32>
    %692 = arith.cmpi eq, %678, %691 : vector<8x16xi32>
    %cst_160 = arith.constant 0.000000e+00 : f32
    %693 = vector.shape_cast %690 : vector<8x1xf32> to vector<8x1xf32>
    %694 = vector.broadcast %693 : vector<8x1xf32> to vector<8x16xf32>
    %695 = vector.broadcast %cst_160 : f32 to vector<8x16xf32>
    %696 = arith.select %692, %694, %695 : vector<8x16xi1>, vector<8x16xf32>
    %697 = arith.addf %688, %696 : vector<8x16xf32>
    %698 = vector.extract_strided_slice %368 {offsets = [0, 6], sizes = [8, 1], strides = [1, 1]} : vector<16x16xi32> to vector<8x1xi32>
    %699 = vector.extract_strided_slice %372 {offsets = [0, 6], sizes = [8, 1], strides = [1, 1]} : vector<16x16xf32> to vector<8x1xf32>
    %700 = vector.broadcast %698 : vector<8x1xi32> to vector<8x16xi32>
    %701 = arith.cmpi eq, %678, %700 : vector<8x16xi32>
    %cst_161 = arith.constant 0.000000e+00 : f32
    %702 = vector.shape_cast %699 : vector<8x1xf32> to vector<8x1xf32>
    %703 = vector.broadcast %702 : vector<8x1xf32> to vector<8x16xf32>
    %704 = vector.broadcast %cst_161 : f32 to vector<8x16xf32>
    %705 = arith.select %701, %703, %704 : vector<8x16xi1>, vector<8x16xf32>
    %706 = arith.addf %697, %705 : vector<8x16xf32>
    %707 = vector.extract_strided_slice %368 {offsets = [0, 7], sizes = [8, 1], strides = [1, 1]} : vector<16x16xi32> to vector<8x1xi32>
    %708 = vector.extract_strided_slice %372 {offsets = [0, 7], sizes = [8, 1], strides = [1, 1]} : vector<16x16xf32> to vector<8x1xf32>
    %709 = vector.broadcast %707 : vector<8x1xi32> to vector<8x16xi32>
    %710 = arith.cmpi eq, %678, %709 : vector<8x16xi32>
    %cst_162 = arith.constant 0.000000e+00 : f32
    %711 = vector.shape_cast %708 : vector<8x1xf32> to vector<8x1xf32>
    %712 = vector.broadcast %711 : vector<8x1xf32> to vector<8x16xf32>
    %713 = vector.broadcast %cst_162 : f32 to vector<8x16xf32>
    %714 = arith.select %710, %712, %713 : vector<8x16xi1>, vector<8x16xf32>
    %715 = arith.addf %706, %714 : vector<8x16xf32>
    %716 = vector.extract_strided_slice %405 {offsets = [0, 6], sizes = [8, 1], strides = [1, 1]} : vector<16x16xi32> to vector<8x1xi32>
    %717 = vector.extract_strided_slice %409 {offsets = [0, 6], sizes = [8, 1], strides = [1, 1]} : vector<16x16xf32> to vector<8x1xf32>
    %718 = vector.broadcast %716 : vector<8x1xi32> to vector<8x16xi32>
    %719 = arith.cmpi eq, %678, %718 : vector<8x16xi32>
    %cst_163 = arith.constant 0.000000e+00 : f32
    %720 = vector.shape_cast %717 : vector<8x1xf32> to vector<8x1xf32>
    %721 = vector.broadcast %720 : vector<8x1xf32> to vector<8x16xf32>
    %722 = vector.broadcast %cst_163 : f32 to vector<8x16xf32>
    %723 = arith.select %719, %721, %722 : vector<8x16xi1>, vector<8x16xf32>
    %724 = arith.addf %715, %723 : vector<8x16xf32>
    %725 = vector.extract_strided_slice %405 {offsets = [0, 7], sizes = [8, 1], strides = [1, 1]} : vector<16x16xi32> to vector<8x1xi32>
    %726 = vector.extract_strided_slice %409 {offsets = [0, 7], sizes = [8, 1], strides = [1, 1]} : vector<16x16xf32> to vector<8x1xf32>
    %727 = vector.broadcast %725 : vector<8x1xi32> to vector<8x16xi32>
    %728 = arith.cmpi eq, %678, %727 : vector<8x16xi32>
    %cst_164 = arith.constant 0.000000e+00 : f32
    %729 = vector.shape_cast %726 : vector<8x1xf32> to vector<8x1xf32>
    %730 = vector.broadcast %729 : vector<8x1xf32> to vector<8x16xf32>
    %731 = vector.broadcast %cst_164 : f32 to vector<8x16xf32>
    %732 = arith.select %728, %730, %731 : vector<8x16xi1>, vector<8x16xf32>
    %733 = arith.addf %724, %732 : vector<8x16xf32>
    %734 = vector.extract_strided_slice %440 {offsets = [0, 6], sizes = [8, 1], strides = [1, 1]} : vector<16x16xi32> to vector<8x1xi32>
    %735 = vector.extract_strided_slice %444 {offsets = [0, 6], sizes = [8, 1], strides = [1, 1]} : vector<16x16xf32> to vector<8x1xf32>
    %736 = vector.broadcast %734 : vector<8x1xi32> to vector<8x16xi32>
    %737 = arith.cmpi eq, %678, %736 : vector<8x16xi32>
    %cst_165 = arith.constant 0.000000e+00 : f32
    %738 = vector.shape_cast %735 : vector<8x1xf32> to vector<8x1xf32>
    %739 = vector.broadcast %738 : vector<8x1xf32> to vector<8x16xf32>
    %740 = vector.broadcast %cst_165 : f32 to vector<8x16xf32>
    %741 = arith.select %737, %739, %740 : vector<8x16xi1>, vector<8x16xf32>
    %742 = arith.addf %733, %741 : vector<8x16xf32>
    %743 = vector.extract_strided_slice %440 {offsets = [0, 7], sizes = [8, 1], strides = [1, 1]} : vector<16x16xi32> to vector<8x1xi32>
    %744 = vector.extract_strided_slice %444 {offsets = [0, 7], sizes = [8, 1], strides = [1, 1]} : vector<16x16xf32> to vector<8x1xf32>
    %745 = vector.broadcast %743 : vector<8x1xi32> to vector<8x16xi32>
    %746 = arith.cmpi eq, %678, %745 : vector<8x16xi32>
    %cst_166 = arith.constant 0.000000e+00 : f32
    %747 = vector.shape_cast %744 : vector<8x1xf32> to vector<8x1xf32>
    %748 = vector.broadcast %747 : vector<8x1xf32> to vector<8x16xf32>
    %749 = vector.broadcast %cst_166 : f32 to vector<8x16xf32>
    %750 = arith.select %746, %748, %749 : vector<8x16xi1>, vector<8x16xf32>
    %751 = arith.addf %742, %750 : vector<8x16xf32>
    %752 = vector.extract_strided_slice %197 {offsets = [64, 8], sizes = [16, 8], strides = [1, 1]} : vector<160x32xf32> to vector<16x8xf32>
    %cst_167 = arith.constant dense<0.000000e+00> : vector<8x8xf32>
    %753 = tpu.matmul %751, %752, %cst_167 {dimension_numbers = #tpu.dot_dimension_numbers<[1], [0], [0], [1], [0, 0, 1, 1], [], []>} : vector<8x16xf32>, vector<16x8xf32>, vector<8x8xf32> -> vector<8x8xf32>
    %754 = arith.addf %677, %753 : vector<8x8xf32>
    %cst_168 = arith.constant 0.000000e+00 : f32
    %755 = vector.broadcast %cst_168 : f32 to vector<8x8xf32>
    %756 = tpu.iota {dimensions = array<i32: 1>} : vector<8x64xi32>
    %cst_169 = arith.constant 0.000000e+00 : f32
    %757 = vector.broadcast %cst_169 : f32 to vector<8x64xf32>
    %758 = vector.extract_strided_slice %331 {offsets = [0, 8], sizes = [8, 1], strides = [1, 1]} : vector<16x16xi32> to vector<8x1xi32>
    %759 = vector.extract_strided_slice %335 {offsets = [0, 8], sizes = [8, 1], strides = [1, 1]} : vector<16x16xf32> to vector<8x1xf32>
    %760 = vector.broadcast %758 : vector<8x1xi32> to vector<8x64xi32>
    %761 = arith.cmpi eq, %756, %760 : vector<8x64xi32>
    %cst_170 = arith.constant 0.000000e+00 : f32
    %762 = vector.shape_cast %759 : vector<8x1xf32> to vector<8x1xf32>
    %763 = vector.broadcast %762 : vector<8x1xf32> to vector<8x64xf32>
    %764 = vector.broadcast %cst_170 : f32 to vector<8x64xf32>
    %765 = arith.select %761, %763, %764 : vector<8x64xi1>, vector<8x64xf32>
    %766 = arith.addf %757, %765 : vector<8x64xf32>
    %767 = vector.extract_strided_slice %331 {offsets = [0, 9], sizes = [8, 1], strides = [1, 1]} : vector<16x16xi32> to vector<8x1xi32>
    %768 = vector.extract_strided_slice %335 {offsets = [0, 9], sizes = [8, 1], strides = [1, 1]} : vector<16x16xf32> to vector<8x1xf32>
    %769 = vector.broadcast %767 : vector<8x1xi32> to vector<8x64xi32>
    %770 = arith.cmpi eq, %756, %769 : vector<8x64xi32>
    %cst_171 = arith.constant 0.000000e+00 : f32
    %771 = vector.shape_cast %768 : vector<8x1xf32> to vector<8x1xf32>
    %772 = vector.broadcast %771 : vector<8x1xf32> to vector<8x64xf32>
    %773 = vector.broadcast %cst_171 : f32 to vector<8x64xf32>
    %774 = arith.select %770, %772, %773 : vector<8x64xi1>, vector<8x64xf32>
    %775 = arith.addf %766, %774 : vector<8x64xf32>
    %776 = vector.extract_strided_slice %368 {offsets = [0, 8], sizes = [8, 1], strides = [1, 1]} : vector<16x16xi32> to vector<8x1xi32>
    %777 = vector.extract_strided_slice %372 {offsets = [0, 8], sizes = [8, 1], strides = [1, 1]} : vector<16x16xf32> to vector<8x1xf32>
    %778 = vector.broadcast %776 : vector<8x1xi32> to vector<8x64xi32>
    %779 = arith.cmpi eq, %756, %778 : vector<8x64xi32>
    %cst_172 = arith.constant 0.000000e+00 : f32
    %780 = vector.shape_cast %777 : vector<8x1xf32> to vector<8x1xf32>
    %781 = vector.broadcast %780 : vector<8x1xf32> to vector<8x64xf32>
    %782 = vector.broadcast %cst_172 : f32 to vector<8x64xf32>
    %783 = arith.select %779, %781, %782 : vector<8x64xi1>, vector<8x64xf32>
    %784 = arith.addf %775, %783 : vector<8x64xf32>
    %785 = vector.extract_strided_slice %368 {offsets = [0, 9], sizes = [8, 1], strides = [1, 1]} : vector<16x16xi32> to vector<8x1xi32>
    %786 = vector.extract_strided_slice %372 {offsets = [0, 9], sizes = [8, 1], strides = [1, 1]} : vector<16x16xf32> to vector<8x1xf32>
    %787 = vector.broadcast %785 : vector<8x1xi32> to vector<8x64xi32>
    %788 = arith.cmpi eq, %756, %787 : vector<8x64xi32>
    %cst_173 = arith.constant 0.000000e+00 : f32
    %789 = vector.shape_cast %786 : vector<8x1xf32> to vector<8x1xf32>
    %790 = vector.broadcast %789 : vector<8x1xf32> to vector<8x64xf32>
    %791 = vector.broadcast %cst_173 : f32 to vector<8x64xf32>
    %792 = arith.select %788, %790, %791 : vector<8x64xi1>, vector<8x64xf32>
    %793 = arith.addf %784, %792 : vector<8x64xf32>
    %794 = vector.extract_strided_slice %405 {offsets = [0, 8], sizes = [8, 1], strides = [1, 1]} : vector<16x16xi32> to vector<8x1xi32>
    %795 = vector.extract_strided_slice %409 {offsets = [0, 8], sizes = [8, 1], strides = [1, 1]} : vector<16x16xf32> to vector<8x1xf32>
    %796 = vector.broadcast %794 : vector<8x1xi32> to vector<8x64xi32>
    %797 = arith.cmpi eq, %756, %796 : vector<8x64xi32>
    %cst_174 = arith.constant 0.000000e+00 : f32
    %798 = vector.shape_cast %795 : vector<8x1xf32> to vector<8x1xf32>
    %799 = vector.broadcast %798 : vector<8x1xf32> to vector<8x64xf32>
    %800 = vector.broadcast %cst_174 : f32 to vector<8x64xf32>
    %801 = arith.select %797, %799, %800 : vector<8x64xi1>, vector<8x64xf32>
    %802 = arith.addf %793, %801 : vector<8x64xf32>
    %803 = vector.extract_strided_slice %405 {offsets = [0, 9], sizes = [8, 1], strides = [1, 1]} : vector<16x16xi32> to vector<8x1xi32>
    %804 = vector.extract_strided_slice %409 {offsets = [0, 9], sizes = [8, 1], strides = [1, 1]} : vector<16x16xf32> to vector<8x1xf32>
    %805 = vector.broadcast %803 : vector<8x1xi32> to vector<8x64xi32>
    %806 = arith.cmpi eq, %756, %805 : vector<8x64xi32>
    %cst_175 = arith.constant 0.000000e+00 : f32
    %807 = vector.shape_cast %804 : vector<8x1xf32> to vector<8x1xf32>
    %808 = vector.broadcast %807 : vector<8x1xf32> to vector<8x64xf32>
    %809 = vector.broadcast %cst_175 : f32 to vector<8x64xf32>
    %810 = arith.select %806, %808, %809 : vector<8x64xi1>, vector<8x64xf32>
    %811 = arith.addf %802, %810 : vector<8x64xf32>
    %812 = vector.extract_strided_slice %440 {offsets = [0, 8], sizes = [8, 1], strides = [1, 1]} : vector<16x16xi32> to vector<8x1xi32>
    %813 = vector.extract_strided_slice %444 {offsets = [0, 8], sizes = [8, 1], strides = [1, 1]} : vector<16x16xf32> to vector<8x1xf32>
    %814 = vector.broadcast %812 : vector<8x1xi32> to vector<8x64xi32>
    %815 = arith.cmpi eq, %756, %814 : vector<8x64xi32>
    %cst_176 = arith.constant 0.000000e+00 : f32
    %816 = vector.shape_cast %813 : vector<8x1xf32> to vector<8x1xf32>
    %817 = vector.broadcast %816 : vector<8x1xf32> to vector<8x64xf32>
    %818 = vector.broadcast %cst_176 : f32 to vector<8x64xf32>
    %819 = arith.select %815, %817, %818 : vector<8x64xi1>, vector<8x64xf32>
    %820 = arith.addf %811, %819 : vector<8x64xf32>
    %821 = vector.extract_strided_slice %440 {offsets = [0, 9], sizes = [8, 1], strides = [1, 1]} : vector<16x16xi32> to vector<8x1xi32>
    %822 = vector.extract_strided_slice %444 {offsets = [0, 9], sizes = [8, 1], strides = [1, 1]} : vector<16x16xf32> to vector<8x1xf32>
    %823 = vector.broadcast %821 : vector<8x1xi32> to vector<8x64xi32>
    %824 = arith.cmpi eq, %756, %823 : vector<8x64xi32>
    %cst_177 = arith.constant 0.000000e+00 : f32
    %825 = vector.shape_cast %822 : vector<8x1xf32> to vector<8x1xf32>
    %826 = vector.broadcast %825 : vector<8x1xf32> to vector<8x64xf32>
    %827 = vector.broadcast %cst_177 : f32 to vector<8x64xf32>
    %828 = arith.select %824, %826, %827 : vector<8x64xi1>, vector<8x64xf32>
    %829 = arith.addf %820, %828 : vector<8x64xf32>
    %830 = vector.extract_strided_slice %197 {offsets = [0, 16], sizes = [64, 8], strides = [1, 1]} : vector<160x32xf32> to vector<64x8xf32>
    %cst_178 = arith.constant dense<0.000000e+00> : vector<8x8xf32>
    %831 = tpu.matmul %829, %830, %cst_178 {dimension_numbers = #tpu.dot_dimension_numbers<[1], [0], [0], [1], [0, 0, 1, 1], [], []>} : vector<8x64xf32>, vector<64x8xf32>, vector<8x8xf32> -> vector<8x8xf32>
    %832 = arith.addf %755, %831 : vector<8x8xf32>
    %833 = tpu.iota {dimensions = array<i32: 1>} : vector<8x16xi32>
    %cst_179 = arith.constant 0.000000e+00 : f32
    %834 = vector.broadcast %cst_179 : f32 to vector<8x16xf32>
    %835 = vector.extract_strided_slice %331 {offsets = [0, 10], sizes = [8, 1], strides = [1, 1]} : vector<16x16xi32> to vector<8x1xi32>
    %836 = vector.extract_strided_slice %335 {offsets = [0, 10], sizes = [8, 1], strides = [1, 1]} : vector<16x16xf32> to vector<8x1xf32>
    %837 = vector.broadcast %835 : vector<8x1xi32> to vector<8x16xi32>
    %838 = arith.cmpi eq, %833, %837 : vector<8x16xi32>
    %cst_180 = arith.constant 0.000000e+00 : f32
    %839 = vector.shape_cast %836 : vector<8x1xf32> to vector<8x1xf32>
    %840 = vector.broadcast %839 : vector<8x1xf32> to vector<8x16xf32>
    %841 = vector.broadcast %cst_180 : f32 to vector<8x16xf32>
    %842 = arith.select %838, %840, %841 : vector<8x16xi1>, vector<8x16xf32>
    %843 = arith.addf %834, %842 : vector<8x16xf32>
    %844 = vector.extract_strided_slice %331 {offsets = [0, 11], sizes = [8, 1], strides = [1, 1]} : vector<16x16xi32> to vector<8x1xi32>
    %845 = vector.extract_strided_slice %335 {offsets = [0, 11], sizes = [8, 1], strides = [1, 1]} : vector<16x16xf32> to vector<8x1xf32>
    %846 = vector.broadcast %844 : vector<8x1xi32> to vector<8x16xi32>
    %847 = arith.cmpi eq, %833, %846 : vector<8x16xi32>
    %cst_181 = arith.constant 0.000000e+00 : f32
    %848 = vector.shape_cast %845 : vector<8x1xf32> to vector<8x1xf32>
    %849 = vector.broadcast %848 : vector<8x1xf32> to vector<8x16xf32>
    %850 = vector.broadcast %cst_181 : f32 to vector<8x16xf32>
    %851 = arith.select %847, %849, %850 : vector<8x16xi1>, vector<8x16xf32>
    %852 = arith.addf %843, %851 : vector<8x16xf32>
    %853 = vector.extract_strided_slice %368 {offsets = [0, 10], sizes = [8, 1], strides = [1, 1]} : vector<16x16xi32> to vector<8x1xi32>
    %854 = vector.extract_strided_slice %372 {offsets = [0, 10], sizes = [8, 1], strides = [1, 1]} : vector<16x16xf32> to vector<8x1xf32>
    %855 = vector.broadcast %853 : vector<8x1xi32> to vector<8x16xi32>
    %856 = arith.cmpi eq, %833, %855 : vector<8x16xi32>
    %cst_182 = arith.constant 0.000000e+00 : f32
    %857 = vector.shape_cast %854 : vector<8x1xf32> to vector<8x1xf32>
    %858 = vector.broadcast %857 : vector<8x1xf32> to vector<8x16xf32>
    %859 = vector.broadcast %cst_182 : f32 to vector<8x16xf32>
    %860 = arith.select %856, %858, %859 : vector<8x16xi1>, vector<8x16xf32>
    %861 = arith.addf %852, %860 : vector<8x16xf32>
    %862 = vector.extract_strided_slice %368 {offsets = [0, 11], sizes = [8, 1], strides = [1, 1]} : vector<16x16xi32> to vector<8x1xi32>
    %863 = vector.extract_strided_slice %372 {offsets = [0, 11], sizes = [8, 1], strides = [1, 1]} : vector<16x16xf32> to vector<8x1xf32>
    %864 = vector.broadcast %862 : vector<8x1xi32> to vector<8x16xi32>
    %865 = arith.cmpi eq, %833, %864 : vector<8x16xi32>
    %cst_183 = arith.constant 0.000000e+00 : f32
    %866 = vector.shape_cast %863 : vector<8x1xf32> to vector<8x1xf32>
    %867 = vector.broadcast %866 : vector<8x1xf32> to vector<8x16xf32>
    %868 = vector.broadcast %cst_183 : f32 to vector<8x16xf32>
    %869 = arith.select %865, %867, %868 : vector<8x16xi1>, vector<8x16xf32>
    %870 = arith.addf %861, %869 : vector<8x16xf32>
    %871 = vector.extract_strided_slice %405 {offsets = [0, 10], sizes = [8, 1], strides = [1, 1]} : vector<16x16xi32> to vector<8x1xi32>
    %872 = vector.extract_strided_slice %409 {offsets = [0, 10], sizes = [8, 1], strides = [1, 1]} : vector<16x16xf32> to vector<8x1xf32>
    %873 = vector.broadcast %871 : vector<8x1xi32> to vector<8x16xi32>
    %874 = arith.cmpi eq, %833, %873 : vector<8x16xi32>
    %cst_184 = arith.constant 0.000000e+00 : f32
    %875 = vector.shape_cast %872 : vector<8x1xf32> to vector<8x1xf32>
    %876 = vector.broadcast %875 : vector<8x1xf32> to vector<8x16xf32>
    %877 = vector.broadcast %cst_184 : f32 to vector<8x16xf32>
    %878 = arith.select %874, %876, %877 : vector<8x16xi1>, vector<8x16xf32>
    %879 = arith.addf %870, %878 : vector<8x16xf32>
    %880 = vector.extract_strided_slice %405 {offsets = [0, 11], sizes = [8, 1], strides = [1, 1]} : vector<16x16xi32> to vector<8x1xi32>
    %881 = vector.extract_strided_slice %409 {offsets = [0, 11], sizes = [8, 1], strides = [1, 1]} : vector<16x16xf32> to vector<8x1xf32>
    %882 = vector.broadcast %880 : vector<8x1xi32> to vector<8x16xi32>
    %883 = arith.cmpi eq, %833, %882 : vector<8x16xi32>
    %cst_185 = arith.constant 0.000000e+00 : f32
    %884 = vector.shape_cast %881 : vector<8x1xf32> to vector<8x1xf32>
    %885 = vector.broadcast %884 : vector<8x1xf32> to vector<8x16xf32>
    %886 = vector.broadcast %cst_185 : f32 to vector<8x16xf32>
    %887 = arith.select %883, %885, %886 : vector<8x16xi1>, vector<8x16xf32>
    %888 = arith.addf %879, %887 : vector<8x16xf32>
    %889 = vector.extract_strided_slice %440 {offsets = [0, 10], sizes = [8, 1], strides = [1, 1]} : vector<16x16xi32> to vector<8x1xi32>
    %890 = vector.extract_strided_slice %444 {offsets = [0, 10], sizes = [8, 1], strides = [1, 1]} : vector<16x16xf32> to vector<8x1xf32>
    %891 = vector.broadcast %889 : vector<8x1xi32> to vector<8x16xi32>
    %892 = arith.cmpi eq, %833, %891 : vector<8x16xi32>
    %cst_186 = arith.constant 0.000000e+00 : f32
    %893 = vector.shape_cast %890 : vector<8x1xf32> to vector<8x1xf32>
    %894 = vector.broadcast %893 : vector<8x1xf32> to vector<8x16xf32>
    %895 = vector.broadcast %cst_186 : f32 to vector<8x16xf32>
    %896 = arith.select %892, %894, %895 : vector<8x16xi1>, vector<8x16xf32>
    %897 = arith.addf %888, %896 : vector<8x16xf32>
    %898 = vector.extract_strided_slice %440 {offsets = [0, 11], sizes = [8, 1], strides = [1, 1]} : vector<16x16xi32> to vector<8x1xi32>
    %899 = vector.extract_strided_slice %444 {offsets = [0, 11], sizes = [8, 1], strides = [1, 1]} : vector<16x16xf32> to vector<8x1xf32>
    %900 = vector.broadcast %898 : vector<8x1xi32> to vector<8x16xi32>
    %901 = arith.cmpi eq, %833, %900 : vector<8x16xi32>
    %cst_187 = arith.constant 0.000000e+00 : f32
    %902 = vector.shape_cast %899 : vector<8x1xf32> to vector<8x1xf32>
    %903 = vector.broadcast %902 : vector<8x1xf32> to vector<8x16xf32>
    %904 = vector.broadcast %cst_187 : f32 to vector<8x16xf32>
    %905 = arith.select %901, %903, %904 : vector<8x16xi1>, vector<8x16xf32>
    %906 = arith.addf %897, %905 : vector<8x16xf32>
    %907 = vector.extract_strided_slice %197 {offsets = [64, 16], sizes = [16, 8], strides = [1, 1]} : vector<160x32xf32> to vector<16x8xf32>
    %cst_188 = arith.constant dense<0.000000e+00> : vector<8x8xf32>
    %908 = tpu.matmul %906, %907, %cst_188 {dimension_numbers = #tpu.dot_dimension_numbers<[1], [0], [0], [1], [0, 0, 1, 1], [], []>} : vector<8x16xf32>, vector<16x8xf32>, vector<8x8xf32> -> vector<8x8xf32>
    %909 = arith.addf %832, %908 : vector<8x8xf32>
    %cst_189 = arith.constant 0.000000e+00 : f32
    %910 = vector.broadcast %cst_189 : f32 to vector<8x8xf32>
    %911 = tpu.iota {dimensions = array<i32: 1>} : vector<8x64xi32>
    %cst_190 = arith.constant 0.000000e+00 : f32
    %912 = vector.broadcast %cst_190 : f32 to vector<8x64xf32>
    %913 = vector.extract_strided_slice %331 {offsets = [0, 12], sizes = [8, 1], strides = [1, 1]} : vector<16x16xi32> to vector<8x1xi32>
    %914 = vector.extract_strided_slice %335 {offsets = [0, 12], sizes = [8, 1], strides = [1, 1]} : vector<16x16xf32> to vector<8x1xf32>
    %915 = vector.broadcast %913 : vector<8x1xi32> to vector<8x64xi32>
    %916 = arith.cmpi eq, %911, %915 : vector<8x64xi32>
    %cst_191 = arith.constant 0.000000e+00 : f32
    %917 = vector.shape_cast %914 : vector<8x1xf32> to vector<8x1xf32>
    %918 = vector.broadcast %917 : vector<8x1xf32> to vector<8x64xf32>
    %919 = vector.broadcast %cst_191 : f32 to vector<8x64xf32>
    %920 = arith.select %916, %918, %919 : vector<8x64xi1>, vector<8x64xf32>
    %921 = arith.addf %912, %920 : vector<8x64xf32>
    %922 = vector.extract_strided_slice %331 {offsets = [0, 13], sizes = [8, 1], strides = [1, 1]} : vector<16x16xi32> to vector<8x1xi32>
    %923 = vector.extract_strided_slice %335 {offsets = [0, 13], sizes = [8, 1], strides = [1, 1]} : vector<16x16xf32> to vector<8x1xf32>
    %924 = vector.broadcast %922 : vector<8x1xi32> to vector<8x64xi32>
    %925 = arith.cmpi eq, %911, %924 : vector<8x64xi32>
    %cst_192 = arith.constant 0.000000e+00 : f32
    %926 = vector.shape_cast %923 : vector<8x1xf32> to vector<8x1xf32>
    %927 = vector.broadcast %926 : vector<8x1xf32> to vector<8x64xf32>
    %928 = vector.broadcast %cst_192 : f32 to vector<8x64xf32>
    %929 = arith.select %925, %927, %928 : vector<8x64xi1>, vector<8x64xf32>
    %930 = arith.addf %921, %929 : vector<8x64xf32>
    %931 = vector.extract_strided_slice %368 {offsets = [0, 12], sizes = [8, 1], strides = [1, 1]} : vector<16x16xi32> to vector<8x1xi32>
    %932 = vector.extract_strided_slice %372 {offsets = [0, 12], sizes = [8, 1], strides = [1, 1]} : vector<16x16xf32> to vector<8x1xf32>
    %933 = vector.broadcast %931 : vector<8x1xi32> to vector<8x64xi32>
    %934 = arith.cmpi eq, %911, %933 : vector<8x64xi32>
    %cst_193 = arith.constant 0.000000e+00 : f32
    %935 = vector.shape_cast %932 : vector<8x1xf32> to vector<8x1xf32>
    %936 = vector.broadcast %935 : vector<8x1xf32> to vector<8x64xf32>
    %937 = vector.broadcast %cst_193 : f32 to vector<8x64xf32>
    %938 = arith.select %934, %936, %937 : vector<8x64xi1>, vector<8x64xf32>
    %939 = arith.addf %930, %938 : vector<8x64xf32>
    %940 = vector.extract_strided_slice %368 {offsets = [0, 13], sizes = [8, 1], strides = [1, 1]} : vector<16x16xi32> to vector<8x1xi32>
    %941 = vector.extract_strided_slice %372 {offsets = [0, 13], sizes = [8, 1], strides = [1, 1]} : vector<16x16xf32> to vector<8x1xf32>
    %942 = vector.broadcast %940 : vector<8x1xi32> to vector<8x64xi32>
    %943 = arith.cmpi eq, %911, %942 : vector<8x64xi32>
    %cst_194 = arith.constant 0.000000e+00 : f32
    %944 = vector.shape_cast %941 : vector<8x1xf32> to vector<8x1xf32>
    %945 = vector.broadcast %944 : vector<8x1xf32> to vector<8x64xf32>
    %946 = vector.broadcast %cst_194 : f32 to vector<8x64xf32>
    %947 = arith.select %943, %945, %946 : vector<8x64xi1>, vector<8x64xf32>
    %948 = arith.addf %939, %947 : vector<8x64xf32>
    %949 = vector.extract_strided_slice %405 {offsets = [0, 12], sizes = [8, 1], strides = [1, 1]} : vector<16x16xi32> to vector<8x1xi32>
    %950 = vector.extract_strided_slice %409 {offsets = [0, 12], sizes = [8, 1], strides = [1, 1]} : vector<16x16xf32> to vector<8x1xf32>
    %951 = vector.broadcast %949 : vector<8x1xi32> to vector<8x64xi32>
    %952 = arith.cmpi eq, %911, %951 : vector<8x64xi32>
    %cst_195 = arith.constant 0.000000e+00 : f32
    %953 = vector.shape_cast %950 : vector<8x1xf32> to vector<8x1xf32>
    %954 = vector.broadcast %953 : vector<8x1xf32> to vector<8x64xf32>
    %955 = vector.broadcast %cst_195 : f32 to vector<8x64xf32>
    %956 = arith.select %952, %954, %955 : vector<8x64xi1>, vector<8x64xf32>
    %957 = arith.addf %948, %956 : vector<8x64xf32>
    %958 = vector.extract_strided_slice %405 {offsets = [0, 13], sizes = [8, 1], strides = [1, 1]} : vector<16x16xi32> to vector<8x1xi32>
    %959 = vector.extract_strided_slice %409 {offsets = [0, 13], sizes = [8, 1], strides = [1, 1]} : vector<16x16xf32> to vector<8x1xf32>
    %960 = vector.broadcast %958 : vector<8x1xi32> to vector<8x64xi32>
    %961 = arith.cmpi eq, %911, %960 : vector<8x64xi32>
    %cst_196 = arith.constant 0.000000e+00 : f32
    %962 = vector.shape_cast %959 : vector<8x1xf32> to vector<8x1xf32>
    %963 = vector.broadcast %962 : vector<8x1xf32> to vector<8x64xf32>
    %964 = vector.broadcast %cst_196 : f32 to vector<8x64xf32>
    %965 = arith.select %961, %963, %964 : vector<8x64xi1>, vector<8x64xf32>
    %966 = arith.addf %957, %965 : vector<8x64xf32>
    %967 = vector.extract_strided_slice %440 {offsets = [0, 12], sizes = [8, 1], strides = [1, 1]} : vector<16x16xi32> to vector<8x1xi32>
    %968 = vector.extract_strided_slice %444 {offsets = [0, 12], sizes = [8, 1], strides = [1, 1]} : vector<16x16xf32> to vector<8x1xf32>
    %969 = vector.broadcast %967 : vector<8x1xi32> to vector<8x64xi32>
    %970 = arith.cmpi eq, %911, %969 : vector<8x64xi32>
    %cst_197 = arith.constant 0.000000e+00 : f32
    %971 = vector.shape_cast %968 : vector<8x1xf32> to vector<8x1xf32>
    %972 = vector.broadcast %971 : vector<8x1xf32> to vector<8x64xf32>
    %973 = vector.broadcast %cst_197 : f32 to vector<8x64xf32>
    %974 = arith.select %970, %972, %973 : vector<8x64xi1>, vector<8x64xf32>
    %975 = arith.addf %966, %974 : vector<8x64xf32>
    %976 = vector.extract_strided_slice %440 {offsets = [0, 13], sizes = [8, 1], strides = [1, 1]} : vector<16x16xi32> to vector<8x1xi32>
    %977 = vector.extract_strided_slice %444 {offsets = [0, 13], sizes = [8, 1], strides = [1, 1]} : vector<16x16xf32> to vector<8x1xf32>
    %978 = vector.broadcast %976 : vector<8x1xi32> to vector<8x64xi32>
    %979 = arith.cmpi eq, %911, %978 : vector<8x64xi32>
    %cst_198 = arith.constant 0.000000e+00 : f32
    %980 = vector.shape_cast %977 : vector<8x1xf32> to vector<8x1xf32>
    %981 = vector.broadcast %980 : vector<8x1xf32> to vector<8x64xf32>
    %982 = vector.broadcast %cst_198 : f32 to vector<8x64xf32>
    %983 = arith.select %979, %981, %982 : vector<8x64xi1>, vector<8x64xf32>
    %984 = arith.addf %975, %983 : vector<8x64xf32>
    %985 = vector.extract_strided_slice %197 {offsets = [0, 24], sizes = [64, 8], strides = [1, 1]} : vector<160x32xf32> to vector<64x8xf32>
    %cst_199 = arith.constant dense<0.000000e+00> : vector<8x8xf32>
    %986 = tpu.matmul %984, %985, %cst_199 {dimension_numbers = #tpu.dot_dimension_numbers<[1], [0], [0], [1], [0, 0, 1, 1], [], []>} : vector<8x64xf32>, vector<64x8xf32>, vector<8x8xf32> -> vector<8x8xf32>
    %987 = arith.addf %910, %986 : vector<8x8xf32>
    %988 = tpu.iota {dimensions = array<i32: 1>} : vector<8x16xi32>
    %cst_200 = arith.constant 0.000000e+00 : f32
    %989 = vector.broadcast %cst_200 : f32 to vector<8x16xf32>
    %990 = vector.extract_strided_slice %331 {offsets = [0, 14], sizes = [8, 1], strides = [1, 1]} : vector<16x16xi32> to vector<8x1xi32>
    %991 = vector.extract_strided_slice %335 {offsets = [0, 14], sizes = [8, 1], strides = [1, 1]} : vector<16x16xf32> to vector<8x1xf32>
    %992 = vector.broadcast %990 : vector<8x1xi32> to vector<8x16xi32>
    %993 = arith.cmpi eq, %988, %992 : vector<8x16xi32>
    %cst_201 = arith.constant 0.000000e+00 : f32
    %994 = vector.shape_cast %991 : vector<8x1xf32> to vector<8x1xf32>
    %995 = vector.broadcast %994 : vector<8x1xf32> to vector<8x16xf32>
    %996 = vector.broadcast %cst_201 : f32 to vector<8x16xf32>
    %997 = arith.select %993, %995, %996 : vector<8x16xi1>, vector<8x16xf32>
    %998 = arith.addf %989, %997 : vector<8x16xf32>
    %999 = vector.extract_strided_slice %331 {offsets = [0, 15], sizes = [8, 1], strides = [1, 1]} : vector<16x16xi32> to vector<8x1xi32>
    %1000 = vector.extract_strided_slice %335 {offsets = [0, 15], sizes = [8, 1], strides = [1, 1]} : vector<16x16xf32> to vector<8x1xf32>
    %1001 = vector.broadcast %999 : vector<8x1xi32> to vector<8x16xi32>
    %1002 = arith.cmpi eq, %988, %1001 : vector<8x16xi32>
    %cst_202 = arith.constant 0.000000e+00 : f32
    %1003 = vector.shape_cast %1000 : vector<8x1xf32> to vector<8x1xf32>
    %1004 = vector.broadcast %1003 : vector<8x1xf32> to vector<8x16xf32>
    %1005 = vector.broadcast %cst_202 : f32 to vector<8x16xf32>
    %1006 = arith.select %1002, %1004, %1005 : vector<8x16xi1>, vector<8x16xf32>
    %1007 = arith.addf %998, %1006 : vector<8x16xf32>
    %1008 = vector.extract_strided_slice %368 {offsets = [0, 14], sizes = [8, 1], strides = [1, 1]} : vector<16x16xi32> to vector<8x1xi32>
    %1009 = vector.extract_strided_slice %372 {offsets = [0, 14], sizes = [8, 1], strides = [1, 1]} : vector<16x16xf32> to vector<8x1xf32>
    %1010 = vector.broadcast %1008 : vector<8x1xi32> to vector<8x16xi32>
    %1011 = arith.cmpi eq, %988, %1010 : vector<8x16xi32>
    %cst_203 = arith.constant 0.000000e+00 : f32
    %1012 = vector.shape_cast %1009 : vector<8x1xf32> to vector<8x1xf32>
    %1013 = vector.broadcast %1012 : vector<8x1xf32> to vector<8x16xf32>
    %1014 = vector.broadcast %cst_203 : f32 to vector<8x16xf32>
    %1015 = arith.select %1011, %1013, %1014 : vector<8x16xi1>, vector<8x16xf32>
    %1016 = arith.addf %1007, %1015 : vector<8x16xf32>
    %1017 = vector.extract_strided_slice %368 {offsets = [0, 15], sizes = [8, 1], strides = [1, 1]} : vector<16x16xi32> to vector<8x1xi32>
    %1018 = vector.extract_strided_slice %372 {offsets = [0, 15], sizes = [8, 1], strides = [1, 1]} : vector<16x16xf32> to vector<8x1xf32>
    %1019 = vector.broadcast %1017 : vector<8x1xi32> to vector<8x16xi32>
    %1020 = arith.cmpi eq, %988, %1019 : vector<8x16xi32>
    %cst_204 = arith.constant 0.000000e+00 : f32
    %1021 = vector.shape_cast %1018 : vector<8x1xf32> to vector<8x1xf32>
    %1022 = vector.broadcast %1021 : vector<8x1xf32> to vector<8x16xf32>
    %1023 = vector.broadcast %cst_204 : f32 to vector<8x16xf32>
    %1024 = arith.select %1020, %1022, %1023 : vector<8x16xi1>, vector<8x16xf32>
    %1025 = arith.addf %1016, %1024 : vector<8x16xf32>
    %1026 = vector.extract_strided_slice %405 {offsets = [0, 14], sizes = [8, 1], strides = [1, 1]} : vector<16x16xi32> to vector<8x1xi32>
    %1027 = vector.extract_strided_slice %409 {offsets = [0, 14], sizes = [8, 1], strides = [1, 1]} : vector<16x16xf32> to vector<8x1xf32>
    %1028 = vector.broadcast %1026 : vector<8x1xi32> to vector<8x16xi32>
    %1029 = arith.cmpi eq, %988, %1028 : vector<8x16xi32>
    %cst_205 = arith.constant 0.000000e+00 : f32
    %1030 = vector.shape_cast %1027 : vector<8x1xf32> to vector<8x1xf32>
    %1031 = vector.broadcast %1030 : vector<8x1xf32> to vector<8x16xf32>
    %1032 = vector.broadcast %cst_205 : f32 to vector<8x16xf32>
    %1033 = arith.select %1029, %1031, %1032 : vector<8x16xi1>, vector<8x16xf32>
    %1034 = arith.addf %1025, %1033 : vector<8x16xf32>
    %1035 = vector.extract_strided_slice %405 {offsets = [0, 15], sizes = [8, 1], strides = [1, 1]} : vector<16x16xi32> to vector<8x1xi32>
    %1036 = vector.extract_strided_slice %409 {offsets = [0, 15], sizes = [8, 1], strides = [1, 1]} : vector<16x16xf32> to vector<8x1xf32>
    %1037 = vector.broadcast %1035 : vector<8x1xi32> to vector<8x16xi32>
    %1038 = arith.cmpi eq, %988, %1037 : vector<8x16xi32>
    %cst_206 = arith.constant 0.000000e+00 : f32
    %1039 = vector.shape_cast %1036 : vector<8x1xf32> to vector<8x1xf32>
    %1040 = vector.broadcast %1039 : vector<8x1xf32> to vector<8x16xf32>
    %1041 = vector.broadcast %cst_206 : f32 to vector<8x16xf32>
    %1042 = arith.select %1038, %1040, %1041 : vector<8x16xi1>, vector<8x16xf32>
    %1043 = arith.addf %1034, %1042 : vector<8x16xf32>
    %1044 = vector.extract_strided_slice %440 {offsets = [0, 14], sizes = [8, 1], strides = [1, 1]} : vector<16x16xi32> to vector<8x1xi32>
    %1045 = vector.extract_strided_slice %444 {offsets = [0, 14], sizes = [8, 1], strides = [1, 1]} : vector<16x16xf32> to vector<8x1xf32>
    %1046 = vector.broadcast %1044 : vector<8x1xi32> to vector<8x16xi32>
    %1047 = arith.cmpi eq, %988, %1046 : vector<8x16xi32>
    %cst_207 = arith.constant 0.000000e+00 : f32
    %1048 = vector.shape_cast %1045 : vector<8x1xf32> to vector<8x1xf32>
    %1049 = vector.broadcast %1048 : vector<8x1xf32> to vector<8x16xf32>
    %1050 = vector.broadcast %cst_207 : f32 to vector<8x16xf32>
    %1051 = arith.select %1047, %1049, %1050 : vector<8x16xi1>, vector<8x16xf32>
    %1052 = arith.addf %1043, %1051 : vector<8x16xf32>
    %1053 = vector.extract_strided_slice %440 {offsets = [0, 15], sizes = [8, 1], strides = [1, 1]} : vector<16x16xi32> to vector<8x1xi32>
    %1054 = vector.extract_strided_slice %444 {offsets = [0, 15], sizes = [8, 1], strides = [1, 1]} : vector<16x16xf32> to vector<8x1xf32>
    %1055 = vector.broadcast %1053 : vector<8x1xi32> to vector<8x16xi32>
    %1056 = arith.cmpi eq, %988, %1055 : vector<8x16xi32>
    %cst_208 = arith.constant 0.000000e+00 : f32
    %1057 = vector.shape_cast %1054 : vector<8x1xf32> to vector<8x1xf32>
    %1058 = vector.broadcast %1057 : vector<8x1xf32> to vector<8x16xf32>
    %1059 = vector.broadcast %cst_208 : f32 to vector<8x16xf32>
    %1060 = arith.select %1056, %1058, %1059 : vector<8x16xi1>, vector<8x16xf32>
    %1061 = arith.addf %1052, %1060 : vector<8x16xf32>
    %1062 = vector.extract_strided_slice %197 {offsets = [64, 24], sizes = [16, 8], strides = [1, 1]} : vector<160x32xf32> to vector<16x8xf32>
    %cst_209 = arith.constant dense<0.000000e+00> : vector<8x8xf32>
    %1063 = tpu.matmul %1061, %1062, %cst_209 {dimension_numbers = #tpu.dot_dimension_numbers<[1], [0], [0], [1], [0, 0, 1, 1], [], []>} : vector<8x16xf32>, vector<16x8xf32>, vector<8x8xf32> -> vector<8x8xf32>
    %1064 = arith.addf %987, %1063 : vector<8x8xf32>
    %1065 = tpu.concatenate %599, %754, %909, %1064 in 1 : vector<8x8xf32>, vector<8x8xf32>, vector<8x8xf32>, vector<8x8xf32> -> vector<8x32xf32>
    %cst_210 = arith.constant 0.000000e+00 : f32
    %1066 = vector.broadcast %cst_210 : f32 to vector<8x8xf32>
    %1067 = tpu.iota {dimensions = array<i32: 1>} : vector<8x64xi32>
    %cst_211 = arith.constant 0.000000e+00 : f32
    %1068 = vector.broadcast %cst_211 : f32 to vector<8x64xf32>
    %1069 = vector.extract_strided_slice %331 {offsets = [8, 0], sizes = [8, 1], strides = [1, 1]} : vector<16x16xi32> to vector<8x1xi32>
    %1070 = vector.extract_strided_slice %335 {offsets = [8, 0], sizes = [8, 1], strides = [1, 1]} : vector<16x16xf32> to vector<8x1xf32>
    %1071 = vector.broadcast %1069 : vector<8x1xi32> to vector<8x64xi32>
    %1072 = arith.cmpi eq, %1067, %1071 : vector<8x64xi32>
    %cst_212 = arith.constant 0.000000e+00 : f32
    %1073 = vector.shape_cast %1070 : vector<8x1xf32> to vector<8x1xf32>
    %1074 = vector.broadcast %1073 : vector<8x1xf32> to vector<8x64xf32>
    %1075 = vector.broadcast %cst_212 : f32 to vector<8x64xf32>
    %1076 = arith.select %1072, %1074, %1075 : vector<8x64xi1>, vector<8x64xf32>
    %1077 = arith.addf %1068, %1076 : vector<8x64xf32>
    %1078 = vector.extract_strided_slice %331 {offsets = [8, 1], sizes = [8, 1], strides = [1, 1]} : vector<16x16xi32> to vector<8x1xi32>
    %1079 = vector.extract_strided_slice %335 {offsets = [8, 1], sizes = [8, 1], strides = [1, 1]} : vector<16x16xf32> to vector<8x1xf32>
    %1080 = vector.broadcast %1078 : vector<8x1xi32> to vector<8x64xi32>
    %1081 = arith.cmpi eq, %1067, %1080 : vector<8x64xi32>
    %cst_213 = arith.constant 0.000000e+00 : f32
    %1082 = vector.shape_cast %1079 : vector<8x1xf32> to vector<8x1xf32>
    %1083 = vector.broadcast %1082 : vector<8x1xf32> to vector<8x64xf32>
    %1084 = vector.broadcast %cst_213 : f32 to vector<8x64xf32>
    %1085 = arith.select %1081, %1083, %1084 : vector<8x64xi1>, vector<8x64xf32>
    %1086 = arith.addf %1077, %1085 : vector<8x64xf32>
    %1087 = vector.extract_strided_slice %368 {offsets = [8, 0], sizes = [8, 1], strides = [1, 1]} : vector<16x16xi32> to vector<8x1xi32>
    %1088 = vector.extract_strided_slice %372 {offsets = [8, 0], sizes = [8, 1], strides = [1, 1]} : vector<16x16xf32> to vector<8x1xf32>
    %1089 = vector.broadcast %1087 : vector<8x1xi32> to vector<8x64xi32>
    %1090 = arith.cmpi eq, %1067, %1089 : vector<8x64xi32>
    %cst_214 = arith.constant 0.000000e+00 : f32
    %1091 = vector.shape_cast %1088 : vector<8x1xf32> to vector<8x1xf32>
    %1092 = vector.broadcast %1091 : vector<8x1xf32> to vector<8x64xf32>
    %1093 = vector.broadcast %cst_214 : f32 to vector<8x64xf32>
    %1094 = arith.select %1090, %1092, %1093 : vector<8x64xi1>, vector<8x64xf32>
    %1095 = arith.addf %1086, %1094 : vector<8x64xf32>
    %1096 = vector.extract_strided_slice %368 {offsets = [8, 1], sizes = [8, 1], strides = [1, 1]} : vector<16x16xi32> to vector<8x1xi32>
    %1097 = vector.extract_strided_slice %372 {offsets = [8, 1], sizes = [8, 1], strides = [1, 1]} : vector<16x16xf32> to vector<8x1xf32>
    %1098 = vector.broadcast %1096 : vector<8x1xi32> to vector<8x64xi32>
    %1099 = arith.cmpi eq, %1067, %1098 : vector<8x64xi32>
    %cst_215 = arith.constant 0.000000e+00 : f32
    %1100 = vector.shape_cast %1097 : vector<8x1xf32> to vector<8x1xf32>
    %1101 = vector.broadcast %1100 : vector<8x1xf32> to vector<8x64xf32>
    %1102 = vector.broadcast %cst_215 : f32 to vector<8x64xf32>
    %1103 = arith.select %1099, %1101, %1102 : vector<8x64xi1>, vector<8x64xf32>
    %1104 = arith.addf %1095, %1103 : vector<8x64xf32>
    %1105 = vector.extract_strided_slice %405 {offsets = [8, 0], sizes = [8, 1], strides = [1, 1]} : vector<16x16xi32> to vector<8x1xi32>
    %1106 = vector.extract_strided_slice %409 {offsets = [8, 0], sizes = [8, 1], strides = [1, 1]} : vector<16x16xf32> to vector<8x1xf32>
    %1107 = vector.broadcast %1105 : vector<8x1xi32> to vector<8x64xi32>
    %1108 = arith.cmpi eq, %1067, %1107 : vector<8x64xi32>
    %cst_216 = arith.constant 0.000000e+00 : f32
    %1109 = vector.shape_cast %1106 : vector<8x1xf32> to vector<8x1xf32>
    %1110 = vector.broadcast %1109 : vector<8x1xf32> to vector<8x64xf32>
    %1111 = vector.broadcast %cst_216 : f32 to vector<8x64xf32>
    %1112 = arith.select %1108, %1110, %1111 : vector<8x64xi1>, vector<8x64xf32>
    %1113 = arith.addf %1104, %1112 : vector<8x64xf32>
    %1114 = vector.extract_strided_slice %405 {offsets = [8, 1], sizes = [8, 1], strides = [1, 1]} : vector<16x16xi32> to vector<8x1xi32>
    %1115 = vector.extract_strided_slice %409 {offsets = [8, 1], sizes = [8, 1], strides = [1, 1]} : vector<16x16xf32> to vector<8x1xf32>
    %1116 = vector.broadcast %1114 : vector<8x1xi32> to vector<8x64xi32>
    %1117 = arith.cmpi eq, %1067, %1116 : vector<8x64xi32>
    %cst_217 = arith.constant 0.000000e+00 : f32
    %1118 = vector.shape_cast %1115 : vector<8x1xf32> to vector<8x1xf32>
    %1119 = vector.broadcast %1118 : vector<8x1xf32> to vector<8x64xf32>
    %1120 = vector.broadcast %cst_217 : f32 to vector<8x64xf32>
    %1121 = arith.select %1117, %1119, %1120 : vector<8x64xi1>, vector<8x64xf32>
    %1122 = arith.addf %1113, %1121 : vector<8x64xf32>
    %1123 = vector.extract_strided_slice %440 {offsets = [8, 0], sizes = [8, 1], strides = [1, 1]} : vector<16x16xi32> to vector<8x1xi32>
    %1124 = vector.extract_strided_slice %444 {offsets = [8, 0], sizes = [8, 1], strides = [1, 1]} : vector<16x16xf32> to vector<8x1xf32>
    %1125 = vector.broadcast %1123 : vector<8x1xi32> to vector<8x64xi32>
    %1126 = arith.cmpi eq, %1067, %1125 : vector<8x64xi32>
    %cst_218 = arith.constant 0.000000e+00 : f32
    %1127 = vector.shape_cast %1124 : vector<8x1xf32> to vector<8x1xf32>
    %1128 = vector.broadcast %1127 : vector<8x1xf32> to vector<8x64xf32>
    %1129 = vector.broadcast %cst_218 : f32 to vector<8x64xf32>
    %1130 = arith.select %1126, %1128, %1129 : vector<8x64xi1>, vector<8x64xf32>
    %1131 = arith.addf %1122, %1130 : vector<8x64xf32>
    %1132 = vector.extract_strided_slice %440 {offsets = [8, 1], sizes = [8, 1], strides = [1, 1]} : vector<16x16xi32> to vector<8x1xi32>
    %1133 = vector.extract_strided_slice %444 {offsets = [8, 1], sizes = [8, 1], strides = [1, 1]} : vector<16x16xf32> to vector<8x1xf32>
    %1134 = vector.broadcast %1132 : vector<8x1xi32> to vector<8x64xi32>
    %1135 = arith.cmpi eq, %1067, %1134 : vector<8x64xi32>
    %cst_219 = arith.constant 0.000000e+00 : f32
    %1136 = vector.shape_cast %1133 : vector<8x1xf32> to vector<8x1xf32>
    %1137 = vector.broadcast %1136 : vector<8x1xf32> to vector<8x64xf32>
    %1138 = vector.broadcast %cst_219 : f32 to vector<8x64xf32>
    %1139 = arith.select %1135, %1137, %1138 : vector<8x64xi1>, vector<8x64xf32>
    %1140 = arith.addf %1131, %1139 : vector<8x64xf32>
    %1141 = vector.extract_strided_slice %197 {offsets = [80, 0], sizes = [64, 8], strides = [1, 1]} : vector<160x32xf32> to vector<64x8xf32>
    %cst_220 = arith.constant dense<0.000000e+00> : vector<8x8xf32>
    %1142 = tpu.matmul %1140, %1141, %cst_220 {dimension_numbers = #tpu.dot_dimension_numbers<[1], [0], [0], [1], [0, 0, 1, 1], [], []>} : vector<8x64xf32>, vector<64x8xf32>, vector<8x8xf32> -> vector<8x8xf32>
    %1143 = arith.addf %1066, %1142 : vector<8x8xf32>
    %1144 = tpu.iota {dimensions = array<i32: 1>} : vector<8x16xi32>
    %cst_221 = arith.constant 0.000000e+00 : f32
    %1145 = vector.broadcast %cst_221 : f32 to vector<8x16xf32>
    %1146 = vector.extract_strided_slice %331 {offsets = [8, 2], sizes = [8, 1], strides = [1, 1]} : vector<16x16xi32> to vector<8x1xi32>
    %1147 = vector.extract_strided_slice %335 {offsets = [8, 2], sizes = [8, 1], strides = [1, 1]} : vector<16x16xf32> to vector<8x1xf32>
    %1148 = vector.broadcast %1146 : vector<8x1xi32> to vector<8x16xi32>
    %1149 = arith.cmpi eq, %1144, %1148 : vector<8x16xi32>
    %cst_222 = arith.constant 0.000000e+00 : f32
    %1150 = vector.shape_cast %1147 : vector<8x1xf32> to vector<8x1xf32>
    %1151 = vector.broadcast %1150 : vector<8x1xf32> to vector<8x16xf32>
    %1152 = vector.broadcast %cst_222 : f32 to vector<8x16xf32>
    %1153 = arith.select %1149, %1151, %1152 : vector<8x16xi1>, vector<8x16xf32>
    %1154 = arith.addf %1145, %1153 : vector<8x16xf32>
    %1155 = vector.extract_strided_slice %331 {offsets = [8, 3], sizes = [8, 1], strides = [1, 1]} : vector<16x16xi32> to vector<8x1xi32>
    %1156 = vector.extract_strided_slice %335 {offsets = [8, 3], sizes = [8, 1], strides = [1, 1]} : vector<16x16xf32> to vector<8x1xf32>
    %1157 = vector.broadcast %1155 : vector<8x1xi32> to vector<8x16xi32>
    %1158 = arith.cmpi eq, %1144, %1157 : vector<8x16xi32>
    %cst_223 = arith.constant 0.000000e+00 : f32
    %1159 = vector.shape_cast %1156 : vector<8x1xf32> to vector<8x1xf32>
    %1160 = vector.broadcast %1159 : vector<8x1xf32> to vector<8x16xf32>
    %1161 = vector.broadcast %cst_223 : f32 to vector<8x16xf32>
    %1162 = arith.select %1158, %1160, %1161 : vector<8x16xi1>, vector<8x16xf32>
    %1163 = arith.addf %1154, %1162 : vector<8x16xf32>
    %1164 = vector.extract_strided_slice %368 {offsets = [8, 2], sizes = [8, 1], strides = [1, 1]} : vector<16x16xi32> to vector<8x1xi32>
    %1165 = vector.extract_strided_slice %372 {offsets = [8, 2], sizes = [8, 1], strides = [1, 1]} : vector<16x16xf32> to vector<8x1xf32>
    %1166 = vector.broadcast %1164 : vector<8x1xi32> to vector<8x16xi32>
    %1167 = arith.cmpi eq, %1144, %1166 : vector<8x16xi32>
    %cst_224 = arith.constant 0.000000e+00 : f32
    %1168 = vector.shape_cast %1165 : vector<8x1xf32> to vector<8x1xf32>
    %1169 = vector.broadcast %1168 : vector<8x1xf32> to vector<8x16xf32>
    %1170 = vector.broadcast %cst_224 : f32 to vector<8x16xf32>
    %1171 = arith.select %1167, %1169, %1170 : vector<8x16xi1>, vector<8x16xf32>
    %1172 = arith.addf %1163, %1171 : vector<8x16xf32>
    %1173 = vector.extract_strided_slice %368 {offsets = [8, 3], sizes = [8, 1], strides = [1, 1]} : vector<16x16xi32> to vector<8x1xi32>
    %1174 = vector.extract_strided_slice %372 {offsets = [8, 3], sizes = [8, 1], strides = [1, 1]} : vector<16x16xf32> to vector<8x1xf32>
    %1175 = vector.broadcast %1173 : vector<8x1xi32> to vector<8x16xi32>
    %1176 = arith.cmpi eq, %1144, %1175 : vector<8x16xi32>
    %cst_225 = arith.constant 0.000000e+00 : f32
    %1177 = vector.shape_cast %1174 : vector<8x1xf32> to vector<8x1xf32>
    %1178 = vector.broadcast %1177 : vector<8x1xf32> to vector<8x16xf32>
    %1179 = vector.broadcast %cst_225 : f32 to vector<8x16xf32>
    %1180 = arith.select %1176, %1178, %1179 : vector<8x16xi1>, vector<8x16xf32>
    %1181 = arith.addf %1172, %1180 : vector<8x16xf32>
    %1182 = vector.extract_strided_slice %405 {offsets = [8, 2], sizes = [8, 1], strides = [1, 1]} : vector<16x16xi32> to vector<8x1xi32>
    %1183 = vector.extract_strided_slice %409 {offsets = [8, 2], sizes = [8, 1], strides = [1, 1]} : vector<16x16xf32> to vector<8x1xf32>
    %1184 = vector.broadcast %1182 : vector<8x1xi32> to vector<8x16xi32>
    %1185 = arith.cmpi eq, %1144, %1184 : vector<8x16xi32>
    %cst_226 = arith.constant 0.000000e+00 : f32
    %1186 = vector.shape_cast %1183 : vector<8x1xf32> to vector<8x1xf32>
    %1187 = vector.broadcast %1186 : vector<8x1xf32> to vector<8x16xf32>
    %1188 = vector.broadcast %cst_226 : f32 to vector<8x16xf32>
    %1189 = arith.select %1185, %1187, %1188 : vector<8x16xi1>, vector<8x16xf32>
    %1190 = arith.addf %1181, %1189 : vector<8x16xf32>
    %1191 = vector.extract_strided_slice %405 {offsets = [8, 3], sizes = [8, 1], strides = [1, 1]} : vector<16x16xi32> to vector<8x1xi32>
    %1192 = vector.extract_strided_slice %409 {offsets = [8, 3], sizes = [8, 1], strides = [1, 1]} : vector<16x16xf32> to vector<8x1xf32>
    %1193 = vector.broadcast %1191 : vector<8x1xi32> to vector<8x16xi32>
    %1194 = arith.cmpi eq, %1144, %1193 : vector<8x16xi32>
    %cst_227 = arith.constant 0.000000e+00 : f32
    %1195 = vector.shape_cast %1192 : vector<8x1xf32> to vector<8x1xf32>
    %1196 = vector.broadcast %1195 : vector<8x1xf32> to vector<8x16xf32>
    %1197 = vector.broadcast %cst_227 : f32 to vector<8x16xf32>
    %1198 = arith.select %1194, %1196, %1197 : vector<8x16xi1>, vector<8x16xf32>
    %1199 = arith.addf %1190, %1198 : vector<8x16xf32>
    %1200 = vector.extract_strided_slice %440 {offsets = [8, 2], sizes = [8, 1], strides = [1, 1]} : vector<16x16xi32> to vector<8x1xi32>
    %1201 = vector.extract_strided_slice %444 {offsets = [8, 2], sizes = [8, 1], strides = [1, 1]} : vector<16x16xf32> to vector<8x1xf32>
    %1202 = vector.broadcast %1200 : vector<8x1xi32> to vector<8x16xi32>
    %1203 = arith.cmpi eq, %1144, %1202 : vector<8x16xi32>
    %cst_228 = arith.constant 0.000000e+00 : f32
    %1204 = vector.shape_cast %1201 : vector<8x1xf32> to vector<8x1xf32>
    %1205 = vector.broadcast %1204 : vector<8x1xf32> to vector<8x16xf32>
    %1206 = vector.broadcast %cst_228 : f32 to vector<8x16xf32>
    %1207 = arith.select %1203, %1205, %1206 : vector<8x16xi1>, vector<8x16xf32>
    %1208 = arith.addf %1199, %1207 : vector<8x16xf32>
    %1209 = vector.extract_strided_slice %440 {offsets = [8, 3], sizes = [8, 1], strides = [1, 1]} : vector<16x16xi32> to vector<8x1xi32>
    %1210 = vector.extract_strided_slice %444 {offsets = [8, 3], sizes = [8, 1], strides = [1, 1]} : vector<16x16xf32> to vector<8x1xf32>
    %1211 = vector.broadcast %1209 : vector<8x1xi32> to vector<8x16xi32>
    %1212 = arith.cmpi eq, %1144, %1211 : vector<8x16xi32>
    %cst_229 = arith.constant 0.000000e+00 : f32
    %1213 = vector.shape_cast %1210 : vector<8x1xf32> to vector<8x1xf32>
    %1214 = vector.broadcast %1213 : vector<8x1xf32> to vector<8x16xf32>
    %1215 = vector.broadcast %cst_229 : f32 to vector<8x16xf32>
    %1216 = arith.select %1212, %1214, %1215 : vector<8x16xi1>, vector<8x16xf32>
    %1217 = arith.addf %1208, %1216 : vector<8x16xf32>
    %1218 = vector.extract_strided_slice %197 {offsets = [144, 0], sizes = [16, 8], strides = [1, 1]} : vector<160x32xf32> to vector<16x8xf32>
    %cst_230 = arith.constant dense<0.000000e+00> : vector<8x8xf32>
    %1219 = tpu.matmul %1217, %1218, %cst_230 {dimension_numbers = #tpu.dot_dimension_numbers<[1], [0], [0], [1], [0, 0, 1, 1], [], []>} : vector<8x16xf32>, vector<16x8xf32>, vector<8x8xf32> -> vector<8x8xf32>
    %1220 = arith.addf %1143, %1219 : vector<8x8xf32>
    %cst_231 = arith.constant 0.000000e+00 : f32
    %1221 = vector.broadcast %cst_231 : f32 to vector<8x8xf32>
    %1222 = tpu.iota {dimensions = array<i32: 1>} : vector<8x64xi32>
    %cst_232 = arith.constant 0.000000e+00 : f32
    %1223 = vector.broadcast %cst_232 : f32 to vector<8x64xf32>
    %1224 = vector.extract_strided_slice %331 {offsets = [8, 4], sizes = [8, 1], strides = [1, 1]} : vector<16x16xi32> to vector<8x1xi32>
    %1225 = vector.extract_strided_slice %335 {offsets = [8, 4], sizes = [8, 1], strides = [1, 1]} : vector<16x16xf32> to vector<8x1xf32>
    %1226 = vector.broadcast %1224 : vector<8x1xi32> to vector<8x64xi32>
    %1227 = arith.cmpi eq, %1222, %1226 : vector<8x64xi32>
    %cst_233 = arith.constant 0.000000e+00 : f32
    %1228 = vector.shape_cast %1225 : vector<8x1xf32> to vector<8x1xf32>
    %1229 = vector.broadcast %1228 : vector<8x1xf32> to vector<8x64xf32>
    %1230 = vector.broadcast %cst_233 : f32 to vector<8x64xf32>
    %1231 = arith.select %1227, %1229, %1230 : vector<8x64xi1>, vector<8x64xf32>
    %1232 = arith.addf %1223, %1231 : vector<8x64xf32>
    %1233 = vector.extract_strided_slice %331 {offsets = [8, 5], sizes = [8, 1], strides = [1, 1]} : vector<16x16xi32> to vector<8x1xi32>
    %1234 = vector.extract_strided_slice %335 {offsets = [8, 5], sizes = [8, 1], strides = [1, 1]} : vector<16x16xf32> to vector<8x1xf32>
    %1235 = vector.broadcast %1233 : vector<8x1xi32> to vector<8x64xi32>
    %1236 = arith.cmpi eq, %1222, %1235 : vector<8x64xi32>
    %cst_234 = arith.constant 0.000000e+00 : f32
    %1237 = vector.shape_cast %1234 : vector<8x1xf32> to vector<8x1xf32>
    %1238 = vector.broadcast %1237 : vector<8x1xf32> to vector<8x64xf32>
    %1239 = vector.broadcast %cst_234 : f32 to vector<8x64xf32>
    %1240 = arith.select %1236, %1238, %1239 : vector<8x64xi1>, vector<8x64xf32>
    %1241 = arith.addf %1232, %1240 : vector<8x64xf32>
    %1242 = vector.extract_strided_slice %368 {offsets = [8, 4], sizes = [8, 1], strides = [1, 1]} : vector<16x16xi32> to vector<8x1xi32>
    %1243 = vector.extract_strided_slice %372 {offsets = [8, 4], sizes = [8, 1], strides = [1, 1]} : vector<16x16xf32> to vector<8x1xf32>
    %1244 = vector.broadcast %1242 : vector<8x1xi32> to vector<8x64xi32>
    %1245 = arith.cmpi eq, %1222, %1244 : vector<8x64xi32>
    %cst_235 = arith.constant 0.000000e+00 : f32
    %1246 = vector.shape_cast %1243 : vector<8x1xf32> to vector<8x1xf32>
    %1247 = vector.broadcast %1246 : vector<8x1xf32> to vector<8x64xf32>
    %1248 = vector.broadcast %cst_235 : f32 to vector<8x64xf32>
    %1249 = arith.select %1245, %1247, %1248 : vector<8x64xi1>, vector<8x64xf32>
    %1250 = arith.addf %1241, %1249 : vector<8x64xf32>
    %1251 = vector.extract_strided_slice %368 {offsets = [8, 5], sizes = [8, 1], strides = [1, 1]} : vector<16x16xi32> to vector<8x1xi32>
    %1252 = vector.extract_strided_slice %372 {offsets = [8, 5], sizes = [8, 1], strides = [1, 1]} : vector<16x16xf32> to vector<8x1xf32>
    %1253 = vector.broadcast %1251 : vector<8x1xi32> to vector<8x64xi32>
    %1254 = arith.cmpi eq, %1222, %1253 : vector<8x64xi32>
    %cst_236 = arith.constant 0.000000e+00 : f32
    %1255 = vector.shape_cast %1252 : vector<8x1xf32> to vector<8x1xf32>
    %1256 = vector.broadcast %1255 : vector<8x1xf32> to vector<8x64xf32>
    %1257 = vector.broadcast %cst_236 : f32 to vector<8x64xf32>
    %1258 = arith.select %1254, %1256, %1257 : vector<8x64xi1>, vector<8x64xf32>
    %1259 = arith.addf %1250, %1258 : vector<8x64xf32>
    %1260 = vector.extract_strided_slice %405 {offsets = [8, 4], sizes = [8, 1], strides = [1, 1]} : vector<16x16xi32> to vector<8x1xi32>
    %1261 = vector.extract_strided_slice %409 {offsets = [8, 4], sizes = [8, 1], strides = [1, 1]} : vector<16x16xf32> to vector<8x1xf32>
    %1262 = vector.broadcast %1260 : vector<8x1xi32> to vector<8x64xi32>
    %1263 = arith.cmpi eq, %1222, %1262 : vector<8x64xi32>
    %cst_237 = arith.constant 0.000000e+00 : f32
    %1264 = vector.shape_cast %1261 : vector<8x1xf32> to vector<8x1xf32>
    %1265 = vector.broadcast %1264 : vector<8x1xf32> to vector<8x64xf32>
    %1266 = vector.broadcast %cst_237 : f32 to vector<8x64xf32>
    %1267 = arith.select %1263, %1265, %1266 : vector<8x64xi1>, vector<8x64xf32>
    %1268 = arith.addf %1259, %1267 : vector<8x64xf32>
    %1269 = vector.extract_strided_slice %405 {offsets = [8, 5], sizes = [8, 1], strides = [1, 1]} : vector<16x16xi32> to vector<8x1xi32>
    %1270 = vector.extract_strided_slice %409 {offsets = [8, 5], sizes = [8, 1], strides = [1, 1]} : vector<16x16xf32> to vector<8x1xf32>
    %1271 = vector.broadcast %1269 : vector<8x1xi32> to vector<8x64xi32>
    %1272 = arith.cmpi eq, %1222, %1271 : vector<8x64xi32>
    %cst_238 = arith.constant 0.000000e+00 : f32
    %1273 = vector.shape_cast %1270 : vector<8x1xf32> to vector<8x1xf32>
    %1274 = vector.broadcast %1273 : vector<8x1xf32> to vector<8x64xf32>
    %1275 = vector.broadcast %cst_238 : f32 to vector<8x64xf32>
    %1276 = arith.select %1272, %1274, %1275 : vector<8x64xi1>, vector<8x64xf32>
    %1277 = arith.addf %1268, %1276 : vector<8x64xf32>
    %1278 = vector.extract_strided_slice %440 {offsets = [8, 4], sizes = [8, 1], strides = [1, 1]} : vector<16x16xi32> to vector<8x1xi32>
    %1279 = vector.extract_strided_slice %444 {offsets = [8, 4], sizes = [8, 1], strides = [1, 1]} : vector<16x16xf32> to vector<8x1xf32>
    %1280 = vector.broadcast %1278 : vector<8x1xi32> to vector<8x64xi32>
    %1281 = arith.cmpi eq, %1222, %1280 : vector<8x64xi32>
    %cst_239 = arith.constant 0.000000e+00 : f32
    %1282 = vector.shape_cast %1279 : vector<8x1xf32> to vector<8x1xf32>
    %1283 = vector.broadcast %1282 : vector<8x1xf32> to vector<8x64xf32>
    %1284 = vector.broadcast %cst_239 : f32 to vector<8x64xf32>
    %1285 = arith.select %1281, %1283, %1284 : vector<8x64xi1>, vector<8x64xf32>
    %1286 = arith.addf %1277, %1285 : vector<8x64xf32>
    %1287 = vector.extract_strided_slice %440 {offsets = [8, 5], sizes = [8, 1], strides = [1, 1]} : vector<16x16xi32> to vector<8x1xi32>
    %1288 = vector.extract_strided_slice %444 {offsets = [8, 5], sizes = [8, 1], strides = [1, 1]} : vector<16x16xf32> to vector<8x1xf32>
    %1289 = vector.broadcast %1287 : vector<8x1xi32> to vector<8x64xi32>
    %1290 = arith.cmpi eq, %1222, %1289 : vector<8x64xi32>
    %cst_240 = arith.constant 0.000000e+00 : f32
    %1291 = vector.shape_cast %1288 : vector<8x1xf32> to vector<8x1xf32>
    %1292 = vector.broadcast %1291 : vector<8x1xf32> to vector<8x64xf32>
    %1293 = vector.broadcast %cst_240 : f32 to vector<8x64xf32>
    %1294 = arith.select %1290, %1292, %1293 : vector<8x64xi1>, vector<8x64xf32>
    %1295 = arith.addf %1286, %1294 : vector<8x64xf32>
    %1296 = vector.extract_strided_slice %197 {offsets = [80, 8], sizes = [64, 8], strides = [1, 1]} : vector<160x32xf32> to vector<64x8xf32>
    %cst_241 = arith.constant dense<0.000000e+00> : vector<8x8xf32>
    %1297 = tpu.matmul %1295, %1296, %cst_241 {dimension_numbers = #tpu.dot_dimension_numbers<[1], [0], [0], [1], [0, 0, 1, 1], [], []>} : vector<8x64xf32>, vector<64x8xf32>, vector<8x8xf32> -> vector<8x8xf32>
    %1298 = arith.addf %1221, %1297 : vector<8x8xf32>
    %1299 = tpu.iota {dimensions = array<i32: 1>} : vector<8x16xi32>
    %cst_242 = arith.constant 0.000000e+00 : f32
    %1300 = vector.broadcast %cst_242 : f32 to vector<8x16xf32>
    %1301 = vector.extract_strided_slice %331 {offsets = [8, 6], sizes = [8, 1], strides = [1, 1]} : vector<16x16xi32> to vector<8x1xi32>
    %1302 = vector.extract_strided_slice %335 {offsets = [8, 6], sizes = [8, 1], strides = [1, 1]} : vector<16x16xf32> to vector<8x1xf32>
    %1303 = vector.broadcast %1301 : vector<8x1xi32> to vector<8x16xi32>
    %1304 = arith.cmpi eq, %1299, %1303 : vector<8x16xi32>
    %cst_243 = arith.constant 0.000000e+00 : f32
    %1305 = vector.shape_cast %1302 : vector<8x1xf32> to vector<8x1xf32>
    %1306 = vector.broadcast %1305 : vector<8x1xf32> to vector<8x16xf32>
    %1307 = vector.broadcast %cst_243 : f32 to vector<8x16xf32>
    %1308 = arith.select %1304, %1306, %1307 : vector<8x16xi1>, vector<8x16xf32>
    %1309 = arith.addf %1300, %1308 : vector<8x16xf32>
    %1310 = vector.extract_strided_slice %331 {offsets = [8, 7], sizes = [8, 1], strides = [1, 1]} : vector<16x16xi32> to vector<8x1xi32>
    %1311 = vector.extract_strided_slice %335 {offsets = [8, 7], sizes = [8, 1], strides = [1, 1]} : vector<16x16xf32> to vector<8x1xf32>
    %1312 = vector.broadcast %1310 : vector<8x1xi32> to vector<8x16xi32>
    %1313 = arith.cmpi eq, %1299, %1312 : vector<8x16xi32>
    %cst_244 = arith.constant 0.000000e+00 : f32
    %1314 = vector.shape_cast %1311 : vector<8x1xf32> to vector<8x1xf32>
    %1315 = vector.broadcast %1314 : vector<8x1xf32> to vector<8x16xf32>
    %1316 = vector.broadcast %cst_244 : f32 to vector<8x16xf32>
    %1317 = arith.select %1313, %1315, %1316 : vector<8x16xi1>, vector<8x16xf32>
    %1318 = arith.addf %1309, %1317 : vector<8x16xf32>
    %1319 = vector.extract_strided_slice %368 {offsets = [8, 6], sizes = [8, 1], strides = [1, 1]} : vector<16x16xi32> to vector<8x1xi32>
    %1320 = vector.extract_strided_slice %372 {offsets = [8, 6], sizes = [8, 1], strides = [1, 1]} : vector<16x16xf32> to vector<8x1xf32>
    %1321 = vector.broadcast %1319 : vector<8x1xi32> to vector<8x16xi32>
    %1322 = arith.cmpi eq, %1299, %1321 : vector<8x16xi32>
    %cst_245 = arith.constant 0.000000e+00 : f32
    %1323 = vector.shape_cast %1320 : vector<8x1xf32> to vector<8x1xf32>
    %1324 = vector.broadcast %1323 : vector<8x1xf32> to vector<8x16xf32>
    %1325 = vector.broadcast %cst_245 : f32 to vector<8x16xf32>
    %1326 = arith.select %1322, %1324, %1325 : vector<8x16xi1>, vector<8x16xf32>
    %1327 = arith.addf %1318, %1326 : vector<8x16xf32>
    %1328 = vector.extract_strided_slice %368 {offsets = [8, 7], sizes = [8, 1], strides = [1, 1]} : vector<16x16xi32> to vector<8x1xi32>
    %1329 = vector.extract_strided_slice %372 {offsets = [8, 7], sizes = [8, 1], strides = [1, 1]} : vector<16x16xf32> to vector<8x1xf32>
    %1330 = vector.broadcast %1328 : vector<8x1xi32> to vector<8x16xi32>
    %1331 = arith.cmpi eq, %1299, %1330 : vector<8x16xi32>
    %cst_246 = arith.constant 0.000000e+00 : f32
    %1332 = vector.shape_cast %1329 : vector<8x1xf32> to vector<8x1xf32>
    %1333 = vector.broadcast %1332 : vector<8x1xf32> to vector<8x16xf32>
    %1334 = vector.broadcast %cst_246 : f32 to vector<8x16xf32>
    %1335 = arith.select %1331, %1333, %1334 : vector<8x16xi1>, vector<8x16xf32>
    %1336 = arith.addf %1327, %1335 : vector<8x16xf32>
    %1337 = vector.extract_strided_slice %405 {offsets = [8, 6], sizes = [8, 1], strides = [1, 1]} : vector<16x16xi32> to vector<8x1xi32>
    %1338 = vector.extract_strided_slice %409 {offsets = [8, 6], sizes = [8, 1], strides = [1, 1]} : vector<16x16xf32> to vector<8x1xf32>
    %1339 = vector.broadcast %1337 : vector<8x1xi32> to vector<8x16xi32>
    %1340 = arith.cmpi eq, %1299, %1339 : vector<8x16xi32>
    %cst_247 = arith.constant 0.000000e+00 : f32
    %1341 = vector.shape_cast %1338 : vector<8x1xf32> to vector<8x1xf32>
    %1342 = vector.broadcast %1341 : vector<8x1xf32> to vector<8x16xf32>
    %1343 = vector.broadcast %cst_247 : f32 to vector<8x16xf32>
    %1344 = arith.select %1340, %1342, %1343 : vector<8x16xi1>, vector<8x16xf32>
    %1345 = arith.addf %1336, %1344 : vector<8x16xf32>
    %1346 = vector.extract_strided_slice %405 {offsets = [8, 7], sizes = [8, 1], strides = [1, 1]} : vector<16x16xi32> to vector<8x1xi32>
    %1347 = vector.extract_strided_slice %409 {offsets = [8, 7], sizes = [8, 1], strides = [1, 1]} : vector<16x16xf32> to vector<8x1xf32>
    %1348 = vector.broadcast %1346 : vector<8x1xi32> to vector<8x16xi32>
    %1349 = arith.cmpi eq, %1299, %1348 : vector<8x16xi32>
    %cst_248 = arith.constant 0.000000e+00 : f32
    %1350 = vector.shape_cast %1347 : vector<8x1xf32> to vector<8x1xf32>
    %1351 = vector.broadcast %1350 : vector<8x1xf32> to vector<8x16xf32>
    %1352 = vector.broadcast %cst_248 : f32 to vector<8x16xf32>
    %1353 = arith.select %1349, %1351, %1352 : vector<8x16xi1>, vector<8x16xf32>
    %1354 = arith.addf %1345, %1353 : vector<8x16xf32>
    %1355 = vector.extract_strided_slice %440 {offsets = [8, 6], sizes = [8, 1], strides = [1, 1]} : vector<16x16xi32> to vector<8x1xi32>
    %1356 = vector.extract_strided_slice %444 {offsets = [8, 6], sizes = [8, 1], strides = [1, 1]} : vector<16x16xf32> to vector<8x1xf32>
    %1357 = vector.broadcast %1355 : vector<8x1xi32> to vector<8x16xi32>
    %1358 = arith.cmpi eq, %1299, %1357 : vector<8x16xi32>
    %cst_249 = arith.constant 0.000000e+00 : f32
    %1359 = vector.shape_cast %1356 : vector<8x1xf32> to vector<8x1xf32>
    %1360 = vector.broadcast %1359 : vector<8x1xf32> to vector<8x16xf32>
    %1361 = vector.broadcast %cst_249 : f32 to vector<8x16xf32>
    %1362 = arith.select %1358, %1360, %1361 : vector<8x16xi1>, vector<8x16xf32>
    %1363 = arith.addf %1354, %1362 : vector<8x16xf32>
    %1364 = vector.extract_strided_slice %440 {offsets = [8, 7], sizes = [8, 1], strides = [1, 1]} : vector<16x16xi32> to vector<8x1xi32>
    %1365 = vector.extract_strided_slice %444 {offsets = [8, 7], sizes = [8, 1], strides = [1, 1]} : vector<16x16xf32> to vector<8x1xf32>
    %1366 = vector.broadcast %1364 : vector<8x1xi32> to vector<8x16xi32>
    %1367 = arith.cmpi eq, %1299, %1366 : vector<8x16xi32>
    %cst_250 = arith.constant 0.000000e+00 : f32
    %1368 = vector.shape_cast %1365 : vector<8x1xf32> to vector<8x1xf32>
    %1369 = vector.broadcast %1368 : vector<8x1xf32> to vector<8x16xf32>
    %1370 = vector.broadcast %cst_250 : f32 to vector<8x16xf32>
    %1371 = arith.select %1367, %1369, %1370 : vector<8x16xi1>, vector<8x16xf32>
    %1372 = arith.addf %1363, %1371 : vector<8x16xf32>
    %1373 = vector.extract_strided_slice %197 {offsets = [144, 8], sizes = [16, 8], strides = [1, 1]} : vector<160x32xf32> to vector<16x8xf32>
    %cst_251 = arith.constant dense<0.000000e+00> : vector<8x8xf32>
    %1374 = tpu.matmul %1372, %1373, %cst_251 {dimension_numbers = #tpu.dot_dimension_numbers<[1], [0], [0], [1], [0, 0, 1, 1], [], []>} : vector<8x16xf32>, vector<16x8xf32>, vector<8x8xf32> -> vector<8x8xf32>
    %1375 = arith.addf %1298, %1374 : vector<8x8xf32>
    %cst_252 = arith.constant 0.000000e+00 : f32
    %1376 = vector.broadcast %cst_252 : f32 to vector<8x8xf32>
    %1377 = tpu.iota {dimensions = array<i32: 1>} : vector<8x64xi32>
    %cst_253 = arith.constant 0.000000e+00 : f32
    %1378 = vector.broadcast %cst_253 : f32 to vector<8x64xf32>
    %1379 = vector.extract_strided_slice %331 {offsets = [8, 8], sizes = [8, 1], strides = [1, 1]} : vector<16x16xi32> to vector<8x1xi32>
    %1380 = vector.extract_strided_slice %335 {offsets = [8, 8], sizes = [8, 1], strides = [1, 1]} : vector<16x16xf32> to vector<8x1xf32>
    %1381 = vector.broadcast %1379 : vector<8x1xi32> to vector<8x64xi32>
    %1382 = arith.cmpi eq, %1377, %1381 : vector<8x64xi32>
    %cst_254 = arith.constant 0.000000e+00 : f32
    %1383 = vector.shape_cast %1380 : vector<8x1xf32> to vector<8x1xf32>
    %1384 = vector.broadcast %1383 : vector<8x1xf32> to vector<8x64xf32>
    %1385 = vector.broadcast %cst_254 : f32 to vector<8x64xf32>
    %1386 = arith.select %1382, %1384, %1385 : vector<8x64xi1>, vector<8x64xf32>
    %1387 = arith.addf %1378, %1386 : vector<8x64xf32>
    %1388 = vector.extract_strided_slice %331 {offsets = [8, 9], sizes = [8, 1], strides = [1, 1]} : vector<16x16xi32> to vector<8x1xi32>
    %1389 = vector.extract_strided_slice %335 {offsets = [8, 9], sizes = [8, 1], strides = [1, 1]} : vector<16x16xf32> to vector<8x1xf32>
    %1390 = vector.broadcast %1388 : vector<8x1xi32> to vector<8x64xi32>
    %1391 = arith.cmpi eq, %1377, %1390 : vector<8x64xi32>
    %cst_255 = arith.constant 0.000000e+00 : f32
    %1392 = vector.shape_cast %1389 : vector<8x1xf32> to vector<8x1xf32>
    %1393 = vector.broadcast %1392 : vector<8x1xf32> to vector<8x64xf32>
    %1394 = vector.broadcast %cst_255 : f32 to vector<8x64xf32>
    %1395 = arith.select %1391, %1393, %1394 : vector<8x64xi1>, vector<8x64xf32>
    %1396 = arith.addf %1387, %1395 : vector<8x64xf32>
    %1397 = vector.extract_strided_slice %368 {offsets = [8, 8], sizes = [8, 1], strides = [1, 1]} : vector<16x16xi32> to vector<8x1xi32>
    %1398 = vector.extract_strided_slice %372 {offsets = [8, 8], sizes = [8, 1], strides = [1, 1]} : vector<16x16xf32> to vector<8x1xf32>
    %1399 = vector.broadcast %1397 : vector<8x1xi32> to vector<8x64xi32>
    %1400 = arith.cmpi eq, %1377, %1399 : vector<8x64xi32>
    %cst_256 = arith.constant 0.000000e+00 : f32
    %1401 = vector.shape_cast %1398 : vector<8x1xf32> to vector<8x1xf32>
    %1402 = vector.broadcast %1401 : vector<8x1xf32> to vector<8x64xf32>
    %1403 = vector.broadcast %cst_256 : f32 to vector<8x64xf32>
    %1404 = arith.select %1400, %1402, %1403 : vector<8x64xi1>, vector<8x64xf32>
    %1405 = arith.addf %1396, %1404 : vector<8x64xf32>
    %1406 = vector.extract_strided_slice %368 {offsets = [8, 9], sizes = [8, 1], strides = [1, 1]} : vector<16x16xi32> to vector<8x1xi32>
    %1407 = vector.extract_strided_slice %372 {offsets = [8, 9], sizes = [8, 1], strides = [1, 1]} : vector<16x16xf32> to vector<8x1xf32>
    %1408 = vector.broadcast %1406 : vector<8x1xi32> to vector<8x64xi32>
    %1409 = arith.cmpi eq, %1377, %1408 : vector<8x64xi32>
    %cst_257 = arith.constant 0.000000e+00 : f32
    %1410 = vector.shape_cast %1407 : vector<8x1xf32> to vector<8x1xf32>
    %1411 = vector.broadcast %1410 : vector<8x1xf32> to vector<8x64xf32>
    %1412 = vector.broadcast %cst_257 : f32 to vector<8x64xf32>
    %1413 = arith.select %1409, %1411, %1412 : vector<8x64xi1>, vector<8x64xf32>
    %1414 = arith.addf %1405, %1413 : vector<8x64xf32>
    %1415 = vector.extract_strided_slice %405 {offsets = [8, 8], sizes = [8, 1], strides = [1, 1]} : vector<16x16xi32> to vector<8x1xi32>
    %1416 = vector.extract_strided_slice %409 {offsets = [8, 8], sizes = [8, 1], strides = [1, 1]} : vector<16x16xf32> to vector<8x1xf32>
    %1417 = vector.broadcast %1415 : vector<8x1xi32> to vector<8x64xi32>
    %1418 = arith.cmpi eq, %1377, %1417 : vector<8x64xi32>
    %cst_258 = arith.constant 0.000000e+00 : f32
    %1419 = vector.shape_cast %1416 : vector<8x1xf32> to vector<8x1xf32>
    %1420 = vector.broadcast %1419 : vector<8x1xf32> to vector<8x64xf32>
    %1421 = vector.broadcast %cst_258 : f32 to vector<8x64xf32>
    %1422 = arith.select %1418, %1420, %1421 : vector<8x64xi1>, vector<8x64xf32>
    %1423 = arith.addf %1414, %1422 : vector<8x64xf32>
    %1424 = vector.extract_strided_slice %405 {offsets = [8, 9], sizes = [8, 1], strides = [1, 1]} : vector<16x16xi32> to vector<8x1xi32>
    %1425 = vector.extract_strided_slice %409 {offsets = [8, 9], sizes = [8, 1], strides = [1, 1]} : vector<16x16xf32> to vector<8x1xf32>
    %1426 = vector.broadcast %1424 : vector<8x1xi32> to vector<8x64xi32>
    %1427 = arith.cmpi eq, %1377, %1426 : vector<8x64xi32>
    %cst_259 = arith.constant 0.000000e+00 : f32
    %1428 = vector.shape_cast %1425 : vector<8x1xf32> to vector<8x1xf32>
    %1429 = vector.broadcast %1428 : vector<8x1xf32> to vector<8x64xf32>
    %1430 = vector.broadcast %cst_259 : f32 to vector<8x64xf32>
    %1431 = arith.select %1427, %1429, %1430 : vector<8x64xi1>, vector<8x64xf32>
    %1432 = arith.addf %1423, %1431 : vector<8x64xf32>
    %1433 = vector.extract_strided_slice %440 {offsets = [8, 8], sizes = [8, 1], strides = [1, 1]} : vector<16x16xi32> to vector<8x1xi32>
    %1434 = vector.extract_strided_slice %444 {offsets = [8, 8], sizes = [8, 1], strides = [1, 1]} : vector<16x16xf32> to vector<8x1xf32>
    %1435 = vector.broadcast %1433 : vector<8x1xi32> to vector<8x64xi32>
    %1436 = arith.cmpi eq, %1377, %1435 : vector<8x64xi32>
    %cst_260 = arith.constant 0.000000e+00 : f32
    %1437 = vector.shape_cast %1434 : vector<8x1xf32> to vector<8x1xf32>
    %1438 = vector.broadcast %1437 : vector<8x1xf32> to vector<8x64xf32>
    %1439 = vector.broadcast %cst_260 : f32 to vector<8x64xf32>
    %1440 = arith.select %1436, %1438, %1439 : vector<8x64xi1>, vector<8x64xf32>
    %1441 = arith.addf %1432, %1440 : vector<8x64xf32>
    %1442 = vector.extract_strided_slice %440 {offsets = [8, 9], sizes = [8, 1], strides = [1, 1]} : vector<16x16xi32> to vector<8x1xi32>
    %1443 = vector.extract_strided_slice %444 {offsets = [8, 9], sizes = [8, 1], strides = [1, 1]} : vector<16x16xf32> to vector<8x1xf32>
    %1444 = vector.broadcast %1442 : vector<8x1xi32> to vector<8x64xi32>
    %1445 = arith.cmpi eq, %1377, %1444 : vector<8x64xi32>
    %cst_261 = arith.constant 0.000000e+00 : f32
    %1446 = vector.shape_cast %1443 : vector<8x1xf32> to vector<8x1xf32>
    %1447 = vector.broadcast %1446 : vector<8x1xf32> to vector<8x64xf32>
    %1448 = vector.broadcast %cst_261 : f32 to vector<8x64xf32>
    %1449 = arith.select %1445, %1447, %1448 : vector<8x64xi1>, vector<8x64xf32>
    %1450 = arith.addf %1441, %1449 : vector<8x64xf32>
    %1451 = vector.extract_strided_slice %197 {offsets = [80, 16], sizes = [64, 8], strides = [1, 1]} : vector<160x32xf32> to vector<64x8xf32>
    %cst_262 = arith.constant dense<0.000000e+00> : vector<8x8xf32>
    %1452 = tpu.matmul %1450, %1451, %cst_262 {dimension_numbers = #tpu.dot_dimension_numbers<[1], [0], [0], [1], [0, 0, 1, 1], [], []>} : vector<8x64xf32>, vector<64x8xf32>, vector<8x8xf32> -> vector<8x8xf32>
    %1453 = arith.addf %1376, %1452 : vector<8x8xf32>
    %1454 = tpu.iota {dimensions = array<i32: 1>} : vector<8x16xi32>
    %cst_263 = arith.constant 0.000000e+00 : f32
    %1455 = vector.broadcast %cst_263 : f32 to vector<8x16xf32>
    %1456 = vector.extract_strided_slice %331 {offsets = [8, 10], sizes = [8, 1], strides = [1, 1]} : vector<16x16xi32> to vector<8x1xi32>
    %1457 = vector.extract_strided_slice %335 {offsets = [8, 10], sizes = [8, 1], strides = [1, 1]} : vector<16x16xf32> to vector<8x1xf32>
    %1458 = vector.broadcast %1456 : vector<8x1xi32> to vector<8x16xi32>
    %1459 = arith.cmpi eq, %1454, %1458 : vector<8x16xi32>
    %cst_264 = arith.constant 0.000000e+00 : f32
    %1460 = vector.shape_cast %1457 : vector<8x1xf32> to vector<8x1xf32>
    %1461 = vector.broadcast %1460 : vector<8x1xf32> to vector<8x16xf32>
    %1462 = vector.broadcast %cst_264 : f32 to vector<8x16xf32>
    %1463 = arith.select %1459, %1461, %1462 : vector<8x16xi1>, vector<8x16xf32>
    %1464 = arith.addf %1455, %1463 : vector<8x16xf32>
    %1465 = vector.extract_strided_slice %331 {offsets = [8, 11], sizes = [8, 1], strides = [1, 1]} : vector<16x16xi32> to vector<8x1xi32>
    %1466 = vector.extract_strided_slice %335 {offsets = [8, 11], sizes = [8, 1], strides = [1, 1]} : vector<16x16xf32> to vector<8x1xf32>
    %1467 = vector.broadcast %1465 : vector<8x1xi32> to vector<8x16xi32>
    %1468 = arith.cmpi eq, %1454, %1467 : vector<8x16xi32>
    %cst_265 = arith.constant 0.000000e+00 : f32
    %1469 = vector.shape_cast %1466 : vector<8x1xf32> to vector<8x1xf32>
    %1470 = vector.broadcast %1469 : vector<8x1xf32> to vector<8x16xf32>
    %1471 = vector.broadcast %cst_265 : f32 to vector<8x16xf32>
    %1472 = arith.select %1468, %1470, %1471 : vector<8x16xi1>, vector<8x16xf32>
    %1473 = arith.addf %1464, %1472 : vector<8x16xf32>
    %1474 = vector.extract_strided_slice %368 {offsets = [8, 10], sizes = [8, 1], strides = [1, 1]} : vector<16x16xi32> to vector<8x1xi32>
    %1475 = vector.extract_strided_slice %372 {offsets = [8, 10], sizes = [8, 1], strides = [1, 1]} : vector<16x16xf32> to vector<8x1xf32>
    %1476 = vector.broadcast %1474 : vector<8x1xi32> to vector<8x16xi32>
    %1477 = arith.cmpi eq, %1454, %1476 : vector<8x16xi32>
    %cst_266 = arith.constant 0.000000e+00 : f32
    %1478 = vector.shape_cast %1475 : vector<8x1xf32> to vector<8x1xf32>
    %1479 = vector.broadcast %1478 : vector<8x1xf32> to vector<8x16xf32>
    %1480 = vector.broadcast %cst_266 : f32 to vector<8x16xf32>
    %1481 = arith.select %1477, %1479, %1480 : vector<8x16xi1>, vector<8x16xf32>
    %1482 = arith.addf %1473, %1481 : vector<8x16xf32>
    %1483 = vector.extract_strided_slice %368 {offsets = [8, 11], sizes = [8, 1], strides = [1, 1]} : vector<16x16xi32> to vector<8x1xi32>
    %1484 = vector.extract_strided_slice %372 {offsets = [8, 11], sizes = [8, 1], strides = [1, 1]} : vector<16x16xf32> to vector<8x1xf32>
    %1485 = vector.broadcast %1483 : vector<8x1xi32> to vector<8x16xi32>
    %1486 = arith.cmpi eq, %1454, %1485 : vector<8x16xi32>
    %cst_267 = arith.constant 0.000000e+00 : f32
    %1487 = vector.shape_cast %1484 : vector<8x1xf32> to vector<8x1xf32>
    %1488 = vector.broadcast %1487 : vector<8x1xf32> to vector<8x16xf32>
    %1489 = vector.broadcast %cst_267 : f32 to vector<8x16xf32>
    %1490 = arith.select %1486, %1488, %1489 : vector<8x16xi1>, vector<8x16xf32>
    %1491 = arith.addf %1482, %1490 : vector<8x16xf32>
    %1492 = vector.extract_strided_slice %405 {offsets = [8, 10], sizes = [8, 1], strides = [1, 1]} : vector<16x16xi32> to vector<8x1xi32>
    %1493 = vector.extract_strided_slice %409 {offsets = [8, 10], sizes = [8, 1], strides = [1, 1]} : vector<16x16xf32> to vector<8x1xf32>
    %1494 = vector.broadcast %1492 : vector<8x1xi32> to vector<8x16xi32>
    %1495 = arith.cmpi eq, %1454, %1494 : vector<8x16xi32>
    %cst_268 = arith.constant 0.000000e+00 : f32
    %1496 = vector.shape_cast %1493 : vector<8x1xf32> to vector<8x1xf32>
    %1497 = vector.broadcast %1496 : vector<8x1xf32> to vector<8x16xf32>
    %1498 = vector.broadcast %cst_268 : f32 to vector<8x16xf32>
    %1499 = arith.select %1495, %1497, %1498 : vector<8x16xi1>, vector<8x16xf32>
    %1500 = arith.addf %1491, %1499 : vector<8x16xf32>
    %1501 = vector.extract_strided_slice %405 {offsets = [8, 11], sizes = [8, 1], strides = [1, 1]} : vector<16x16xi32> to vector<8x1xi32>
    %1502 = vector.extract_strided_slice %409 {offsets = [8, 11], sizes = [8, 1], strides = [1, 1]} : vector<16x16xf32> to vector<8x1xf32>
    %1503 = vector.broadcast %1501 : vector<8x1xi32> to vector<8x16xi32>
    %1504 = arith.cmpi eq, %1454, %1503 : vector<8x16xi32>
    %cst_269 = arith.constant 0.000000e+00 : f32
    %1505 = vector.shape_cast %1502 : vector<8x1xf32> to vector<8x1xf32>
    %1506 = vector.broadcast %1505 : vector<8x1xf32> to vector<8x16xf32>
    %1507 = vector.broadcast %cst_269 : f32 to vector<8x16xf32>
    %1508 = arith.select %1504, %1506, %1507 : vector<8x16xi1>, vector<8x16xf32>
    %1509 = arith.addf %1500, %1508 : vector<8x16xf32>
    %1510 = vector.extract_strided_slice %440 {offsets = [8, 10], sizes = [8, 1], strides = [1, 1]} : vector<16x16xi32> to vector<8x1xi32>
    %1511 = vector.extract_strided_slice %444 {offsets = [8, 10], sizes = [8, 1], strides = [1, 1]} : vector<16x16xf32> to vector<8x1xf32>
    %1512 = vector.broadcast %1510 : vector<8x1xi32> to vector<8x16xi32>
    %1513 = arith.cmpi eq, %1454, %1512 : vector<8x16xi32>
    %cst_270 = arith.constant 0.000000e+00 : f32
    %1514 = vector.shape_cast %1511 : vector<8x1xf32> to vector<8x1xf32>
    %1515 = vector.broadcast %1514 : vector<8x1xf32> to vector<8x16xf32>
    %1516 = vector.broadcast %cst_270 : f32 to vector<8x16xf32>
    %1517 = arith.select %1513, %1515, %1516 : vector<8x16xi1>, vector<8x16xf32>
    %1518 = arith.addf %1509, %1517 : vector<8x16xf32>
    %1519 = vector.extract_strided_slice %440 {offsets = [8, 11], sizes = [8, 1], strides = [1, 1]} : vector<16x16xi32> to vector<8x1xi32>
    %1520 = vector.extract_strided_slice %444 {offsets = [8, 11], sizes = [8, 1], strides = [1, 1]} : vector<16x16xf32> to vector<8x1xf32>
    %1521 = vector.broadcast %1519 : vector<8x1xi32> to vector<8x16xi32>
    %1522 = arith.cmpi eq, %1454, %1521 : vector<8x16xi32>
    %cst_271 = arith.constant 0.000000e+00 : f32
    %1523 = vector.shape_cast %1520 : vector<8x1xf32> to vector<8x1xf32>
    %1524 = vector.broadcast %1523 : vector<8x1xf32> to vector<8x16xf32>
    %1525 = vector.broadcast %cst_271 : f32 to vector<8x16xf32>
    %1526 = arith.select %1522, %1524, %1525 : vector<8x16xi1>, vector<8x16xf32>
    %1527 = arith.addf %1518, %1526 : vector<8x16xf32>
    %1528 = vector.extract_strided_slice %197 {offsets = [144, 16], sizes = [16, 8], strides = [1, 1]} : vector<160x32xf32> to vector<16x8xf32>
    %cst_272 = arith.constant dense<0.000000e+00> : vector<8x8xf32>
    %1529 = tpu.matmul %1527, %1528, %cst_272 {dimension_numbers = #tpu.dot_dimension_numbers<[1], [0], [0], [1], [0, 0, 1, 1], [], []>} : vector<8x16xf32>, vector<16x8xf32>, vector<8x8xf32> -> vector<8x8xf32>
    %1530 = arith.addf %1453, %1529 : vector<8x8xf32>
    %cst_273 = arith.constant 0.000000e+00 : f32
    %1531 = vector.broadcast %cst_273 : f32 to vector<8x8xf32>
    %1532 = tpu.iota {dimensions = array<i32: 1>} : vector<8x64xi32>
    %cst_274 = arith.constant 0.000000e+00 : f32
    %1533 = vector.broadcast %cst_274 : f32 to vector<8x64xf32>
    %1534 = vector.extract_strided_slice %331 {offsets = [8, 12], sizes = [8, 1], strides = [1, 1]} : vector<16x16xi32> to vector<8x1xi32>
    %1535 = vector.extract_strided_slice %335 {offsets = [8, 12], sizes = [8, 1], strides = [1, 1]} : vector<16x16xf32> to vector<8x1xf32>
    %1536 = vector.broadcast %1534 : vector<8x1xi32> to vector<8x64xi32>
    %1537 = arith.cmpi eq, %1532, %1536 : vector<8x64xi32>
    %cst_275 = arith.constant 0.000000e+00 : f32
    %1538 = vector.shape_cast %1535 : vector<8x1xf32> to vector<8x1xf32>
    %1539 = vector.broadcast %1538 : vector<8x1xf32> to vector<8x64xf32>
    %1540 = vector.broadcast %cst_275 : f32 to vector<8x64xf32>
    %1541 = arith.select %1537, %1539, %1540 : vector<8x64xi1>, vector<8x64xf32>
    %1542 = arith.addf %1533, %1541 : vector<8x64xf32>
    %1543 = vector.extract_strided_slice %331 {offsets = [8, 13], sizes = [8, 1], strides = [1, 1]} : vector<16x16xi32> to vector<8x1xi32>
    %1544 = vector.extract_strided_slice %335 {offsets = [8, 13], sizes = [8, 1], strides = [1, 1]} : vector<16x16xf32> to vector<8x1xf32>
    %1545 = vector.broadcast %1543 : vector<8x1xi32> to vector<8x64xi32>
    %1546 = arith.cmpi eq, %1532, %1545 : vector<8x64xi32>
    %cst_276 = arith.constant 0.000000e+00 : f32
    %1547 = vector.shape_cast %1544 : vector<8x1xf32> to vector<8x1xf32>
    %1548 = vector.broadcast %1547 : vector<8x1xf32> to vector<8x64xf32>
    %1549 = vector.broadcast %cst_276 : f32 to vector<8x64xf32>
    %1550 = arith.select %1546, %1548, %1549 : vector<8x64xi1>, vector<8x64xf32>
    %1551 = arith.addf %1542, %1550 : vector<8x64xf32>
    %1552 = vector.extract_strided_slice %368 {offsets = [8, 12], sizes = [8, 1], strides = [1, 1]} : vector<16x16xi32> to vector<8x1xi32>
    %1553 = vector.extract_strided_slice %372 {offsets = [8, 12], sizes = [8, 1], strides = [1, 1]} : vector<16x16xf32> to vector<8x1xf32>
    %1554 = vector.broadcast %1552 : vector<8x1xi32> to vector<8x64xi32>
    %1555 = arith.cmpi eq, %1532, %1554 : vector<8x64xi32>
    %cst_277 = arith.constant 0.000000e+00 : f32
    %1556 = vector.shape_cast %1553 : vector<8x1xf32> to vector<8x1xf32>
    %1557 = vector.broadcast %1556 : vector<8x1xf32> to vector<8x64xf32>
    %1558 = vector.broadcast %cst_277 : f32 to vector<8x64xf32>
    %1559 = arith.select %1555, %1557, %1558 : vector<8x64xi1>, vector<8x64xf32>
    %1560 = arith.addf %1551, %1559 : vector<8x64xf32>
    %1561 = vector.extract_strided_slice %368 {offsets = [8, 13], sizes = [8, 1], strides = [1, 1]} : vector<16x16xi32> to vector<8x1xi32>
    %1562 = vector.extract_strided_slice %372 {offsets = [8, 13], sizes = [8, 1], strides = [1, 1]} : vector<16x16xf32> to vector<8x1xf32>
    %1563 = vector.broadcast %1561 : vector<8x1xi32> to vector<8x64xi32>
    %1564 = arith.cmpi eq, %1532, %1563 : vector<8x64xi32>
    %cst_278 = arith.constant 0.000000e+00 : f32
    %1565 = vector.shape_cast %1562 : vector<8x1xf32> to vector<8x1xf32>
    %1566 = vector.broadcast %1565 : vector<8x1xf32> to vector<8x64xf32>
    %1567 = vector.broadcast %cst_278 : f32 to vector<8x64xf32>
    %1568 = arith.select %1564, %1566, %1567 : vector<8x64xi1>, vector<8x64xf32>
    %1569 = arith.addf %1560, %1568 : vector<8x64xf32>
    %1570 = vector.extract_strided_slice %405 {offsets = [8, 12], sizes = [8, 1], strides = [1, 1]} : vector<16x16xi32> to vector<8x1xi32>
    %1571 = vector.extract_strided_slice %409 {offsets = [8, 12], sizes = [8, 1], strides = [1, 1]} : vector<16x16xf32> to vector<8x1xf32>
    %1572 = vector.broadcast %1570 : vector<8x1xi32> to vector<8x64xi32>
    %1573 = arith.cmpi eq, %1532, %1572 : vector<8x64xi32>
    %cst_279 = arith.constant 0.000000e+00 : f32
    %1574 = vector.shape_cast %1571 : vector<8x1xf32> to vector<8x1xf32>
    %1575 = vector.broadcast %1574 : vector<8x1xf32> to vector<8x64xf32>
    %1576 = vector.broadcast %cst_279 : f32 to vector<8x64xf32>
    %1577 = arith.select %1573, %1575, %1576 : vector<8x64xi1>, vector<8x64xf32>
    %1578 = arith.addf %1569, %1577 : vector<8x64xf32>
    %1579 = vector.extract_strided_slice %405 {offsets = [8, 13], sizes = [8, 1], strides = [1, 1]} : vector<16x16xi32> to vector<8x1xi32>
    %1580 = vector.extract_strided_slice %409 {offsets = [8, 13], sizes = [8, 1], strides = [1, 1]} : vector<16x16xf32> to vector<8x1xf32>
    %1581 = vector.broadcast %1579 : vector<8x1xi32> to vector<8x64xi32>
    %1582 = arith.cmpi eq, %1532, %1581 : vector<8x64xi32>
    %cst_280 = arith.constant 0.000000e+00 : f32
    %1583 = vector.shape_cast %1580 : vector<8x1xf32> to vector<8x1xf32>
    %1584 = vector.broadcast %1583 : vector<8x1xf32> to vector<8x64xf32>
    %1585 = vector.broadcast %cst_280 : f32 to vector<8x64xf32>
    %1586 = arith.select %1582, %1584, %1585 : vector<8x64xi1>, vector<8x64xf32>
    %1587 = arith.addf %1578, %1586 : vector<8x64xf32>
    %1588 = vector.extract_strided_slice %440 {offsets = [8, 12], sizes = [8, 1], strides = [1, 1]} : vector<16x16xi32> to vector<8x1xi32>
    %1589 = vector.extract_strided_slice %444 {offsets = [8, 12], sizes = [8, 1], strides = [1, 1]} : vector<16x16xf32> to vector<8x1xf32>
    %1590 = vector.broadcast %1588 : vector<8x1xi32> to vector<8x64xi32>
    %1591 = arith.cmpi eq, %1532, %1590 : vector<8x64xi32>
    %cst_281 = arith.constant 0.000000e+00 : f32
    %1592 = vector.shape_cast %1589 : vector<8x1xf32> to vector<8x1xf32>
    %1593 = vector.broadcast %1592 : vector<8x1xf32> to vector<8x64xf32>
    %1594 = vector.broadcast %cst_281 : f32 to vector<8x64xf32>
    %1595 = arith.select %1591, %1593, %1594 : vector<8x64xi1>, vector<8x64xf32>
    %1596 = arith.addf %1587, %1595 : vector<8x64xf32>
    %1597 = vector.extract_strided_slice %440 {offsets = [8, 13], sizes = [8, 1], strides = [1, 1]} : vector<16x16xi32> to vector<8x1xi32>
    %1598 = vector.extract_strided_slice %444 {offsets = [8, 13], sizes = [8, 1], strides = [1, 1]} : vector<16x16xf32> to vector<8x1xf32>
    %1599 = vector.broadcast %1597 : vector<8x1xi32> to vector<8x64xi32>
    %1600 = arith.cmpi eq, %1532, %1599 : vector<8x64xi32>
    %cst_282 = arith.constant 0.000000e+00 : f32
    %1601 = vector.shape_cast %1598 : vector<8x1xf32> to vector<8x1xf32>
    %1602 = vector.broadcast %1601 : vector<8x1xf32> to vector<8x64xf32>
    %1603 = vector.broadcast %cst_282 : f32 to vector<8x64xf32>
    %1604 = arith.select %1600, %1602, %1603 : vector<8x64xi1>, vector<8x64xf32>
    %1605 = arith.addf %1596, %1604 : vector<8x64xf32>
    %1606 = vector.extract_strided_slice %197 {offsets = [80, 24], sizes = [64, 8], strides = [1, 1]} : vector<160x32xf32> to vector<64x8xf32>
    %cst_283 = arith.constant dense<0.000000e+00> : vector<8x8xf32>
    %1607 = tpu.matmul %1605, %1606, %cst_283 {dimension_numbers = #tpu.dot_dimension_numbers<[1], [0], [0], [1], [0, 0, 1, 1], [], []>} : vector<8x64xf32>, vector<64x8xf32>, vector<8x8xf32> -> vector<8x8xf32>
    %1608 = arith.addf %1531, %1607 : vector<8x8xf32>
    %1609 = tpu.iota {dimensions = array<i32: 1>} : vector<8x16xi32>
    %cst_284 = arith.constant 0.000000e+00 : f32
    %1610 = vector.broadcast %cst_284 : f32 to vector<8x16xf32>
    %1611 = vector.extract_strided_slice %331 {offsets = [8, 14], sizes = [8, 1], strides = [1, 1]} : vector<16x16xi32> to vector<8x1xi32>
    %1612 = vector.extract_strided_slice %335 {offsets = [8, 14], sizes = [8, 1], strides = [1, 1]} : vector<16x16xf32> to vector<8x1xf32>
    %1613 = vector.broadcast %1611 : vector<8x1xi32> to vector<8x16xi32>
    %1614 = arith.cmpi eq, %1609, %1613 : vector<8x16xi32>
    %cst_285 = arith.constant 0.000000e+00 : f32
    %1615 = vector.shape_cast %1612 : vector<8x1xf32> to vector<8x1xf32>
    %1616 = vector.broadcast %1615 : vector<8x1xf32> to vector<8x16xf32>
    %1617 = vector.broadcast %cst_285 : f32 to vector<8x16xf32>
    %1618 = arith.select %1614, %1616, %1617 : vector<8x16xi1>, vector<8x16xf32>
    %1619 = arith.addf %1610, %1618 : vector<8x16xf32>
    %1620 = vector.extract_strided_slice %331 {offsets = [8, 15], sizes = [8, 1], strides = [1, 1]} : vector<16x16xi32> to vector<8x1xi32>
    %1621 = vector.extract_strided_slice %335 {offsets = [8, 15], sizes = [8, 1], strides = [1, 1]} : vector<16x16xf32> to vector<8x1xf32>
    %1622 = vector.broadcast %1620 : vector<8x1xi32> to vector<8x16xi32>
    %1623 = arith.cmpi eq, %1609, %1622 : vector<8x16xi32>
    %cst_286 = arith.constant 0.000000e+00 : f32
    %1624 = vector.shape_cast %1621 : vector<8x1xf32> to vector<8x1xf32>
    %1625 = vector.broadcast %1624 : vector<8x1xf32> to vector<8x16xf32>
    %1626 = vector.broadcast %cst_286 : f32 to vector<8x16xf32>
    %1627 = arith.select %1623, %1625, %1626 : vector<8x16xi1>, vector<8x16xf32>
    %1628 = arith.addf %1619, %1627 : vector<8x16xf32>
    %1629 = vector.extract_strided_slice %368 {offsets = [8, 14], sizes = [8, 1], strides = [1, 1]} : vector<16x16xi32> to vector<8x1xi32>
    %1630 = vector.extract_strided_slice %372 {offsets = [8, 14], sizes = [8, 1], strides = [1, 1]} : vector<16x16xf32> to vector<8x1xf32>
    %1631 = vector.broadcast %1629 : vector<8x1xi32> to vector<8x16xi32>
    %1632 = arith.cmpi eq, %1609, %1631 : vector<8x16xi32>
    %cst_287 = arith.constant 0.000000e+00 : f32
    %1633 = vector.shape_cast %1630 : vector<8x1xf32> to vector<8x1xf32>
    %1634 = vector.broadcast %1633 : vector<8x1xf32> to vector<8x16xf32>
    %1635 = vector.broadcast %cst_287 : f32 to vector<8x16xf32>
    %1636 = arith.select %1632, %1634, %1635 : vector<8x16xi1>, vector<8x16xf32>
    %1637 = arith.addf %1628, %1636 : vector<8x16xf32>
    %1638 = vector.extract_strided_slice %368 {offsets = [8, 15], sizes = [8, 1], strides = [1, 1]} : vector<16x16xi32> to vector<8x1xi32>
    %1639 = vector.extract_strided_slice %372 {offsets = [8, 15], sizes = [8, 1], strides = [1, 1]} : vector<16x16xf32> to vector<8x1xf32>
    %1640 = vector.broadcast %1638 : vector<8x1xi32> to vector<8x16xi32>
    %1641 = arith.cmpi eq, %1609, %1640 : vector<8x16xi32>
    %cst_288 = arith.constant 0.000000e+00 : f32
    %1642 = vector.shape_cast %1639 : vector<8x1xf32> to vector<8x1xf32>
    %1643 = vector.broadcast %1642 : vector<8x1xf32> to vector<8x16xf32>
    %1644 = vector.broadcast %cst_288 : f32 to vector<8x16xf32>
    %1645 = arith.select %1641, %1643, %1644 : vector<8x16xi1>, vector<8x16xf32>
    %1646 = arith.addf %1637, %1645 : vector<8x16xf32>
    %1647 = vector.extract_strided_slice %405 {offsets = [8, 14], sizes = [8, 1], strides = [1, 1]} : vector<16x16xi32> to vector<8x1xi32>
    %1648 = vector.extract_strided_slice %409 {offsets = [8, 14], sizes = [8, 1], strides = [1, 1]} : vector<16x16xf32> to vector<8x1xf32>
    %1649 = vector.broadcast %1647 : vector<8x1xi32> to vector<8x16xi32>
    %1650 = arith.cmpi eq, %1609, %1649 : vector<8x16xi32>
    %cst_289 = arith.constant 0.000000e+00 : f32
    %1651 = vector.shape_cast %1648 : vector<8x1xf32> to vector<8x1xf32>
    %1652 = vector.broadcast %1651 : vector<8x1xf32> to vector<8x16xf32>
    %1653 = vector.broadcast %cst_289 : f32 to vector<8x16xf32>
    %1654 = arith.select %1650, %1652, %1653 : vector<8x16xi1>, vector<8x16xf32>
    %1655 = arith.addf %1646, %1654 : vector<8x16xf32>
    %1656 = vector.extract_strided_slice %405 {offsets = [8, 15], sizes = [8, 1], strides = [1, 1]} : vector<16x16xi32> to vector<8x1xi32>
    %1657 = vector.extract_strided_slice %409 {offsets = [8, 15], sizes = [8, 1], strides = [1, 1]} : vector<16x16xf32> to vector<8x1xf32>
    %1658 = vector.broadcast %1656 : vector<8x1xi32> to vector<8x16xi32>
    %1659 = arith.cmpi eq, %1609, %1658 : vector<8x16xi32>
    %cst_290 = arith.constant 0.000000e+00 : f32
    %1660 = vector.shape_cast %1657 : vector<8x1xf32> to vector<8x1xf32>
    %1661 = vector.broadcast %1660 : vector<8x1xf32> to vector<8x16xf32>
    %1662 = vector.broadcast %cst_290 : f32 to vector<8x16xf32>
    %1663 = arith.select %1659, %1661, %1662 : vector<8x16xi1>, vector<8x16xf32>
    %1664 = arith.addf %1655, %1663 : vector<8x16xf32>
    %1665 = vector.extract_strided_slice %440 {offsets = [8, 14], sizes = [8, 1], strides = [1, 1]} : vector<16x16xi32> to vector<8x1xi32>
    %1666 = vector.extract_strided_slice %444 {offsets = [8, 14], sizes = [8, 1], strides = [1, 1]} : vector<16x16xf32> to vector<8x1xf32>
    %1667 = vector.broadcast %1665 : vector<8x1xi32> to vector<8x16xi32>
    %1668 = arith.cmpi eq, %1609, %1667 : vector<8x16xi32>
    %cst_291 = arith.constant 0.000000e+00 : f32
    %1669 = vector.shape_cast %1666 : vector<8x1xf32> to vector<8x1xf32>
    %1670 = vector.broadcast %1669 : vector<8x1xf32> to vector<8x16xf32>
    %1671 = vector.broadcast %cst_291 : f32 to vector<8x16xf32>
    %1672 = arith.select %1668, %1670, %1671 : vector<8x16xi1>, vector<8x16xf32>
    %1673 = arith.addf %1664, %1672 : vector<8x16xf32>
    %1674 = vector.extract_strided_slice %440 {offsets = [8, 15], sizes = [8, 1], strides = [1, 1]} : vector<16x16xi32> to vector<8x1xi32>
    %1675 = vector.extract_strided_slice %444 {offsets = [8, 15], sizes = [8, 1], strides = [1, 1]} : vector<16x16xf32> to vector<8x1xf32>
    %1676 = vector.broadcast %1674 : vector<8x1xi32> to vector<8x16xi32>
    %1677 = arith.cmpi eq, %1609, %1676 : vector<8x16xi32>
    %cst_292 = arith.constant 0.000000e+00 : f32
    %1678 = vector.shape_cast %1675 : vector<8x1xf32> to vector<8x1xf32>
    %1679 = vector.broadcast %1678 : vector<8x1xf32> to vector<8x16xf32>
    %1680 = vector.broadcast %cst_292 : f32 to vector<8x16xf32>
    %1681 = arith.select %1677, %1679, %1680 : vector<8x16xi1>, vector<8x16xf32>
    %1682 = arith.addf %1673, %1681 : vector<8x16xf32>
    %1683 = vector.extract_strided_slice %197 {offsets = [144, 24], sizes = [16, 8], strides = [1, 1]} : vector<160x32xf32> to vector<16x8xf32>
    %cst_293 = arith.constant dense<0.000000e+00> : vector<8x8xf32>
    %1684 = tpu.matmul %1682, %1683, %cst_293 {dimension_numbers = #tpu.dot_dimension_numbers<[1], [0], [0], [1], [0, 0, 1, 1], [], []>} : vector<8x16xf32>, vector<16x8xf32>, vector<8x8xf32> -> vector<8x8xf32>
    %1685 = arith.addf %1608, %1684 : vector<8x8xf32>
    %1686 = tpu.concatenate %1220, %1375, %1530, %1685 in 1 : vector<8x8xf32>, vector<8x8xf32>, vector<8x8xf32>, vector<8x8xf32> -> vector<8x32xf32>
    %1687 = tpu.concatenate %1065, %1686 in 0 : vector<8x32xf32>, vector<8x32xf32> -> vector<16x32xf32>
    %c0_294 = arith.constant 0 : index
    %c0_295 = arith.constant 0 : index
    %c0_296 = arith.constant 0 : index
    %1688 = vector.load %arg10[%c0_294, %c0_295, %c0_296] : memref<1x33x32xf32, #tpu.memory_space<vmem>>, vector<1x33x32xf32>
    %1689 = vector.shape_cast %1688 : vector<1x33x32xf32> to vector<33x32xf32>
    %1690 = vector.extract_strided_slice %1689 {offsets = [0, 0], sizes = [32, 32], strides = [1, 1]} : vector<33x32xf32> to vector<32x32xf32>
    %cst_297 = arith.constant dense<0.000000e+00> : vector<16x32xf32>
    %1691 = tpu.matmul %1687, %1690, %cst_297 {dimension_numbers = #tpu.dot_dimension_numbers<[1], [0], [0], [1], [0, 0, 1, 1], [], []>} : vector<16x32xf32>, vector<32x32xf32>, vector<16x32xf32> -> vector<16x32xf32>
    %1692 = vector.extract_strided_slice %1689 {offsets = [32, 0], sizes = [1, 32], strides = [1, 1]} : vector<33x32xf32> to vector<1x32xf32>
    %1693 = vector.broadcast %1692 : vector<1x32xf32> to vector<16x32xf32>
    %1694 = arith.addf %1691, %1693 : vector<16x32xf32>
    %1695 = arith.addf %184, %1694 : vector<16x32xf32>
    %1696 = vector.extract_strided_slice %6 {offsets = [2, 0], sizes = [1, 32], strides = [1, 1]} : vector<6x32xf32> to vector<1x32xf32>
    %1697 = vector.extract_strided_slice %6 {offsets = [3, 0], sizes = [1, 32], strides = [1, 1]} : vector<6x32xf32> to vector<1x32xf32>
    %cst_298 = arith.constant dense<0.000000e+00> : vector<16xf32>
    %1698 = vector.multi_reduction <add>, %1695, %cst_298 [1] : vector<16x32xf32> to vector<16xf32>
    %1699 = vector.shape_cast %1698 : vector<16xf32> to vector<16x1xf32>
    %cst_299 = arith.constant 3.200000e+01 : f32
    %1700 = vector.broadcast %cst_299 : f32 to vector<16x1xf32>
    %1701 = arith.divf %1699, %1700 : vector<16x1xf32>
    %1702 = vector.broadcast %1701 : vector<16x1xf32> to vector<16x32xf32>
    %1703 = arith.subf %1695, %1702 : vector<16x32xf32>
    %1704 = arith.mulf %1703, %1703 : vector<16x32xf32>
    %cst_300 = arith.constant dense<0.000000e+00> : vector<16xf32>
    %1705 = vector.multi_reduction <add>, %1704, %cst_300 [1] : vector<16x32xf32> to vector<16xf32>
    %1706 = vector.shape_cast %1705 : vector<16xf32> to vector<16x1xf32>
    %cst_301 = arith.constant 3.200000e+01 : f32
    %1707 = vector.broadcast %cst_301 : f32 to vector<16x1xf32>
    %1708 = arith.divf %1706, %1707 : vector<16x1xf32>
    %1709 = vector.broadcast %1701 : vector<16x1xf32> to vector<16x32xf32>
    %1710 = arith.subf %1695, %1709 : vector<16x32xf32>
    %cst_302 = arith.constant 9.99999974E-6 : f32
    %1711 = vector.broadcast %cst_302 : f32 to vector<16x1xf32>
    %1712 = arith.addf %1708, %1711 : vector<16x1xf32>
    %1713 = math.rsqrt %1712 : vector<16x1xf32>
    %1714 = vector.broadcast %1713 : vector<16x1xf32> to vector<16x32xf32>
    %1715 = arith.mulf %1710, %1714 : vector<16x32xf32>
    %1716 = vector.broadcast %1696 : vector<1x32xf32> to vector<16x32xf32>
    %1717 = arith.mulf %1715, %1716 : vector<16x32xf32>
    %1718 = vector.broadcast %1697 : vector<1x32xf32> to vector<16x32xf32>
    %1719 = arith.addf %1717, %1718 : vector<16x32xf32>
    %c0_303 = arith.constant 0 : index
    %c0_304 = arith.constant 0 : index
    %c0_305 = arith.constant 0 : index
    %1720 = vector.load %arg11[%c0_303, %c0_304, %c0_305] : memref<1x33x64xf32, #tpu.memory_space<vmem>>, vector<1x33x64xf32>
    %1721 = vector.shape_cast %1720 : vector<1x33x64xf32> to vector<33x64xf32>
    %1722 = vector.extract_strided_slice %1721 {offsets = [0, 0], sizes = [32, 64], strides = [1, 1]} : vector<33x64xf32> to vector<32x64xf32>
    %cst_306 = arith.constant dense<0.000000e+00> : vector<16x64xf32>
    %1723 = tpu.matmul %1719, %1722, %cst_306 {dimension_numbers = #tpu.dot_dimension_numbers<[1], [0], [0], [1], [0, 0, 1, 1], [], []>} : vector<16x32xf32>, vector<32x64xf32>, vector<16x64xf32> -> vector<16x64xf32>
    %1724 = vector.extract_strided_slice %1721 {offsets = [32, 0], sizes = [1, 64], strides = [1, 1]} : vector<33x64xf32> to vector<1x64xf32>
    %1725 = vector.broadcast %1724 : vector<1x64xf32> to vector<16x64xf32>
    %1726 = arith.addf %1723, %1725 : vector<16x64xf32>
    %cst_307 = arith.constant 0.000000e+00 : f32
    %1727 = vector.broadcast %cst_307 : f32 to vector<16x64xf32>
    %1728 = arith.maximumf %1726, %1727 : vector<16x64xf32>
    %c0_308 = arith.constant 0 : index
    %c0_309 = arith.constant 0 : index
    %c0_310 = arith.constant 0 : index
    %1729 = vector.load %arg12[%c0_308, %c0_309, %c0_310] : memref<1x65x32xf32, #tpu.memory_space<vmem>>, vector<1x65x32xf32>
    %1730 = vector.shape_cast %1729 : vector<1x65x32xf32> to vector<65x32xf32>
    %1731 = vector.extract_strided_slice %1730 {offsets = [0, 0], sizes = [64, 32], strides = [1, 1]} : vector<65x32xf32> to vector<64x32xf32>
    %cst_311 = arith.constant dense<0.000000e+00> : vector<16x32xf32>
    %1732 = tpu.matmul %1728, %1731, %cst_311 {dimension_numbers = #tpu.dot_dimension_numbers<[1], [0], [0], [1], [0, 0, 1, 1], [], []>} : vector<16x64xf32>, vector<64x32xf32>, vector<16x32xf32> -> vector<16x32xf32>
    %1733 = vector.extract_strided_slice %1730 {offsets = [64, 0], sizes = [1, 32], strides = [1, 1]} : vector<65x32xf32> to vector<1x32xf32>
    %1734 = vector.broadcast %1733 : vector<1x32xf32> to vector<16x32xf32>
    %1735 = arith.addf %1732, %1734 : vector<16x32xf32>
    %1736 = arith.addf %1719, %1735 : vector<16x32xf32>
    %1737 = vector.extract_strided_slice %6 {offsets = [4, 0], sizes = [1, 32], strides = [1, 1]} : vector<6x32xf32> to vector<1x32xf32>
    %1738 = vector.extract_strided_slice %6 {offsets = [5, 0], sizes = [1, 32], strides = [1, 1]} : vector<6x32xf32> to vector<1x32xf32>
    %cst_312 = arith.constant dense<0.000000e+00> : vector<16xf32>
    %1739 = vector.multi_reduction <add>, %1736, %cst_312 [1] : vector<16x32xf32> to vector<16xf32>
    %1740 = vector.shape_cast %1739 : vector<16xf32> to vector<16x1xf32>
    %cst_313 = arith.constant 3.200000e+01 : f32
    %1741 = vector.broadcast %cst_313 : f32 to vector<16x1xf32>
    %1742 = arith.divf %1740, %1741 : vector<16x1xf32>
    %1743 = vector.broadcast %1742 : vector<16x1xf32> to vector<16x32xf32>
    %1744 = arith.subf %1736, %1743 : vector<16x32xf32>
    %1745 = arith.mulf %1744, %1744 : vector<16x32xf32>
    %cst_314 = arith.constant dense<0.000000e+00> : vector<16xf32>
    %1746 = vector.multi_reduction <add>, %1745, %cst_314 [1] : vector<16x32xf32> to vector<16xf32>
    %1747 = vector.shape_cast %1746 : vector<16xf32> to vector<16x1xf32>
    %cst_315 = arith.constant 3.200000e+01 : f32
    %1748 = vector.broadcast %cst_315 : f32 to vector<16x1xf32>
    %1749 = arith.divf %1747, %1748 : vector<16x1xf32>
    %1750 = vector.broadcast %1742 : vector<16x1xf32> to vector<16x32xf32>
    %1751 = arith.subf %1736, %1750 : vector<16x32xf32>
    %cst_316 = arith.constant 9.99999974E-6 : f32
    %1752 = vector.broadcast %cst_316 : f32 to vector<16x1xf32>
    %1753 = arith.addf %1749, %1752 : vector<16x1xf32>
    %1754 = math.rsqrt %1753 : vector<16x1xf32>
    %1755 = vector.broadcast %1754 : vector<16x1xf32> to vector<16x32xf32>
    %1756 = arith.mulf %1751, %1755 : vector<16x32xf32>
    %1757 = vector.broadcast %1737 : vector<1x32xf32> to vector<16x32xf32>
    %1758 = arith.mulf %1756, %1757 : vector<16x32xf32>
    %1759 = vector.broadcast %1738 : vector<1x32xf32> to vector<16x32xf32>
    %1760 = arith.addf %1758, %1759 : vector<16x32xf32>
    %c0_317 = arith.constant 0 : index
    %c0_318 = arith.constant 0 : index
    %c0_319 = arith.constant 0 : index
    %1761 = vector.load %arg14[%c0_317, %c0_318, %c0_319] : memref<1x16x32xf32, #tpu.memory_space<vmem>>, vector<1x16x32xf32>
    %1762 = vector.shape_cast %1761 : vector<1x16x32xf32> to vector<16x32xf32>
    %1763 = vector.shape_cast %1760 : vector<16x32xf32> to vector<1x16x32xf32>
    tpu.vector_store %arg14[%c0_317, %c0_318, %c0_319], %1763 {strides = array<i32>} : memref<1x16x32xf32, #tpu.memory_space<vmem>>, vector<1x16x32xf32>,
    %c0_320 = arith.constant 0 : index
    %c0_321 = arith.constant 0 : index
    %1764 = vector.load %arg15[%c0_320, %c0_321] : memref<16x32xf32, #tpu.memory_space<vmem>>, vector<16x32xf32>
    tpu.vector_store %arg15[%c0_320, %c0_321], %1760 {strides = array<i32>} : memref<16x32xf32, #tpu.memory_space<vmem>>, vector<16x32xf32>,
    return
  }
  func.func @transform_0(%arg0: i32) -> (i32, i32) {
    %c0_i32 = arith.constant 0 : i32
    %c0_i32_0 = arith.constant 0 : i32
    %c0_i32_1 = arith.constant 0 : i32
    return %c0_i32, %c0_i32_0 : i32, i32
  }
  func.func @transform_1(%arg0: i32) -> (i32, i32) {
    %c0_i32 = arith.constant 0 : i32
    %c0_i32_0 = arith.constant 0 : i32
    %c0_i32_1 = arith.constant 0 : i32
    return %c0_i32, %c0_i32_0 : i32, i32
  }
  func.func @transform_2(%arg0: i32) -> (i32, i32) {
    %c0_i32 = arith.constant 0 : i32
    %c0_i32_0 = arith.constant 0 : i32
    %c0_i32_1 = arith.constant 0 : i32
    return %c0_i32, %c0_i32_0 : i32, i32
  }
  func.func @transform_3(%arg0: i32) -> (i32, i32) {
    %c0_i32 = arith.constant 0 : i32
    %c0_i32_0 = arith.constant 0 : i32
    %c0_i32_1 = arith.constant 0 : i32
    return %c0_i32, %c0_i32_0 : i32, i32
  }
  func.func @transform_4(%arg0: i32) -> (i32, i32) {
    %c0_i32 = arith.constant 0 : i32
    %c0_i32_0 = arith.constant 0 : i32
    %c0_i32_1 = arith.constant 0 : i32
    return %c0_i32, %c0_i32_0 : i32, i32
  }
  func.func @transform_5(%arg0: i32) -> (i32, i32, i32) {
    %c0_i32 = arith.constant 0 : i32
    %c0_i32_0 = arith.constant 0 : i32
    %c0_i32_1 = arith.constant 0 : i32
    return %arg0, %c0_i32, %c0_i32_0 : i32, i32, i32
  }
  func.func @transform_6(%arg0: i32) -> (i32, i32, i32) {
    %c0_i32 = arith.constant 0 : i32
    %c0_i32_0 = arith.constant 0 : i32
    %c0_i32_1 = arith.constant 0 : i32
    return %arg0, %c0_i32, %c0_i32_0 : i32, i32, i32
  }
  func.func @transform_7(%arg0: i32) -> (i32, i32, i32) {
    %c0_i32 = arith.constant 0 : i32
    %c0_i32_0 = arith.constant 0 : i32
    %c0_i32_1 = arith.constant 0 : i32
    return %arg0, %c0_i32, %c0_i32_0 : i32, i32, i32
  }
  func.func @transform_8(%arg0: i32) -> (i32, i32, i32) {
    %c0_i32 = arith.constant 0 : i32
    %c0_i32_0 = arith.constant 0 : i32
    %c0_i32_1 = arith.constant 0 : i32
    return %arg0, %c0_i32, %c0_i32_0 : i32, i32, i32
  }
  func.func @transform_9(%arg0: i32) -> (i32, i32, i32) {
    %c0_i32 = arith.constant 0 : i32
    %c0_i32_0 = arith.constant 0 : i32
    %c0_i32_1 = arith.constant 0 : i32
    return %arg0, %c0_i32, %c0_i32_0 : i32, i32, i32
  }
  func.func @transform_10(%arg0: i32) -> (i32, i32, i32) {
    %c0_i32 = arith.constant 0 : i32
    %c0_i32_0 = arith.constant 0 : i32
    %c0_i32_1 = arith.constant 0 : i32
    return %arg0, %c0_i32, %c0_i32_0 : i32, i32, i32
  }
  func.func @transform_11(%arg0: i32) -> (i32, i32, i32) {
    %c0_i32 = arith.constant 0 : i32
    %c0_i32_0 = arith.constant 0 : i32
    %c0_i32_1 = arith.constant 0 : i32
    return %arg0, %c0_i32, %c0_i32_0 : i32, i32, i32
  }
  func.func @transform_12(%arg0: i32) -> (i32, i32, i32) {
    %c0_i32 = arith.constant 0 : i32
    %c0_i32_0 = arith.constant 0 : i32
    %c0_i32_1 = arith.constant 0 : i32
    return %arg0, %c0_i32, %c0_i32_0 : i32, i32, i32
  }
  func.func @transform_13(%arg0: i32) -> (i32, i32, i32) {
    %c0_i32 = arith.constant 0 : i32
    %c0_i32_0 = arith.constant 0 : i32
    %c0_i32_1 = arith.constant 0 : i32
    return %arg0, %c0_i32, %c0_i32_0 : i32, i32, i32
  }
}

</mosaic_0001>

<bundles_post_ra>
// kernel: tpu_custom_call.1
= control target key start
LH: loop header
LB: loop body
LE: loop exit
PB: predicated region body
PF: predicated region fallthrough
CT: control target
= control target key end

     0   :  { %s11052_s0 = inlined_call_operand.vmem [shape: f32[16,32], index: 0, kind: input, shape index: {}]   ;;  %s11053_s1 = inlined_call_operand.vmem [shape: f32[16,32], index: 1, kind: input, shape index: {}]   ;;  %s11054_s2 = inlined_call_operand.vmem [shape: f32[16,4], index: 2, kind: input, shape index: {}]   ;;  %s11055_s3 = inlined_call_operand.vmem [shape: f32[160,32], index: 3, kind: input, shape index: {}]   ;;  %s11056_s4 = inlined_call_operand.vmem [shape: f32[160,1], index: 4, kind: input, shape index: {}]   ;;  %s11057_s5 = inlined_call_operand.vmem [shape: f32[2,33,96], index: 5, kind: input, shape index: {}]   ;;  %s11058_s6 = inlined_call_operand.vmem [shape: f32[2,33,32], index: 6, kind: input, shape index: {}]   ;;  %s11059_s7 = inlined_call_operand.vmem [shape: f32[2,33,48], index: 7, kind: input, shape index: {}]   ;;  %s11060_s8 = inlined_call_operand.vmem [shape: f32[2,33,32], index: 8, kind: input, shape index: {}]   ;;  %s11061_s9 = inlined_call_operand.vmem [shape: f32[2,33,32], index: 9, kind: input, shape index: {}]   ;;  %s11062_s10 = inlined_call_operand.vmem [shape: f32[2,33,64], index: 10, kind: input, shape index: {}]   ;;  %s11063_s11 = inlined_call_operand.vmem [shape: f32[2,65,32], index: 11, kind: input, shape index: {}]   ;;  %s11064_s12 = inlined_call_operand.vmem [shape: f32[2,6,32], index: 12, kind: input, shape index: {}]   ;;  %s11065_s13 = inlined_call_operand.hbm [shape: f32[2,16,32], index: 13, kind: output, shape index: {}]  }
   0x1   :  { %11231 = sst [smem:[#allocation204_spill]] %s11054_s2 }
   0x2   :  { %11232 = sst [smem:[#allocation205_spill]] %s11057_s5 }
   0x3   :  { %11233 = sst [smem:[#allocation206_spill]] %s11058_s6 }
   0x4   :  { %11234 = sst [smem:[#allocation207_spill]] %s11065_s13 }
   0x5   :  { %18 = vsyncpa [#allocation4], 0 }
   0x6   :  { %20 = vsyncpa [#allocation4 + $0x1], 0  ;;  %s8130_s25 = smov 0   ;;  %s8132_s26 = smov 0  }
   0x7   :  { %s8134_s27 = smov 0   ;;  %s8136_s28 = smov 0  }
   0x8 LB: > { %11235 = sst [smem:[#allocation6_spill]] %s8004_s25  ;;  %s8151_s29 = sadd.s32 4294967295, %s8016_s28   ;;  %s8016_s28 = sphi %s8136_s28, %s11774_s28   ;;  %s8012_s27 = sphi %s8134_s27, %s11777_s27   ;;  %s8008_s26 = sphi %s8132_s26, %s11776_s26   ;;  %s8004_s25 = sphi %s8130_s25, %s11775_s25  }
   0x9   : > { %11236 = sst [smem:[#allocation7_spill]] %s8008_s26  ;;  %s6457_s30 = sadd.s32 4294967294, %s8016_s28  }
   0xa   : > { %11237 = sst [smem:[#allocation8_spill]] %s8012_s27  ;;  %s8155_s14 = sadd.s32 1, %s8016_s28  }
   0xb   : > { %11238 = sst [smem:[#allocation9_spill]] %s8016_s28  ;;  %s346_s15 = sadd.s32 1, %s8012_s27 }
   0xc   : > { %11239 = sst [smem:[#allocation10_spill]] %s8155_s14  ;;  %s343_s16 = ssub.s32 %s8016_s28, %s8155_s14 }
   0xd   : > { %p356_p0 = scmp.ne.s32.totalorder %s8012_s27, %s8008_s26  ;;  %p344_p1 = scmp.eq.s32.totalorder %s343_s16, 0 }
   0xe   : > { %p357_p2 = scmp.eq.s32.totalorder %s8151_s29, 1  ;;  %p362_p3 = scmp.ne.s32.totalorder %s8008_s26, %s8004_s25 }
   0xf   : > { %p363_p4 = scmp.eq.s32.totalorder %s6457_s30, 1  ;;  %p6460_p7 = scmp.ge.s32.totalorder %s8016_s28, 1 }
  0x10   : > { %s8166_s17 = scalar_select %p344_p1, %s8012_s27, %s346_s15  }
  0x11   : > { %p8168_p5 = por %p357_p2, %p356_p0  ;;  %p8172_p6 = por %p363_p4, %p362_p3 }
  0x12   : > { %11240 = sst [smem:[#allocation11_spill]] %s8166_s17  ;;  %p459_p8 = scmp.lt.s32.totalorder %s8016_s28, 3 }
  0x13   : > { %s11241_s18 = scalar_select %p8168_p5, 1, 0 }
  0x14   : > { %s11243_s19 = scalar_select %p8172_p6, 1, 0 }
  0x15   : > { %11242 = sst [smem:[#allocation12_spill]] %s11241_s18  ;;  %p460_p9 = pnand %p6460_p7, %p459_p8 }
  0x16   : > { %11244 = sst [smem:[#allocation13_spill]] %s11243_s19 }
  0x17   : > { %463 = sbr.rel (%p460_p9) target bundleno = 5526 (0x1596), region = 72 }
  0x1e   : > { %s11073_s20 = sand.u32 1, %s8008_s26   ;;  %p537_p10 = scmp.lt.s32.totalorder %s8151_s29, 1 }
  0x1f   : > { %s6461_s21 = sshll.u32 %s11073_s20, 4  ;;  %s11245_s5 = sld [smem:[#allocation205_spill]] }
  0x20   : > { %s538_s22 = scalar_select %p537_p10, %s8151_s29, 1 }
  0x21   : > { %s11246_s6 = sld [smem:[#allocation206_spill]]  ;;  %s8223_s20 = scalar_lea.vmem [#allocation3], %s6461_s21 }
  0x22   : > { %s7388_s23 = smul.u32 40, %s538_s22  ;;  %s6469_s24 = sshll.u32 %s538_s22, 3 }
  0x23   : > { %s7389_s30 = smul.u32 72, %s538_s22  ;;  %s8186_s17 = scalar_lea.vmem %s11064_s12, %s6469_s24 }
  0x24   : > { %s8201_s26 = scalar_lea.vmem %s11059_s7, %s7388_s23  ;;  %s8206_s24 = scalar_lea.vmem %s11060_s8, %s7388_s23 }
  0x25   : > { %s8191_s19 = scalar_lea.vmem %s11245_s5, %s7388_s23  ;;  %s8211_s27 = scalar_lea.vmem %s11061_s9, %s7388_s23 }
  0x26   : > { %s8216_s25 = scalar_lea.vmem %s11062_s10, %s7388_s23  ;;  %s8221_s18 = scalar_lea.vmem %s11063_s11, %s7389_s30 }
  0x27   : > { %s8196_s13 = scalar_lea.vmem %s11246_s6, %s7388_s23  ;;  %p6470_p11 = scmp.ne.s32.totalorder %s8151_s29, 0 }
  0x28   : > { %v580_v0 = vld [vmem:[%s11052_s0] sm:$0xff] (!%p6470_p11)  ;;  %vm582_vm0 = vcmask (!%p6470_p11), 261120   ;;  %v581_v1 = vld [vmem:[%s11052_s0 + $0x8] sm:$0xff] (!%p6470_p11) }
  0x29   : > { %579 = sbr.rel (%p6470_p11) target bundleno = 48 (0x30), region = 76  ;;  %583 = vst.msk [vmem:[#allocation2] sm:$0xff] (!%p6470_p11), %vm582_vm0, %v580_v0  ;;  %584 = vst.msk [vmem:[#allocation2 + $0x8] sm:$0xff] (!%p6470_p11), %vm582_vm0, %v581_v1 }
  0x30 PF: > { %v590_v2 = vld [vmem:[%s8191_s19] sm:$0xff]  ;;  %v591_v3 = vld [vmem:[%s8191_s19 + $0x8] sm:$0xff]  ;;  %v592_v4 = vld [vmem:[%s8191_s19 + $0x10] sm:$0xff]  ;;  %vm11127_vm1 = vcmask 261120   ;;  %v11099_v15 = vmov 0.0   ;;  %vm11131_vm2 = vmmov 0  }
  0x31   : > { %v7480_v5 = vpack.i.bf16 %v591_v3, %v590_v2  ;;  %v7180_v6 = vpack.c.bf16 %v591_v3, %v590_v2  ;;  %v593_v7 = vld [vmem:[%s8191_s19 + $0x18] sm:$0xff]  ;;  %v585_v8 = vld [vmem:[#allocation2] sm:$0xff]  ;;  %v8241_v12 = vld [vmem:[#allocation2 + $0x8] sm:$0xff]  ;;  %s11088_s30 = smov 120   ;;  %s11080_s14 = smov 96   ;;  %vm11136_vm3 = vcmask 64512  }
  0x32   : > { %v587_v9 = vld [vmem:[%s11053_s1] sm:$0xff]  ;;  %v7184_v10 = vpack.c.bf16 %v593_v7, %v592_v4  ;;  %6788 = vmatprep.mubr.msk.f32.mxu1 %vm11127_vm1, %v585_v8  ;;  %v588_v13 = vld [vmem:[%s11053_s1 + $0x8] sm:$0xff]  ;;  %s8022_s28 = smov 80   ;;  %s11078_s2 = smov 88   ;;  %v7485_v21 = vpack.i.bf16 %v593_v7, %v592_v4  ;;  %vm2975_vm4 = vcmask 15360   ;;  %vm11134_vm5 = vcmask 130048  }
  0x33   : > { %v595_v11 = vadd.f32 %v587_v9, %v585_v8  ;;  %7181 = vmatprep.subr.bf16.mxu0 %v7180_v6  ;;  %v596_v14 = vadd.f32 %v588_v13, %v8241_v12  ;;  %v8252_v16 = vld [vmem:[%s8191_s19 + $0x20] ss:$0 sm:$0xff]  ;;  %s8024_s22 = smov 72   ;;  %s11084_s15 = smov 112   ;;  %vm11130_vm6 = vcmask 195584   ;;  %vm11140_vm7 = vcmask 31744  }
  0x34   : > { %7183 = vmatpush3.bf16.msra.mxu0 %v7180_v6  ;;  %s11082_s19 = smov 104   ;;  %s8027_s16 = smov 64   ;;  %vm11135_vm8 = vcmask 97280   ;;  %vm2950_vm9 = vcmask 7168   ;;  %vm2808_vm10 = vcmask 326944   ;;  %vm2776_vm11 = vcmask 294144  }
  0x35   : > { %6777 = vmatprep.mubr.msk.f32.mxu0 %vm11127_vm1, %v595_v11  ;;  %7185 = vmatprep.subr.bf16.mxu0 %v7184_v10  ;;  %s11247_s23 = sld [smem:[#allocation204_spill]]  ;;  %s11090_s6 = smov 4   ;;  %vm2870_vm12 = vcmask 392544   ;;  %vm2839_vm13 = vcmask 359744  }
  0x36   : > { %s8038_s5 = smov 2   ;;  %s11256_s21 = smov 120  }
  0x38   : > { %7187 = vmatpush3.bf16.msra.mxu0 %v7184_v10 }
  0x39   : > { %6791 = vmatprep.subr.mxu0 %v11099_v15 }
  0x3b   : > { %6778 = vmatmul.mubr.msk.f32.vlgmr.msra.gmra.mrb[0].mxu0 %vm11127_vm1, %v596_v14 }
  0x3c   : > { %6793 = vmatprep.mubr.msk.f32.mxu0 %vm11131_vm2, %v11099_v15 }
 0x10e   : > { %v6779_v17 = vpop.f32.mrb[0].mxu0 }
 0x10f   : > { %v674_v18 = vpop.f32.mrb[1].mxu0  ;;  %v680_v20 = vadd.f32 %v6779_v17, %v8252_v16 }
 0x110   : > { %v675_v19 = vadd.f32 %v8252_v16, %v674_v18 }
 0x112   : > { %947 = vrot.lane.b32.xlu1 %v675_v19, %s11088_s30  ;;  %785 = vrot.lane.b32.xlu0 %v675_v19, %s11080_s14 }
 0x116   : > { %1116 = vrot.lane.b32.xlu1 %v675_v19, %s8022_s28  ;;  %949 = vrot.lane.b32.xlu0 %v675_v19, %s11078_s2 }
 0x11a   : > { %1282 = vrot.lane.b32.xlu1 %v675_v19, %s8024_s22  ;;  %1114 = vrot.lane.b32.xlu0 %v675_v19, %s11084_s15 }
 0x11e   : > { %1464 = vrot.lane.b32.xlu1 %v680_v20, %s11080_s14  ;;  %1280 = vrot.lane.b32.xlu0 %v675_v19, %s11082_s19  ;;  %s8033_s14 = smov 125  }
 0x122   : > { %1625 = vrot.lane.b32.xlu1 %v680_v20, %s11088_s30  ;;  %1627 = vrot.lane.b32.xlu0 %v680_v20, %s11078_s2  ;;  %s11092_s2 = smov 8  }
 0x126   : > { %1792 = vrot.lane.b32.xlu1 %v680_v20, %s11084_s15  ;;  %1794 = vrot.lane.b32.xlu0 %v680_v20, %s8022_s28  ;;  %s8029_s28 = smov 16  }
 0x12a   : > { %1958 = vrot.lane.b32.xlu1 %v680_v20, %s11082_s19  ;;  %1960 = vrot.lane.b32.xlu0 %v680_v20, %s8024_s22  ;;  %s11086_s22 = smov 24  }
 0x12e   : > { %7481 = vrot.lane.b32.xlu0 %v7480_v5, %s8027_s16  ;;  %7486 = vrot.lane.b32.xlu1 %v7485_v21, %s8027_s16 }
 0x184   : > { %v948_v22 = vpop.permute.xlu1 %947  ;;  %v786_v23 = vpop.permute.xlu0 %785 }
 0x185   : > { %6792 = vmatpush3.xpose.msk.msra.mxu0 %vm11136_vm3, %v786_v23 }
 0x186   : > { %6801 = vmatprep.subr.mxu0 %v11099_v15 }
 0x188   : > { %v1117_v24 = vpop.permute.xlu1 %1116  ;;  %6794 = vmatmul.mubr.msk.f32.vlgmr.msra.gmra.mrb[2].mxu0 %vm11136_vm3, %v675_v19  ;;  %v950_v25 = vpop.permute.xlu0 %949 }
 0x189   : > { %6802 = vmatpush3.xpose.msk.msra.mxu0 %vm11136_vm3, %v950_v25  ;;  %6803 = vmatprep.mubr.msk.f32.mxu0 %vm11131_vm2, %v11099_v15 }
 0x18a   : > { %6811 = vmatprep.subr.mxu0 %v11099_v15 }
 0x18c   : > { %v1283_v26 = vpop.permute.xlu1 %1282  ;;  %6804 = vmatmul.mubr.msk.f32.vlgmr.msra.gmra.mrb[4].mxu0 %vm11136_vm3, %v948_v22  ;;  %v1115_v27 = vpop.permute.xlu0 %1114 }
 0x18d   : > { %6812 = vmatpush3.xpose.msk.msra.mxu0 %vm11136_vm3, %v1117_v24  ;;  %6813 = vmatprep.mubr.msk.f32.mxu0 %vm11131_vm2, %v11099_v15 }
 0x18e   : > { %6821 = vmatprep.subr.mxu0 %v11099_v15 }
 0x190   : > { %v1465_v28 = vpop.permute.xlu1 %1464  ;;  %6814 = vmatmul.mubr.msk.f32.vlgmr.msra.gmra.mrb[6].mxu0 %vm11136_vm3, %v1115_v27  ;;  %v1281_v29 = vpop.permute.xlu0 %1280 }
 0x191   : > { %6822 = vmatpush3.xpose.msk.msra.mxu0 %vm11136_vm3, %v1283_v26  ;;  %6823 = vmatprep.mubr.msk.f32.mxu0 %vm11131_vm2, %v11099_v15 }
 0x192   : > { %6831 = vmatprep.subr.mxu0 %v11099_v15 }
 0x194   : > { %v1626_v30 = vpop.permute.xlu1 %1625  ;;  %6824 = vmatmul.mubr.msk.f32.vlgmr.msra.gmra.mrb[8].mxu0 %vm11136_vm3, %v1281_v29  ;;  %v1628_v31 = vpop.permute.xlu0 %1627 }
 0x195   : > { %6832 = vmatpush3.xpose.msk.msra.mxu0 %vm11136_vm3, %v1465_v28  ;;  %6833 = vmatprep.mubr.msk.f32.mxu0 %vm11131_vm2, %v11099_v15 }
 0x196   : > { %6841 = vmatprep.subr.mxu0 %v11099_v15 }
 0x198   : > { %v1793_v32 = vpop.permute.xlu1 %1792  ;;  %6834 = vmatmul.mubr.msk.f32.vlgmr.msra.gmra.mrb[10].mxu0 %vm11136_vm3, %v680_v20  ;;  %v1795_v33 = vpop.permute.xlu0 %1794 }
 0x199   : > { %6842 = vmatpush3.xpose.msk.msra.mxu0 %vm11136_vm3, %v1628_v31  ;;  %6843 = vmatprep.mubr.msk.f32.mxu0 %vm11131_vm2, %v11099_v15 }
 0x19a   : > { %6851 = vmatprep.subr.mxu0 %v11099_v15 }
 0x19c   : > { %v1959_v34 = vpop.permute.xlu1 %1958  ;;  %6844 = vmatmul.mubr.msk.f32.vlgmr.msra.gmra.mrb[12].mxu0 %vm11136_vm3, %v1626_v30  ;;  %v1961_v35 = vpop.permute.xlu0 %1960 }
 0x19d   : > { %6852 = vmatpush3.xpose.msk.msra.mxu0 %vm11136_vm3, %v1795_v33  ;;  %6853 = vmatprep.mubr.msk.f32.mxu0 %vm11131_vm2, %v11099_v15 }
 0x19e   : > { %6861 = vmatprep.subr.mxu0 %v11099_v15 }
 0x1a0   : > { %6854 = vmatmul.mubr.msk.f32.vlgmr.msra.gmra.mrb[14].mxu0 %vm11136_vm3, %v1793_v32  ;;  %v7482_v36 = vpop.permute.xlu0 %7481  ;;  %v7487_v37 = vpop.permute.xlu1 %7486 }
 0x1a1   : > { %6862 = vmatpush3.xpose.msk.msra.mxu0 %vm11136_vm3, %v1961_v35  ;;  %6863 = vmatprep.mubr.msk.f32.mxu0 %vm11131_vm2, %v11099_v15  ;;  %v7489_v38 = vunpack.i.h.bf16 %v7487_v37  ;;  %v7488_v39 = vunpack.i.l.bf16 %v7487_v37  ;;  %v7484_v40 = vunpack.i.h.bf16 %v7482_v36  ;;  %v7483_v41 = vunpack.i.l.bf16 %v7482_v36 }
 0x1a3   : > { %v7188_v42 = vpack.c.bf16 %v7484_v40, %v7483_v41  ;;  %v7192_v43 = vpack.c.bf16 %v7489_v38, %v7488_v39 }
 0x1a4   : > { %6864 = vmatmul.mubr.msk.f32.vlgmr.msra.gmra.mrb[16].mxu0 %vm11136_vm3, %v1959_v34 }
 0x1a5   : > { %7189 = vmatprep.subr.bf16.mxu1 %v7188_v42 }
 0x1a6   : > { %7191 = vmatpush3.bf16.msra.mxu1 %v7188_v42 }
 0x1a7   : > { %7193 = vmatprep.subr.bf16.mxu1 %v7192_v43 }
 0x1aa   : > { %7195 = vmatpush3.bf16.msra.mxu1 %v7192_v43 }
 0x1ab   : > { %6796 = vmatprep.subr.mxu1 %v11099_v15 }
 0x1ad   : > { %6789 = vmatmul.mubr.msk.f32.vlgmr.msra.gmra.mrb[0].mxu1 %vm11127_vm1, %v8241_v12 }
 0x1ae   : > { %6798 = vmatprep.mubr.msk.f32.mxu1 %vm11131_vm2, %v11099_v15 }
 0x25b   : > { %v858_v44 = vpop.f32.mrb[2].mxu0 }
 0x25c   : > { %v862_v45 = vmul.f32 0.35355338, %v858_v44  ;;  %v6795_v46 = vpop.f32.mrb[3].mxu0 }
 0x25e   : > { %v863_v47 = vsel %vm11136_vm3, %v862_v45, -inf }
 0x25f   : > { %864 = vmax.xlane.f32.xlu0 %v863_v47  ;;  %v1021_v48 = vpop.f32.mrb[4].mxu0 }
 0x260   : > { %v1025_v49 = vmul.f32 0.35355338, %v1021_v48  ;;  %v6805_v50 = vpop.f32.mrb[5].mxu0 }
 0x262   : > { %v1026_v51 = vsel %vm11136_vm3, %v1025_v49, -inf }
 0x263   : > { %1027 = vmax.xlane.f32.xlu1 %v1026_v51  ;;  %v1188_v52 = vpop.f32.mrb[6].mxu0 }
 0x264   : > { %v1192_v53 = vmul.f32 0.35355338, %v1188_v52  ;;  %v6815_v54 = vpop.f32.mrb[7].mxu0 }
 0x266   : > { %v1193_v55 = vsel %vm11136_vm3, %v1192_v53, -inf }
 0x267   : > { %1194 = vmax.xlane.f32.xlu0 %v1193_v55  ;;  %v1354_v56 = vpop.f32.mrb[8].mxu0 }
 0x268   : > { %v1358_v57 = vmul.f32 0.35355338, %v1354_v56  ;;  %v6825_v58 = vpop.f32.mrb[9].mxu0 }
 0x26a   : > { %v1359_v59 = vsel %vm11136_vm3, %v1358_v57, -inf }
 0x26b   : > { %1360 = vmax.xlane.f32.xlu0 %v1359_v59  ;;  %v1536_v60 = vpop.f32.mrb[10].mxu0 }
 0x26c   : > { %v1540_v61 = vmul.f32 0.35355338, %v1536_v60  ;;  %v6835_v62 = vpop.f32.mrb[11].mxu0 }
 0x26e   : > { %v1541_v63 = vsel %vm11136_vm3, %v1540_v61, -inf }
 0x26f   : > { %1542 = vmax.xlane.f32.xlu1 %v1541_v63  ;;  %v1699_v0 = vpop.f32.mrb[12].mxu0 }
 0x270   : > { %v8315_v1 = vmul.f32 0.35355338, %v1699_v0  ;;  %v6845_v2 = vpop.f32.mrb[13].mxu0 }
 0x272   : > { %v1704_v3 = vsel %vm11136_vm3, %v8315_v1, -inf }
 0x273   : > { %1705 = vmax.xlane.f32.xlu0 %v1704_v3  ;;  %v1866_v4 = vpop.f32.mrb[14].mxu0 }
 0x274   : > { %v8319_v5 = vmul.f32 0.35355338, %v1866_v4  ;;  %v6855_v6 = vpop.f32.mrb[15].mxu0 }
 0x276   : > { %v1871_v7 = vsel %vm11136_vm3, %v8319_v5, -inf }
 0x277   : > { %1872 = vmax.xlane.f32.xlu1 %v1871_v7  ;;  %v2032_v8 = vpop.f32.mrb[16].mxu0 }
 0x278   : > { %v6865_v9 = vpop.f32.mrb[17].mxu0 }
 0x280   : > { %v6790_v10 = vpop.f32.mrb[0].mxu1 }
 0x281   : > { %v775_v11 = vpop.f32.mrb[1].mxu1 }
 0x288   : > { %700 = vrot.lane.b32.xlu1 %v8252_v16, %s8027_s16  ;;  %v2036_v16 = vmul.f32 0.35355338, %v2032_v8  ;;  %s11255_s16 = smov 12  }
 0x28a   : > { %v2037_v23 = vsel %vm11136_vm3, %v2036_v16, -inf }
 0x2ec   : > { %v865_v24 = vpop.xlane.xlu0 %864 }
 0x2ed   : > { %v866_v25 = vsub.f32 %v862_v45, %v865_v24 }
 0x2ef   : > { %v867_v27 = vmul.f32 1.442695, %v866_v25  ;;  %v2290_v25 = vld [vmem:[%s8206_s24] sm:$0xff] }
 0x2f0   : > { %v1028_v12 = vpop.xlane.xlu1 %1027 }
 0x2f1   : > { %v1029_v28 = vsub.f32 %v1025_v49, %v1028_v12 }
 0x2f3   : > { %v1030_v29 = vmul.f32 1.442695, %v1029_v28  ;;  %v2292_v28 = vld [vmem:[%s8206_s24 + $0x10] sm:$0xff] }
 0x2f4   : > { %v1195_v26 = vpop.xlane.xlu0 %1194 }
 0x2f5   : > { %v1196_v30 = vsub.f32 %v1192_v53, %v1195_v26  ;;  %v2291_v26 = vld [vmem:[%s8206_s24 + $0x8] sm:$0xff] }
 0x2f7   : > { %v1197_v32 = vmul.f32 1.442695, %v1196_v30 }
 0x2f8   : > { %v1361_v31 = vpop.xlane.xlu0 %1360 }
 0x2f9   : > { %v1362_v33 = vsub.f32 %v1358_v57, %v1361_v31  ;;  %v2270_v31 = vld [vmem:[%s11055_s3] sm:$0xff] }
 0x2fb   : > { %v1363_v34 = vmul.f32 1.442695, %v1362_v33  ;;  %v2272_v33 = vld [vmem:[%s11055_s3 + $0x10] sm:$0xff] }
 0x2fc   : > { %v1543_v13 = vpop.xlane.xlu1 %1542 }
 0x2fd   : > { %v1544_v14 = vsub.f32 %v1540_v61, %v1543_v13 }
 0x2ff   : > { %v1545_v17 = vmul.f32 1.442695, %v1544_v14 }
 0x300   : > { %v1706_v44 = vpop.xlane.xlu0 %1705 }
 0x301   : > { %7869 = vpow2.f32 %v1545_v17  ;;  %v1707_v45 = vsub.f32 %v8315_v1, %v1706_v44 }
 0x302   : > { %7871 = vpow2.f32 %v867_v27  ;;  %v7204_v27 = vpack.c.bf16 %v2291_v26, %v2290_v25 }
 0x303   : > { %7873 = vpow2.f32 %v1030_v29  ;;  %v1708_v46 = vmul.f32 1.442695, %v1707_v45  ;;  %v2293_v29 = vld [vmem:[%s8206_s24 + $0x18] sm:$0xff] }
 0x304   : > { %v1873_v18 = vpop.xlane.xlu1 %1872  ;;  %7875 = vpow2.f32 %v1197_v32  ;;  %v7208_v30 = vpack.c.bf16 %v2293_v29, %v2292_v28  ;;  %v2271_v32 = vld [vmem:[%s11055_s3 + $0x8] sm:$0xff]  ;;  %v11096_v29 = vlaneseq }
 0x305   : > { %7877 = vpow2.f32 %v1363_v34  ;;  %v1874_v47 = vsub.f32 %v8319_v5, %v1873_v18  ;;  %v2273_v34 = vld [vmem:[%s11055_s3 + $0x18] sm:$0xff] }
 0x306   : > { %7879 = vpow2.f32 %v1708_v46 }
 0x307   : > { %v1875_v48 = vmul.f32 1.442695, %v1874_v47  ;;  %v11097_v47 = vmov 0  }
 0x308   : > { %v701_v19 = vpop.permute.xlu1 %700  ;;  %7491 = vset.pattern.permute.xlu1 %v11097_v47  ;;  %7490 = vset.pattern.permute.xlu0 %v11097_v47 }
 0x309   : > { %v776_v20 = vadd.f32 %v775_v11, %v701_v19  ;;  %v781_v43 = vadd.f32 %v6790_v10, %v701_v19  ;;  %7881 = vpow2.f32 %v1875_v48  ;;  %v2139_v48 = vld [vmem:[%s8196_s13] sm:$0xff] }
 0x30b   : > { %v8325_v21 = vpop.eup %7869  ;;  %1038 = vrot.lane.b32.xlu0 %v776_v20, %s11088_s30  ;;  %6797 = vmatpush3.msra.mxu1 %v776_v20 }
 0x30c   : > { %v1547_v22 = vsel %vm11136_vm3, %v8325_v21, 0.0  ;;  %6806 = vmatprep.subr.mxu1 %v11099_v15  ;;  %v7872_v35 = vpop.eup %7871 }
 0x30d   : > { %1548 = vadd.xlane.f32.xlu1 %v1547_v22  ;;  %v869_v36 = vsel %vm11136_vm3, %v7872_v35, 0.0  ;;  %v7874_v37 = vpop.eup %7873 }
 0x30e   : > { %v1032_v38 = vsel %vm11136_vm3, %v7874_v37, 0.0  ;;  %v7876_v39 = vpop.eup %7875 }
 0x30f   : > { %v1199_v40 = vsel %vm11136_vm3, %v7876_v39, 0.0  ;;  %v7878_v41 = vpop.eup %7877 }
 0x310   : > { %v1365_v42 = vsel %vm11136_vm3, %v7878_v41, 0.0  ;;  %v8342_v49 = vpop.eup %7879 }
 0x311   : > { %v1710_v50 = vsel %vm11136_vm3, %v8342_v49, 0.0 }
 0x313   : > { %v8346_v51 = vpop.eup %7881 }
 0x314   : > { %v1877_v52 = vsel %vm11136_vm3, %v8346_v51, 0.0 }
 0x31e   : > { %1370 = vrot.lane.b32.xlu1 %v776_v20, %s11082_s19 }
 0x32a   : > { %2038 = vmax.xlane.f32.xlu0 %v2037_v23 }
 0x340   : > { %1204 = vrot.lane.b32.xlu0 %v776_v20, %s11084_s15 }
 0x35f   : > { %870 = vadd.xlane.f32.xlu0 %v869_v36  ;;  %v2275_v36 = vld [vmem:[%s11055_s3 + $0x28] sm:$0xff] }
 0x363   : > { %1033 = vadd.xlane.f32.xlu0 %v1032_v38 }
 0x367   : > { %1200 = vadd.xlane.f32.xlu0 %v1199_v40 }
 0x36b   : > { %1366 = vadd.xlane.f32.xlu0 %v1365_v42 }
 0x37d   : > { %v1039_v53 = vpop.permute.xlu0 %1038 }
 0x381   : > { %1716 = vrot.lane.b32.xlu0 %v781_v43, %s11088_s30  ;;  %s11254_s30 = smov 4  }
 0x385   : > { %1882 = vrot.lane.b32.xlu0 %v781_v43, %s11084_s15  ;;  %s11094_s15 = smov 12  }
 0x39a   : > { %v1549_v0 = vpop.xlane.xlu1 %1548 }
 0x39e   : > { %v1371_v7 = vpop.permute.xlu1 %1370 }
 0x3a4   : > { %1711 = vadd.xlane.f32.xlu0 %v1710_v50  ;;  %v2141_v50 = vld [vmem:[%s8196_s13 + $0x10] sm:$0xff] }
 0x3a8   : > { %1878 = vadd.xlane.f32.xlu0 %v1877_v52 }
 0x3b7   : > { %v2039_v54 = vpop.xlane.xlu0 %2038 }
 0x3b8   : > { %v2040_v55 = vsub.f32 %v2036_v16, %v2039_v54 }
 0x3ba   : > { %v2041_v56 = vmul.f32 1.442695, %v2040_v55 }
 0x3bb   : > { %v1205_v59 = vpop.permute.xlu0 %1204 }
 0x3bc   : > { %7883 = vpow2.f32 %v2041_v56 }
 0x3c6   : > { %v8350_v57 = vpop.eup %7883 }
 0x3c7   : > { %v2043_v58 = vsel %vm11136_vm3, %v8350_v57, 0.0 }
 0x3c8   : > { %2044 = vadd.xlane.f32.xlu0 %v2043_v58  ;;  %v8032_v58 = vmov 4.0  }
 0x3de   : > { %2048 = vrot.lane.b32.xlu0 %v781_v43, %s11082_s19  ;;  %s8036_s19 = smov 126  }
 0x3ec   : > { %v871_v60 = vpop.xlane.xlu0 %870 }
 0x3ed   : > { %7885 = vrcp.f32 %v871_v60  ;;  %v2524_v60 = vld [vmem:[%s11056_s4] sm:$0xff] }
 0x3f0   : > { %v1034_v61 = vpop.xlane.xlu0 %1033 }
 0x3f1   : > { %7887 = vrcp.f32 %v1034_v61  ;;  %v8441_v61 = vld [vmem:[%s11247_s23] sm:$0xff] }
 0x3f4   : > { %v1201_v62 = vpop.xlane.xlu0 %1200 }
 0x3f5   : > { %7889 = vrcp.f32 %v1201_v62  ;;  %v2544_v62 = vsub.f32 1.0, %v2524_v60 }
 0x3f7   : > { %v7886_v63 = vpop.eup %7885 }
 0x3f8   : > { %v1367_v1 = vpop.xlane.xlu0 %1366  ;;  %v873_v2 = vmul.f32 %v7886_v63, %v7872_v35  ;;  %v2274_v35 = vld [vmem:[%s11055_s3 + $0x20] sm:$0xff]  ;;  %v2527_v63 = vld [vmem:[%s11056_s4 + $0x18] sm:$0xff] }
 0x3f9   : > { %7891 = vrcp.f32 %v1367_v1 }
 0x3fa   : > { %6799 = vmatmul.mubr.msk.f32.vlgmr.msra.gmra.mrb[2].mxu1 %vm11136_vm3, %v873_v2  ;;  %7893 = vrcp.f32 %v1549_v0  ;;  %v2547_v0 = vsub.f32 1.0, %v2527_v63 }
 0x3fb   : > { %v7888_v3 = vpop.eup %7887  ;;  %6807 = vmatpush3.msra.mxu1 %v1039_v53  ;;  %6808 = vmatprep.mubr.msk.f32.mxu1 %vm11131_vm2, %v11099_v15 }
 0x3fc   : > { %6816 = vmatprep.subr.mxu1 %v11099_v15  ;;  %v1036_v4 = vmul.f32 %v7888_v3, %v7874_v37  ;;  %v1717_v12 = vpop.permute.xlu0 %1716  ;;  %v8451_v3 = vld [vmem:[%s11247_s23 + $0x8] sm:$0xff] }
 0x3fe   : > { %6809 = vmatmul.mubr.msk.f32.vlgmr.msra.gmra.mrb[4].mxu1 %vm11136_vm3, %v1036_v4  ;;  %v2525_v4 = vld [vmem:[%s11056_s4 + $0x8] sm:$0xff] }
 0x3ff   : > { %v7890_v5 = vpop.eup %7889  ;;  %6817 = vmatpush3.msra.mxu1 %v1205_v59  ;;  %6818 = vmatprep.mubr.msk.f32.mxu1 %vm11131_vm2, %v11099_v15  ;;  %v8431_v59 = vsel %vm2975_vm4, 8.0, %v8032_v58 }
 0x400   : > { %6826 = vmatprep.subr.mxu1 %v11099_v15  ;;  %v1203_v6 = vmul.f32 %v7890_v5, %v7876_v39  ;;  %v1883_v13 = vpop.permute.xlu0 %1882  ;;  %v2276_v5 = vld [vmem:[%s11055_s3 + $0x30] sm:$0xff] }
 0x402   : > { %6819 = vmatmul.mubr.msk.f32.vlgmr.msra.gmra.mrb[6].mxu1 %vm11136_vm3, %v1203_v6  ;;  %v2277_v6 = vld [vmem:[%s11055_s3 + $0x38] sm:$0xff] }
 0x403   : > { %v7892_v8 = vpop.eup %7891  ;;  %6827 = vmatpush3.msra.mxu1 %v1371_v7  ;;  %6828 = vmatprep.mubr.msk.f32.mxu1 %vm11131_vm2, %v11099_v15  ;;  %v2278_v7 = vld [vmem:[%s11055_s3 + $0x40] sm:$0xff] }
 0x404   : > { %6836 = vmatprep.subr.mxu1 %v11099_v15  ;;  %v1369_v9 = vmul.f32 %v7892_v8, %v7878_v41  ;;  %v7894_v10 = vpop.eup %7893  ;;  %v2545_v8 = vsub.f32 1.0, %v2525_v4 }
 0x405   : > { %v1551_v11 = vmul.f32 %v7894_v10, %v8325_v21 }
 0x406   : > { %6829 = vmatmul.mubr.msk.f32.vlgmr.msra.gmra.mrb[8].mxu1 %vm11136_vm3, %v1369_v9 }
 0x407   : > { %6837 = vmatpush3.msra.mxu1 %v781_v43  ;;  %6838 = vmatprep.mubr.msk.f32.mxu1 %vm11131_vm2, %v11099_v15 }
 0x408   : > { %6846 = vmatprep.subr.mxu1 %v11099_v15 }
 0x40a   : > { %6839 = vmatmul.mubr.msk.f32.vlgmr.msra.gmra.mrb[10].mxu1 %vm11136_vm3, %v1551_v11  ;;  %v2526_v11 = vld [vmem:[%s11056_s4 + $0x10] sm:$0xff] }
 0x40b   : > { %6847 = vmatpush3.msra.mxu1 %v1717_v12  ;;  %6848 = vmatprep.mubr.msk.f32.mxu1 %vm11131_vm2, %v11099_v15  ;;  %v2279_v12 = vld [vmem:[%s11055_s3 + $0x48] sm:$0xff] }
 0x40c   : > { %6856 = vmatprep.subr.mxu1 %v11099_v15 }
 0x431   : > { %v1712_v14 = vpop.xlane.xlu0 %1711 }
 0x432   : > { %7895 = vrcp.f32 %v1712_v14  ;;  %v2546_v14 = vsub.f32 1.0, %v2526_v11  ;;  %v2289_v11 = vld [vmem:[%s11055_s3 + $0x98] sm:$0xff] }
 0x435   : > { %v1879_v17 = vpop.xlane.xlu0 %1878 }
 0x436   : > { %7897 = vrcp.f32 %v1879_v17 }
 0x43c   : > { %v7896_v18 = vpop.eup %7895 }
 0x43d   : > { %v1714_v19 = vmul.f32 %v7896_v18, %v8342_v49  ;;  %v2140_v49 = vld [vmem:[%s8196_s13 + $0x8] sm:$0xff] }
 0x43e   : > { %v7196_v52 = vpack.c.bf16 %v2140_v49, %v2139_v48  ;;  %v8530_v49 = vld [vmem:[%s8206_s24 + $0x20] ss:$0 sm:$0xff]  ;;  %s11258_s24 = smov 104  }
 0x43f   : > { %6849 = vmatmul.mubr.msk.f32.vlgmr.msra.gmra.mrb[12].mxu1 %vm11136_vm3, %v1714_v19  ;;  %v2528_v19 = vld [vmem:[%s11056_s4 + $0x20] sm:$0xff] }
 0x440   : > { %v7898_v20 = vpop.eup %7897  ;;  %6857 = vmatpush3.msra.mxu1 %v1883_v13  ;;  %6858 = vmatprep.mubr.msk.f32.mxu1 %vm11131_vm2, %v11099_v15 }
 0x441   : > { %v1881_v21 = vmul.f32 %v7898_v20, %v8346_v51  ;;  %6866 = vmatprep.subr.mxu1 %v11099_v15  ;;  %v2142_v51 = vld [vmem:[%s8196_s13 + $0x18] sm:$0xff]  ;;  %7197 = vmatprep.subr.bf16.mxu0 %v7196_v52 }
 0x442   : > { %v7200_v53 = vpack.c.bf16 %v2142_v51, %v2141_v50  ;;  %7199 = vmatpush3.bf16.msra.mxu0 %v7196_v52  ;;  %v2280_v50 = vld [vmem:[%s11055_s3 + $0x50] sm:$0xff]  ;;  %v2281_v51 = vld [vmem:[%s11055_s3 + $0x58] sm:$0xff]  ;;  %v2282_v52 = vld [vmem:[%s11055_s3 + $0x60] sm:$0xff] }
 0x443   : > { %6859 = vmatmul.mubr.msk.f32.vlgmr.msra.gmra.mrb[14].mxu1 %vm11136_vm3, %v1881_v21  ;;  %v2548_v21 = vsub.f32 1.0, %v2528_v19 }
 0x444   : > { %6868 = vmatprep.mubr.msk.f32.mxu1 %vm11131_vm2, %v11099_v15  ;;  %7201 = vmatprep.subr.bf16.mxu0 %v7200_v53 }
 0x446   : > { %7203 = vmatpush3.bf16.msra.mxu0 %v7200_v53 }
 0x455   : > { %v2045_v22 = vpop.xlane.xlu0 %2044 }
 0x456   : > { %7899 = vrcp.f32 %v2045_v22 }
 0x459   : > { %v2049_v16 = vpop.permute.xlu0 %2048 }
 0x45a   : > { %6867 = vmatpush3.msra.mxu1 %v2049_v16 }
 0x45b   : > { %7205 = vmatprep.subr.bf16.mxu1 %v7204_v27 }
 0x460   : > { %v7900_v23 = vpop.eup %7899 }
 0x461   : > { %v2047_v24 = vmul.f32 %v7900_v23, %v8350_v57 }
 0x463   : > { %6869 = vmatmul.mubr.msk.f32.vlgmr.msra.gmra.mrb[16].mxu1 %vm11136_vm3, %v2047_v24 }
 0x464   : > { %7207 = vmatpush3.bf16.msra.mxu1 %v7204_v27  ;;  %6890 = vmatprep.mubr.msk.f32.mxu1 %vm11127_vm1, %v2270_v31 }
 0x465   : > { %7209 = vmatprep.subr.bf16.mxu1 %v7208_v30 }
 0x468   : > { %7211 = vmatpush3.bf16.msra.mxu1 %v7208_v30 }
 0x46b   : > { %6891 = vmatmul.mubr.msk.f32.vlgmr.msra.gmra.mrb[18].mxu1 %vm11127_vm1, %v2271_v32 }
 0x46c   : > { %6893 = vmatprep.mubr.msk.f32.mxu1 %vm11127_vm1, %v2272_v33 }
 0x46f   : > { %6894 = vmatmul.mubr.msk.f32.gmra.mrb[20].mxu1 %vm11127_vm1, %v2273_v34  ;;  %v8502_v34 = vshrl.u32 %v11096_v29, 7 }
 0x470   : > { %6896 = vmatprep.mubr.msk.f32.mxu1 %vm11127_vm1, %v2274_v35 }
 0x471   : > { %11248 = vst [vmem:[#allocation14_spill] sm:$0xff] %v8502_v34 }
 0x473   : > { %6897 = vmatmul.mubr.msk.f32.gmra.mrb[22].mxu1 %vm11127_vm1, %v2275_v36 }
 0x474   : > { %6899 = vmatprep.mubr.msk.f32.mxu1 %vm11127_vm1, %v2276_v5  ;;  %v2287_v5 = vld [vmem:[%s11055_s3 + $0x88] sm:$0xff] }
 0x477   : > { %6900 = vmatmul.mubr.msk.f32.gmra.mrb[24].mxu1 %vm11127_vm1, %v2277_v6 }
 0x478   : > { %6902 = vmatprep.mubr.msk.f32.mxu1 %vm11127_vm1, %v2278_v7 }
 0x47b   : > { %6903 = vmatmul.mubr.msk.f32.gmra.mrb[26].mxu1 %vm11127_vm1, %v2279_v12 }
 0x47c   : > { %6905 = vmatprep.mubr.msk.f32.mxu1 %vm11127_vm1, %v2280_v50 }
 0x47f   : > { %6906 = vmatmul.mubr.msk.f32.gmra.mrb[28].mxu1 %vm11127_vm1, %v2281_v51 }
 0x480   : > { %6908 = vmatprep.mubr.msk.f32.mxu1 %vm11127_vm1, %v2282_v52 }
 0x4cd   : > { %v8415_v37 = vpop.f32.mrb[2].mxu1 }
 0x4ce   : > { %v6800_v38 = vpop.f32.mrb[3].mxu1 }
 0x4cf   : > { %v8509_v38 = vsub.s32 0, %v8502_v34 }
 0x4d1   : > { %v1110_v39 = vpop.f32.mrb[4].mxu1 }
 0x4d2   : > { %1447 = vrot.lane.b32.xlu0 %v1110_v39, %s11092_s2  ;;  %v6810_v40 = vpop.f32.mrb[5].mxu1 }
 0x4d5   : > { %v1276_v41 = vpop.f32.mrb[6].mxu1 }
 0x4d6   : > { %1451 = vrot.lane.b32.xlu1 %v1276_v41, %s8029_s28  ;;  %v6820_v42 = vpop.f32.mrb[7].mxu1 }
 0x4d9   : > { %v1442_v43 = vpop.f32.mrb[8].mxu1 }
 0x4da   : > { %1455 = vrot.lane.b32.xlu1 %v1442_v43, %s11086_s22  ;;  %v6830_v44 = vpop.f32.mrb[9].mxu1 }
 0x4dd   : > { %v8420_v45 = vpop.f32.mrb[10].mxu1 }
 0x4de   : > { %v6840_v46 = vpop.f32.mrb[11].mxu1 }
 0x512   : > { %v1788_v54 = vpop.f32.mrb[12].mxu1 }
 0x513   : > { %2125 = vrot.lane.b32.xlu0 %v1788_v54, %s11092_s2  ;;  %v6850_v55 = vpop.f32.mrb[13].mxu1 }
 0x514   : > { %v2283_v55 = vld [vmem:[%s11055_s3 + $0x68] sm:$0xff] }
 0x515   : > { %6909 = vmatmul.mubr.msk.f32.gmra.mrb[30].mxu1 %vm11127_vm1, %v2283_v55 }
 0x516   : > { %v1954_v56 = vpop.f32.mrb[14].mxu1 }
 0x517   : > { %2129 = vrot.lane.b32.xlu0 %v1954_v56, %s8029_s28  ;;  %v6860_v57 = vpop.f32.mrb[15].mxu1  ;;  %v2284_v56 = vld [vmem:[%s11055_s3 + $0x70] sm:$0xff] }
 0x518   : > { %6911 = vmatprep.mubr.msk.f32.mxu1 %vm11127_vm1, %v2284_v56 }
 0x51b   : > { %3055 = vrot.lane.b32.xlu0 %v8431_v59, %s11092_s2  ;;  %s8057_s2 = smov 84  }
 0x51f   : > { %2980 = vrot.lane.b32.xlu0 %v8441_v61, %s8033_s14 }
 0x523   : > { %2566 = vperm.xlu0 %7490, %v2544_v62   ;;  %v2285_v62 = vld [vmem:[%s11055_s3 + $0x78] sm:$0xff] }
 0x524   : > { %6912 = vmatmul.mubr.msk.f32.gmra.mrb[32].mxu1 %vm11127_vm1, %v2285_v62 }
 0x527   : > { %2581 = vperm.xlu0 %7490, %v2547_v0   ;;  %v2286_v0 = vld [vmem:[%s11055_s3 + $0x80] sm:$0xff] }
 0x528   : > { %6914 = vmatprep.mubr.msk.f32.mxu1 %vm11127_vm1, %v2286_v0 }
 0x529   : > { %6915 = vmatmul.mubr.msk.f32.gmra.mrb[34].mxu1 %vm11127_vm1, %v2287_v5 }
 0x52b   : > { %2982 = vrot.lane.b32.xlu0 %v8451_v3, %s8033_s14  ;;  %s8039_s14 = smov 1  }
 0x536   : > { %v2120_v1 = vpop.f32.mrb[16].mxu1 }
 0x537   : > { %2133 = vrot.lane.b32.xlu1 %v2120_v1, %s11086_s22  ;;  %v6870_v2 = vpop.f32.mrb[17].mxu1 }
 0x53b   : > { %3052 = vrot.lane.b32.xlu1 %v8431_v59, %s11090_s6  ;;  %s11740_s6 = smov 24  }
 0x53e   : > { %v6892_v22 = vpop.f32.mrb[18].mxu1 }
 0x53f   : > { %3058 = vrot.lane.b32.xlu1 %v8431_v59, %s11094_s15  ;;  %s8037_s15 = smov 127   ;;  %v2425_v16 = vpop.f32.mrb[19].mxu1  ;;  %v2431_v57 = vadd.f32 %v6892_v22, %v8530_v49 }
 0x540   : > { %v2426_v54 = vadd.f32 %v8530_v49, %v2425_v16 }
 0x542   : > { %v6895_v23 = vpop.f32.mrb[20].mxu1 }
 0x543   : > { %2953 = vrot.lane.b32.xlu1 %v8441_v61, %s8036_s19  ;;  %v2435_v24 = vpop.f32.mrb[21].mxu1  ;;  %v2441_v58 = vadd.f32 %v6895_v23, %v8530_v49 }
 0x544   : > { %v1448_v9 = vpop.permute.xlu0 %1447  ;;  %v2436_v2 = vadd.f32 %v8530_v49, %v2435_v24 }
 0x545   : > { %v1458_v13 = vsel %vm11136_vm3, %v8415_v37, %v1448_v9  ;;  %v2288_v9 = vld [vmem:[%s11055_s3 + $0x90] sm:$0xff] }
 0x546   : > { %v8492_v25 = vpop.f32.mrb[22].mxu1  ;;  %6917 = vmatprep.mubr.msk.f32.mxu1 %vm11127_vm1, %v2288_v9  ;;  %v2542_v9 = vld [vmem:[%s11056_s4 + $0x90] sm:$0xff] }
 0x547   : > { %2959 = vrot.lane.b32.xlu1 %v8441_v61, %s8037_s15  ;;  %v8494_v26 = vpop.f32.mrb[23].mxu1  ;;  %6918 = vmatmul.mubr.msk.f32.gmra.mrb[36].mxu1 %vm11127_vm1, %v2289_v11 }
 0x548   : > { %v1452_v10 = vpop.permute.xlu1 %1451 }
 0x549   : > { %v1460_v17 = vsel %vm11134_vm5, %v1458_v13, %v1452_v10 }
 0x54b   : > { %2571 = vperm.xlu1 %7491, %v2545_v8  }
 0x54c   : > { %v1456_v18 = vpop.permute.xlu1 %1455 }
 0x54d   : > { %v1462_v20 = vsel %vm11130_vm6, %v1460_v17, %v1456_v18 }
 0x54e   : > { %6879 = vmatprep.mubr.msk.f32.mxu0 %vm11127_vm1, %v1462_v20 }
 0x54f   : > { %2576 = vperm.xlu1 %7491, %v2546_v14  }
 0x553   : > { %2586 = vperm.xlu1 %7491, %v2548_v21  }
 0x585   : > { %v2126_v27 = vpop.permute.xlu0 %2125 }
 0x586   : > { %v2136_v30 = vsel %vm11136_vm3, %v8420_v45, %v2126_v27 }
 0x589   : > { %v2130_v28 = vpop.permute.xlu0 %2129 }
 0x58a   : > { %v2137_v31 = vsel %vm11134_vm5, %v2136_v30, %v2130_v28 }
 0x58d   : > { %v3056_v37 = vpop.permute.xlu0 %3055 }
 0x591   : > { %v2981_v44 = vpop.permute.xlu0 %2980 }
 0x5a2   : > { %v2567_v53 = vpop.permute.xlu0 %2566 }
 0x5a6   : > { %v2582_v60 = vpop.permute.xlu0 %2581 }
 0x5a7   : > { %v8568_v4 = vmul.f32 %v2582_v60, %v2441_v58  ;;  %v2531_v60 = vld [vmem:[%s11056_s4 + $0x38] sm:$0xff] }
 0x5a9   : > { %v2134_v32 = vpop.permute.xlu1 %2133  ;;  %11251 = vst [vmem:[#allocation17_spill] sm:$0xff] %v8568_v4 }
 0x5aa   : > { %v2138_v33 = vsel %vm11130_vm6, %v2137_v31, %v2134_v32  ;;  %v2983_v18 = vpop.permute.xlu0 %2982  ;;  %v8624_v32 = vpop.f32.mrb[24].mxu1 }
 0x5ab   : > { %6880 = vmatmul.mubr.msk.f32.vlgmr.msra.gmra.mrb[18].mxu0 %vm11127_vm1, %v2138_v33  ;;  %v8631_v33 = vpop.f32.mrb[25].mxu1 }
 0x5ac   : > { %6935 = vmatprep.mubr.msk.f32.mxu0 %vm11131_vm2, %v11099_v15 }
 0x5ad   : > { %v3053_v35 = vpop.permute.xlu1 %3052 }
 0x5ae   : > { %v3061_v36 = vsel %vm11140_vm7, %v8431_v59, %v3053_v35  ;;  %v8556_v59 = vmul.f32 %v2567_v53, %v2426_v54  ;;  %v2533_v35 = vld [vmem:[%s11056_s4 + $0x48] sm:$0xff] }
 0x5af   : > { %v3062_v39 = vsel %vm11136_vm3, %v3061_v36, %v3056_v37  ;;  %v8638_v37 = vpop.f32.mrb[26].mxu1 }
 0x5b0   : > { %11249 = vst [vmem:[#allocation15_spill] sm:$0xff] %v8556_v59 }
 0x5b1   : > { %v3059_v40 = vpop.permute.xlu1 %3058 }
 0x5b2   : > { %v8513_v41 = vsel %vm11135_vm8, %v3062_v39, %v3059_v40  ;;  %v2553_v39 = vsub.f32 1.0, %v2533_v35  ;;  %v2465_v40 = vpop.f32.mrb[27].mxu1 }
 0x5b3   : > { %v8517_v42 = vrot.slane %v8513_v41, %v8509_v38  ;;  %v8660_v52 = vpop.f32.mrb[28].mxu1 }
 0x5b4   : > { %v8662_v53 = vpop.f32.mrb[29].mxu1 }
 0x5b5   : > { %3075 = vrot.lane.b32.xlu1 %v8517_v42, %s8029_s28  ;;  %v2954_v43 = vpop.permute.xlu1 %2953 }
 0x5b6   : > { %v2986_v46 = vsel %vm2950_vm9, %v2981_v44, %v2954_v43 }
 0x5b9   : > { %2955 = vrot.lane.b32.xlu1 %v8451_v3, %s8036_s19  ;;  %v2960_v45 = vpop.permute.xlu1 %2959  ;;  %s11253_s19 = smov 8  }
 0x5ba   : > { %v2965_v48 = vsel %vm2950_vm9, %v2954_v43, %v2960_v45  ;;  %v2978_v21 = vsel %vm2950_vm9, %v2960_v45, %v8441_v61  ;;  %v11101_v43 = vmov 0.0|0.0  }
 0x5bb   : > { %2969 = vrot.lane.b32.xlu0 %v2965_v48, %s8038_s5  ;;  %7220 = vmatprep.subr.bf16.mxu0 %v11101_v43 }
 0x5bd   : > { %2990 = vrot.lane.b32.xlu1 %v2986_v46, %s8038_s5 }
 0x5c1   : > { %2944 = vrot.lane.b32.xlu1 %v8441_v61, %s8039_s14 }
 0x5c5   : > { %2961 = vrot.lane.b32.xlu1 %v8451_v3, %s8037_s15  ;;  %s11386_s15 = smov 88  }
 0x5ca   : > { %v2572_v63 = vpop.permute.xlu1 %2571 }
 0x5cb   : > { %v8565_v1 = vmul.f32 %v2572_v63, %v2431_v57 }
 0x5cd   : > { %11250 = vst [vmem:[#allocation16_spill] sm:$0xff] %v8565_v1  ;;  %v8577_v6 = vpack.i.bf16 %v8565_v1, %v8556_v59 }
 0x5ce   : > { %v2577_v8 = vpop.permute.xlu1 %2576 }
 0x5cf   : > { %v8584_v10 = vmul.f32 %v2577_v8, %v2436_v2  ;;  %v2551_v8 = vsub.f32 1.0, %v2531_v60 }
 0x5d1   : > { %11252 = vst [vmem:[#allocation18_spill] sm:$0xff] %v8584_v10  ;;  %v8593_v12 = vpack.i.bf16 %v8568_v4, %v8584_v10 }
 0x5d2   : > { %v8598_v14 = vpop.permute.xlu1 %2586 }
 0x5e8   : > { %v8664_v55 = vpop.f32.mrb[30].mxu1 }
 0x5e9   : > { %v8666_v56 = vpop.f32.mrb[31].mxu1 }
 0x5f7   : > { %v8668_v57 = vpop.f32.mrb[32].mxu1 }
 0x5f8   : > { %v8675_v62 = vpop.f32.mrb[33].mxu1 }
 0x5fc   : > { %v8679_v2 = vpop.f32.mrb[34].mxu1 }
 0x627   : > { %v8600_v17 = vpop.permute.xlu1 %3075 }
 0x62b   : > { %v2956_v19 = vpop.permute.xlu1 %2955 }
 0x62c   : > { %v2987_v20 = vsel %vm2950_vm9, %v2983_v18, %v2956_v19  ;;  %v2562_v18 = vsub.f32 1.0, %v2542_v9  ;;  %v2471_v9 = vadd.f32 %v8638_v37, %v8530_v49 }
 0x62d   : > { %2992 = vrot.lane.b32.xlu0 %v2987_v20, %s8038_s5  ;;  %v2970_v24 = vpop.permute.xlu0 %2969  ;;  %v8698_v20 = vpop.f32.mrb[35].mxu1 }
 0x62f   : > { %v2991_v22 = vpop.permute.xlu1 %2990 }
 0x630   : > { %v8607_v16 = vsel %vm2975_vm4, %v2978_v21, %v2991_v22  ;;  %v2534_v21 = vld [vmem:[%s11056_s4 + $0x50] sm:$0xff] }
 0x631   : > { %3032 = vrot.lane.b32.xlu0 %v8607_v16, %s11253_s19  ;;  %3026 = vrot.lane.b32.xlu1 %v8607_v16, %s11254_s30  ;;  %v2530_v22 = vld [vmem:[%s11056_s4 + $0x30] sm:$0xff] }
 0x633   : > { %v2945_v23 = vpop.permute.xlu1 %2944 }
 0x634   : > { %v2951_v27 = vsel %vm2950_vm9, %v8441_v61, %v2945_v23  ;;  %v2532_v61 = vld [vmem:[%s11056_s4 + $0x40] sm:$0xff]  ;;  %v8706_v23 = vpop.f32.mrb[36].mxu1 }
 0x635   : > { %2946 = vrot.lane.b32.xlu1 %v8451_v3, %s8039_s14  ;;  %v8618_v28 = vsel %vm2975_vm4, %v2951_v27, %v2970_v24  ;;  %v2552_v36 = vsub.f32 1.0, %v2532_v61  ;;  %v8708_v24 = vpop.f32.mrb[37].mxu1  ;;  %v2554_v27 = vsub.f32 1.0, %v2534_v21  ;;  %v2543_v61 = vld [vmem:[%s11056_s4 + $0x98] sm:$0xff]  ;;  %s11257_s14 = smov 112  }
 0x636   : > { %3000 = vrot.lane.b32.xlu0 %v8618_v28, %s11254_s30 }
 0x637   : > { %v2962_v30 = vpop.permute.xlu1 %2961 }
 0x638   : > { %v2966_v31 = vsel %vm2950_vm9, %v2956_v19, %v2962_v30  ;;  %v2979_v46 = vsel %vm2950_vm9, %v2962_v30, %v8451_v3  ;;  %v2550_v30 = vsub.f32 1.0, %v2530_v22 }
 0x639   : > { %2971 = vrot.lane.b32.xlu1 %v2966_v31, %s8038_s5  ;;  %v2536_v31 = vld [vmem:[%s11056_s4 + $0x60] sm:$0xff]  ;;  %s8058_s5 = smov [#allocation3]  }
 0x63a   : > { %3006 = vrot.lane.b32.xlu0 %v8618_v28, %s11253_s19  ;;  %s7958_s22 = sshll.u32 %s8058_s5, 4  ;;  %s7959_s22 = int_to_ptr.vmem [resolvable:$false] %s7958_s22 }
 0x63d   : > { %3038 = vrot.lane.b32.xlu1 %v8607_v16, %s11255_s16 }
 0x63e   : > { %3012 = vrot.lane.b32.xlu0 %v8618_v28, %s11255_s16 }
 0x641   : > { %2606 = vperm.xlu1 %7491, %v2552_v36   ;;  %v2556_v36 = vsub.f32 1.0, %v2536_v31 }
 0x642   : > { %2611 = vperm.xlu0 %7490, %v2553_v39   ;;  %v2563_v39 = vsub.f32 1.0, %v2543_v61  ;;  %v2540_v61 = vld [vmem:[%s11056_s4 + $0x80] sm:$0xff] }
 0x67e   : > { %v8643_v44 = vpop.f32.mrb[18].mxu0 }
 0x67f   : > { %v8645_v45 = vpop.f32.mrb[19].mxu0 }
 0x69f   : > { %v2993_v48 = vpop.permute.xlu0 %2992 }
 0x6a0   : > { %v8650_v50 = vsel %vm2975_vm4, %v2979_v46, %v2993_v48  ;;  %v2538_v46 = vld [vmem:[%s11056_s4 + $0x70] sm:$0xff]  ;;  %v2535_v48 = vld [vmem:[%s11056_s4 + $0x58] sm:$0xff] }
 0x6a1   : > { %3034 = vrot.lane.b32.xlu0 %v8650_v50, %s11253_s19  ;;  %3028 = vrot.lane.b32.xlu1 %v8650_v50, %s11254_s30 }
 0x6a3   : > { %v8656_v51 = vpop.permute.xlu1 %3026  ;;  %v8670_v58 = vpop.permute.xlu0 %3032 }
 0x6a5   : > { %3040 = vrot.lane.b32.xlu0 %v8650_v50, %s11255_s16 }
 0x6a7   : > { %v2947_v54 = vpop.permute.xlu1 %2946 }
 0x6a8   : > { %v2952_v63 = vsel %vm2950_vm9, %v8451_v3, %v2947_v54  ;;  %v2529_v3 = vld [vmem:[%s11056_s4 + $0x28] sm:$0xff]  ;;  %v8694_v11 = vpop.permute.xlu0 %3000 }
 0x6a9   : > { %v2549_v19 = vsub.f32 1.0, %v2529_v3  ;;  %v2537_v3 = vld [vmem:[%s11056_s4 + $0x68] sm:$0xff] }
 0x6aa   : > { %v2557_v22 = vsub.f32 1.0, %v2537_v3 }
 0x6ab   : > { %v2972_v0 = vpop.permute.xlu1 %2971 }
 0x6ac   : > { %v8682_v5 = vsel %vm2975_vm4, %v2952_v63, %v2972_v0  ;;  %v8716_v35 = vpop.permute.xlu0 %3006  ;;  %v2466_v63 = vadd.f32 %v8530_v49, %v2465_v40  ;;  %v2558_v0 = vsub.f32 1.0, %v2538_v46  ;;  %v2539_v40 = vld [vmem:[%s11056_s4 + $0x78] sm:$0xff] }
 0x6ad   : > { %3014 = vrot.lane.b32.xlu0 %v8682_v5, %s11255_s16  ;;  %3002 = vrot.lane.b32.xlu1 %v8682_v5, %s11254_s30  ;;  %v2559_v37 = vsub.f32 1.0, %v2539_v40  ;;  %v2456_v40 = vadd.f32 %v8530_v49, %v8631_v33 }
 0x6af   : > { %v8724_v54 = vpop.permute.xlu1 %3038 }
 0x6b0   : > { %v8726_v60 = vpop.permute.xlu0 %3012 }
 0x6b1   : > { %2601 = vperm.xlu0 %7490, %v2551_v8   ;;  %3008 = vrot.lane.b32.xlu1 %v8682_v5, %s11253_s19  ;;  %v2555_v8 = vsub.f32 1.0, %v2535_v48 }
 0x6b5   : > { %2656 = vperm.xlu0 %7490, %v2562_v18   ;;  %2591 = vperm.xlu1 %7491, %v2549_v19  }
 0x6b9   : > { %2616 = vperm.xlu0 %7490, %v2554_v27   ;;  %2596 = vperm.xlu1 %7491, %v2550_v30  }
 0x6bd   : > { %2626 = vperm.xlu0 %7490, %v2556_v36   ;;  %2661 = vperm.xlu1 %7491, %v2563_v39   ;;  %v2560_v36 = vsub.f32 1.0, %v2540_v61  ;;  %v2541_v39 = vld [vmem:[%s11056_s4 + $0x88] sm:$0xff] }
 0x6be   : > { %v2561_v46 = vsub.f32 1.0, %v2541_v39 }
 0x6c0   : > { %v2607_v18 = vpop.permute.xlu1 %2606 }
 0x6c1   : > { %v2672_v19 = vmul.f32 %v2607_v18, %v2466_v63  ;;  %v2612_v21 = vpop.permute.xlu0 %2611  ;;  %2636 = vperm.xlu0 %7490, %v2558_v0   ;;  %2621 = vperm.xlu1 %7491, %v2555_v8   ;;  %v2451_v18 = vadd.f32 %v8492_v25, %v8530_v49 }
 0x6c2   : > { %v2673_v27 = vmul.f32 %v2612_v21, %v2471_v9 }
 0x6c4   : > { %v7221_v30 = vpack.c.bf16 %v2673_v27, %v2672_v19  ;;  %v8737_v31 = vpack.i.bf16 %v2673_v27, %v2672_v19  ;;  %v2446_v19 = vadd.f32 %v8530_v49, %v8494_v26  ;;  %v2461_v27 = vadd.f32 %v8624_v32, %v8530_v49 }
 0x6c5   : > { %2631 = vperm.xlu1 %7491, %v2557_v22   ;;  %7493 = vrot.lane.b32.xlu0 %v8577_v6, %s11256_s21  ;;  %v2516_v32 = vadd.f32 %v8530_v49, %v8708_v24 }
 0x6c6   : > { %7222 = vmatpush3.bf16.msra.mxu0 %v7221_v30  ;;  %v8775_v22 = vmul.f32 %v8598_v14, %v2446_v19  ;;  %v2521_v14 = vadd.f32 %v8706_v23, %v8530_v49  ;;  %v2476_v23 = vadd.f32 %v8530_v49, %v8662_v53  ;;  %v2486_v53 = vadd.f32 %v8530_v49, %v8666_v56 }
 0x6c7   : > { %7223 = vmatprep.subr.bf16.mxu0 %v11101_v43  ;;  %v2496_v56 = vadd.f32 %v8530_v49, %v8675_v62 }
 0x6c8   : > { %11259 = vst [vmem:[#allocation19_spill] sm:$0xff] %v8775_v22 }
 0x6c9   : > { %2641 = vperm.xlu1 %7491, %v2559_v37  }
 0x6cd   : > { %2646 = vperm.xlu1 %7491, %v2560_v36  }
 0x6d1   : > { %2651 = vperm.xlu1 %7491, %v2561_v46  }
 0x6d5   : > { %7498 = vrot.lane.b32.xlu1 %v8577_v6, %s11257_s14 }
 0x6d9   : > { %7503 = vrot.lane.b32.xlu1 %v8577_v6, %s11258_s24 }
 0x6dd   : > { %7508 = vrot.lane.b32.xlu1 %v8593_v12, %s11256_s21 }
 0x6e1   : > { %7513 = vrot.lane.b32.xlu1 %v8593_v12, %s11257_s14 }
 0x6e5   : > { %7518 = vrot.lane.b32.xlu1 %v8593_v12, %s11258_s24 }
 0x713   : > { %v8758_v48 = vpop.permute.xlu0 %3034  ;;  %v8760_v63 = vpop.permute.xlu1 %3028 }
 0x717   : > { %v8762_v0 = vpop.permute.xlu0 %3040 }
 0x71f   : > { %v8764_v8 = vpop.permute.xlu1 %3002  ;;  %v8766_v9 = vpop.permute.xlu0 %3014 }
 0x723   : > { %v8768_v6 = vpop.permute.xlu1 %3008 }
 0x730   : > { %v2602_v3 = vpop.permute.xlu0 %2601 }
 0x731   : > { %v8787_v61 = vmul.f32 %v2602_v3, %v2461_v27  ;;  %v2481_v3 = vadd.f32 %v8660_v52, %v8530_v49  ;;  %v2491_v52 = vadd.f32 %v8664_v55, %v8530_v49 }
 0x733   : > { %11261 = vst [vmem:[#allocation21_spill] sm:$0xff] %v8787_v61 }
 0x734   : > { %v2657_v12 = vpop.permute.xlu0 %2656  ;;  %v2592_v21 = vpop.permute.xlu1 %2591 }
 0x735   : > { %v8781_v30 = vmul.f32 %v2592_v21, %v2451_v18  ;;  %v8804_v19 = vmul.f32 %v2657_v12, %v2516_v32 }
 0x737   : > { %11260 = vst [vmem:[#allocation20_spill] sm:$0xff] %v8781_v30  ;;  %v7522_v37 = vpack.i.bf16 %v8781_v30, %v8775_v22  ;;  %11263 = vst [vmem:[#allocation23_spill] sm:$0xff] %v8804_v19 }
 0x738   : > { %v2597_v26 = vpop.permute.xlu1 %2596  ;;  %v2617_v33 = vpop.permute.xlu0 %2616 }
 0x739   : > { %v8793_v36 = vmul.f32 %v2597_v26, %v2456_v40  ;;  %7523 = vrot.lane.b32.xlu1 %v7522_v37, %s11256_s21  ;;  %v8818_v12 = vmul.f32 %v2617_v33, %v2476_v23 }
 0x73b   : > { %11262 = vst [vmem:[#allocation22_spill] sm:$0xff] %v8793_v36  ;;  %v7542_v39 = vpack.i.bf16 %v8787_v61, %v8793_v36  ;;  %11265 = vst [vmem:[#allocation25_spill] sm:$0xff] %v8818_v12 }
 0x73c   : > { %v2662_v18 = vpop.permute.xlu1 %2661  ;;  %v2627_v40 = vpop.permute.xlu0 %2626 }
 0x73d   : > { %v8806_v24 = vmul.f32 %v2662_v18, %v2521_v14  ;;  %7528 = vrot.lane.b32.xlu1 %v7522_v37, %s11257_s14  ;;  %7543 = vrot.lane.b32.xlu0 %v7542_v39, %s11257_s14  ;;  %v2501_v18 = vadd.f32 %v8668_v57, %v8530_v49  ;;  %v8833_v33 = vmul.f32 %v2627_v40, %v2486_v53 }
 0x73e   : > { %v2511_v53 = vadd.f32 %v8679_v2, %v8530_v49 }
 0x73f   : > { %11264 = vst [vmem:[#allocation24_spill] sm:$0xff] %v8806_v24  ;;  %v7592_v21 = vpack.i.bf16 %v8806_v24, %v8804_v19  ;;  %11267 = vst [vmem:[#allocation27_spill] sm:$0xff] %v8833_v33 }
 0x740   : > { %v2622_v26 = vpop.permute.xlu1 %2621 }
 0x741   : > { %v8820_v14 = vmul.f32 %v2622_v26, %v2481_v3  ;;  %7533 = vrot.lane.b32.xlu1 %v7522_v37, %s11258_s24  ;;  %7563 = vrot.lane.b32.xlu0 %v8737_v31, %s11258_s24  ;;  %v2637_v37 = vpop.permute.xlu0 %2636 }
 0x742   : > { %v8845_v55 = vmul.f32 %v2637_v37, %v2496_v56  ;;  %v2506_v56 = vadd.f32 %v8530_v49, %v8698_v20  ;;  %v6500_v49 = vld [vmem:[%s8196_s13 + $0x20] ss:$0 sm:$0xff] }
 0x743   : > { %11266 = vst [vmem:[#allocation26_spill] sm:$0xff] %v8820_v14  ;;  %v7567_v32 = vpack.i.bf16 %v8820_v14, %v8818_v12  ;;  %v2221_v20 = vadd.f32 %v6500_v49, %v8645_v45  ;;  %v2226_v45 = vadd.f32 %v8643_v44, %v6500_v49 }
 0x744   : > { %v2632_v27 = vpop.permute.xlu1 %2631  ;;  %11270 = vst [vmem:[#allocation30_spill] sm:$0xff] %v8845_v55 }
 0x745   : > { %v8835_v3 = vmul.f32 %v2632_v27, %v2491_v52  ;;  %7538 = vrot.lane.b32.xlu1 %v7542_v39, %s11256_s21  ;;  %7593 = vrot.lane.b32.xlu0 %v7592_v21, %s11256_s21  ;;  %v8920_v7 = vpop.permute.xlu0 %7493 }
 0x746   : > { %11288 = vst [vmem:[#allocation48_spill] sm:$0xff] %v8920_v7 }
 0x747   : > { %11268 = vst [vmem:[#allocation28_spill] sm:$0xff] %v8835_v3  ;;  %v8841_v23 = vpack.i.bf16 %v8835_v3, %v8833_v33 }
 0x748   : > { %v2642_v26 = vpop.permute.xlu1 %2641 }
 0x749   : > { %11269 = vst [vmem:[#allocation29_spill] sm:$0xff] %v8841_v23  ;;  %v8847_v62 = vmul.f32 %v2642_v26, %v2501_v18  ;;  %7548 = vrot.lane.b32.xlu1 %v7542_v39, %s11258_s24 }
 0x74b   : > { %11271 = vst [vmem:[#allocation31_spill] sm:$0xff] %v8847_v62  ;;  %v8852_v27 = vpack.i.bf16 %v8847_v62, %v8845_v55 }
 0x74c   : > { %v2647_v40 = vpop.permute.xlu1 %2646 }
 0x74d   : > { %7553 = vrot.lane.b32.xlu1 %v8737_v31, %s11256_s21  ;;  %v8862_v37 = vmul.f32 %v2647_v40, %v2506_v56  ;;  %v7950_v56 = vld [vmem:[#allocation2 + $0x8] sm:$0xff] }
 0x74f   : > { %11272 = vst [vmem:[#allocation32_spill] sm:$0xff] %v8862_v37 }
 0x750   : > { %v2652_v18 = vpop.permute.xlu1 %2651 }
 0x751   : > { %v8864_v39 = vmul.f32 %v2652_v18, %v2511_v53  ;;  %7558 = vrot.lane.b32.xlu1 %v8737_v31, %s11257_s14  ;;  %v7949_v31 = vld [vmem:[#allocation2] sm:$0xff]  ;;  %v2230_v18 = vadd.f32 %v7950_v56, %v2226_v45 }
 0x752   : > { %v2229_v40 = vadd.f32 %v7949_v31, %v2221_v20  ;;  %v2686_v20 = vld [vmem:[%s8201_s26] sm:$0xff]  ;;  %v2687_v31 = vld [vmem:[%s8201_s26 + $0x8] sm:$0xff] }
 0x753   : > { %11273 = vst [vmem:[#allocation33_spill] sm:$0xff] %v8864_v39  ;;  %v8870_v26 = vpack.i.bf16 %v8864_v39, %v8862_v37  ;;  %v2234_v2 = vsel %vm11127_vm1, %v2230_v18, 0.0  ;;  %v7212_v52 = vpack.c.bf16 %v2687_v31, %v2686_v20 }
 0x754   : > { %v2231_v53 = vsel %vm11127_vm1, %v2229_v40, 0.0 }
 0x755   : > { %7568 = vrot.lane.b32.xlu1 %v7567_v32, %s11256_s21  ;;  %7213 = vmatprep.subr.bf16.mxu1 %v7212_v52 }
 0x756   : > { %7215 = vmatpush3.bf16.msra.mxu1 %v7212_v52 }
 0x759   : > { %7573 = vrot.lane.b32.xlu1 %v7567_v32, %s11257_s14 }
 0x75d   : > { %7578 = vrot.lane.b32.xlu1 %v8841_v23, %s11256_s21  ;;  %v11337_v23 = vmov 4  }
 0x761   : > { %7583 = vrot.lane.b32.xlu1 %v8852_v27, %s11256_s21 }
 0x764   : > { %2232 = vadd.xlane.f32.xlu0 %v2231_v53  ;;  %v8892_v53 = vpop.permute.xlu1 %7498 }
 0x765   : > { %7588 = vrot.lane.b32.xlu1 %v8870_v26, %s11256_s21  ;;  %11274 = vst [vmem:[#allocation34_spill] sm:$0xff] %v8892_v53  ;;  %v11157_v53 = vmov 5   ;;  %s8056_s21 = smov 92  }
 0x768   : > { %v8894_v57 = vpop.permute.xlu1 %7503 }
 0x769   : > { %7598 = vrot.lane.b32.xlu1 %v7592_v21, %s11257_s14  ;;  %11275 = vst [vmem:[#allocation35_spill] sm:$0xff] %v8894_v57 }
 0x76c   : > { %v8896_v46 = vpop.permute.xlu1 %7508 }
 0x76d   : > { %7603 = vrot.lane.b32.xlu1 %v7592_v21, %s11258_s24  ;;  %11276 = vst [vmem:[#allocation36_spill] sm:$0xff] %v8896_v46  ;;  %v11172_v46 = vmov 11  }
 0x770   : > { %v8898_v21 = vpop.permute.xlu1 %7513 }
 0x771   : > { %11277 = vst [vmem:[#allocation37_spill] sm:$0xff] %v8898_v21  ;;  %v11336_v21 = vmov 7  }
 0x774   : > { %v8900_v44 = vpop.permute.xlu1 %7518 }
 0x775   : > { %11278 = vst [vmem:[#allocation38_spill] sm:$0xff] %v8900_v44 }
 0x791   : > { %2235 = vadd.xlane.f32.xlu1 %v2234_v2 }
 0x7a2   : > { %7608 = vrot.lane.b32.xlu1 %v7567_v32, %s11258_s24 }
 0x7ab   : > { %v8902_v49 = vpop.permute.xlu1 %7523 }
 0x7ac   : > { %11279 = vst [vmem:[#allocation39_spill] sm:$0xff] %v8902_v49  ;;  %v11339_v49 = vmov 1  }
 0x7af   : > { %v8904_v2 = vpop.permute.xlu1 %7528  ;;  %v8924_v47 = vpop.permute.xlu0 %7543 }
 0x7b0   : > { %11280 = vst [vmem:[#allocation40_spill] sm:$0xff] %v8904_v2  ;;  %11290 = vst [vmem:[#allocation50_spill] sm:$0xff] %v8924_v47 }
 0x7b3   : > { %v8906_v32 = vpop.permute.xlu1 %7533  ;;  %v8928_v43 = vpop.permute.xlu0 %7563 }
 0x7b4   : > { %11281 = vst [vmem:[#allocation41_spill] sm:$0xff] %v8906_v32  ;;  %11292 = vst [vmem:[#allocation52_spill] sm:$0xff] %v8928_v43  ;;  %v11162_v43 = vmov 14  }
 0x7b7   : > { %v8908_v45 = vpop.permute.xlu1 %7538  ;;  %v8932_v39 = vpop.permute.xlu0 %7593 }
 0x7b8   : > { %11282 = vst [vmem:[#allocation42_spill] sm:$0xff] %v8908_v45  ;;  %11294 = vst [vmem:[#allocation54_spill] sm:$0xff] %v8932_v39 }
 0x7bb   : > { %v8910_v56 = vpop.permute.xlu1 %7548 }
 0x7bc   : > { %11283 = vst [vmem:[#allocation43_spill] sm:$0xff] %v8910_v56 }
 0x7bf   : > { %v8912_v52 = vpop.permute.xlu1 %7553 }
 0x7c0   : > { %11284 = vst [vmem:[#allocation44_spill] sm:$0xff] %v8912_v52 }
 0x7c3   : > { %v7559_v20 = vpop.permute.xlu1 %7558 }
 0x7c7   : > { %v8914_v31 = vpop.permute.xlu1 %7568 }
 0x7c8   : > { %11285 = vst [vmem:[#allocation45_spill] sm:$0xff] %v8914_v31 }
 0x7cb   : > { %v8916_v25 = vpop.permute.xlu1 %7573 }
 0x7cc   : > { %11286 = vst [vmem:[#allocation46_spill] sm:$0xff] %v8916_v25 }
 0x7cf   : > { %v8918_v13 = vpop.permute.xlu1 %7578 }
 0x7d0   : > { %11287 = vst [vmem:[#allocation47_spill] sm:$0xff] %v8918_v13  ;;  %v2689_v13 = vld [vmem:[%s8201_s26 + $0x18] sm:$0xff] }
 0x7d3   : > { %v8922_v29 = vpop.permute.xlu1 %7583 }
 0x7d4   : > { %11289 = vst [vmem:[#allocation49_spill] sm:$0xff] %v8922_v29 }
 0x7d7   : > { %v8926_v15 = vpop.permute.xlu1 %7588 }
 0x7d8   : > { %11291 = vst [vmem:[#allocation51_spill] sm:$0xff] %v8926_v15 }
 0x7db   : > { %v8930_v37 = vpop.permute.xlu1 %7598 }
 0x7dc   : > { %11293 = vst [vmem:[#allocation53_spill] sm:$0xff] %v8930_v37  ;;  %v2688_v37 = vld [vmem:[%s8201_s26 + $0x10] sm:$0xff] }
 0x7dd   : > { %v7216_v31 = vpack.c.bf16 %v2689_v13, %v2688_v37 }
 0x7df   : > { %v8934_v55 = vpop.permute.xlu1 %7603  ;;  %7217 = vmatprep.subr.bf16.mxu1 %v7216_v31 }
 0x7e0   : > { %11295 = vst [vmem:[#allocation55_spill] sm:$0xff] %v8934_v55  ;;  %7219 = vmatpush3.bf16.msra.mxu1 %v7216_v31  ;;  %v11296_v55 = vmov 0.0|0.0  }
 0x7e1   : > { %7250 = vmatprep.subr.bf16.mxu1 %v11296_v55 }
 0x7f1   : > { %v2233_v25 = vpop.xlane.xlu0 %2232 }
 0x7f2   : > { %v2238_v62 = vmul.f32 0.03125, %v2233_v25 }
 0x7f4   : > { %v2240_v12 = vsub.f32 %v2229_v40, %v2238_v62 }
 0x7f6   : > { %v2242_v15 = vmul.f32 %v2240_v12, %v2240_v12 }
 0x7f8   : > { %v2244_v29 = vsel %vm11127_vm1, %v2242_v15, 0.0 }
 0x81e   : > { %v2236_v33 = vpop.xlane.xlu1 %2235 }
 0x81f   : > { %v2239_v3 = vmul.f32 0.03125, %v2236_v33 }
 0x821   : > { %v2241_v14 = vsub.f32 %v2230_v18, %v2239_v3 }
 0x823   : > { %v2243_v19 = vmul.f32 %v2241_v14, %v2241_v14 }
 0x825   : > { %v2247_v24 = vsel %vm11127_vm1, %v2243_v19, 0.0 }
 0x826   : > { %2248 = vadd.xlane.f32.xlu0 %v2247_v24  ;;  %v589_v24 = vld [vmem:[%s8186_s17] sm:$0x3f] }
 0x827   : > { %v2261_v15 = vrot.slane %v589_v24, %v8509_v38 }
 0x82a   : > { %2245 = vadd.xlane.f32.xlu0 %v2244_v29  ;;  %v2266_v29 = vsub.s32 1, %v8502_v34 }
 0x82c   : > { %v2267_v31 = vrot.slane %v589_v24, %v2266_v29  ;;  %v3019_v24 = vsel %vm11140_vm7, %v8682_v5, %v8764_v8 }
 0x8b3   : > { %v2249_v25 = vpop.xlane.xlu0 %2248 }
 0x8b4   : > { %v2251_v33 = vmul.f32 0.03125, %v2249_v25 }
 0x8b6   : > { %v2253_v62 = vadd.f32 1e-05, %v2251_v33  ;;  %v7561_v33 = vunpack.i.h.bf16 %v7559_v20 }
 0x8b7   : > { %v2246_v3 = vpop.xlane.xlu0 %2245 }
 0x8b8   : > { %7901 = vrsqrt.f32 %v2253_v62  ;;  %v2250_v40 = vmul.f32 0.03125, %v2246_v3  ;;  %v7560_v62 = vunpack.i.l.bf16 %v7559_v20 }
 0x8ba   : > { %v2252_v19 = vadd.f32 1e-05, %v2250_v40  ;;  %v7951_v40 = vld [vmem:[%s11053_s1] sm:$0xff] }
 0x8bc   : > { %7903 = vrsqrt.f32 %v2252_v19 }
 0x8bd   : > { %7905 = vrcp.f32 %v8517_v42 }
 0x8be   : > { %7907 = vrcp.f32 %v8600_v17 }
 0x8c2   : > { %v7902_v18 = vpop.eup %7901 }
 0x8c3   : > { %v2257_v39 = vmul.f32 %v7902_v18, %v2241_v14  ;;  %v7952_v14 = vld [vmem:[%s11053_s1 + $0x8] sm:$0xff] }
 0x8c5   : > { %v2263_v37 = vmul.f32 %v2261_v15, %v2257_v39  ;;  %v7251_v39 = vpack.c.bf16 %v7561_v33, %v7560_v62 }
 0x8c6   : > { %v7904_v13 = vpop.eup %7903 }
 0x8c7   : > { %v2256_v56 = vmul.f32 %v7904_v13, %v2240_v12  ;;  %v8944_v25 = vadd.f32 %v2267_v31, %v2263_v37  ;;  %v7906_v29 = vpop.eup %7905  ;;  %v3021_v13 = vsel %vm11136_vm3, %v3019_v24, %v8768_v6 }
 0x8c9   : > { %v2262_v32 = vmul.f32 %v2261_v15, %v2256_v56  ;;  %11297 = vst [vmem:[#allocation56_spill] sm:$0xff] %v8944_v25  ;;  %v2685_v12 = vadd.f32 %v7952_v14, %v8944_v25  ;;  %v6524_v56 = vld [vmem:[%s8201_s26 + $0x20] ss:$0 sm:$0xff]  ;;  %s11382_s26 = smov 96  }
 0x8cb   : > { %v8946_v3 = vadd.f32 %v2267_v31, %v2262_v32  ;;  %v11299_v32 = vmov 0.0   ;;  %v3018_v31 = vsel %vm11140_vm7, %v8618_v28, %v8694_v11  ;;  %v3023_v11 = vsel %vm11135_vm8, %v3021_v13, %v8766_v9 }
 0x8cc   : > { %v3020_v8 = vsel %vm11136_vm3, %v3018_v31, %v8716_v35 }
 0x8cd   : > { %11298 = vst [vmem:[#allocation57_spill] sm:$0xff] %v8946_v3  ;;  %v2684_v19 = vadd.f32 %v7951_v40, %v8946_v3  ;;  %v3022_v28 = vsel %vm11135_vm8, %v3020_v8, %v8726_v60 }
 0x8cf   : > { %6928 = vmatprep.mubr.msk.f32.mxu1 %vm11127_vm1, %v2684_v19 }
 0x8d0   : > { %6929 = vmatmul.mubr.msk.f32.vlgmr.msra.gmra.mrb[38].mxu1 %vm11127_vm1, %v2685_v12 }
 0x8d1   : > { %7252 = vmatpush3.bf16.msra.mxu1 %v7251_v39  ;;  %6987 = vmatprep.mubr.msk.f32.mxu1 %vm11131_vm2, %v11299_v32 }
 0x8d2   : > { %7253 = vmatprep.subr.bf16.mxu1 %v11296_v55 }
 0x9a3   : > { %v6930_v20 = vpop.f32.mrb[38].mxu1 }
 0x9a4   : > { %v8966_v18 = vadd.f32 %v6930_v20, %v6524_v56  ;;  %v2767_v15 = vpop.f32.mrb[39].mxu1 }
 0x9a5   : > { %v8970_v37 = vadd.f32 %v6524_v56, %v2767_v15 }
 0x9a6   : > { %v3071_v33 = vmul.f32 %v7906_v29, %v8966_v18  ;;  %v2812_v62 = vsel %vm2808_vm10, %v8966_v18, -inf  ;;  %v2780_v5 = vsel %vm2776_vm11, %v8966_v18, -inf  ;;  %v2874_v14 = vsel %vm2870_vm12, %v8966_v18, -inf }
 0x9a7   : > { %v3070_v40 = vmul.f32 %v7906_v29, %v8970_v37  ;;  %2813 = vmax.xlane.f32.xlu0 %v2812_v62  ;;  %2781 = vmax.xlane.f32.xlu1 %v2780_v5  ;;  %v2843_v35 = vsel %vm2839_vm13, %v8966_v18, -inf  ;;  %v2809_v60 = vsel %vm2808_vm10, %v8970_v37, -inf  ;;  %v2777_v9 = vsel %vm2776_vm11, %v8970_v37, -inf  ;;  %v7908_v62 = vpop.eup %7907 }
 0x9a8   : > { %v3073_v6 = vadd.f32 %v3071_v33, %v3023_v11  ;;  %v2871_v31 = vsel %vm2870_vm12, %v8970_v37, -inf  ;;  %v2840_v33 = vsel %vm2839_vm13, %v8970_v37, -inf  ;;  %v3079_v5 = vmul.f32 %v7908_v62, %v8970_v37  ;;  %v9012_v11 = vpop.permute.xlu1 %7608 }
 0x9a9   : > { %v3072_v19 = vadd.f32 %v3070_v40, %v3022_v28  ;;  %v3080_v8 = vmul.f32 %v7908_v62, %v8966_v18  ;;  %v11123_v40 = vmov 3   ;;  %v11125_v28 = vmov 2   ;;  %11300 = vst [vmem:[#allocation58_spill] sm:$0xff] %v9012_v11 }
 0x9aa   : > { %v3092_v12 = vmul.f32 %v3073_v6, %v8517_v42  ;;  %7613 = vset.pattern.permute.xlu0 %v11123_v40  ;;  %7612 = vset.pattern.permute.xlu1 %v11125_v28 }
 0x9ab   : > { %2875 = vmax.xlane.f32.xlu0 %v2874_v14  ;;  %2844 = vmax.xlane.f32.xlu1 %v2843_v35  ;;  %v3091_v39 = vmul.f32 %v3072_v19, %v8517_v42  ;;  %v7390_v35 = vtrunc.f32 %v8513_v41 }
 0x9ac   : > { %v6528_v56 = vadd.f32 -0.5, %v3092_v12 }
 0x9ad   : > { %v6527_v20 = vadd.f32 -0.5, %v3091_v39 }
 0x9ae   : > { %v3100_v24 = vfloor.f32 %v6528_v56 }
 0x9af   : > { %2810 = vmax.xlane.f32.xlu0 %v2809_v60  ;;  %2778 = vmax.xlane.f32.xlu1 %v2777_v9  ;;  %v3099_v15 = vfloor.f32 %v6527_v20  ;;  %v7391_v60 = vcvt.f32.s32 %v7390_v35 }
 0x9b0   : > { %v8997_v29 = vsub.f32 %v6528_v56, %v3100_v24  ;;  %v7394_v12 = vtrunc.f32 %v3100_v24 }
 0x9b1   : > { %v8999_v13 = vsub.f32 %v6527_v20, %v3099_v15  ;;  %v7392_v20 = vtrunc.f32 %v3099_v15  ;;  %v6531_v24 = vadd.s32 4294967295, %v7391_v60 }
 0x9b2   : > { %v7395_v9 = vcvt.f32.s32 %v7394_v12 }
 0x9b3   : > { %2872 = vmax.xlane.f32.xlu0 %v2871_v31  ;;  %2841 = vmax.xlane.f32.xlu1 %v2840_v33  ;;  %v3044_v31 = vsel %vm11140_vm7, %v8607_v16, %v8656_v51  ;;  %v3045_v33 = vsel %vm11140_vm7, %v8650_v50, %v8760_v63  ;;  %v9037_v41 = vcvt.f32.s32 %v7392_v20 }
 0x9b4   : > { %v3046_v15 = vsel %vm11136_vm3, %v3044_v31, %v8670_v58  ;;  %vm3142_vm14 = vcmp.gt.s32.totalorder %v7395_v9, 0  ;;  %v3112_v51 = vadd.s32 1, %v7395_v9  ;;  %v9049_v58 = vrot.slane %v6531_v24, %v8509_v38 }
 0x9b5   : > { %v3048_v16 = vsel %vm11135_vm8, %v3046_v15, %v8724_v54  ;;  %v3143_v40 = vsel %vm3142_vm14, %v7395_v9, 0  ;;  %vm3140_vm15 = vcmp.gt.s32.totalorder %v9037_v41, 0  ;;  %v9053_v31 = vadd.s32 1, %v9037_v41 }
 0x9b6   : > { %vm3186_vm0 = vcmp.gt.s32.totalorder %v3112_v51, 0  ;;  %vm3146_vm4 = vcmp.lt.s32.totalorder %v9049_v58, %v3143_v40  ;;  %v3116_v24 = vsub.f32 1.0, %v8997_v29  ;;  %vm3122_vm11 = vcmp.ge.s32.totalorder %v7395_v9, 0 }
 0x9b7   : > { %vm3184_vm9 = vcmp.gt.s32.totalorder %v9053_v31, 0  ;;  %vm3129_vm12 = vcmp.le.s32.totalorder %v7395_v9, %v9049_v58  ;;  %vm3175_vm14 = vcmp.ge.s32.totalorder %v3112_v51, 0  ;;  %vm3128_vm1 = vcmp.le.s32.totalorder %v9037_v41, %v9049_v58 }
 0x9b8   : > { %vm3174_vm5 = vcmp.ge.s32.totalorder %v9053_v31, 0 }
 0x9c4   : > { %3083 = vrot.lane.b32.xlu1 %v3079_v5, %s11257_s14 }
 0x9c9   : > { %3085 = vrot.lane.b32.xlu0 %v3080_v8, %s11257_s14  ;;  %v3047_v8 = vsel %vm11136_vm3, %v3045_v33, %v8758_v48  ;;  %v9058_v33 = vsel %vm3140_vm15, %v9037_v41, 0  ;;  %vm3177_vm15 = vcmp.le.s32.totalorder %v3112_v51, %v9049_v58  ;;  %vm3176_vm3 = vcmp.le.s32.totalorder %v9053_v31, %v9049_v58 }
 0x9ca   : > { %v3049_v50 = vsel %vm11135_vm8, %v3047_v8, %v8762_v0  ;;  %v9061_v8 = vrot.slane %v7391_v60, %v8509_v38  ;;  %vm9109_vm2 = vmand %vm3175_vm14, %vm3177_vm15 }
 0xa34   : > { %v9014_v6 = vpop.xlane.xlu0 %2813  ;;  %v9016_v17 = vpop.xlane.xlu1 %2781 }
 0xa38   : > { %v9018_v19 = vpop.xlane.xlu0 %2875  ;;  %v9020_v14 = vpop.xlane.xlu1 %2844 }
 0xa3c   : > { %v9023_v39 = vpop.xlane.xlu0 %2810  ;;  %v9025_v56 = vpop.xlane.xlu1 %2778 }
 0xa40   : > { %v9033_v62 = vpop.xlane.xlu0 %2872  ;;  %v9035_v5 = vpop.xlane.xlu1 %2841 }
 0xa44   : > { %v3086_v63 = vpop.permute.xlu0 %3085  ;;  %v3084_v35 = vpop.permute.xlu1 %3083 }
 0xa45   : > { %v3090_v12 = vadd.f32 %v3086_v63, %v3049_v50  ;;  %v3089_v20 = vadd.f32 %v3084_v35, %v3048_v16  ;;  %v3187_v50 = vsel %vm3186_vm0, %v3112_v51, 0  ;;  %v3147_v35 = vsel %vm3146_vm4, %v9049_v58, %v3143_v40 }
 0xa46   : > { %vm3190_vm13 = vcmp.lt.s32.totalorder %v9049_v58, %v3187_v50  ;;  %vm3121_vm0 = vcmp.ge.s32.totalorder %v9037_v41, 0  ;;  %v11153_v41 = vmov 10  }
 0xa47   : > { %v3096_v48 = vmul.f32 %v3090_v12, %v8517_v42  ;;  %v3095_v54 = vmul.f32 %v3089_v20, %v8517_v42 }
 0xa49   : > { %v6530_v0 = vadd.f32 -0.5, %v3096_v48  ;;  %v6529_v15 = vadd.f32 -0.5, %v3095_v54  ;;  %v3185_v48 = vsel %vm3184_vm9, %v9053_v31, 0  ;;  %vm9098_vm9 = vmand %vm3122_vm11, %vm3129_vm12 }
 0xa4a   : > { %vm3188_vm14 = vcmp.lt.s32.totalorder %v9049_v58, %v3185_v48 }
 0xa4b   : > { %v3102_v63 = vfloor.f32 %v6530_v0  ;;  %v3101_v42 = vfloor.f32 %v6529_v15 }
 0xa4d   : > { %v3106_v12 = vsub.f32 %v6530_v0, %v3102_v63  ;;  %v7398_v38 = vtrunc.f32 %v3102_v63  ;;  %v9070_v60 = vsub.f32 %v6529_v15, %v3101_v42  ;;  %v7396_v20 = vtrunc.f32 %v3101_v42 }
 0xa4e   : > { %v11301_v15 = vsub.f32 1.0, %v8999_v13 }
 0xa4f   : > { %v7399_v54 = vcvt.f32.s32 %v7398_v38  ;;  %v3118_v40 = vsub.f32 1.0, %v3106_v12  ;;  %v9075_v28 = vcvt.f32.s32 %v7396_v20  ;;  %v9078_v16 = vmul.f32 %v3116_v24, %v3106_v12 }
 0xa50   : > { %v9081_v0 = vmul.f32 %v3106_v12, %v8997_v29  ;;  %v9086_v63 = vmul.f32 %v11301_v15, %v9070_v60  ;;  %v9090_v42 = vmul.f32 %v9070_v60, %v8999_v13  ;;  %v3117_v44 = vsub.f32 1.0, %v9070_v60 }
 0xa51   : > { %v3114_v38 = vadd.s32 1, %v7399_v54  ;;  %vm3150_vm4 = vcmp.gt.s32.totalorder %v7399_v54, 0  ;;  %v9093_v20 = vadd.s32 1, %v9075_v28  ;;  %v9104_v34 = vmul.f32 %v3118_v40, %v3116_v24 }
 0xa52   : > { %v3151_v15 = vsel %vm3150_vm4, %v7399_v54, 0  ;;  %vm3133_vm6 = vcmp.ge.s32.totalorder %v7399_v54, 0  ;;  %v3191_v60 = vsel %vm3190_vm13, %v9049_v58, %v3187_v50  ;;  %v9183_v50 = vsel %vm3188_vm14, %v9049_v58, %v3185_v48 }
 0xa53   : > { %vm3154_vm11 = vcmp.lt.s32.totalorder %v9049_v58, %v3151_v15  ;;  %vm3214_vm12 = vcmp.gt.s32.totalorder %v3114_v38, 0  ;;  %vm3212_vm8 = vcmp.gt.s32.totalorder %v9093_v20, 0  ;;  %vm9118_vm4 = vmand %vm9098_vm9, %vm3133_vm6  ;;  %vm3209_vm13 = vcmp.le.s32.totalorder %v3114_v38, %v9049_v58 }
 0xa54   : > { %v3155_v51 = vsel %vm3154_vm11, %v9049_v58, %v3151_v15  ;;  %v3215_v24 = vsel %vm3214_vm12, %v3114_v38, 0  ;;  %v3213_v25 = vsel %vm3212_vm8, %v9093_v20, 0  ;;  %vm9129_vm15 = vmand %vm9109_vm2, %vm3133_vm6  ;;  %vm3137_vm6 = vcmp.le.s32.totalorder %v7399_v54, %v9049_v58 }
 0xa55   : > { %v3161_v47 = vmul.u32 %v9061_v8, %v3155_v51  ;;  %vm3218_vm7 = vcmp.lt.s32.totalorder %v9049_v58, %v3215_v24  ;;  %vm3216_vm10 = vcmp.lt.s32.totalorder %v9049_v58, %v3213_v25  ;;  %vm9142_vm8 = vmand %vm3121_vm0, %vm3128_vm1  ;;  %v9150_v51 = vmul.f32 %v3118_v40, %v8997_v29 }
 0xa56   : > { %v3219_v2 = vsel %vm3218_vm7, %v9049_v58, %v3215_v24  ;;  %v3217_v57 = vsel %vm3216_vm10, %v9049_v58, %v3213_v25  ;;  %vm9157_vm11 = vmand %vm3174_vm5, %vm3176_vm3  ;;  %vm11314_vm1 = vcmp.lt.s32.totalorder %v9049_v58, %v9058_v33  ;;  %vm3205_vm7 = vcmp.ge.s32.totalorder %v3114_v38, 0 }
 0xa57   : > { %v9164_v24 = vadd.s32 %v3161_v47, %v3147_v35  ;;  %v3221_v25 = vmul.u32 %v3219_v2, %v9061_v8  ;;  %v9172_v29 = vsel %vm11314_vm1, %v9049_v58, %v9058_v33  ;;  %vm9176_vm3 = vmand %vm9118_vm4, %vm3137_vm6  ;;  %v3220_v2 = vmul.u32 %v3217_v57, %v9061_v8 }
 0xa58   : > { %vm9188_vm5 = vmand %vm9129_vm15, %vm3137_vm6  ;;  %v11321_v48 = vsub.f32 1.0, %v8999_v13  ;;  %vm3132_vm12 = vcmp.ge.s32.totalorder %v9075_v28, 0  ;;  %vm3136_vm4 = vcmp.le.s32.totalorder %v9075_v28, %v9049_v58  ;;  %v9221_v38 = vmul.f32 %v3117_v44, %v8999_v13 }
 0xa59   : > { %v9192_v33 = vadd.s32 %v3221_v25, %v3147_v35  ;;  %v9194_v40 = vadd.s32 %v3221_v25, %v3191_v60  ;;  %4689 = vperm.xlu0 %7613, %v9164_v24   ;;  %4679 = vperm.xlu1 %7612, %v9164_v24   ;;  %vm3207_vm10 = vmand %vm9098_vm9, %vm3205_vm7  ;;  %v9202_v57 = vadd.s32 %v3220_v2, %v9172_v29  ;;  %v11146_v25 = vmov 6  }
 0xa5a   : > { %v9205_v11 = vadd.s32 %v3220_v2, %v9183_v50  ;;  %vm9207_vm0 = vmand %vm3207_vm10, %vm3209_vm13  ;;  %v9213_v9 = vmul.f32 %v3117_v44, %v11321_v48  ;;  %v11144_v2 = vmov 7   ;;  %vm3204_vm6 = vcmp.ge.s32.totalorder %v9093_v20, 0 }
 0xa5b   : > { %vm3235_vm9 = vmand %vm9109_vm2, %vm3205_vm7  ;;  %vm3208_vm7 = vcmp.le.s32.totalorder %v9093_v20, %v9049_v58  ;;  %v9246_v13 = vadd.s32 %v3191_v60, %v3161_v47  ;;  %v11328_v48 = vmov 0   ;;  %v11334_v20 = vmov 6  }
 0xa5c   : > { %vm9223_vm14 = vmand %vm3235_vm9, %vm3209_vm13  ;;  %v11150_v15 = vmov 4   ;;  %v11335_v60 = vmov 3  }
 0xa5d   : > { %7614 = vset.pattern.permute.xlu0 %v11146_v25  ;;  %7615 = vset.pattern.permute.xlu1 %v11144_v2  ;;  %vm3134_vm15 = vmand %vm9142_vm8, %vm3132_vm12  ;;  %v11329_v2 = vmov 2  }
 0xa5e   : > { %4985 = vperm.xlu0 %7614, %v9164_v24   ;;  %4995 = vperm.xlu1 %7615, %v9164_v24   ;;  %vm9233_vm2 = vmand %vm3134_vm15, %vm3136_vm4  ;;  %vm11435_vm15 = vcmask 31744  }
 0xa5f   : > { %vm3180_vm1 = vmand %vm9157_vm11, %vm3132_vm12 }
 0xa60   : > { %vm9242_vm10 = vmand %vm3180_vm1, %vm3136_vm4 }
 0xa61   : > { %vm3206_vm13 = vmand %vm9142_vm8, %vm3204_vm6  ;;  %vm3148_vm8 = vcmp.gt.s32.totalorder %v9075_v28, 0 }
 0xa62   : > { %7620 = vset.pattern.permute.xlu0 %v11328_v48  ;;  %7616 = vset.pattern.permute.xlu1 %v11329_v2  ;;  %vm9252_vm9 = vmand %vm3206_vm13, %vm3208_vm7 }
 0xa63   : > { %4595 = vperm.xlu0 %7620, %v9164_v24   ;;  %4699 = vperm.xlu1 %7616, %v9246_v13   ;;  %vm3234_vm12 = vmand %vm9157_vm11, %vm3204_vm6 }
 0xa64   : > { %vm9260_vm4 = vmand %vm3234_vm12, %vm3208_vm7 }
 0xa65   : > { %vm11437_vm6 = vmmov %vm11435_vm15 }
 0xa66   : > { %vm11439_vm1 = vmmov %vm11437_vm6 }
 0xa67   : > { %4616 = vperm.xlu0 %7620, %v9246_v13   ;;  %7617 = vset.pattern.permute.xlu1 %v11334_v20  ;;  %vm11441_vm7 = vmmov %vm11439_vm1 }
 0xa68   : > { %5005 = vperm.xlu1 %7617, %v9246_v13   ;;  %vm11450_vm13 = vmmov %vm11439_vm1 }
 0xa69   : > { %vm11451_vm12 = vmmov %vm11439_vm1 }
 0xa6b   : > { %7624 = vset.pattern.permute.xlu0 %v11150_v15  ;;  %v11159_v15 = vmov 1  }
 0xa6c   : > { %4925 = vperm.xlu0 %7624, %v9246_v13   ;;  %7618 = vset.pattern.permute.xlu1 %v11335_v60 }
 0xa6d   : > { %4709 = vperm.xlu1 %7618, %v9246_v13  }
 0xa70   : > { %7626 = vset.pattern.permute.xlu0 %v11153_v41  ;;  %v3149_v41 = vsel %vm3148_vm8, %v9075_v28, 0  ;;  %vm11468_vm8 = vmmov %vm11439_vm1 }
 0xa71   : > { %5331 = vperm.xlu0 %7626, %v9164_v24   ;;  %7619 = vset.pattern.permute.xlu1 %v11336_v21  ;;  %vm3152_vm11 = vcmp.lt.s32.totalorder %v9049_v58, %v3149_v41 }
 0xa72   : > { %5015 = vperm.xlu1 %7619, %v9246_v13   ;;  %v3153_v45 = vsel %vm3152_vm11, %v9049_v58, %v3149_v41  ;;  %v11175_v58 = vmov 15   ;;  %v11342_v41 = vmov 12   ;;  %vm11469_vm11 = vmmov %vm11439_vm1 }
 0xa73   : > { %v3160_v28 = vmul.u32 %v9061_v8, %v3153_v45  ;;  %v11340_v8 = vmov 10  }
 0xa75   : > { %7628 = vset.pattern.permute.xlu0 %v11157_v53  ;;  %v11165_v53 = vmov 12   ;;  %v9304_v45 = vadd.s32 %v9183_v50, %v3160_v28  ;;  %v11170_v50 = vmov 8  }
 0xa76   : > { %4935 = vperm.xlu0 %7628, %v9246_v13   ;;  %7621 = vset.pattern.permute.xlu1 %v11159_v15  ;;  %v11338_v15 = vmov 5  }
 0xa77   : > { %4606 = vperm.xlu1 %7621, %v9164_v24  }
 0xa7a   : > { %7629 = vset.pattern.permute.xlu0 %v11162_v43  ;;  %v11168_v43 = vmov 9  }
 0xa7b   : > { %5667 = vperm.xlu0 %7629, %v9164_v24   ;;  %7622 = vset.pattern.permute.xlu1 %v11337_v23 }
 0xa7c   : > { %4905 = vperm.xlu1 %7622, %v9164_v24  }
 0xa7f   : > { %7639 = vset.pattern.permute.xlu0 %v11165_v53  ;;  %v9297_v53 = vadd.s32 %v3160_v28, %v9172_v29  ;;  %v11341_v29 = vmov 14  }
 0xa80   : > { %5607 = vperm.xlu0 %7639, %v9246_v13   ;;  %7623 = vset.pattern.permute.xlu1 %v11338_v15 }
 0xa81   : > { %4915 = vperm.xlu1 %7623, %v9164_v24  }
 0xa84   : > { %7640 = vset.pattern.permute.xlu0 %v11168_v43 }
 0xa85   : > { %5281 = vperm.xlu0 %7640, %v9246_v13   ;;  %7625 = vset.pattern.permute.xlu1 %v11339_v49 }
 0xa86   : > { %4627 = vperm.xlu1 %7625, %v9246_v13  }
 0xa89   : > { %7642 = vset.pattern.permute.xlu0 %v11335_v60 }
 0xa8a   : > { %7627 = vset.pattern.permute.xlu1 %v11172_v46  ;;  %3345 = vperm.xlu0 %7642, %v9297_v53  }
 0xa8b   : > { %5341 = vperm.xlu1 %7627, %v9164_v24  }
 0xa8e   : > { %7643 = vset.pattern.permute.xlu0 %v11329_v2 }
 0xa8f   : > { %7630 = vset.pattern.permute.xlu1 %v11175_v58  ;;  %3355 = vperm.xlu0 %7643, %v9304_v45  }
 0xa90   : > { %5677 = vperm.xlu1 %7630, %v9164_v24  }
 0xa93   : > { %7646 = vset.pattern.permute.xlu0 %v11339_v49 }
 0xa94   : > { %7631 = vset.pattern.permute.xlu1 %v11340_v8  ;;  %3262 = vperm.xlu0 %7646, %v9297_v53  }
 0xa95   : > { %5351 = vperm.xlu1 %7631, %v9246_v13  }
 0xa98   : > { %7648 = vset.pattern.permute.xlu0 %v11334_v20 }
 0xa99   : > { %7632 = vset.pattern.permute.xlu1 %v11341_v29  ;;  %3642 = vperm.xlu0 %7648, %v9297_v53  }
 0xa9a   : > { %5687 = vperm.xlu1 %7632, %v9246_v13  }
 0xa9d   : > { %3662 = vperm.xlu0 %7648, %v9304_v45  }
 0xa9e   : > { %7633 = vset.pattern.permute.xlu1 %v11172_v46 }
 0xa9f   : > { %5361 = vperm.xlu1 %7633, %v9246_v13  }
 0xaa1   : > { %7650 = vset.pattern.permute.xlu0 %v11337_v23 }
 0xaa2   : > { %3562 = vperm.xlu0 %7650, %v9297_v53  }
 0xaa3   : > { %7634 = vset.pattern.permute.xlu1 %v11175_v58 }
 0xaa4   : > { %5697 = vperm.xlu1 %7634, %v9246_v13  }
 0xaa6   : > { %7655 = vset.pattern.permute.xlu0 %v11338_v15 }
 0xaa7   : > { %3592 = vperm.xlu0 %7655, %v9304_v45  }
 0xaa8   : > { %7635 = vset.pattern.permute.xlu1 %v11170_v50 }
 0xaa9   : > { %5251 = vperm.xlu1 %7635, %v9164_v24  }
 0xaab   : > { %7656 = vset.pattern.permute.xlu0 %v11341_v29 }
 0xaac   : > { %4324 = vperm.xlu0 %7656, %v9297_v53  }
 0xaad   : > { %7636 = vset.pattern.permute.xlu1 %v11168_v43 }
 0xaae   : > { %5261 = vperm.xlu1 %7636, %v9164_v24  }
 0xab0   : > { %7661 = vset.pattern.permute.xlu0 %v11175_v58 }
 0xab1   : > { %4354 = vperm.xlu0 %7661, %v9304_v45  }
 0xab2   : > { %7637 = vset.pattern.permute.xlu1 %v11342_v41 }
 0xab3   : > { %5587 = vperm.xlu1 %7637, %v9164_v24  }
 0xab5   : > { %7664 = vset.pattern.permute.xlu0 %v11342_v41 }
 0xab6   : > { %4244 = vperm.xlu0 %7664, %v9297_v53  }
 0xab7   : > { %7638 = vset.pattern.permute.xlu1 %v11170_v50 }
 0xab8   : > { %5271 = vperm.xlu1 %7638, %v9246_v13  }
 0xaba   : > { %4264 = vperm.xlu0 %7664, %v9304_v45  }
 0xabc   : > { %7641 = vset.pattern.permute.xlu1 %v11329_v2 }
 0xabd   : > { %3335 = vperm.xlu1 %7641, %v9297_v53  }
 0xabe   : > { %7668 = vset.pattern.permute.xlu0 %v11329_v2 }
 0xabf   : > { %4719 = vperm.xlu0 %7668, %v9192_v33  }
 0xac1   : > { %7644 = vset.pattern.permute.xlu1 %v11335_v60 }
 0xac2   : > { %3365 = vperm.xlu1 %7644, %v9304_v45  }
 0xac3   : > { %4739 = vperm.xlu0 %7668, %v9194_v40  }
 0xac6   : > { %7645 = vset.pattern.permute.xlu1 %v11328_v48 }
 0xac7   : > { %7672 = vset.pattern.permute.xlu0 %v11334_v20  ;;  %3251 = vperm.xlu1 %7645, %v9297_v53  }
 0xac8   : > { %5045 = vperm.xlu0 %7672, %v9194_v40  }
 0xacb   : > { %3272 = vperm.xlu1 %7645, %v9304_v45  }
 0xacc   : > { %7674 = vset.pattern.permute.xlu0 %v11336_v21 }
 0xacd   : > { %5055 = vperm.xlu0 %7674, %v9194_v40  }
 0xacf   : > { %7647 = vset.pattern.permute.xlu1 %v11339_v49 }
 0xad0   : > { %3283 = vperm.xlu1 %7647, %v9304_v45  }
 0xad1   : > { %7676 = vset.pattern.permute.xlu0 %v11337_v23 }
 0xad2   : > { %4945 = vperm.xlu0 %7676, %v9192_v33  }
 0xad4   : > { %7649 = vset.pattern.permute.xlu1 %v11336_v21 }
 0xad5   : > { %3652 = vperm.xlu1 %7649, %v9297_v53  }
 0xad6   : > { %7677 = vset.pattern.permute.xlu0 %v11339_v49 }
 0xad7   : > { %4648 = vperm.xlu0 %7677, %v9192_v33  }
 0xad8   : > { %v9364_v28 = vpop.permute.xlu0 %4689  ;;  %v9366_v43 = vpop.permute.xlu1 %4679 }
 0xad9   : > { %11343 = vst [vmem:[#allocation59_spill] sm:$0xff] %v9364_v28  ;;  %11344 = vst [vmem:[#allocation60_spill] sm:$0xff] %v9366_v43  ;;  %3672 = vperm.xlu1 %7649, %v9304_v45  }
 0xadb   : > { %7686 = vset.pattern.permute.xlu0 %v11175_v58 }
 0xadc   : > { %5717 = vperm.xlu0 %7686, %v9192_v33  }
 0xadd   : > { %v9371_v50 = vpop.permute.xlu0 %4985  ;;  %7651 = vset.pattern.permute.xlu1 %v11338_v15  ;;  %v9374_v46 = vpop.permute.xlu1 %4995 }
 0xade   : > { %11345 = vst [vmem:[#allocation61_spill] sm:$0xff] %v9371_v50  ;;  %11346 = vst [vmem:[#allocation62_spill] sm:$0xff] %v9374_v46  ;;  %3572 = vperm.xlu1 %7651, %v9297_v53  }
 0xae0   : > { %7687 = vset.pattern.permute.xlu0 %v11340_v8 }
 0xae1   : > { %5391 = vperm.xlu0 %7687, %v9194_v40  }
 0xae2   : > { %v9379_v28 = vpop.permute.xlu0 %4595  ;;  %7652 = vset.pattern.permute.xlu1 %v11337_v23  ;;  %v9382_v43 = vpop.permute.xlu1 %4699 }
 0xae3   : > { %11347 = vst [vmem:[#allocation63_spill] sm:$0xff] %v9379_v28  ;;  %11348 = vst [vmem:[#allocation64_spill] sm:$0xff] %v9382_v43  ;;  %3582 = vperm.xlu1 %7652, %v9304_v45   ;;  %v11352_v43 = vmov 11  }
 0xae5   : > { %7688 = vset.pattern.permute.xlu0 %v11341_v29 }
 0xae6   : > { %v9386_v58 = vpop.permute.xlu0 %4616  ;;  %5727 = vperm.xlu0 %7688, %v9194_v40  }
 0xae7   : > { %11349 = vst [vmem:[#allocation65_spill] sm:$0xff] %v9386_v58  ;;  %7653 = vset.pattern.permute.xlu1 %v11340_v8  ;;  %v9390_v46 = vpop.permute.xlu1 %5005 }
 0xae8   : > { %11350 = vst [vmem:[#allocation66_spill] sm:$0xff] %v9390_v46  ;;  %3988 = vperm.xlu1 %7653, %v9297_v53   ;;  %v11355_v46 = vmov 15  }
 0xaea   : > { %7692 = vset.pattern.permute.xlu0 %v11342_v41 }
 0xaeb   : > { %v9394_v28 = vpop.permute.xlu0 %4925  ;;  %5627 = vperm.xlu0 %7692, %v9192_v33  }
 0xaec   : > { %11351 = vst [vmem:[#allocation67_spill] sm:$0xff] %v9394_v28  ;;  %7654 = vset.pattern.permute.xlu1 %v11352_v43  ;;  %v9398_v50 = vpop.permute.xlu1 %4709 }
 0xaed   : > { %11353 = vst [vmem:[#allocation68_spill] sm:$0xff] %v9398_v50  ;;  %3998 = vperm.xlu1 %7654, %v9297_v53  }
 0xaef   : > { %7694 = vset.pattern.permute.xlu0 %v11335_v60 }
 0xaf0   : > { %v9402_v58 = vpop.permute.xlu0 %5331  ;;  %3385 = vperm.xlu0 %7694, %v9202_v57  }
 0xaf1   : > { %11354 = vst [vmem:[#allocation69_spill] sm:$0xff] %v9402_v58  ;;  %7657 = vset.pattern.permute.xlu1 %v11355_v46  ;;  %v9406_v7 = vpop.permute.xlu1 %5015 }
 0xaf2   : > { %11356 = vst [vmem:[#allocation70_spill] sm:$0xff] %v9406_v7  ;;  %4334 = vperm.xlu1 %7657, %v9297_v53  }
 0xaf4   : > { %7697 = vset.pattern.permute.xlu0 %v11339_v49 }
 0xaf5   : > { %v9410_v28 = vpop.permute.xlu0 %4935  ;;  %3304 = vperm.xlu0 %7697, %v9202_v57  }
 0xaf6   : > { %11357 = vst [vmem:[#allocation71_spill] sm:$0xff] %v9410_v28  ;;  %7658 = vset.pattern.permute.xlu1 %v11340_v8  ;;  %v9414_v50 = vpop.permute.xlu1 %4606 }
 0xaf7   : > { %11358 = vst [vmem:[#allocation72_spill] sm:$0xff] %v9414_v50  ;;  %4008 = vperm.xlu1 %7658, %v9304_v45  }
 0xaf9   : > { %7698 = vset.pattern.permute.xlu0 %v11328_v48 }
 0xafa   : > { %v9418_v58 = vpop.permute.xlu0 %5667  ;;  %3314 = vperm.xlu0 %7698, %v9205_v11  }
 0xafb   : > { %11359 = vst [vmem:[#allocation73_spill] sm:$0xff] %v9418_v58  ;;  %7659 = vset.pattern.permute.xlu1 %v11341_v29  ;;  %v9422_v7 = vpop.permute.xlu1 %4905 }
 0xafc   : > { %11360 = vst [vmem:[#allocation74_spill] sm:$0xff] %v9422_v7  ;;  %4344 = vperm.xlu1 %7659, %v9304_v45   ;;  %v11364_v7 = vmov 8  }
 0xafe   : > { %7704 = vset.pattern.permute.xlu0 %v11337_v23 }
 0xaff   : > { %v9426_v28 = vpop.permute.xlu0 %5607  ;;  %3602 = vperm.xlu0 %7704, %v9202_v57  }
 0xb00   : > { %11361 = vst [vmem:[#allocation75_spill] sm:$0xff] %v9426_v28  ;;  %7660 = vset.pattern.permute.xlu1 %v11352_v43  ;;  %v9430_v50 = vpop.permute.xlu1 %4915 }
 0xb01   : > { %11362 = vst [vmem:[#allocation76_spill] sm:$0xff] %v9430_v50  ;;  %4018 = vperm.xlu1 %7660, %v9304_v45   ;;  %v11366_v50 = vmov 9  }
 0xb03   : > { %7706 = vset.pattern.permute.xlu0 %v11340_v8 }
 0xb04   : > { %v9434_v58 = vpop.permute.xlu0 %5281  ;;  %4028 = vperm.xlu0 %7706, %v9202_v57  }
 0xb05   : > { %11363 = vst [vmem:[#allocation77_spill] sm:$0xff] %v9434_v58  ;;  %7662 = vset.pattern.permute.xlu1 %v11364_v7  ;;  %v9438_v52 = vpop.permute.xlu1 %4627 }
 0xb06   : > { %11365 = vst [vmem:[#allocation78_spill] sm:$0xff] %v9438_v52  ;;  %3908 = vperm.xlu1 %7662, %v9297_v53   ;;  %v11199_v52 = vmov 13  }
 0xb08   : > { %7710 = vset.pattern.permute.xlu0 %v11338_v15 }
 0xb09   : > { %v9442_v28 = vpop.permute.xlu0 %3345  ;;  %3632 = vperm.xlu0 %7710, %v9205_v11  }
 0xb0a   : > { %7663 = vset.pattern.permute.xlu1 %v11366_v50  ;;  %v9446_v36 = vpop.permute.xlu1 %5341 }
 0xb0b   : > { %11367 = vst [vmem:[#allocation79_spill] sm:$0xff] %v9446_v36  ;;  %3918 = vperm.xlu1 %7663, %v9297_v53  }
 0xb0d   : > { %7712 = vset.pattern.permute.xlu0 %v11340_v8 }
 0xb0e   : > { %v9450_v58 = vpop.permute.xlu0 %3355  ;;  %4048 = vperm.xlu0 %7712, %v9205_v11  }
 0xb0f   : > { %7665 = vset.pattern.permute.xlu1 %v11199_v52  ;;  %v9454_v61 = vpop.permute.xlu1 %5677 }
 0xb10   : > { %11368 = vst [vmem:[#allocation80_spill] sm:$0xff] %v9454_v61  ;;  %4254 = vperm.xlu1 %7665, %v9297_v53  }
 0xb12   : > { %7713 = vset.pattern.permute.xlu0 %v11341_v29 }
 0xb13   : > { %v9458_v22 = vpop.permute.xlu0 %3262  ;;  %4384 = vperm.xlu0 %7713, %v9205_v11  }
 0xb14   : > { %11369 = vst [vmem:[#allocation81_spill] sm:$0xff] %v9458_v22  ;;  %7666 = vset.pattern.permute.xlu1 %v11364_v7  ;;  %v9462_v36 = vpop.permute.xlu1 %5351 }
 0xb15   : > { %11370 = vst [vmem:[#allocation82_spill] sm:$0xff] %v9462_v36  ;;  %3928 = vperm.xlu1 %7666, %v9304_v45   ;;  %v2784_v36 = vsub.f32 %v8966_v18, %v9016_v17 }
 0xb17   : > { %7717 = vset.pattern.permute.xlu0 %v11342_v41 }
 0xb18   : > { %v9466_v30 = vpop.permute.xlu0 %3642  ;;  %4284 = vperm.xlu0 %7717, %v9202_v57  }
 0xb19   : > { %11371 = vst [vmem:[#allocation83_spill] sm:$0xff] %v9466_v30  ;;  %7667 = vset.pattern.permute.xlu1 %v11366_v50  ;;  %v9470_v53 = vpop.permute.xlu1 %5687  ;;  %v2787_v30 = vmul.f32 1.442695, %v2784_v36 }
 0xb1a   : > { %11372 = vst [vmem:[#allocation84_spill] sm:$0xff] %v9470_v53  ;;  %3938 = vperm.xlu1 %7667, %v9304_v45   ;;  %v2816_v53 = vsub.f32 %v8966_v18, %v9014_v6  ;;  %v2878_v6 = vsub.f32 %v8966_v18, %v9018_v19 }
 0xb1b   : > { %7909 = vpow2.f32 %v2787_v30 }
 0xb1c   : > { %v9473_v52 = vpop.permute.xlu0 %3662  ;;  %7718 = vset.pattern.permute.xlu0 %v11366_v50 }
 0xb1d   : > { %11373 = vst [vmem:[#allocation85_spill] sm:$0xff] %v9473_v52  ;;  %3958 = vperm.xlu0 %7718, %v9202_v57   ;;  %v2819_v52 = vmul.f32 1.442695, %v2816_v53  ;;  %v2815_v53 = vsub.f32 %v8970_v37, %v9023_v39 }
 0xb1e   : > { %7669 = vset.pattern.permute.xlu1 %v11334_v20  ;;  %v9480_v61 = vpop.permute.xlu1 %5361 }
 0xb1f   : > { %11374 = vst [vmem:[#allocation86_spill] sm:$0xff] %v9480_v61  ;;  %5025 = vperm.xlu1 %7669, %v9192_v33   ;;  %v2847_v61 = vsub.f32 %v8966_v18, %v9020_v14  ;;  %7911 = vpow2.f32 %v2819_v52  ;;  %v2881_v14 = vmul.f32 1.442695, %v2878_v6  ;;  %v2817_v19 = vmul.f32 1.442695, %v2815_v53 }
 0xb21   : > { %v9485_v22 = vpop.permute.xlu0 %3562  ;;  %7719 = vset.pattern.permute.xlu0 %v11364_v7 }
 0xb22   : > { %11375 = vst [vmem:[#allocation87_spill] sm:$0xff] %v9485_v22  ;;  %3968 = vperm.xlu0 %7719, %v9205_v11  }
 0xb23   : > { %7670 = vset.pattern.permute.xlu1 %v11335_v60  ;;  %v9490_v17 = vpop.permute.xlu1 %5697 }
 0xb24   : > { %11376 = vst [vmem:[#allocation88_spill] sm:$0xff] %v9490_v17  ;;  %4729 = vperm.xlu1 %7670, %v9192_v33   ;;  %v2850_v17 = vmul.f32 1.442695, %v2847_v61 }
 0xb25   : > { %v9515_v61 = vpop.eup %7909 }
 0xb26   : > { %v9495_v10 = vpop.permute.xlu0 %3592  ;;  %7720 = vset.pattern.permute.xlu0 %v11342_v41  ;;  %7913 = vpow2.f32 %v2850_v17  ;;  %v2877_v17 = vsub.f32 %v8970_v37, %v9033_v62 }
 0xb27   : > { %11377 = vst [vmem:[#allocation89_spill] sm:$0xff] %v9495_v10  ;;  %4304 = vperm.xlu0 %7720, %v9205_v11   ;;  %7915 = vpow2.f32 %v2881_v14 }
 0xb28   : > { %7671 = vset.pattern.permute.xlu1 %v11336_v21  ;;  %v9500_v36 = vpop.permute.xlu1 %5251  ;;  %7917 = vpow2.f32 %v2817_v19 }
 0xb29   : > { %11378 = vst [vmem:[#allocation90_spill] sm:$0xff] %v9500_v36  ;;  %5035 = vperm.xlu1 %7671, %v9192_v33   ;;  %v9527_v6 = vpop.eup %7911  ;;  %v2879_v36 = vmul.f32 1.442695, %v2877_v17 }
 0xb2b   : > { %v9505_v30 = vpop.permute.xlu0 %4324  ;;  %7721 = vset.pattern.permute.xlu0 %v11366_v50  ;;  %7919 = vpow2.f32 %v2879_v36 }
 0xb2c   : > { %11379 = vst [vmem:[#allocation91_spill] sm:$0xff] %v9505_v30  ;;  %3978 = vperm.xlu0 %7721, %v9205_v11  }
 0xb2d   : > { %7673 = vset.pattern.permute.xlu1 %v11335_v60  ;;  %v9512_v52 = vpop.permute.xlu1 %5261 }
 0xb2e   : > { %11380 = vst [vmem:[#allocation92_spill] sm:$0xff] %v9512_v52  ;;  %4749 = vperm.xlu1 %7673, %v9194_v40  }
 0xb30   : > { %v9517_v18 = vpop.permute.xlu0 %4354  ;;  %2793 = vrot.lane.b32.xlu0 %v9515_v61, %s11382_s26  ;;  %v9533_v53 = vpop.eup %7913 }
 0xb31   : > { %11381 = vst [vmem:[#allocation93_spill] sm:$0xff] %v9517_v18  ;;  %7724 = vset.pattern.permute.xlu0 %v11334_v20 }
 0xb32   : > { %7675 = vset.pattern.permute.xlu1 %v11328_v48  ;;  %v9525_v39 = vpop.permute.xlu1 %5587 }
 0xb33   : > { %11383 = vst [vmem:[#allocation94_spill] sm:$0xff] %v9525_v39  ;;  %4637 = vperm.xlu1 %7675, %v9192_v33   ;;  %v9543_v39 = vpop.eup %7915 }
 0xb34   : > { %2825 = vrot.lane.b32.xlu0 %v9527_v6, %s8056_s21 }
 0xb35   : > { %v9531_v14 = vpop.permute.xlu0 %4244 }
 0xb36   : > { %11384 = vst [vmem:[#allocation95_spill] sm:$0xff] %v9531_v14 }
 0xb37   : > { %7678 = vset.pattern.permute.xlu1 %v11338_v15  ;;  %v9536_v62 = vpop.permute.xlu1 %5271 }
 0xb38   : > { %11385 = vst [vmem:[#allocation96_spill] sm:$0xff] %v9536_v62  ;;  %4955 = vperm.xlu1 %7678, %v9192_v33   ;;  %2856 = vrot.lane.b32.xlu0 %v9533_v53, %s11386_s15  ;;  %v9552_v62 = vpop.eup %7917 }
 0xb39   : > { %v9541_v52 = vpop.permute.xlu0 %4264  ;;  %v9561_v14 = vpop.eup %7919 }
 0xb3a   : > { %11387 = vst [vmem:[#allocation97_spill] sm:$0xff] %v9541_v52 }
 0xb3c   : > { %7679 = vset.pattern.permute.xlu1 %v11328_v48  ;;  %2887 = vrot.lane.b32.xlu0 %v9543_v39, %s8057_s2  ;;  %v9547_v19 = vpop.permute.xlu1 %3335 }
 0xb3d   : > { %4658 = vperm.xlu1 %7679, %v9194_v40  }
 0xb3e   : > { %v9550_v17 = vpop.permute.xlu0 %4719 }
 0xb3f   : > { %11388 = vst [vmem:[#allocation98_spill] sm:$0xff] %v9550_v17 }
 0xb40   : > { %2823 = vrot.lane.b32.xlu0 %v9552_v62, %s8056_s21 }
 0xb41   : > { %7680 = vset.pattern.permute.xlu1 %v11340_v8  ;;  %v9556_v36 = vpop.permute.xlu1 %3365 }
 0xb42   : > { %11389 = vst [vmem:[#allocation99_spill] sm:$0xff] %v9556_v36  ;;  %v9558_v52 = vpop.permute.xlu0 %4739  ;;  %5371 = vperm.xlu1 %7680, %v9192_v33  }
 0xb43   : > { %11390 = vst [vmem:[#allocation100_spill] sm:$0xff] %v9558_v52 }
 0xb44   : > { %2885 = vrot.lane.b32.xlu0 %v9561_v14, %s8057_s2 }
 0xb46   : > { %7681 = vset.pattern.permute.xlu1 %v11337_v23  ;;  %v9565_v18 = vpop.permute.xlu1 %3251 }
 0xb47   : > { %11391 = vst [vmem:[#allocation101_spill] sm:$0xff] %v9565_v18  ;;  %v9567_v17 = vpop.permute.xlu0 %5045  ;;  %4965 = vperm.xlu1 %7681, %v9194_v40  }
 0xb48   : > { %11392 = vst [vmem:[#allocation102_spill] sm:$0xff] %v9567_v17 }
 0xb4a   : > { %v9570_v30 = vpop.permute.xlu1 %3272 }
 0xb4b   : > { %11393 = vst [vmem:[#allocation103_spill] sm:$0xff] %v9570_v30  ;;  %7682 = vset.pattern.permute.xlu1 %v11341_v29 }
 0xb4c   : > { %v9573_v10 = vpop.permute.xlu0 %5055  ;;  %5707 = vperm.xlu1 %7682, %v9192_v33  }
 0xb4d   : > { %11394 = vst [vmem:[#allocation104_spill] sm:$0xff] %v9573_v10 }
 0xb4f   : > { %v9576_v52 = vpop.permute.xlu1 %3283 }
 0xb50   : > { %11395 = vst [vmem:[#allocation105_spill] sm:$0xff] %v9576_v52  ;;  %7683 = vset.pattern.permute.xlu1 %v11339_v49 }
 0xb51   : > { %v9579_v22 = vpop.permute.xlu0 %4945  ;;  %4669 = vperm.xlu1 %7683, %v9194_v40  }
 0xb52   : > { %11396 = vst [vmem:[#allocation106_spill] sm:$0xff] %v9579_v22 }
 0xb54   : > { %v9582_v18 = vpop.permute.xlu1 %3652 }
 0xb55   : > { %11397 = vst [vmem:[#allocation107_spill] sm:$0xff] %v9582_v18  ;;  %7684 = vset.pattern.permute.xlu1 %v11352_v43 }
 0xb56   : > { %v9585_v17 = vpop.permute.xlu0 %4648  ;;  %5381 = vperm.xlu1 %7684, %v9192_v33  }
 0xb57   : > { %11398 = vst [vmem:[#allocation108_spill] sm:$0xff] %v9585_v17 }
 0xb58   : > { %v9588_v30 = vpop.permute.xlu1 %3672 }
 0xb59   : > { %11399 = vst [vmem:[#allocation109_spill] sm:$0xff] %v9588_v30 }
 0xb5a   : > { %7685 = vset.pattern.permute.xlu1 %v11338_v15 }
 0xb5b   : > { %v9591_v10 = vpop.permute.xlu0 %5717  ;;  %4975 = vperm.xlu1 %7685, %v9194_v40  }
 0xb5c   : > { %11400 = vst [vmem:[#allocation110_spill] sm:$0xff] %v9591_v10 }
 0xb5d   : > { %v9594_v52 = vpop.permute.xlu1 %3572 }
 0xb5e   : > { %11401 = vst [vmem:[#allocation111_spill] sm:$0xff] %v9594_v52 }
 0xb5f   : > { %7689 = vset.pattern.permute.xlu1 %v11352_v43 }
 0xb60   : > { %v9597_v22 = vpop.permute.xlu0 %5391  ;;  %5401 = vperm.xlu1 %7689, %v9194_v40  }
 0xb61   : > { %11402 = vst [vmem:[#allocation112_spill] sm:$0xff] %v9597_v22 }
 0xb62   : > { %v9600_v18 = vpop.permute.xlu1 %3582 }
 0xb63   : > { %11403 = vst [vmem:[#allocation113_spill] sm:$0xff] %v9600_v18 }
 0xb64   : > { %7690 = vset.pattern.permute.xlu1 %v11355_v46 }
 0xb65   : > { %v9603_v17 = vpop.permute.xlu0 %5727  ;;  %5737 = vperm.xlu1 %7690, %v9194_v40  }
 0xb66   : > { %11404 = vst [vmem:[#allocation114_spill] sm:$0xff] %v9603_v17 }
 0xb67   : > { %v9606_v30 = vpop.permute.xlu1 %3988 }
 0xb68   : > { %11405 = vst [vmem:[#allocation115_spill] sm:$0xff] %v9606_v30 }
 0xb69   : > { %7691 = vset.pattern.permute.xlu1 %v11364_v7 }
 0xb6a   : > { %v9609_v10 = vpop.permute.xlu0 %5627  ;;  %5291 = vperm.xlu1 %7691, %v9192_v33  }
 0xb6b   : > { %11406 = vst [vmem:[#allocation116_spill] sm:$0xff] %v9609_v10 }
 0xb6c   : > { %v9612_v52 = vpop.permute.xlu1 %3998 }
 0xb6d   : > { %11407 = vst [vmem:[#allocation117_spill] sm:$0xff] %v9612_v52 }
 0xb6e   : > { %7693 = vset.pattern.permute.xlu1 %v11329_v2 }
 0xb6f   : > { %v9615_v22 = vpop.permute.xlu0 %3385  ;;  %3375 = vperm.xlu1 %7693, %v9202_v57  }
 0xb70   : > { %11408 = vst [vmem:[#allocation118_spill] sm:$0xff] %v9615_v22 }
 0xb71   : > { %v9618_v18 = vpop.permute.xlu1 %4334 }
 0xb72   : > { %11409 = vst [vmem:[#allocation119_spill] sm:$0xff] %v9618_v18 }
 0xb73   : > { %3395 = vperm.xlu1 %7693, %v9205_v11  }
 0xb74   : > { %v9621_v17 = vpop.permute.xlu0 %3304 }
 0xb75   : > { %11410 = vst [vmem:[#allocation120_spill] sm:$0xff] %v9621_v17 }
 0xb76   : > { %v9623_v30 = vpop.permute.xlu1 %4008 }
 0xb77   : > { %11411 = vst [vmem:[#allocation121_spill] sm:$0xff] %v9623_v30  ;;  %7695 = vset.pattern.permute.xlu1 %v11335_v60 }
 0xb78   : > { %3405 = vperm.xlu1 %7695, %v9205_v11  }
 0xb79   : > { %v9627_v10 = vpop.permute.xlu0 %3314 }
 0xb7a   : > { %11412 = vst [vmem:[#allocation122_spill] sm:$0xff] %v9627_v10 }
 0xb7b   : > { %v9629_v52 = vpop.permute.xlu1 %4344 }
 0xb7c   : > { %11413 = vst [vmem:[#allocation123_spill] sm:$0xff] %v9629_v52  ;;  %7696 = vset.pattern.permute.xlu1 %v11328_v48 }
 0xb7d   : > { %3293 = vperm.xlu1 %7696, %v9202_v57  }
 0xb7e   : > { %v9633_v4 = vpop.permute.xlu0 %3602 }
 0xb7f   : > { %11414 = vst [vmem:[#allocation124_spill] sm:$0xff] %v9633_v4 }
 0xb80   : > { %v9635_v18 = vpop.permute.xlu1 %4018 }
 0xb81   : > { %11415 = vst [vmem:[#allocation125_spill] sm:$0xff] %v9635_v18  ;;  %7699 = vset.pattern.permute.xlu1 %v11334_v20 }
 0xb82   : > { %3682 = vperm.xlu1 %7699, %v9202_v57  }
 0xb83   : > { %v9639_v30 = vpop.permute.xlu0 %4028 }
 0xb84   : > { %11416 = vst [vmem:[#allocation126_spill] sm:$0xff] %v9639_v30 }
 0xb85   : > { %v9641_v17 = vpop.permute.xlu1 %3908 }
 0xb86   : > { %11417 = vst [vmem:[#allocation127_spill] sm:$0xff] %v9641_v17  ;;  %7700 = vset.pattern.permute.xlu1 %v11339_v49 }
 0xb87   : > { %3325 = vperm.xlu1 %7700, %v9205_v11  }
 0xb88   : > { %v9645_v52 = vpop.permute.xlu0 %3632 }
 0xb89   : > { %11418 = vst [vmem:[#allocation128_spill] sm:$0xff] %v9645_v52 }
 0xb8a   : > { %v9647_v10 = vpop.permute.xlu1 %3918 }
 0xb8b   : > { %11419 = vst [vmem:[#allocation129_spill] sm:$0xff] %v9647_v10  ;;  %7701 = vset.pattern.permute.xlu1 %v11336_v21 }
 0xb8c   : > { %3692 = vperm.xlu1 %7701, %v9202_v57  }
 0xb8d   : > { %v9651_v18 = vpop.permute.xlu0 %4048 }
 0xb8e   : > { %11420 = vst [vmem:[#allocation130_spill] sm:$0xff] %v9651_v18 }
 0xb8f   : > { %v9653_v4 = vpop.permute.xlu1 %4254 }
 0xb90   : > { %11421 = vst [vmem:[#allocation131_spill] sm:$0xff] %v9653_v4  ;;  %7702 = vset.pattern.permute.xlu1 %v11334_v20 }
 0xb91   : > { %3702 = vperm.xlu1 %7702, %v9205_v11  }
 0xb92   : > { %v9657_v17 = vpop.permute.xlu0 %4384 }
 0xb93   : > { %11422 = vst [vmem:[#allocation132_spill] sm:$0xff] %v9657_v17 }
 0xb94   : > { %v9659_v30 = vpop.permute.xlu1 %3928 }
 0xb95   : > { %11423 = vst [vmem:[#allocation133_spill] sm:$0xff] %v9659_v30  ;;  %7703 = vset.pattern.permute.xlu1 %v11336_v21 }
 0xb96   : > { %3712 = vperm.xlu1 %7703, %v9205_v11  }
 0xb97   : > { %v9663_v10 = vpop.permute.xlu0 %4284 }
 0xb98   : > { %11424 = vst [vmem:[#allocation134_spill] sm:$0xff] %v9663_v10 }
 0xb99   : > { %v9665_v52 = vpop.permute.xlu1 %3938 }
 0xb9a   : > { %11425 = vst [vmem:[#allocation135_spill] sm:$0xff] %v9665_v52  ;;  %7705 = vset.pattern.permute.xlu1 %v11338_v15 }
 0xb9b   : > { %3612 = vperm.xlu1 %7705, %v9202_v57  }
 0xb9c   : > { %v9669_v4 = vpop.permute.xlu0 %3958 }
 0xb9d   : > { %11426 = vst [vmem:[#allocation136_spill] sm:$0xff] %v9669_v4 }
 0xb9e   : > { %v9671_v18 = vpop.permute.xlu1 %5025 }
 0xb9f   : > { %11427 = vst [vmem:[#allocation137_spill] sm:$0xff] %v9671_v18  ;;  %7707 = vset.pattern.permute.xlu1 %v11337_v23 }
 0xba0   : > { %3622 = vperm.xlu1 %7707, %v9205_v11  }
 0xba1   : > { %v9675_v30 = vpop.permute.xlu0 %3968 }
 0xba2   : > { %11428 = vst [vmem:[#allocation138_spill] sm:$0xff] %v9675_v30 }
 0xba3   : > { %v9677_v17 = vpop.permute.xlu1 %4729 }
 0xba4   : > { %11429 = vst [vmem:[#allocation139_spill] sm:$0xff] %v9677_v17  ;;  %7708 = vset.pattern.permute.xlu1 %v11341_v29  ;;  %v2783_v17 = vsub.f32 %v8970_v37, %v9025_v56 }
 0xba5   : > { %4364 = vperm.xlu1 %7708, %v9202_v57  }
 0xba6   : > { %v9681_v52 = vpop.permute.xlu0 %4304 }
 0xba7   : > { %11430 = vst [vmem:[#allocation140_spill] sm:$0xff] %v9681_v52  ;;  %v2785_v52 = vmul.f32 1.442695, %v2783_v17 }
 0xba8   : > { %v9683_v10 = vpop.permute.xlu1 %5035 }
 0xba9   : > { %11431 = vst [vmem:[#allocation141_spill] sm:$0xff] %v9683_v10  ;;  %7709 = vset.pattern.permute.xlu1 %v11352_v43  ;;  %v2846_v10 = vsub.f32 %v8970_v37, %v9035_v5  ;;  %7921 = vpow2.f32 %v2785_v52 }
 0xbaa   : > { %4038 = vperm.xlu1 %7709, %v9202_v57  }
 0xbab   : > { %v9687_v18 = vpop.permute.xlu0 %3978 }
 0xbac   : > { %11432 = vst [vmem:[#allocation142_spill] sm:$0xff] %v9687_v18  ;;  %v2848_v18 = vmul.f32 1.442695, %v2846_v10 }
 0xbad   : > { %v9689_v4 = vpop.permute.xlu1 %4749 }
 0xbae   : > { %11433 = vst [vmem:[#allocation143_spill] sm:$0xff] %v9689_v4  ;;  %7711 = vset.pattern.permute.xlu1 %v11355_v46  ;;  %7923 = vpow2.f32 %v2848_v18 }
 0xbaf   : > { %v2794_v30 = vpop.permute.xlu0 %2793  ;;  %4374 = vperm.xlu1 %7711, %v9202_v57  }
 0xbb2   : > { %v9695_v55 = vpop.permute.xlu1 %4637 }
 0xbb3   : > { %11434 = vst [vmem:[#allocation144_spill] sm:$0xff] %v9695_v55  ;;  %v2826_v59 = vpop.permute.xlu0 %2825  ;;  %7714 = vset.pattern.permute.xlu1 %v11352_v43  ;;  %v9712_v10 = vpop.eup %7921 }
 0xbb4   : > { %4058 = vperm.xlu1 %7714, %v9205_v11   ;;  %v2832_v4 = vsel %vm11435_vm15, %v2826_v59, 0.0  ;;  %vm11470_vm15 = vmmov %vm11439_vm1 }
 0xbb5   : > { %2833 = vadd.xlane.f32.xlu0 %v2832_v4 }
 0xbb7   : > { %v2857_v56 = vpop.permute.xlu0 %2856  ;;  %v9702_v1 = vpop.permute.xlu1 %4955 }
 0xbb8   : > { %11436 = vst [vmem:[#allocation145_spill] sm:$0xff] %v9702_v1  ;;  %7715 = vset.pattern.permute.xlu1 %v11355_v46  ;;  %v2863_v17 = vsel %vm11437_vm6, %v2857_v56, 0.0  ;;  %vm11471_vm6 = vcmask 64512  }
 0xbb9   : > { %2864 = vadd.xlane.f32.xlu0 %v2863_v17  ;;  %4394 = vperm.xlu1 %7715, %v9205_v11   ;;  %v9720_v17 = vpop.eup %7923 }
 0xbbb   : > { %v2888_v37 = vpop.permute.xlu0 %2887 }
 0xbbc   : > { %v9707_v5 = vpop.permute.xlu1 %4658  ;;  %v2894_v36 = vsel %vm11451_vm12, %v2888_v37, 0.0 }
 0xbbd   : > { %11438 = vst [vmem:[#allocation146_spill] sm:$0xff] %v9707_v5  ;;  %7716 = vset.pattern.permute.xlu1 %v11364_v7 }
 0xbbe   : > { %3948 = vperm.xlu1 %7716, %v9202_v57  }
 0xbbf   : > { %v2824_v59 = vpop.permute.xlu0 %2823 }
 0xbc0   : > { %v2829_v4 = vsel %vm11439_vm1, %v2824_v59, 0.0  ;;  %vm11472_vm1 = vcmask 97280  }
 0xbc1   : > { %2830 = vadd.xlane.f32.xlu0 %v2829_v4  ;;  %v9714_v52 = vpop.permute.xlu1 %5371 }
 0xbc2   : > { %11440 = vst [vmem:[#allocation147_spill] sm:$0xff] %v9714_v52  ;;  %2791 = vrot.lane.b32.xlu1 %v9712_v10, %s11382_s26 }
 0xbc3   : > { %v2886_v56 = vpop.permute.xlu0 %2885  ;;  %7722 = vset.pattern.permute.xlu1 %v11329_v2 }
 0xbc4   : > { %v2891_v18 = vsel %vm11441_vm7, %v2886_v56, 0.0 }
 0xbc5   : > { %2892 = vadd.xlane.f32.xlu0 %v2891_v18  ;;  %v2801_v18 = vsel %vm11450_vm13, %v2794_v30, 0.0 }
 0xbc6   : > { %2854 = vrot.lane.b32.xlu1 %v9720_v17, %s11386_s15  ;;  %v9724_v59 = vpop.permute.xlu1 %4965 }
 0xbc7   : > { %11442 = vst [vmem:[#allocation148_spill] sm:$0xff] %v9724_v59 }
 0xbcb   : > { %v9726_v5 = vpop.permute.xlu1 %5707 }
 0xbcc   : > { %11443 = vst [vmem:[#allocation149_spill] sm:$0xff] %v9726_v5 }
 0xbd0   : > { %v9728_v4 = vpop.permute.xlu1 %4669 }
 0xbd1   : > { %11444 = vst [vmem:[#allocation150_spill] sm:$0xff] %v9728_v4 }
 0xbd5   : > { %v9730_v52 = vpop.permute.xlu1 %5381 }
 0xbd6   : > { %11445 = vst [vmem:[#allocation151_spill] sm:$0xff] %v9730_v52 }
 0xbda   : > { %v9732_v1 = vpop.permute.xlu1 %4975 }
 0xbdb   : > { %11446 = vst [vmem:[#allocation152_spill] sm:$0xff] %v9732_v1 }
 0xbdf   : > { %v9734_v55 = vpop.permute.xlu1 %5401 }
 0xbe0   : > { %11447 = vst [vmem:[#allocation153_spill] sm:$0xff] %v9734_v55 }
 0xbe4   : > { %v9736_v22 = vpop.permute.xlu1 %5737 }
 0xbe5   : > { %11448 = vst [vmem:[#allocation154_spill] sm:$0xff] %v9736_v22 }
 0xbe9   : > { %v9738_v56 = vpop.permute.xlu1 %5291 }
 0xbea   : > { %11449 = vst [vmem:[#allocation155_spill] sm:$0xff] %v9738_v56  ;;  %2802 = vadd.xlane.f32.xlu1 %v2801_v18 }
 0xbee   : > { %2895 = vadd.xlane.f32.xlu1 %v2894_v36  ;;  %v9742_v59 = vpop.permute.xlu1 %3375 }
 0xbf2   : > { %v9744_v5 = vpop.permute.xlu1 %3395 }
 0xbf3   : > { %11452 = vst [vmem:[#allocation156_spill] sm:$0xff] %v9744_v5 }
 0xbf7   : > { %v9746_v4 = vpop.permute.xlu1 %3405 }
 0xbf8   : > { %11453 = vst [vmem:[#allocation157_spill] sm:$0xff] %v9746_v4 }
 0xbfc   : > { %v9748_v52 = vpop.permute.xlu1 %3293 }
 0xbfd   : > { %11454 = vst [vmem:[#allocation158_spill] sm:$0xff] %v9748_v52 }
 0xc01   : > { %v9750_v1 = vpop.permute.xlu1 %3682 }
 0xc02   : > { %11455 = vst [vmem:[#allocation159_spill] sm:$0xff] %v9750_v1 }
 0xc06   : > { %v9752_v55 = vpop.permute.xlu1 %3325 }
 0xc07   : > { %11456 = vst [vmem:[#allocation160_spill] sm:$0xff] %v9752_v55 }
 0xc0b   : > { %v9754_v22 = vpop.permute.xlu1 %3692 }
 0xc0c   : > { %11457 = vst [vmem:[#allocation161_spill] sm:$0xff] %v9754_v22 }
 0xc10   : > { %v9756_v56 = vpop.permute.xlu1 %3702 }
 0xc11   : > { %11458 = vst [vmem:[#allocation162_spill] sm:$0xff] %v9756_v56 }
 0xc15   : > { %v9758_v30 = vpop.permute.xlu1 %3712 }
 0xc16   : > { %11459 = vst [vmem:[#allocation163_spill] sm:$0xff] %v9758_v30 }
 0xc1a   : > { %v9760_v37 = vpop.permute.xlu1 %3612 }
 0xc1b   : > { %11460 = vst [vmem:[#allocation164_spill] sm:$0xff] %v9760_v37 }
 0xc1f   : > { %v9762_v36 = vpop.permute.xlu1 %3622 }
 0xc20   : > { %11461 = vst [vmem:[#allocation165_spill] sm:$0xff] %v9762_v36 }
 0xc24   : > { %v9764_v18 = vpop.permute.xlu1 %4364 }
 0xc25   : > { %11462 = vst [vmem:[#allocation166_spill] sm:$0xff] %v9764_v18 }
 0xc29   : > { %v9766_v5 = vpop.permute.xlu1 %4038 }
 0xc2a   : > { %11463 = vst [vmem:[#allocation167_spill] sm:$0xff] %v9766_v5 }
 0xc2e   : > { %v9768_v4 = vpop.permute.xlu1 %4374 }
 0xc2f   : > { %11464 = vst [vmem:[#allocation168_spill] sm:$0xff] %v9768_v4 }
 0xc33   : > { %v9770_v52 = vpop.permute.xlu1 %4058 }
 0xc34   : > { %11465 = vst [vmem:[#allocation169_spill] sm:$0xff] %v9770_v52 }
 0xc38   : > { %v9772_v1 = vpop.permute.xlu1 %4394 }
 0xc39   : > { %11466 = vst [vmem:[#allocation170_spill] sm:$0xff] %v9772_v1 }
 0xc3d   : > { %v9774_v55 = vpop.permute.xlu1 %3948 }
 0xc3e   : > { %11467 = vst [vmem:[#allocation171_spill] sm:$0xff] %v9774_v55 }
 0xc41   : > { %v2792_v22 = vpop.permute.xlu1 %2791 }
 0xc42   : > { %v2834_v56 = vpop.xlane.xlu0 %2833  ;;  %v2798_v30 = vsel %vm11468_vm8, %v2792_v22, 0.0  ;;  %vm11514_vm8 = vcmask 130048  }
 0xc43   : > { %7925 = vrcp.f32 %v2834_v56  ;;  %2799 = vadd.xlane.f32.xlu1 %v2798_v30 }
 0xc45   : > { %v2855_v37 = vpop.permute.xlu1 %2854 }
 0xc46   : > { %v2860_v36 = vsel %vm11469_vm11, %v2855_v37, 0.0  ;;  %v2865_v52 = vpop.xlane.xlu0 %2864  ;;  %vm11519_vm11 = vmmov 0  }
 0xc47   : > { %2861 = vadd.xlane.f32.xlu1 %v2860_v36 }
 0xc4d   : > { %v7926_v18 = vpop.eup %7925 }
 0xc4e   : > { %v2838_v5 = vmul.f32 %v7926_v18, %v9527_v6  ;;  %v2831_v1 = vpop.xlane.xlu0 %2830 }
 0xc50   : > { %2913 = vrot.lane.b32.xlu0 %v2838_v5, %s11382_s26 }
 0xc52   : > { %v2893_v22 = vpop.xlane.xlu0 %2892 }
 0xc77   : > { %v2803_v4 = vpop.xlane.xlu1 %2802 }
 0xc78   : > { %7927 = vrcp.f32 %v2803_v4 }
 0xc79   : > { %7929 = vrcp.f32 %v2865_v52 }
 0xc7b   : > { %v2896_v55 = vpop.xlane.xlu1 %2895 }
 0xc7c   : > { %7931 = vrcp.f32 %v2896_v55 }
 0xc7d   : > { %7933 = vrcp.f32 %v2831_v1 }
 0xc7e   : > { %7935 = vrcp.f32 %v2893_v22 }
 0xc82   : > { %v7928_v56 = vpop.eup %7927 }
 0xc83   : > { %v2807_v30 = vmul.f32 %v7928_v56, %v9515_v61  ;;  %v7930_v37 = vpop.eup %7929 }
 0xc84   : > { %v2869_v6 = vmul.f32 %v7930_v37, %v9533_v53 }
 0xc85   : > { %2905 = vrot.lane.b32.xlu1 %v2807_v30, %s11382_s26 }
 0xc86   : > { %v7932_v36 = vpop.eup %7931 }
 0xc87   : > { %v2900_v5 = vmul.f32 %v7932_v36, %v9543_v39  ;;  %v7934_v18 = vpop.eup %7933 }
 0xc88   : > { %v2836_v1 = vmul.f32 %v7934_v18, %v9552_v62  ;;  %v7936_v55 = vpop.eup %7935 }
 0xc89   : > { %2921 = vrot.lane.b32.xlu1 %v2869_v6, %s11382_s26  ;;  %2929 = vrot.lane.b32.xlu0 %v2900_v5, %s11382_s26  ;;  %v2898_v61 = vmul.f32 %v7936_v55, %v9561_v14  ;;  %v6533_v55 = vsel %vm9176_vm3, 1.0, %v11299_v32  ;;  %vm11473_vm3 = vmmov %vm11441_vm7 }
 0xc8d   : > { %2911 = vrot.lane.b32.xlu0 %v2836_v1, %s11382_s26 }
 0xc91   : > { %2927 = vrot.lane.b32.xlu0 %v2898_v61, %s11382_s26  ;;  %v6535_v61 = vsel %vm9188_vm5, 1.0, %v11299_v32  ;;  %vm11474_vm5 = vmmov %vm11471_vm6 }
 0xcc2   : > { %v2914_v62 = vpop.permute.xlu0 %2913 }
 0xcd0   : > { %v2800_v52 = vpop.xlane.xlu1 %2799 }
 0xcd1   : > { %7937 = vrcp.f32 %v2800_v52  ;;  %v6537_v52 = vsel %vm9207_vm0, 1.0, %v11299_v32  ;;  %vm11475_vm0 = vmmov %vm11472_vm1 }
 0xcd4   : > { %v2862_v4 = vpop.xlane.xlu1 %2861 }
 0xcd5   : > { %7939 = vrcp.f32 %v2862_v4 }
 0xcdb   : > { %v7938_v53 = vpop.eup %7937 }
 0xcdc   : > { %v2805_v39 = vmul.f32 %v7938_v53, %v9712_v10 }
 0xcde   : > { %2903 = vrot.lane.b32.xlu1 %v2805_v39, %s11382_s26 }
 0xcdf   : > { %v7940_v22 = vpop.eup %7939 }
 0xce0   : > { %v2867_v56 = vmul.f32 %v7940_v22, %v9720_v17 }
 0xce2   : > { %2919 = vrot.lane.b32.xlu1 %v2867_v56, %s11382_s26  ;;  %s7960_s26 = scalar_lea.vmem %s7959_s22, 512 }
 0xcf7   : > { %v2906_v30 = vpop.permute.xlu1 %2905 }
 0xcf8   : > { %v2934_v14 = vsel %vm11470_vm15, %v2906_v30, %v2914_v62 }
 0xcfb   : > { %v2930_v37 = vpop.permute.xlu0 %2929  ;;  %v2922_v36 = vpop.permute.xlu1 %2921 }
 0xcfc   : > { %v2936_v6 = vsel %vm11471_vm6, %v2934_v14, %v2922_v36  ;;  %v6534_v36 = vsel %vm9242_vm10, 1.0, %v11299_v32 }
 0xcfd   : > { %v2939_v5 = vsel %vm11472_vm1, %v2936_v6, %v2930_v37  ;;  %v6532_v37 = vsel %vm9233_vm2, 1.0, %v11299_v32 }
 0xcfe   : > { %v3165_v18 = vmul.f32 %v9104_v34, %v2939_v5  ;;  %v3195_v10 = vmul.f32 %v9150_v51, %v2939_v5  ;;  %v3225_v1 = vmul.f32 %v9078_v16, %v2939_v5  ;;  %v3241_v17 = vmul.f32 %v9081_v0, %v2939_v5 }
 0xcff   : > { %v6539_v34 = vsel %vm9223_vm14, 1.0, %v11299_v32  ;;  %v2912_v54 = vpop.permute.xlu0 %2911 }
 0xd00   : > { %v9813_v51 = vmul.f32 %v6533_v55, %v3165_v18  ;;  %v9815_v16 = vmul.f32 %v6535_v61, %v3195_v10  ;;  %v9817_v0 = vmul.f32 %v6537_v52, %v3225_v1  ;;  %v9819_v31 = vmul.f32 %v6539_v34, %v3241_v17 }
 0xd01   : > { %v11476_v61 = vmov 13  }
 0xd02   : > { %4989 = vperm.xlu0 %7724, %v9813_v51   ;;  %4683 = vperm.xlu1 %7722, %v9813_v51  }
 0xd03   : > { %v2928_v53 = vpop.permute.xlu0 %2927 }
 0xd06   : > { %5009 = vperm.xlu0 %7724, %v9815_v16   ;;  %7723 = vset.pattern.permute.xlu1 %v11335_v60 }
 0xd07   : > { %4693 = vperm.xlu1 %7723, %v9813_v51  }
 0xd0a   : > { %5029 = vperm.xlu0 %7724, %v9817_v0  }
 0xd0b   : > { %7725 = vset.pattern.permute.xlu1 %v11336_v21 }
 0xd0c   : > { %4999 = vperm.xlu1 %7725, %v9813_v51  }
 0xd0e   : > { %7737 = vset.pattern.permute.xlu0 %v11339_v49 }
 0xd0f   : > { %4610 = vperm.xlu0 %7737, %v9813_v51  }
 0xd10   : > { %7726 = vset.pattern.permute.xlu1 %v11329_v2 }
 0xd11   : > { %4703 = vperm.xlu1 %7726, %v9815_v16  }
 0xd13   : > { %7745 = vset.pattern.permute.xlu0 %v11338_v15 }
 0xd14   : > { %4939 = vperm.xlu0 %7745, %v9815_v16  }
 0xd15   : > { %7727 = vset.pattern.permute.xlu1 %v11335_v60 }
 0xd16   : > { %4713 = vperm.xlu1 %7727, %v9815_v16  }
 0xd18   : > { %7746 = vset.pattern.permute.xlu0 %v11341_v29 }
 0xd19   : > { %5671 = vperm.xlu0 %7746, %v9813_v51  }
 0xd1a   : > { %7728 = vset.pattern.permute.xlu1 %v11336_v21 }
 0xd1b   : > { %5019 = vperm.xlu1 %7728, %v9815_v16  }
 0xd1d   : > { %5691 = vperm.xlu0 %7746, %v9815_v16  }
 0xd1f   : > { %7729 = vset.pattern.permute.xlu1 %v11329_v2 }
 0xd20   : > { %4723 = vperm.xlu1 %7729, %v9817_v0  }
 0xd21   : > { %7752 = vset.pattern.permute.xlu0 %v11352_v43 }
 0xd22   : > { %5365 = vperm.xlu0 %7752, %v9815_v16  }
 0xd24   : > { %7730 = vset.pattern.permute.xlu1 %v11335_v60 }
 0xd25   : > { %4733 = vperm.xlu1 %7730, %v9817_v0  }
 0xd26   : > { %7753 = vset.pattern.permute.xlu0 %v11338_v15 }
 0xd27   : > { %4959 = vperm.xlu0 %7753, %v9817_v0  }
 0xd29   : > { %7731 = vset.pattern.permute.xlu1 %v11336_v21 }
 0xd2a   : > { %5039 = vperm.xlu1 %7731, %v9817_v0  }
 0xd2b   : > { %7754 = vset.pattern.permute.xlu0 %v11355_v46 }
 0xd2c   : > { %5701 = vperm.xlu0 %7754, %v9815_v16  }
 0xd2e   : > { %7732 = vset.pattern.permute.xlu1 %v11329_v2 }
 0xd2f   : > { %4743 = vperm.xlu1 %7732, %v9819_v31  }
 0xd30   : > { %7756 = vset.pattern.permute.xlu0 %v11340_v8 }
 0xd31   : > { %5375 = vperm.xlu0 %7756, %v9817_v0  }
 0xd33   : > { %7733 = vset.pattern.permute.xlu1 %v11334_v20 }
 0xd34   : > { %5049 = vperm.xlu1 %7733, %v9819_v31  }
 0xd35   : > { %7757 = vset.pattern.permute.xlu0 %v11337_v23 }
 0xd36   : > { %4969 = vperm.xlu0 %7757, %v9819_v31  }
 0xd38   : > { %7734 = vset.pattern.permute.xlu1 %v11335_v60 }
 0xd39   : > { %4753 = vperm.xlu1 %7734, %v9819_v31  }
 0xd3a   : > { %7759 = vset.pattern.permute.xlu0 %v11339_v49 }
 0xd3b   : > { %4673 = vperm.xlu0 %7759, %v9819_v31  }
 0xd3d   : > { %7735 = vset.pattern.permute.xlu1 %v11336_v21 }
 0xd3e   : > { %5059 = vperm.xlu1 %7735, %v9819_v31  }
 0xd3f   : > { %7765 = vset.pattern.permute.xlu0 %v11352_v43 }
 0xd40   : > { %5405 = vperm.xlu0 %7765, %v9819_v31  }
 0xd42   : > { %7736 = vset.pattern.permute.xlu1 %v11328_v48 }
 0xd43   : > { %4600 = vperm.xlu1 %7736, %v9813_v51  }
 0xd44   : > { %7766 = vset.pattern.permute.xlu0 %v11355_v46 }
 0xd45   : > { %5741 = vperm.xlu0 %7766, %v9819_v31  }
 0xd47   : > { %7738 = vset.pattern.permute.xlu1 %v11337_v23 }
 0xd48   : > { %4909 = vperm.xlu1 %7738, %v9813_v51  }
 0xd49   : > { %7767 = vset.pattern.permute.xlu0 %v11364_v7 }
 0xd4a   : > { %5255 = vperm.xlu0 %7767, %v9813_v51  }
 0xd4c   : > { %7739 = vset.pattern.permute.xlu1 %v11338_v15 }
 0xd4d   : > { %4919 = vperm.xlu1 %7739, %v9813_v51  }
 0xd4e   : > { %7769 = vset.pattern.permute.xlu0 %v11342_v41 }
 0xd4f   : > { %5591 = vperm.xlu0 %7769, %v9813_v51  }
 0xd50   : > { %v2904_v35 = vpop.permute.xlu1 %2903 }
 0xd51   : > { %7740 = vset.pattern.permute.xlu1 %v11328_v48  ;;  %v2933_v12 = vsel %vm11473_vm3, %v2904_v35, %v2912_v54 }
 0xd52   : > { %4621 = vperm.xlu1 %7740, %v9815_v16  }
 0xd53   : > { %7778 = vset.pattern.permute.xlu0 %v11335_v60 }
 0xd54   : > { %v2920_v4 = vpop.permute.xlu1 %2919 }
 0xd55   : > { %v2935_v39 = vsel %vm11474_vm5, %v2933_v12, %v2920_v4 }
 0xd56   : > { %v2938_v22 = vsel %vm11475_vm0, %v2935_v39, %v2928_v53  ;;  %7741 = vset.pattern.permute.xlu1 %v11337_v23 }
 0xd57   : > { %v3164_v56 = vmul.f32 %v9213_v9, %v2938_v22  ;;  %v3194_v62 = vmul.f32 %v9221_v38, %v2938_v22  ;;  %v3224_v30 = vmul.f32 %v9086_v63, %v2938_v22  ;;  %v3240_v14 = vmul.f32 %v9090_v42, %v2938_v22  ;;  %4929 = vperm.xlu1 %7741, %v9815_v16  }
 0xd58   : > { %v6536_v9 = vsel %vm9252_vm9, 1.0, %v11299_v32  ;;  %v6538_v63 = vsel %vm9260_vm4, 1.0, %v11299_v32 }
 0xd59   : > { %v9906_v38 = vmul.f32 %v6532_v37, %v3164_v56  ;;  %v9908_v42 = vmul.f32 %v6534_v36, %v3194_v62  ;;  %v9910_v6 = vmul.f32 %v6536_v9, %v3224_v30  ;;  %v9912_v44 = vmul.f32 %v6538_v63, %v3240_v14 }
 0xd5b   : > { %7742 = vset.pattern.permute.xlu1 %v11339_v49  ;;  %3369 = vperm.xlu0 %7778, %v9908_v42  }
 0xd5c   : > { %4631 = vperm.xlu1 %7742, %v9815_v16  }
 0xd5f   : > { %7780 = vset.pattern.permute.xlu0 %v11329_v2 }
 0xd60   : > { %7743 = vset.pattern.permute.xlu1 %v11340_v8  ;;  %3399 = vperm.xlu0 %7780, %v9912_v44  }
 0xd61   : > { %5335 = vperm.xlu1 %7743, %v9813_v51  }
 0xd64   : > { %7783 = vset.pattern.permute.xlu0 %v11328_v48 }
 0xd65   : > { %7744 = vset.pattern.permute.xlu1 %v11352_v43  ;;  %3277 = vperm.xlu0 %7783, %v9908_v42  }
 0xd66   : > { %5345 = vperm.xlu1 %7744, %v9813_v51  }
 0xd69   : > { %7784 = vset.pattern.permute.xlu0 %v11334_v20 }
 0xd6a   : > { %7747 = vset.pattern.permute.xlu1 %v11355_v46  ;;  %3646 = vperm.xlu0 %7784, %v9906_v38  }
 0xd6b   : > { %5681 = vperm.xlu1 %7747, %v9813_v51  }
 0xd6e   : > { %7789 = vset.pattern.permute.xlu0 %v11336_v21 }
 0xd6f   : > { %7748 = vset.pattern.permute.xlu1 %v11328_v48  ;;  %3676 = vperm.xlu0 %7789, %v9908_v42  }
 0xd70   : > { %4642 = vperm.xlu1 %7748, %v9817_v0  }
 0xd73   : > { %7791 = vset.pattern.permute.xlu0 %v11334_v20 }
 0xd74   : > { %7749 = vset.pattern.permute.xlu1 %v11340_v8  ;;  %3686 = vperm.xlu0 %7791, %v9910_v6  }
 0xd75   : > { %5355 = vperm.xlu1 %7749, %v9815_v16  }
 0xd78   : > { %7792 = vset.pattern.permute.xlu0 %v11339_v49 }
 0xd79   : > { %7750 = vset.pattern.permute.xlu1 %v11337_v23  ;;  %3329 = vperm.xlu0 %7792, %v9912_v44  }
 0xd7a   : > { %4949 = vperm.xlu1 %7750, %v9817_v0  }
 0xd7d   : > { %7794 = vset.pattern.permute.xlu0 %v11334_v20 }
 0xd7e   : > { %7751 = vset.pattern.permute.xlu1 %v11339_v49  ;;  %3706 = vperm.xlu0 %7794, %v9912_v44  }
 0xd7f   : > { %4652 = vperm.xlu1 %7751, %v9817_v0  }
 0xd81   : > { %v9945_v25 = vpop.permute.xlu1 %4683 }
 0xd82   : > { %7796 = vset.pattern.permute.xlu0 %v11338_v15 }
 0xd83   : > { %7755 = vset.pattern.permute.xlu1 %v11328_v48  ;;  %3576 = vperm.xlu0 %7796, %v9906_v38  }
 0xd84   : > { %4663 = vperm.xlu1 %7755, %v9819_v31  }
 0xd86   : > { %v9951_v3 = vpop.permute.xlu1 %4693 }
 0xd87   : > { %7797 = vset.pattern.permute.xlu0 %v11337_v23 }
 0xd88   : > { %7758 = vset.pattern.permute.xlu1 %v11341_v29  ;;  %3586 = vperm.xlu0 %7797, %v9908_v42  }
 0xd89   : > { %5711 = vperm.xlu1 %7758, %v9817_v0  }
 0xd8b   : > { %v9957_v47 = vpop.permute.xlu1 %4999 }
 0xd8c   : > { %7801 = vset.pattern.permute.xlu0 %v11341_v29 }
 0xd8d   : > { %7760 = vset.pattern.permute.xlu1 %v11352_v43  ;;  %4328 = vperm.xlu0 %7801, %v9906_v38  }
 0xd8e   : > { %5385 = vperm.xlu1 %7760, %v9817_v0  }
 0xd90   : > { %v9963_v5 = vpop.permute.xlu1 %4703 }
 0xd91   : > { %7804 = vset.pattern.permute.xlu0 %v11337_v23 }
 0xd92   : > { %7761 = vset.pattern.permute.xlu1 %v11338_v15  ;;  %3606 = vperm.xlu0 %7804, %v9910_v6  }
 0xd93   : > { %4979 = vperm.xlu1 %7761, %v9819_v31  }
 0xd95   : > { %v9969_v18 = vpop.permute.xlu1 %4713 }
 0xd96   : > { %7805 = vset.pattern.permute.xlu0 %v11341_v29 }
 0xd97   : > { %7762 = vset.pattern.permute.xlu1 %v11355_v46  ;;  %4348 = vperm.xlu0 %7805, %v9908_v42  }
 0xd98   : > { %5721 = vperm.xlu1 %7762, %v9817_v0  }
 0xd9a   : > { %v9975_v10 = vpop.permute.xlu1 %5019 }
 0xd9b   : > { %7809 = vset.pattern.permute.xlu0 %v11340_v8 }
 0xd9c   : > { %7763 = vset.pattern.permute.xlu1 %v11340_v8  ;;  %4032 = vperm.xlu0 %7809, %v9910_v6  }
 0xd9d   : > { %5395 = vperm.xlu1 %7763, %v9819_v31  }
 0xd9f   : > { %v9981_v1 = vpop.permute.xlu1 %4723 }
 0xda0   : > { %7810 = vset.pattern.permute.xlu0 %v11337_v23 }
 0xda1   : > { %7764 = vset.pattern.permute.xlu1 %v11341_v29  ;;  %3626 = vperm.xlu0 %7810, %v9912_v44  }
 0xda2   : > { %5731 = vperm.xlu1 %7764, %v9819_v31  }
 0xda4   : > { %v9987_v17 = vpop.permute.xlu1 %4733 }
 0xda5   : > { %7813 = vset.pattern.permute.xlu0 %v11338_v15 }
 0xda6   : > { %7768 = vset.pattern.permute.xlu1 %v11366_v50  ;;  %3636 = vperm.xlu0 %7813, %v9912_v44  }
 0xda7   : > { %5265 = vperm.xlu1 %7768, %v9813_v51  }
 0xda9   : > { %v9993_v55 = vpop.permute.xlu1 %5039 }
 0xdaa   : > { %7817 = vset.pattern.permute.xlu0 %v11352_v43 }
 0xdab   : > { %7770 = vset.pattern.permute.xlu1 %v11476_v61  ;;  %4062 = vperm.xlu0 %7817, %v9912_v44  }
 0xdac   : > { %5601 = vperm.xlu1 %7770, %v9813_v51  }
 0xdae   : > { %v9999_v52 = vpop.permute.xlu1 %4743 }
 0xdaf   : > { %7818 = vset.pattern.permute.xlu0 %v11355_v46 }
 0xdb0   : > { %7771 = vset.pattern.permute.xlu1 %v11364_v7  ;;  %4398 = vperm.xlu0 %7818, %v9912_v44  }
 0xdb1   : > { %5275 = vperm.xlu1 %7771, %v9815_v16  }
 0xdb3   : > { %v10005_v34 = vpop.permute.xlu1 %5049 }
 0xdb4   : > { %7819 = vset.pattern.permute.xlu0 %v11364_v7 }
 0xdb5   : > { %7772 = vset.pattern.permute.xlu1 %v11342_v41  ;;  %3912 = vperm.xlu0 %7819, %v9906_v38  }
 0xdb6   : > { %5611 = vperm.xlu1 %7772, %v9815_v16  }
 0xdb8   : > { %v10011_v51 = vpop.permute.xlu1 %4753 }
 0xdb9   : > { %7821 = vset.pattern.permute.xlu0 %v11342_v41 }
 0xdba   : > { %7773 = vset.pattern.permute.xlu1 %v11366_v50  ;;  %4248 = vperm.xlu0 %7821, %v9906_v38  }
 0xdbb   : > { %5285 = vperm.xlu1 %7773, %v9815_v16  }
 0xdbd   : > { %v10017_v54 = vpop.permute.xlu1 %5059 }
 0xdbe   : > { %4268 = vperm.xlu0 %7821, %v9908_v42  }
 0xdbf   : > { %7774 = vset.pattern.permute.xlu1 %v11364_v7 }
 0xdc0   : > { %5295 = vperm.xlu1 %7774, %v9817_v0  }
 0xdc2   : > { %5631 = vperm.xlu0 %7821, %v9817_v0   ;;  %v10023_v35 = vpop.permute.xlu1 %4600 }
 0xdc4   : > { %7775 = vset.pattern.permute.xlu1 %v11329_v2 }
 0xdc5   : > { %3339 = vperm.xlu1 %7775, %v9906_v38  }
 0xdc6   : > { %5647 = vperm.xlu0 %7821, %v9194_v40  }
 0xdc7   : > { %v10028_v12 = vpop.permute.xlu1 %4909 }
 0xdc9   : > { %7776 = vset.pattern.permute.xlu1 %v11335_v60 }
 0xdca   : > { %7838 = vset.pattern.permute.xlu0 %v11476_v61  ;;  %3349 = vperm.xlu1 %7776, %v9906_v38  }
 0xdcb   : > { %4274 = vperm.xlu0 %7838, %v9304_v45  }
 0xdcc   : > { %v10034_v4 = vpop.permute.xlu1 %4919 }
 0xdce   : > { %7777 = vset.pattern.permute.xlu1 %v11329_v2 }
 0xdcf   : > { %4278 = vperm.xlu0 %7838, %v9908_v42   ;;  %3359 = vperm.xlu1 %7777, %v9908_v42  }
 0xdd1   : > { %v10039_v53 = vpop.permute.xlu1 %4621 }
 0xdd2   : > { %11477 = vst [vmem:[#allocation172_spill] sm:$0xff] %v10039_v53 }
 0xdd3   : > { %4294 = vperm.xlu0 %7838, %v9202_v57   ;;  %3379 = vperm.xlu1 %7777, %v9910_v6  }
 0xdd6   : > { %v10043_v39 = vpop.permute.xlu1 %4929 }
 0xdd7   : > { %4314 = vperm.xlu0 %7838, %v9205_v11   ;;  %7779 = vset.pattern.permute.xlu1 %v11335_v60  ;;  %v10064_v60 = vpop.permute.xlu0 %4989 }
 0xdd8   : > { %3389 = vperm.xlu1 %7779, %v9910_v6  }
 0xddb   : > { %4318 = vperm.xlu0 %7838, %v9912_v44   ;;  %v10049_v2 = vpop.permute.xlu1 %4631  ;;  %v10072_v22 = vpop.permute.xlu0 %5009 }
 0xddc   : > { %11478 = vst [vmem:[#allocation173_spill] sm:$0xff] %v10049_v2  ;;  %3409 = vperm.xlu1 %7779, %v9912_v44   ;;  %v11532_v2 = vld [vmem:[#allocation107_spill] sm:$0xff] }
 0xddf   : > { %7845 = vset.pattern.permute.xlu0 %v11342_v41  ;;  %v10082_v56 = vpop.permute.xlu0 %5029 }
 0xde0   : > { %5651 = vperm.xlu0 %7845, %v9819_v31   ;;  %7781 = vset.pattern.permute.xlu1 %v11328_v48  ;;  %v10055_v57 = vpop.permute.xlu1 %5335 }
 0xde1   : > { %11479 = vst [vmem:[#allocation174_spill] sm:$0xff] %v10055_v57  ;;  %3256 = vperm.xlu1 %7781, %v9906_v38  }
 0xde3   : > { %v10090_v62 = vpop.permute.xlu0 %4610 }
 0xde4   : > { %7846 = vset.pattern.permute.xlu0 %v11476_v61 }
 0xde5   : > { %5597 = vperm.xlu0 %7846, %v9164_v24   ;;  %7782 = vset.pattern.permute.xlu1 %v11339_v49  ;;  %v10061_v11 = vpop.permute.xlu1 %5345 }
 0xde6   : > { %3266 = vperm.xlu1 %7782, %v9906_v38  }
 0xde9   : > { %5617 = vperm.xlu0 %7846, %v9246_v13  }
 0xdea   : > { %3287 = vperm.xlu1 %7782, %v9908_v42   ;;  %v10068_v45 = vpop.permute.xlu1 %5681 }
 0xded   : > { %5621 = vperm.xlu0 %7846, %v9815_v16  }
 0xdee   : > { %7785 = vset.pattern.permute.xlu1 %v11336_v21 }
 0xdef   : > { %3656 = vperm.xlu1 %7785, %v9906_v38   ;;  %v10075_v24 = vpop.permute.xlu1 %4642 }
 0xdf0   : > { %11480 = vst [vmem:[#allocation175_spill] sm:$0xff] %v10075_v24 }
 0xdf1   : > { %5637 = vperm.xlu0 %7846, %v9192_v33  }
 0xdf3   : > { %7786 = vset.pattern.permute.xlu1 %v11328_v48 }
 0xdf4   : > { %3298 = vperm.xlu1 %7786, %v9910_v6   ;;  %v10080_v13 = vpop.permute.xlu1 %5355 }
 0xdf5   : > { %11481 = vst [vmem:[#allocation176_spill] sm:$0xff] %v10080_v13  ;;  %5641 = vperm.xlu0 %7846, %v9817_v0   ;;  %v11536_v13 = vld [vmem:[#allocation158_spill] sm:$0xff] }
 0xdf8   : > { %7787 = vset.pattern.permute.xlu1 %v11334_v20  ;;  %v10099_v20 = vpop.permute.xlu0 %4939 }
 0xdf9   : > { %5657 = vperm.xlu0 %7846, %v9194_v40   ;;  %3666 = vperm.xlu1 %7787, %v9908_v42   ;;  %v10088_v16 = vpop.permute.xlu1 %4949  ;;  %11484 = vst [vmem:[#allocation179_spill] sm:$0xff] %v10099_v20  ;;  %v11600_v20 = vld [vmem:[#allocation59_spill] sm:$0xff] }
 0xdfa   : > { %11482 = vst [vmem:[#allocation177_spill] sm:$0xff] %v10088_v16 }
 0xdfc   : > { %v10107_v37 = vpop.permute.xlu0 %5671 }
 0xdfd   : > { %7854 = vrot.lane.b32.xlu0 %v8852_v27, %s11258_s24  ;;  %7788 = vset.pattern.permute.xlu1 %v11339_v49 }
 0xdfe   : > { %3308 = vperm.xlu1 %7788, %v9910_v6   ;;  %v10096_v30 = vpop.permute.xlu1 %4652  ;;  %7868 = vset.pattern.permute.xlu0 %v11355_v46 }
 0xdff   : > { %11483 = vst [vmem:[#allocation178_spill] sm:$0xff] %v10096_v30 }
 0xe00   : > { %v10114_v36 = vpop.permute.xlu0 %5691 }
 0xe01   : > { %7864 = vrot.lane.b32.xlu0 %v8870_v26, %s11258_s24  ;;  %11487 = vst [vmem:[#allocation182_spill] sm:$0xff] %v10114_v36 }
 0xe02   : > { %7790 = vset.pattern.permute.xlu1 %v11328_v48 }
 0xe03   : > { %3319 = vperm.xlu1 %7790, %v9912_v44   ;;  %v10105_v14 = vpop.permute.xlu1 %4663 }
 0xe04   : > { %11485 = vst [vmem:[#allocation180_spill] sm:$0xff] %v10105_v14  ;;  %v10122_v63 = vpop.permute.xlu0 %5365 }
 0xe05   : > { %11490 = vst [vmem:[#allocation185_spill] sm:$0xff] %v10122_v63 }
 0xe07   : > { %7793 = vset.pattern.permute.xlu1 %v11336_v21 }
 0xe08   : > { %3696 = vperm.xlu1 %7793, %v9910_v6   ;;  %v10111_v49 = vpop.permute.xlu1 %5711  ;;  %v10128_v14 = vpop.permute.xlu0 %4959 }
 0xe09   : > { %11486 = vst [vmem:[#allocation181_spill] sm:$0xff] %v10111_v49  ;;  %11492 = vst [vmem:[#allocation187_spill] sm:$0xff] %v10128_v14  ;;  %v11510_v14 = vld [vmem:[#allocation99_spill] sm:$0xff] }
 0xe0c   : > { %3716 = vperm.xlu1 %7793, %v9912_v44  }
 0xe0d   : > { %v10116_v9 = vpop.permute.xlu1 %5385 }
 0xe0e   : > { %11488 = vst [vmem:[#allocation183_spill] sm:$0xff] %v10116_v9 }
 0xe10   : > { %7795 = vset.pattern.permute.xlu1 %v11337_v23  ;;  %v10134_v23 = vpop.permute.xlu0 %5701 }
 0xe11   : > { %3566 = vperm.xlu1 %7795, %v9906_v38   ;;  %11494 = vst [vmem:[#allocation189_spill] sm:$0xff] %v10134_v23 }
 0xe12   : > { %v10120_v48 = vpop.permute.xlu1 %4979 }
 0xe13   : > { %11489 = vst [vmem:[#allocation184_spill] sm:$0xff] %v10120_v48 }
 0xe14   : > { %v10141_v30 = vpop.permute.xlu0 %5375 }
 0xe15   : > { %7798 = vset.pattern.permute.xlu1 %v11340_v8  ;;  %11496 = vst [vmem:[#allocation191_spill] sm:$0xff] %v10141_v30 }
 0xe16   : > { %3992 = vperm.xlu1 %7798, %v9906_v38  }
 0xe17   : > { %v10126_v21 = vpop.permute.xlu1 %5721 }
 0xe18   : > { %11491 = vst [vmem:[#allocation186_spill] sm:$0xff] %v10126_v21 }
 0xe1a   : > { %7799 = vset.pattern.permute.xlu1 %v11352_v43 }
 0xe1b   : > { %4002 = vperm.xlu1 %7799, %v9906_v38  }
 0xe1c   : > { %v10132_v9 = vpop.permute.xlu1 %5395 }
 0xe1d   : > { %11493 = vst [vmem:[#allocation188_spill] sm:$0xff] %v10132_v9  ;;  %v10148_v9 = vpop.permute.xlu0 %4969 }
 0xe1e   : > { %11498 = vst [vmem:[#allocation193_spill] sm:$0xff] %v10148_v9 }
 0xe1f   : > { %7800 = vset.pattern.permute.xlu1 %v11338_v15 }
 0xe20   : > { %3596 = vperm.xlu1 %7800, %v9908_v42  }
 0xe21   : > { %v10138_v48 = vpop.permute.xlu1 %5731  ;;  %v10156_v49 = vpop.permute.xlu0 %4673 }
 0xe22   : > { %11495 = vst [vmem:[#allocation190_spill] sm:$0xff] %v10138_v48  ;;  %11501 = vst [vmem:[#allocation196_spill] sm:$0xff] %v10156_v49 }
 0xe24   : > { %7802 = vset.pattern.permute.xlu1 %v11355_v46 }
 0xe25   : > { %4338 = vperm.xlu1 %7802, %v9906_v38   ;;  %v10162_v30 = vpop.permute.xlu0 %5405 }
 0xe26   : > { %v10144_v21 = vpop.permute.xlu1 %5265  ;;  %11503 = vst [vmem:[#allocation198_spill] sm:$0xff] %v10162_v30  ;;  %v11508_v30 = vlaneseq }
 0xe27   : > { %11497 = vst [vmem:[#allocation192_spill] sm:$0xff] %v10144_v21 }
 0xe28   : > { %v10180_v49 = vand.u32 127, %v11508_v30 }
 0xe29   : > { %7803 = vset.pattern.permute.xlu1 %v11340_v8  ;;  %v10168_v9 = vpop.permute.xlu0 %5741 }
 0xe2a   : > { %4012 = vperm.xlu1 %7803, %v9908_v42   ;;  %11505 = vst [vmem:[#allocation200_spill] sm:$0xff] %v10168_v9  ;;  %vm3347_vm14 = vcmp.eq.s32.totalorder %v10180_v49, %v9442_v28  ;;  %vm3337_vm2 = vcmp.eq.s32.totalorder %v10180_v49, %v9547_v19  ;;  %vm3357_vm10 = vcmp.eq.s32.totalorder %v10180_v49, %v9450_v58  ;;  %v11511_v58 = vld [vmem:[#allocation118_spill] sm:$0xff] }
 0xe2b   : > { %v10150_v63 = vpop.permute.xlu1 %5601  ;;  %vm3367_vm9 = vcmp.eq.s32.totalorder %v10180_v49, %v11510_v14  ;;  %vm3377_vm4 = vcmp.eq.s32.totalorder %v10180_v49, %v9742_v59  ;;  %vm3387_vm7 = vcmp.eq.s32.totalorder %v10180_v49, %v11511_v58  ;;  %v11513_v59 = vld [vmem:[#allocation157_spill] sm:$0xff]  ;;  %v11516_v58 = vld [vmem:[#allocation15_spill] sm:$0xff]  ;;  %vm3654_vm3 = vcmp.eq.s32.totalorder %v10180_v49, %v11532_v2 }
 0xe2c   : > { %11499 = vst [vmem:[#allocation194_spill] sm:$0xff] %v10150_v63  ;;  %vm3407_vm12 = vcmp.eq.s32.totalorder %v10180_v49, %v11513_v59  ;;  %v11523_v59 = vld [vmem:[#allocation20_spill] sm:$0xff] }
 0xe2e   : > { %7806 = vset.pattern.permute.xlu1 %v11352_v43 }
 0xe2f   : > { %4022 = vperm.xlu1 %7806, %v9908_v42  }
 0xe30   : > { %v10154_v48 = vpop.permute.xlu1 %5275 }
 0xe31   : > { %11500 = vst [vmem:[#allocation195_spill] sm:$0xff] %v10154_v48 }
 0xe33   : > { %7807 = vset.pattern.permute.xlu1 %v11338_v15  ;;  %v10175_v15 = vpop.permute.xlu0 %5255 }
 0xe34   : > { %3616 = vperm.xlu1 %7807, %v9910_v6   ;;  %11507 = vst [vmem:[#allocation202_spill] sm:$0xff] %v10175_v15 }
 0xe35   : > { %v10160_v21 = vpop.permute.xlu1 %5611 }
 0xe36   : > { %11502 = vst [vmem:[#allocation197_spill] sm:$0xff] %v10160_v21 }
 0xe38   : > { %7808 = vset.pattern.permute.xlu1 %v11355_v46 }
 0xe39   : > { %4358 = vperm.xlu1 %7808, %v9908_v42  }
 0xe3a   : > { %v10166_v63 = vpop.permute.xlu1 %5285 }
 0xe3b   : > { %11504 = vst [vmem:[#allocation199_spill] sm:$0xff] %v10166_v63  ;;  %v10183_v63 = vpop.permute.xlu0 %5591 }
 0xe3c   : > { %11509 = vst [vmem:[#allocation203_spill] sm:$0xff] %v10183_v63 }
 0xe3d   : > { %7811 = vset.pattern.permute.xlu1 %v11341_v29 }
 0xe3e   : > { %4368 = vperm.xlu1 %7811, %v9910_v6  }
 0xe3f   : > { %v10172_v48 = vpop.permute.xlu1 %5295 }
 0xe40   : > { %11506 = vst [vmem:[#allocation201_spill] sm:$0xff] %v10172_v48 }
 0xe42   : > { %7812 = vset.pattern.permute.xlu1 %v11352_v43  ;;  %v3370_v43 = vpop.permute.xlu0 %3369 }
 0xe43   : > { %4042 = vperm.xlu1 %7812, %v9910_v6   ;;  %v3372_v28 = vsel %vm3367_vm9, %v3370_v43, 0.0 }
 0xe44   : > { %v3340_v21 = vpop.permute.xlu1 %3339 }
 0xe45   : > { %v3342_v15 = vsel %vm3337_vm2, %v3340_v21, 0.0  ;;  %vm3295_vm2 = vcmp.eq.s32.totalorder %v10180_v49, %v11536_v13 }
 0xe46   : > { %v3400_v19 = vpop.permute.xlu0 %3399 }
 0xe47   : > { %7814 = vset.pattern.permute.xlu1 %v11355_v46 }
 0xe48   : > { %4378 = vperm.xlu1 %7814, %v9910_v6  }
 0xe49   : > { %v3350_v9 = vpop.permute.xlu1 %3349 }
 0xe4a   : > { %v3352_v48 = vsel %vm3347_vm14, %v3350_v9, 0.0 }
 0xe4b   : > { %v3353_v46 = vadd.f32 %v3352_v48, %v3342_v15  ;;  %v3278_v15 = vpop.permute.xlu0 %3277 }
 0xe4c   : > { %7815 = vset.pattern.permute.xlu1 %v11340_v8 }
 0xe4d   : > { %4052 = vperm.xlu1 %7815, %v9912_v44  }
 0xe4e   : > { %v3360_v30 = vpop.permute.xlu1 %3359 }
 0xe4f   : > { %v3362_v63 = vsel %vm3357_vm10, %v3360_v30, 0.0 }
 0xe50   : > { %v3363_v23 = vadd.f32 %v3362_v63, %v3353_v46  ;;  %v11512_v63 = vld [vmem:[#allocation156_spill] sm:$0xff] }
 0xe51   : > { %7816 = vset.pattern.permute.xlu1 %v11341_v29  ;;  %vm3397_vm13 = vcmp.eq.s32.totalorder %v10180_v49, %v11512_v63 }
 0xe52   : > { %4388 = vperm.xlu1 %7816, %v9912_v44   ;;  %v3380_v8 = vpop.permute.xlu1 %3379  ;;  %v3373_v9 = vadd.f32 %v3372_v28, %v3363_v23  ;;  %v3402_v46 = vsel %vm3397_vm13, %v3400_v19, 0.0 }
 0xe53   : > { %v3382_v21 = vsel %vm3377_vm4, %v3380_v8, 0.0 }
 0xe54   : > { %v3383_v48 = vadd.f32 %v3382_v21, %v3373_v9  ;;  %v3647_v9 = vpop.permute.xlu0 %3646  ;;  %v11515_v21 = vld [vmem:[#allocation16_spill] sm:$0xff] }
 0xe56   : > { %7820 = vset.pattern.permute.xlu1 %v11366_v50 }
 0xe57   : > { %3922 = vperm.xlu1 %7820, %v9906_v38   ;;  %v3390_v14 = vpop.permute.xlu1 %3389 }
 0xe58   : > { %v3392_v29 = vsel %vm3387_vm7, %v3390_v14, 0.0  ;;  %v11517_v14 = vpack.c.bf16 %v11515_v21, %v11516_v58  ;;  %v11526_v21 = vld [vmem:[#allocation21_spill] sm:$0xff]  ;;  %v11527_v58 = vld [vmem:[#allocation22_spill] sm:$0xff] }
 0xe59   : > { %v3393_v43 = vadd.f32 %v3392_v29, %v3383_v48  ;;  %v11518_v48 = vmov 0.0|0.0   ;;  %v11520_v29 = vld [vmem:[#allocation17_spill] sm:$0xff] }
 0xe5b   : > { %7822 = vset.pattern.permute.xlu1 %v11476_v61  ;;  %v3403_v23 = vadd.f32 %v3402_v46, %v3393_v43  ;;  %v3410_v30 = vpop.permute.xlu1 %3409  ;;  %v3677_v43 = vpop.permute.xlu0 %3676 }
 0xe5c   : > { %v3412_v28 = vsel %vm3407_vm12, %v3410_v30, 0.0  ;;  %4258 = vperm.xlu1 %7822, %v9906_v38   ;;  %v11521_v38 = vld [vmem:[#allocation18_spill] sm:$0xff]  ;;  %vm11230_vm12 = vcmask 523264  }
 0xe5d   : > { %v3413_v8 = vadd.f32 %v3412_v28, %v3403_v23  ;;  %v11522_v63 = vpack.c.bf16 %v11520_v29, %v11521_v38  ;;  %v11524_v23 = vld [vmem:[#allocation19_spill] sm:$0xff]  ;;  %v11529_v38 = vld [vmem:[#allocation81_spill] sm:$0xff] }
 0xe5e   : > { %v11525_v30 = vpack.c.bf16 %v11523_v59, %v11524_v23  ;;  %vm3264_vm15 = vcmp.eq.s32.totalorder %v10180_v49, %v11529_v38  ;;  %v11530_v23 = vld [vmem:[#allocation101_spill] sm:$0xff] }
 0xe5f   : > { %6936 = vmatmul.mubr.msk.f32.vlgmr.msra.gmra.mrb[20].mxu0 %vm11514_vm8, %v3413_v8  ;;  %v3687_v8 = vpop.permute.xlu0 %3686  ;;  %vm3253_vm6 = vcmp.eq.s32.totalorder %v10180_v49, %v11530_v23 }
 0xe60   : > { %7225 = vmatpush3.bf16.msra.mxu0 %v11517_v14  ;;  %7823 = vset.pattern.permute.xlu1 %v11364_v7  ;;  %v3257_v19 = vpop.permute.xlu1 %3256  ;;  %v11528_v14 = vpack.c.bf16 %v11526_v21, %v11527_v58 }
 0xe61   : > { %3932 = vperm.xlu1 %7823, %v9908_v42   ;;  %7226 = vmatprep.subr.bf16.mxu0 %v11518_v48 }
 0xe62   : > { %6954 = vmatprep.mubr.msk.f32.mxu0 %vm11519_vm11, %v11299_v32 }
 0xe64   : > { %7228 = vmatpush3.bf16.msra.mxu0 %v11522_v63 }
 0xe65   : > { %7824 = vset.pattern.permute.xlu1 %v11366_v50  ;;  %v3267_v46 = vpop.permute.xlu1 %3266  ;;  %7229 = vmatprep.subr.bf16.mxu0 %v11518_v48 }
 0xe66   : > { %3942 = vperm.xlu1 %7824, %v9908_v42   ;;  %v3330_v42 = vpop.permute.xlu0 %3329  ;;  %v3269_v63 = vsel %vm3264_vm15, %v3267_v46, 0.0  ;;  %v11533_v46 = vld [vmem:[#allocation105_spill] sm:$0xff] }
 0xe67   : > { %vm3285_vm5 = vcmp.eq.s32.totalorder %v10180_v49, %v11533_v46 }
 0xe68   : > { %7231 = vmatpush3.bf16.msra.mxu0 %v11525_v30  ;;  %v3259_v30 = vsel %vm3253_vm6, %v3257_v19, 0.0  ;;  %v11534_v19 = vld [vmem:[#allocation83_spill] sm:$0xff] }
 0xe69   : > { %v3288_v28 = vpop.permute.xlu1 %3287  ;;  %7232 = vmatprep.subr.bf16.mxu0 %v11518_v48  ;;  %v3270_v21 = vadd.f32 %v3269_v63, %v3259_v30  ;;  %vm3644_vm0 = vcmp.eq.s32.totalorder %v10180_v49, %v11534_v19  ;;  %v11535_v30 = vld [vmem:[#allocation85_spill] sm:$0xff] }
 0xe6a   : > { %7825 = vset.pattern.permute.xlu1 %v11364_v7  ;;  %v3707_v58 = vpop.permute.xlu0 %3706  ;;  %v3290_v63 = vsel %vm3285_vm5, %v3288_v28, 0.0  ;;  %vm3664_vm14 = vcmp.eq.s32.totalorder %v10180_v49, %v11535_v30  ;;  %v11538_v19 = vld [vmem:[#allocation109_spill] sm:$0xff]  ;;  %v11539_v30 = vld [vmem:[#allocation122_spill] sm:$0xff] }
 0xe6b   : > { %3952 = vperm.xlu1 %7825, %v9910_v6   ;;  %vm3674_vm9 = vcmp.eq.s32.totalorder %v10180_v49, %v11538_v19  ;;  %vm3316_vm4 = vcmp.eq.s32.totalorder %v10180_v49, %v11539_v30  ;;  %v11543_v30 = vld [vmem:[#allocation161_spill] sm:$0xff] }
 0xe6c   : > { %7234 = vmatpush3.bf16.msra.mxu0 %v11528_v14  ;;  %v11531_v14 = vld [vmem:[#allocation103_spill] sm:$0xff]  ;;  %vm3694_vm8 = vcmp.eq.s32.totalorder %v10180_v49, %v11543_v30 }
 0xe6d   : > { %7235 = vmatprep.subr.bf16.mxu0 %v11518_v48  ;;  %vm3274_vm1 = vcmp.eq.s32.totalorder %v10180_v49, %v11531_v14  ;;  %v3649_v14 = vsel %vm3644_vm0, %v3647_v9, 0.0 }
 0xe6e   : > { %v3657_v29 = vpop.permute.xlu1 %3656  ;;  %v3280_v38 = vsel %vm3274_vm1, %v3278_v15, 0.0  ;;  %v10256_v15 = vpop.permute.xlu0 %3576  ;;  %vm11548_vm1 = vcmask 130048  }
 0xe6f   : > { %7826 = vset.pattern.permute.xlu1 %v11342_v41  ;;  %v3281_v23 = vadd.f32 %v3280_v38, %v3270_v21  ;;  %v3659_v36 = vsel %vm3654_vm3, %v3657_v29, 0.0  ;;  %v11537_v38 = vld [vmem:[#allocation120_spill] sm:$0xff] }
 0xe70   : > { %4288 = vperm.xlu1 %7826, %v9910_v6   ;;  %v3660_v57 = vadd.f32 %v3659_v36, %v3649_v14  ;;  %vm3306_vm10 = vcmp.eq.s32.totalorder %v10180_v49, %v11537_v38 }
 0xe71   : > { %v3291_v29 = vadd.f32 %v3290_v63, %v3281_v23 }
 0xe72   : > { %v10268_v14 = vpop.permute.xlu0 %3586 }
 0xe73   : > { %v3299_v59 = vpop.permute.xlu1 %3298 }
 0xe74   : > { %7827 = vset.pattern.permute.xlu1 %v11366_v50  ;;  %v3301_v46 = vsel %vm3295_vm2, %v3299_v59, 0.0  ;;  %v11540_v59 = vld [vmem:[#allocation44_spill] sm:$0xff] }
 0xe75   : > { %3962 = vperm.xlu1 %7827, %v9910_v6   ;;  %v3302_v9 = vadd.f32 %v3301_v46, %v3291_v29  ;;  %v7556_v23 = vunpack.i.h.bf16 %v11540_v59  ;;  %v7555_v63 = vunpack.i.l.bf16 %v11540_v59  ;;  %v11541_v46 = vld [vmem:[#allocation160_spill] sm:$0xff] }
 0xe76   : > { %vm3327_vm7 = vcmp.eq.s32.totalorder %v10180_v49, %v11541_v46 }
 0xe77   : > { %v3332_v29 = vsel %vm3327_vm7, %v3330_v42, 0.0 }
 0xe78   : > { %v3667_v24 = vpop.permute.xlu1 %3666 }
 0xe79   : > { %7828 = vset.pattern.permute.xlu1 %v11476_v61  ;;  %v3669_v2 = vsel %vm3664_vm14, %v3667_v24, 0.0  ;;  %v3679_v24 = vsel %vm3674_vm9, %v3677_v43, 0.0  ;;  %v11542_v43 = vld [vmem:[#allocation159_spill] sm:$0xff] }
 0xe7a   : > { %4298 = vperm.xlu1 %7828, %v9910_v6   ;;  %v3670_v6 = vadd.f32 %v3669_v2, %v3660_v57  ;;  %vm3684_vm13 = vcmp.eq.s32.totalorder %v10180_v49, %v11542_v43  ;;  %v11547_v43 = vld [vmem:[#allocation36_spill] sm:$0xff] }
 0xe7b   : > { %v3689_v38 = vsel %vm3684_vm13, %v3687_v8, 0.0  ;;  %v11545_v8 = vld [vmem:[#allocation48_spill] sm:$0xff] }
 0xe7c   : > { %v3680_v57 = vadd.f32 %v3679_v24, %v3670_v6  ;;  %v11544_v24 = vld [vmem:[#allocation162_spill] sm:$0xff]  ;;  %v7495_v59 = vunpack.i.l.bf16 %v11545_v8 }
 0xe7d   : > { %v3309_v21 = vpop.permute.xlu1 %3308  ;;  %vm3704_vm15 = vcmp.eq.s32.totalorder %v10180_v49, %v11544_v24 }
 0xe7e   : > { %7829 = vset.pattern.permute.xlu1 %v11364_v7  ;;  %v3311_v28 = vsel %vm3306_vm10, %v3309_v21, 0.0  ;;  %v3690_v19 = vadd.f32 %v3689_v38, %v3680_v57  ;;  %v11546_v57 = vld [vmem:[#allocation163_spill] sm:$0xff]  ;;  %v7510_v38 = vunpack.i.l.bf16 %v11547_v43 }
 0xe7f   : > { %3972 = vperm.xlu1 %7829, %v9912_v44   ;;  %v3312_v13 = vadd.f32 %v3311_v28, %v3302_v9  ;;  %v7236_v9 = vpack.c.bf16 %v7556_v23, %v7555_v63  ;;  %v3709_v23 = vsel %vm3704_vm15, %v3707_v58, 0.0  ;;  %vm3714_vm6 = vcmp.eq.s32.totalorder %v10180_v49, %v11546_v57 }
 0xe82   : > { %v3320_v36 = vpop.permute.xlu1 %3319 }
 0xe83   : > { %v3322_v2 = vsel %vm3316_vm4, %v3320_v36, 0.0  ;;  %7830 = vset.pattern.permute.xlu1 %v11342_v41  ;;  %v7496_v36 = vunpack.i.h.bf16 %v11545_v8 }
 0xe84   : > { %v3323_v21 = vadd.f32 %v3322_v2, %v3312_v13  ;;  %4308 = vperm.xlu1 %7830, %v9912_v44   ;;  %v10282_v13 = vpop.permute.xlu0 %4328 }
 0xe86   : > { %v3333_v28 = vadd.f32 %v3332_v29, %v3323_v21  ;;  %v7511_v29 = vunpack.i.h.bf16 %v11547_v43 }
 0xe87   : > { %v3697_v6 = vpop.permute.xlu1 %3696 }
 0xe88   : > { %v3699_v41 = vsel %vm3694_vm8, %v3697_v6, 0.0  ;;  %7831 = vset.pattern.permute.xlu1 %v11366_v50  ;;  %6955 = vmatmul.mubr.msk.f32.vlgmr.msra.gmra.mrb[20].mxu0 %vm11230_vm12, %v3333_v28  ;;  %v3607_v58 = vpop.permute.xlu0 %3606 }
 0xe89   : > { %v3700_v42 = vadd.f32 %v3699_v41, %v3690_v19  ;;  %7237 = vmatpush3.bf16.msra.mxu0 %v7236_v9  ;;  %3982 = vperm.xlu1 %7831, %v9912_v44   ;;  %v7239_v44 = vpack.c.bf16 %v7496_v36, %v7495_v59  ;;  %v7242_v9 = vpack.c.bf16 %v7511_v29, %v7510_v38  ;;  %v11549_v19 = vld [vmem:[#allocation39_spill] sm:$0xff]  ;;  %v11551_v59 = vld [vmem:[#allocation29_spill] sm:$0xff] }
 0xe8a   : > { %6961 = vmatprep.mubr.msk.f32.mxu0 %vm11519_vm11, %v11299_v32  ;;  %7238 = vmatprep.subr.bf16.mxu0 %v11518_v48  ;;  %v7525_v30 = vunpack.i.l.bf16 %v11549_v19 }
 0xe8b   : > { %v3710_v63 = vadd.f32 %v3709_v23, %v3700_v42  ;;  %v3717_v2 = vpop.permute.xlu1 %3716  ;;  %v11550_v42 = vld [vmem:[#allocation42_spill] sm:$0xff] }
 0xe8c   : > { %v3719_v46 = vsel %vm3714_vm6, %v3717_v2, 0.0  ;;  %v10302_v6 = vpop.permute.xlu0 %4348  ;;  %v7541_v8 = vunpack.i.h.bf16 %v11550_v42 }
 0xe8d   : > { %v3720_v21 = vadd.f32 %v3719_v46, %v3710_v63  ;;  %5301 = vperm.xlu1 %7831, %v9192_v33   ;;  %v7526_v33 = vunpack.i.h.bf16 %v11549_v19  ;;  %v11552_v46 = vld [vmem:[#allocation87_spill] sm:$0xff]  ;;  %v11554_v19 = vld [vmem:[#allocation113_spill] sm:$0xff] }
 0xe8e   : > { %vm3564_vm3 = vcmp.eq.s32.totalorder %v10180_v49, %v11552_v46  ;;  %vm3584_vm0 = vcmp.eq.s32.totalorder %v10180_v49, %v11554_v19  ;;  %v11558_v46 = vld [vmem:[#allocation165_spill] sm:$0xff] }
 0xe8f   : > { %6962 = vmatmul.mubr.msk.f32.vlgmr.msra.gmra.mrb[22].mxu0 %vm11548_vm1, %v3720_v21  ;;  %v7245_v24 = vpack.c.bf16 %v7526_v33, %v7525_v30  ;;  %vm3624_vm9 = vcmp.eq.s32.totalorder %v10180_v49, %v11558_v46  ;;  %v11565_v46 = vld [vmem:[#allocation119_spill] sm:$0xff] }
 0xe90   : > { %7240 = vmatpush3.bf16.msra.mxu0 %v7239_v44  ;;  %v3567_v28 = vpop.permute.xlu1 %3566  ;;  %6980 = vmatprep.mubr.msk.f32.mxu0 %vm11519_vm11, %v11299_v32  ;;  %v11553_v44 = vld [vmem:[#allocation111_spill] sm:$0xff]  ;;  %vm4336_vm6 = vcmp.eq.s32.totalorder %v10180_v49, %v11565_v46 }
 0xe91   : > { %5305 = vperm.xlu1 %7831, %v9817_v0   ;;  %7241 = vmatprep.subr.bf16.mxu0 %v11518_v48  ;;  %v7540_v0 = vunpack.i.l.bf16 %v11550_v42  ;;  %v3569_v21 = vsel %vm3564_vm3, %v3567_v28, 0.0  ;;  %vm3574_vm5 = vcmp.eq.s32.totalorder %v10180_v49, %v11553_v44  ;;  %v3589_v28 = vsel %vm3584_vm0, %v10268_v14, 0.0  ;;  %v11556_v42 = vld [vmem:[#allocation124_spill] sm:$0xff] }
 0xe92   : > { %v3579_v29 = vsel %vm3574_vm5, %v10256_v15, 0.0  ;;  %vm3604_vm2 = vcmp.eq.s32.totalorder %v10180_v49, %v11556_v42  ;;  %v11563_v42 = vld [vmem:[#allocation121_spill] sm:$0xff] }
 0xe93   : > { %v7248_v36 = vpack.c.bf16 %v7541_v8, %v7540_v0  ;;  %v3580_v38 = vadd.f32 %v3579_v29, %v3569_v21  ;;  %v3609_v8 = vsel %vm3604_vm2, %v3607_v58, 0.0  ;;  %v11559_v21 = vld [vmem:[#allocation52_spill] sm:$0xff]  ;;  %vm4010_vm8 = vcmp.eq.s32.totalorder %v10180_v49, %v11563_v42 }
 0xe94   : > { %7243 = vmatpush3.bf16.msra.mxu0 %v7242_v9  ;;  %v7565_v44 = vunpack.i.l.bf16 %v11559_v21 }
 0xe95   : > { %7832 = vset.pattern.permute.xlu1 %v11364_v7  ;;  %v10305_v41 = vpop.permute.xlu1 %3992  ;;  %7244 = vmatprep.subr.bf16.mxu0 %v11518_v48  ;;  %v10314_v7 = vpop.permute.xlu0 %4032  ;;  %v3590_v30 = vadd.f32 %v3589_v28, %v3580_v38 }
 0xe96   : > { %5311 = vperm.xlu1 %7832, %v9194_v40  }
 0xe98   : > { %7246 = vmatpush3.bf16.msra.mxu0 %v7245_v24 }
 0xe99   : > { %7247 = vmatprep.subr.bf16.mxu0 %v11518_v48  ;;  %v3627_v57 = vpop.permute.xlu0 %3626 }
 0xe9a   : > { %7834 = vrot.lane.b32.xlu1 %v11551_v59, %s11257_s14  ;;  %v4003_v23 = vpop.permute.xlu1 %4002  ;;  %v3629_v29 = vsel %vm3624_vm9, %v3627_v57, 0.0 }
 0xe9c   : > { %7249 = vmatpush3.bf16.msra.mxu0 %v7248_v36  ;;  %v11557_v36 = vld [vmem:[#allocation164_spill] sm:$0xff] }
 0xe9d   : > { %7265 = vmatprep.subr.bf16.mxu0 %v11518_v48  ;;  %v3637_v43 = vpop.permute.xlu0 %3636  ;;  %vm3614_vm10 = vcmp.eq.s32.totalorder %v10180_v49, %v11557_v36 }
 0xe9e   : > { %5315 = vperm.xlu1 %7832, %v9819_v31  }
 0xe9f   : > { %v3597_v63 = vpop.permute.xlu1 %3596 }
 0xea2   : > { %7840 = vrot.lane.b32.xlu1 %v11551_v59, %s11258_s24 }
 0xea3   : > { %7844 = vset.pattern.permute.xlu1 %v11366_v50  ;;  %v11555_v50 = vld [vmem:[#allocation89_spill] sm:$0xff] }
 0xea4   : > { %v4339_v2 = vpop.permute.xlu1 %4338  ;;  %vm3594_vm14 = vcmp.eq.s32.totalorder %v10180_v49, %v11555_v50 }
 0xea5   : > { %v3599_v33 = vsel %vm3594_vm14, %v3597_v63, 0.0 }
 0xea6   : > { %5321 = vperm.xlu1 %7844, %v9194_v40   ;;  %v10333_v40 = vpop.permute.xlu0 %4062  ;;  %v3600_v24 = vadd.f32 %v3599_v33, %v3590_v30 }
 0xea8   : > { %v3610_v14 = vadd.f32 %v3609_v8, %v3600_v24  ;;  %v11562_v24 = vld [vmem:[#allocation115_spill] sm:$0xff] }
 0xea9   : > { %v4013_v9 = vpop.permute.xlu1 %4012  ;;  %vm3990_vm13 = vcmp.eq.s32.totalorder %v10180_v49, %v11562_v24  ;;  %v11571_v24 = vld [vmem:[#allocation34_spill] sm:$0xff] }
 0xeaa   : > { %5325 = vperm.xlu1 %7844, %v9819_v31   ;;  %v10341_v0 = vpop.permute.xlu0 %4398  ;;  %v3995_v8 = vsel %vm3990_vm13, %v10305_v41, 0.0  ;;  %v7501_v42 = vunpack.i.h.bf16 %v11571_v24  ;;  %vm11581_vm13 = vcmask 130048  }
 0xeae   : > { %7848 = vrot.lane.b32.xlu1 %v8852_v27, %s11257_s14  ;;  %v4023_v15 = vpop.permute.xlu1 %4022  ;;  %v10353_v50 = vpop.permute.xlu0 %3912 }
 0xeaf   : > { %7852 = vset.pattern.permute.xlu1 %v11476_v61  ;;  %v7566_v61 = vunpack.i.h.bf16 %v11559_v21  ;;  %v4341_v21 = vsel %vm4336_vm6, %v4339_v2, 0.0 }
 0xeb1   : > { %v7266_v33 = vpack.c.bf16 %v7566_v61, %v7565_v44  ;;  %v11566_v61 = vld [vmem:[#allocation91_spill] sm:$0xff] }
 0xeb2   : > { %5661 = vperm.xlu1 %7852, %v9819_v31   ;;  %v11560_v31 = vld [vmem:[#allocation128_spill] sm:$0xff]  ;;  %v10361_v30 = vpop.permute.xlu0 %4248  ;;  %vm4326_vm1 = vcmp.eq.s32.totalorder %v10180_v49, %v11566_v61 }
 0xeb3   : > { %v3617_v59 = vpop.permute.xlu1 %3616  ;;  %vm3634_vm4 = vcmp.eq.s32.totalorder %v10180_v49, %v11560_v31 }
 0xeb4   : > { %v3619_v63 = vsel %vm3614_vm10, %v3617_v59, 0.0  ;;  %v3639_v38 = vsel %vm3634_vm4, %v3637_v43, 0.0  ;;  %v11564_v59 = vld [vmem:[#allocation125_spill] sm:$0xff] }
 0xeb5   : > { %v3620_v27 = vadd.f32 %v3619_v63, %v3610_v14  ;;  %v4015_v14 = vsel %vm4010_vm8, %v4013_v9, 0.0  ;;  %vm4020_vm15 = vcmp.eq.s32.totalorder %v10180_v49, %v11564_v59  ;;  %v7500_v59 = vunpack.i.l.bf16 %v11571_v24 }
 0xeb6   : > { %7859 = vrot.lane.b32.xlu1 %v8870_v26, %s11257_s14  ;;  %v11561_v26 = vld [vmem:[#allocation117_spill] sm:$0xff]  ;;  %v10374_v44 = vpop.permute.xlu0 %4268  ;;  %s11765_s14 = sld [smem:[#allocation207_spill]] }
 0xeb7   : > { %v3630_v58 = vadd.f32 %v3629_v29, %v3620_v27  ;;  %vm4000_vm7 = vcmp.eq.s32.totalorder %v10180_v49, %v11561_v26  ;;  %v4025_v27 = vsel %vm4020_vm15, %v4023_v15, 0.0  ;;  %v4331_v29 = vsel %vm4326_vm1, %v10282_v13, 0.0  ;;  %v11570_v15 = vld [vmem:[#allocation93_spill] sm:$0xff]  ;;  %vm11585_vm15 = vmmov %vm11581_vm13 }
 0xeb8   : > { %v4359_v19 = vpop.permute.xlu1 %4358  ;;  %v4005_v43 = vsel %vm4000_vm7, %v4003_v23, 0.0  ;;  %v4342_v9 = vadd.f32 %v4341_v21, %v4331_v29  ;;  %vm4356_vm14 = vcmp.eq.s32.totalorder %v10180_v49, %v11570_v15  ;;  %vm4691_vm1 = vcmp.eq.s32.totalorder %v10180_v49, %v11600_v20  ;;  %v11607_v20 = vld [vmem:[#allocation66_spill] sm:$0xff] }
 0xeb9   : > { %v3640_v28 = vadd.f32 %v3639_v38, %v3630_v58  ;;  %v4006_v36 = vadd.f32 %v4005_v43, %v3995_v8  ;;  %v11567_v58 = vld [vmem:[#allocation126_spill] sm:$0xff]  ;;  %v11568_v38 = vld [vmem:[#allocation167_spill] sm:$0xff]  ;;  %v4361_v26 = vsel %vm4356_vm14, %v4359_v19, 0.0 }
 0xeba   : > { %vm4030_vm3 = vcmp.eq.s32.totalorder %v10180_v49, %v11567_v58  ;;  %vm4040_vm5 = vcmp.eq.s32.totalorder %v10180_v49, %v11568_v38  ;;  %v10388_v8 = vpop.permute.xlu0 %5631  ;;  %v7254_v58 = vpack.c.bf16 %v7501_v42, %v7500_v59  ;;  %v11577_v38 = vld [vmem:[#allocation37_spill] sm:$0xff] }
 0xebb   : > { %6981 = vmatmul.mubr.msk.f32.vlgmr.msra.gmra.mrb[22].mxu0 %vm11230_vm12, %v3640_v28  ;;  %v4016_v23 = vadd.f32 %v4015_v14, %v4006_v36  ;;  %v11569_v28 = vld [vmem:[#allocation123_spill] sm:$0xff]  ;;  %v4035_v2 = vsel %vm4030_vm3, %v10314_v7, 0.0  ;;  %11572 = vst [vmem:[#allocation99_spill] sm:$0xff] %v10388_v8  ;;  %v11573_v36 = vld [vmem:[#allocation166_spill] sm:$0xff] }
 0xebc   : > { %7267 = vmatpush3.bf16.msra.mxu0 %v7266_v33  ;;  %7013 = vmatprep.mubr.msk.f32.mxu0 %vm11519_vm11, %v11299_v32  ;;  %vm4346_vm0 = vcmp.eq.s32.totalorder %v10180_v49, %v11569_v28  ;;  %vm4366_vm2 = vcmp.eq.s32.totalorder %v10180_v49, %v11573_v36  ;;  %v7516_v28 = vunpack.i.h.bf16 %v11577_v38 }
 0xebd   : > { %v4369_v57 = vpop.permute.xlu1 %4368  ;;  %7268 = vmatprep.subr.bf16.mxu0 %v11518_v48  ;;  %v4026_v41 = vadd.f32 %v4025_v27, %v4016_v23  ;;  %v4351_v13 = vsel %vm4346_vm0, %v10302_v6, 0.0  ;;  %v11574_v27 = vld [vmem:[#allocation130_spill] sm:$0xff]  ;;  %v11575_v6 = vld [vmem:[#allocation168_spill] sm:$0xff]  ;;  %v11576_v23 = vld [vmem:[#allocation169_spill] sm:$0xff] }
 0xebe   : > { %v4352_v14 = vadd.f32 %v4351_v13, %v4342_v9  ;;  %v4371_v46 = vsel %vm4366_vm2, %v4369_v57, 0.0  ;;  %vm4050_vm10 = vcmp.eq.s32.totalorder %v10180_v49, %v11574_v27  ;;  %vm4376_vm9 = vcmp.eq.s32.totalorder %v10180_v49, %v11575_v6  ;;  %v10402_v15 = vpop.permute.xlu0 %5647  ;;  %v11579_v13 = vld [vmem:[#allocation132_spill] sm:$0xff]  ;;  %v11584_v6 = vld [vmem:[#allocation38_spill] sm:$0xff] }
 0xebf   : > { %v4036_v43 = vadd.f32 %v4035_v2, %v4026_v41  ;;  %vm4060_vm4 = vcmp.eq.s32.totalorder %v10180_v49, %v11576_v23  ;;  %v7515_v2 = vunpack.i.l.bf16 %v11577_v38  ;;  %11578 = vst [vmem:[#allocation118_spill] sm:$0xff] %v10402_v15  ;;  %vm4386_vm7 = vcmp.eq.s32.totalorder %v10180_v49, %v11579_v13  ;;  %v11587_v38 = vld [vmem:[#allocation41_spill] sm:$0xff] }
 0xec0   : > { %v4362_v21 = vadd.f32 %v4361_v26, %v4352_v14  ;;  %v4065_v41 = vsel %vm4060_vm4, %v10333_v40, 0.0  ;;  %v11582_v40 = vld [vmem:[#allocation170_spill] sm:$0xff]  ;;  %v7520_v23 = vunpack.i.l.bf16 %v11584_v6 }
 0xec1   : > { %vm4396_vm8 = vcmp.eq.s32.totalorder %v10180_v49, %v11582_v40  ;;  %v7257_v59 = vpack.c.bf16 %v7516_v28, %v7515_v2  ;;  %v7536_v28 = vunpack.i.h.bf16 %v11587_v38  ;;  %v7535_v2 = vunpack.i.l.bf16 %v11587_v38  ;;  %v11592_v38 = vld [vmem:[#allocation49_spill] sm:$0xff] }
 0xec2   : > { %v4043_v63 = vpop.permute.xlu1 %4042  ;;  %v4372_v9 = vadd.f32 %v4371_v46, %v4362_v21  ;;  %v4401_v36 = vsel %vm4396_vm8, %v10341_v0, 0.0  ;;  %v11583_v46 = vld [vmem:[#allocation40_spill] sm:$0xff] }
 0xec3   : > { %v4045_v33 = vsel %vm4040_vm5, %v4043_v63, 0.0  ;;  %v7530_v27 = vunpack.i.l.bf16 %v11583_v46 }
 0xec4   : > { %v4046_v7 = vadd.f32 %v4045_v33, %v4036_v43  ;;  %v11580_v43 = vld [vmem:[#allocation35_spill] sm:$0xff] }
 0xec5   : > { %v7506_v24 = vunpack.i.h.bf16 %v11580_v43 }
 0xec7   : > { %v4379_v31 = vpop.permute.xlu1 %4378 }
 0xec8   : > { %v4381_v61 = vsel %vm4376_vm9, %v4379_v31, 0.0  ;;  %v7505_v31 = vunpack.i.l.bf16 %v11580_v43  ;;  %v7275_v43 = vpack.c.bf16 %v7536_v28, %v7535_v2  ;;  %v7586_v28 = vunpack.i.h.bf16 %v11592_v38 }
 0xec9   : > { %v4382_v33 = vadd.f32 %v4381_v61, %v4372_v9  ;;  %v7585_v2 = vunpack.i.l.bf16 %v11592_v38 }
 0xeca   : > { %v7269_v21 = vpack.c.bf16 %v7506_v24, %v7505_v31  ;;  %v11588_v24 = vld [vmem:[#allocation43_spill] sm:$0xff] }
 0xecb   : > { %v7551_v31 = vunpack.i.h.bf16 %v11588_v24  ;;  %v10473_v8 = vpack.c.bf16 %v7586_v28, %v7585_v2  ;;  %v11608_v28 = vld [vmem:[#allocation68_spill] sm:$0xff] }
 0xecc   : > { %v4053_v63 = vpop.permute.xlu1 %4052  ;;  %vm4711_vm9 = vcmp.eq.s32.totalorder %v10180_v49, %v11608_v28 }
 0xecd   : > { %v4055_v19 = vsel %vm4050_vm10, %v4053_v63, 0.0  ;;  %11597 = vst [vmem:[#allocation157_spill] sm:$0xff] %v10473_v8  ;;  %vm5007_vm10 = vcmp.eq.s32.totalorder %v10180_v49, %v11607_v20 }
 0xece   : > { %v4056_v29 = vadd.f32 %v4055_v19, %v4046_v7  ;;  %v7531_v7 = vunpack.i.h.bf16 %v11583_v46  ;;  %v7521_v19 = vunpack.i.h.bf16 %v11584_v6  ;;  %v11590_v6 = vld [vmem:[#allocation45_spill] sm:$0xff] }
 0xed0   : > { %v4066_v57 = vadd.f32 %v4065_v41, %v4056_v29  ;;  %v10421_v29 = vpop.permute.xlu0 %4274  ;;  %v7260_v0 = vpack.c.bf16 %v7531_v7, %v7530_v27  ;;  %v11586_v41 = vld [vmem:[#allocation50_spill] sm:$0xff] }
 0xed1   : > { %v4389_v26 = vpop.permute.xlu1 %4388  ;;  %v7546_v9 = vunpack.i.h.bf16 %v11586_v41  ;;  %v11589_v27 = vld [vmem:[#allocation54_spill] sm:$0xff] }
 0xed2   : > { %v4391_v14 = vsel %vm4386_vm7, %v4389_v26, 0.0  ;;  %6988 = vmatmul.mubr.msk.f32.vlgmr.msra.gmra.mrb[40].mxu1 %vm11581_vm13, %v4066_v57  ;;  %v7272_v57 = vpack.c.bf16 %v7521_v19, %v7520_v23  ;;  %v7571_v19 = vunpack.i.h.bf16 %v11590_v6  ;;  %v7570_v23 = vunpack.i.l.bf16 %v11590_v6  ;;  %v11595_v6 = vld [vmem:[#allocation131_spill] sm:$0xff] }
 0xed3   : > { %v4392_v42 = vadd.f32 %v4391_v14, %v4382_v33  ;;  %7255 = vmatpush3.bf16.msra.mxu1 %v7254_v58  ;;  %7006 = vmatprep.mubr.msk.f32.mxu1 %vm11519_vm11, %v11299_v32  ;;  %v7545_v58 = vunpack.i.l.bf16 %v11586_v41  ;;  %v7550_v14 = vunpack.i.l.bf16 %v11588_v24  ;;  %vm4256_vm6 = vcmp.eq.s32.totalorder %v10180_v49, %v11595_v6  ;;  %v11613_v6 = vld [vmem:[#allocation133_spill] sm:$0xff] }
 0xed4   : > { %7256 = vmatprep.subr.bf16.mxu1 %v11518_v48  ;;  %v10433_v26 = vpop.permute.xlu0 %4278  ;;  %v10469_v15 = vpack.c.bf16 %v7571_v19, %v7570_v23  ;;  %v11603_v19 = vld [vmem:[#allocation60_spill] sm:$0xff]  ;;  %v11604_v23 = vld [vmem:[#allocation61_spill] sm:$0xff] }
 0xed5   : > { %v4402_v63 = vadd.f32 %v4401_v36, %v4392_v42  ;;  %v7263_v13 = vpack.c.bf16 %v7546_v9, %v7545_v58  ;;  %v7278_v42 = vpack.c.bf16 %v7551_v31, %v7550_v14  ;;  %v11591_v9 = vld [vmem:[#allocation47_spill] sm:$0xff]  ;;  %vm4681_vm5 = vcmp.eq.s32.totalorder %v10180_v49, %v11603_v19  ;;  %v11620_v19 = vld [vmem:[#allocation76_spill] sm:$0xff] }
 0xed6   : > { %v10419_v61 = vpop.permute.xlu1 %3922  ;;  %v7581_v58 = vunpack.i.h.bf16 %v11591_v9  ;;  %v11594_v31 = vld [vmem:[#allocation55_spill] sm:$0xff]  ;;  %vm4987_vm0 = vcmp.eq.s32.totalorder %v10180_v49, %v11604_v23  ;;  %v11618_v23 = vld [vmem:[#allocation137_spill] sm:$0xff] }
 0xed7   : > { %7258 = vmatpush3.bf16.msra.mxu1 %v7257_v59  ;;  %7014 = vmatmul.mubr.msk.f32.vlgmr.msra.gmra.mrb[24].mxu0 %vm11585_vm15, %v4402_v63  ;;  %v7596_v63 = vunpack.i.h.bf16 %v11589_v27  ;;  %v7606_v14 = vunpack.i.h.bf16 %v11594_v31  ;;  %vm3930_vm15 = vcmp.eq.s32.totalorder %v10180_v49, %v11613_v6 }
 0xed8   : > { %7270 = vmatpush3.bf16.msra.mxu0 %v7269_v21  ;;  %7259 = vmatprep.subr.bf16.mxu1 %v11518_v48  ;;  %v10442_v36 = vpop.permute.xlu0 %4294  ;;  %v7595_v21 = vunpack.i.l.bf16 %v11589_v27 }
 0xed9   : > { %7271 = vmatprep.subr.bf16.mxu0 %v11518_v48  ;;  %7032 = vmatprep.mubr.msk.f32.mxu0 %vm11519_vm11, %v11299_v32 }
 0xeda   : > { %v10465_v27 = vpack.c.bf16 %v7596_v63, %v7595_v21  ;;  %v11601_v63 = vld [vmem:[#allocation95_spill] sm:$0xff] }
 0xedb   : > { %7261 = vmatpush3.bf16.msra.mxu1 %v7260_v0  ;;  %v4259_v33 = vpop.permute.xlu1 %4258  ;;  %vm4246_vm3 = vcmp.eq.s32.totalorder %v10180_v49, %v11601_v63 }
 0xedc   : > { %7273 = vmatpush3.bf16.msra.mxu0 %v7272_v57  ;;  %7262 = vmatprep.subr.bf16.mxu1 %v11518_v48  ;;  %v10447_v46 = vpop.permute.xlu0 %4314  ;;  %v7580_v57 = vunpack.i.l.bf16 %v11591_v9  ;;  %v4261_v38 = vsel %vm4256_vm6, %v4259_v33, 0.0  ;;  %v11605_v33 = vld [vmem:[#allocation62_spill] sm:$0xff] }
 0xedd   : > { %7274 = vmatprep.subr.bf16.mxu0 %v11518_v48  ;;  %vm4997_vm14 = vcmp.eq.s32.totalorder %v10180_v49, %v11605_v33 }
 0xede   : > { %v10471_v9 = vpack.c.bf16 %v7581_v58, %v7580_v57  ;;  %v4251_v58 = vsel %vm4246_vm3, %v10361_v30, 0.0  ;;  %v11606_v57 = vld [vmem:[#allocation64_spill] sm:$0xff]  ;;  %v4696_v30 = vsel %vm4691_vm1, %v9951_v3, 0.0 }
 0xedf   : > { %7264 = vmatpush3.bf16.msra.mxu1 %v7263_v13  ;;  %v11593_v13 = vld [vmem:[#allocation51_spill] sm:$0xff]  ;;  %vm4701_vm2 = vcmp.eq.s32.totalorder %v10180_v49, %v11606_v57  ;;  %v4262_v2 = vadd.f32 %v4261_v38, %v4251_v58  ;;  %v11614_v38 = vld [vmem:[#allocation134_spill] sm:$0xff]  ;;  %v11616_v3 = vld [vmem:[#allocation136_spill] sm:$0xff] }
 0xee0   : > { %7276 = vmatpush3.bf16.msra.mxu0 %v7275_v43  ;;  %v10438_v40 = vpop.permute.xlu1 %3932  ;;  %7280 = vmatprep.subr.bf16.mxu1 %v11518_v48  ;;  %v10455_v0 = vpop.permute.xlu0 %4318  ;;  %v7591_v43 = vunpack.i.h.bf16 %v11593_v13  ;;  %v7590_v24 = vunpack.i.l.bf16 %v11593_v13  ;;  %11596 = vst [vmem:[#allocation156_spill] sm:$0xff] %v10471_v9  ;;  %vm4286_vm6 = vcmp.eq.s32.totalorder %v10180_v49, %v11614_v38  ;;  %v11615_v58 = vld [vmem:[#allocation135_spill] sm:$0xff]  ;;  %vm3960_vm3 = vcmp.eq.s32.totalorder %v10180_v49, %v11616_v3  ;;  %v11619_v9 = vld [vmem:[#allocation138_spill] sm:$0xff] }
 0xee1   : > { %7277 = vmatprep.subr.bf16.mxu0 %v11518_v48  ;;  %vm3940_vm1 = vcmp.eq.s32.totalorder %v10180_v49, %v11615_v58  ;;  %v3935_v20 = vsel %vm3930_vm15, %v10438_v40, 0.0  ;;  %v11624_v40 = vld [vmem:[#allocation74_spill] sm:$0xff] }
 0xee2   : > { %v10477_v16 = vpack.c.bf16 %v7591_v43, %v7590_v24  ;;  %v11609_v43 = vld [vmem:[#allocation70_spill] sm:$0xff]  ;;  %v5002_v24 = vsel %vm4997_vm14, %v9957_v47, 0.0  ;;  %v4992_v47 = vsel %vm4987_vm0, %v10064_v60, 0.0  ;;  %vm5027_vm0 = vcmp.eq.s32.totalorder %v10180_v49, %v11618_v23 }
 0xee3   : > { %vm5017_vm4 = vcmp.eq.s32.totalorder %v10180_v49, %v11609_v43  ;;  %v4716_v43 = vsel %vm4711_vm9, %v9969_v18, 0.0  ;;  %v11630_v18 = vld [vmem:[#allocation140_spill] sm:$0xff] }
 0xee4   : > { %7279 = vmatpush3.bf16.msra.mxu0 %v7278_v42  ;;  %v7605_v42 = vunpack.i.l.bf16 %v11594_v31  ;;  %11598 = vst [vmem:[#allocation16_spill] sm:$0xff] %v10477_v16  ;;  %v10485_v21 = vpop.permute.xlu0 %5651  ;;  %v11610_v31 = vld [vmem:[#allocation127_spill] sm:$0xff]  ;;  %v5012_v16 = vsel %vm5007_vm10, %v10072_v22, 0.0  ;;  %vm4276_vm10 = vcmp.eq.s32.totalorder %v10180_v49, %v10421_v29  ;;  %vm4306_vm9 = vcmp.eq.s32.totalorder %v10180_v49, %v11630_v18  ;;  %v11648_v18 = vld [vmem:[#allocation86_spill] sm:$0xff] }
 0xee5   : > { %v10444_v59 = vpop.permute.xlu1 %3942  ;;  %7295 = vmatprep.subr.bf16.mxu0 %v11518_v48  ;;  %11602 = vst [vmem:[#allocation17_spill] sm:$0xff] %v10485_v21  ;;  %vm3910_vm7 = vcmp.eq.s32.totalorder %v10180_v49, %v11610_v31  ;;  %v5003_v21 = vadd.f32 %v5002_v24, %v4992_v47  ;;  %v4281_v57 = vsel %vm4276_vm10, %v10433_v26, 0.0  ;;  %v11623_v31 = vld [vmem:[#allocation67_spill] sm:$0xff] }
 0xee6   : > { %v10479_v13 = vpack.c.bf16 %v7606_v14, %v7605_v42  ;;  %v11611_v14 = vld [vmem:[#allocation97_spill] sm:$0xff]  ;;  %v3915_v22 = vsel %vm3910_vm7, %v10353_v50, 0.0  ;;  %vm4907_vm7 = vcmp.eq.s32.totalorder %v10180_v49, %v11624_v40  ;;  %v11627_v47 = vld [vmem:[#allocation171_spill] sm:$0xff] }
 0xee7   : > { %vm4266_vm13 = vcmp.eq.s32.totalorder %v10180_v49, %v11611_v14  ;;  %v11612_v42 = vld [vmem:[#allocation129_spill] sm:$0xff]  ;;  %v11617_v14 = vld [vmem:[#allocation98_spill] sm:$0xff]  ;;  %v5013_v6 = vadd.f32 %v5012_v16, %v5003_v21  ;;  %vm3950_vm10 = vcmp.eq.s32.totalorder %v10180_v49, %v11627_v47 }
 0xee8   : > { %11599 = vst [vmem:[#allocation15_spill] sm:$0xff] %v10479_v13  ;;  %vm3920_vm8 = vcmp.eq.s32.totalorder %v10180_v49, %v11612_v42  ;;  %v4271_v33 = vsel %vm4266_vm13, %v10374_v44, 0.0  ;;  %vm4721_vm14 = vcmp.eq.s32.totalorder %v10180_v49, %v11617_v14  ;;  %v4686_v42 = vsel %vm4681_vm5, %v9945_v25, 0.0  ;;  %v10529_v13 = vpop.permute.xlu0 %5597  ;;  %v11621_v25 = vld [vmem:[#allocation102_spill] sm:$0xff] }
 0xee9   : > { %v3925_v60 = vsel %vm3920_vm8, %v10419_v61, 0.0  ;;  %v4272_v44 = vadd.f32 %v4271_v33, %v4262_v2  ;;  %v4697_v8 = vadd.f32 %v4696_v30, %v4686_v42  ;;  %vm3970_vm13 = vcmp.eq.s32.totalorder %v10180_v49, %v11619_v9  ;;  %v11622_v2 = vld [vmem:[#allocation139_spill] sm:$0xff]  ;;  %v11625_v30 = vld [vmem:[#allocation104_spill] sm:$0xff] }
 0xeea   : > { %v10449_v7 = vpop.permute.xlu1 %3952  ;;  %vm4917_vm5 = vcmp.eq.s32.totalorder %v10180_v49, %v11620_v19  ;;  %vm5047_vm12 = vcmp.eq.s32.totalorder %v10180_v49, %v11621_v25  ;;  %v4706_v61 = vsel %vm4701_vm2, %v9963_v5, 0.0  ;;  %vm4731_vm8 = vcmp.eq.s32.totalorder %v10180_v49, %v11622_v2 }
 0xeeb   : > { %v5022_v5 = vsel %vm5017_vm4, %v9975_v10, 0.0  ;;  %v3926_v24 = vadd.f32 %v3925_v60, %v3915_v22  ;;  %vm5057_vm15 = vcmp.eq.s32.totalorder %v10180_v49, %v11625_v30  ;;  %vm4296_vm4 = vcmp.eq.s32.totalorder %v10180_v49, %v10442_v36  ;;  %v11628_v36 = vld [vmem:[#allocation80_spill] sm:$0xff]  ;;  %v11629_v60 = vld [vmem:[#allocation141_spill] sm:$0xff] }
 0xeec   : > { %v3945_v10 = vsel %vm3940_vm1, %v10444_v59, 0.0  ;;  %v4282_v26 = vadd.f32 %v4281_v57, %v4272_v44  ;;  %v4707_v21 = vadd.f32 %v4706_v61, %v4697_v8  ;;  %v5023_v33 = vadd.f32 %v5022_v5, %v5013_v6  ;;  %v10590_v59 = vpop.permute.xlu0 %5617  ;;  %v11631_v44 = vld [vmem:[#allocation142_spill] sm:$0xff]  ;;  %v11633_v5 = vld [vmem:[#allocation63_spill] sm:$0xff] }
 0xeed   : > { %v3936_v38 = vadd.f32 %v3935_v20, %v3926_v24  ;;  %v3955_v58 = vsel %vm3950_vm10, %v10449_v7, 0.0  ;;  %vm5037_vm1 = vcmp.eq.s32.totalorder %v10180_v49, %v11629_v60  ;;  %v5032_v8 = vsel %vm5027_vm0, %v10082_v56, 0.0  ;;  %v11634_v57 = vld [vmem:[#allocation79_spill] sm:$0xff] }
 0xeee   : > { %v4717_v7 = vadd.f32 %v4716_v43, %v4707_v21  ;;  %v4726_v23 = vsel %vm4721_vm14, %v9981_v1, 0.0  ;;  %v5042_v56 = vsel %vm5037_vm1, %v9993_v55, 0.0  ;;  %v11635_v6 = vld [vmem:[#allocation71_spill] sm:$0xff]  ;;  %v5033_v3 = vadd.f32 %v5032_v8, %v5023_v33  ;;  %v11637_v1 = vld [vmem:[#allocation65_spill] sm:$0xff]  ;;  %v11641_v33 = vld [vmem:[#allocation78_spill] sm:$0xff] }
 0xeef   : > { %v4289_v41 = vpop.permute.xlu1 %4288  ;;  %v3946_v28 = vadd.f32 %v3945_v10, %v3936_v38  ;;  %vm4316_vm10 = vcmp.eq.s32.totalorder %v10180_v49, %v10447_v46  ;;  %vm4618_vm14 = vcmp.eq.s32.totalorder %v10180_v49, %v11637_v1  ;;  %v11638_v55 = vld [vmem:[#allocation69_spill] sm:$0xff]  ;;  %v5052_v43 = vsel %vm5047_vm12, %v10005_v34, 0.0  ;;  %v11640_v38 = vld [vmem:[#allocation84_spill] sm:$0xff]  ;;  %v11652_v8 = vld [vmem:[#allocation110_spill] sm:$0xff] }
 0xef0   : > { %v4291_v50 = vsel %vm4286_vm6, %v4289_v41, 0.0  ;;  %v11626_v41 = vld [vmem:[#allocation100_spill] sm:$0xff]  ;;  %vm5333_vm1 = vcmp.eq.s32.totalorder %v10180_v49, %v11638_v55  ;;  %v4922_v46 = vsel %vm4917_vm5, %v10034_v4, 0.0  ;;  %v4321_v9 = vsel %vm4316_vm10, %v10455_v0, 0.0  ;;  %v10648_v25 = vpop.permute.xlu0 %5621  ;;  %v11664_v1 = vld [vmem:[#allocation182_spill] sm:$0xff] }
 0xef1   : > { %vm4741_vm6 = vcmp.eq.s32.totalorder %v10180_v49, %v11626_v41  ;;  %v4292_v42 = vadd.f32 %v4291_v50, %v4282_v26  ;;  %v3956_v24 = vadd.f32 %v3955_v58, %v3946_v28  ;;  %v11639_v26 = vld [vmem:[#allocation82_spill] sm:$0xff]  ;;  %v4727_v47 = vadd.f32 %v4726_v23, %v4717_v7 }
 0xef2   : > { %v5043_v21 = vadd.f32 %v5042_v56, %v5033_v3  ;;  %vm4629_vm12 = vcmp.eq.s32.totalorder %v10180_v49, %v11641_v33  ;;  %v5062_v4 = vsel %vm5057_vm15, %v10017_v54, 0.0  ;;  %v4912_v0 = vsel %vm4907_vm7, %v10028_v12, 0.0  ;;  %v11645_v12 = vld [vmem:[#allocation143_spill] sm:$0xff]  ;;  %v11659_v56 = vld [vmem:[#allocation177_spill] sm:$0xff]  ;;  %v11662_v3 = vld [vmem:[#allocation176_spill] sm:$0xff] }
 0xef3   : > { %vm11642_vm5 = vcmp.eq.s32.totalorder %v10180_v49, %v11623_v31  ;;  %v4746_v58 = vsel %vm4741_vm6, %v9999_v52, 0.0  ;;  %v4923_v30 = vadd.f32 %v4922_v46, %v4912_v0  ;;  %vm11644_vm15 = vcmask 523264   ;;  %v11647_v52 = vld [vmem:[#allocation88_spill] sm:$0xff]  ;;  %v11671_v0 = vld [vmem:[#allocation53_spill] sm:$0xff]  ;;  %v11674_v33 = vld [vmem:[#allocation146_spill] sm:$0xff] }
 0xef4   : > { %v10475_v53 = vpop.permute.xlu1 %3962  ;;  %vm4751_vm7 = vcmp.eq.s32.totalorder %v10180_v49, %v11645_v12  ;;  %vm11646_vm10 = vcmp.eq.s32.totalorder %v10180_v49, %v11628_v36  ;;  %vm5699_vm6 = vcmp.eq.s32.totalorder %v10180_v49, %v11647_v52  ;;  %v11649_v36 = vld [vmem:[#allocation106_spill] sm:$0xff]  ;;  %v11677_v12 = vld [vmem:[#allocation175_spill] sm:$0xff] }
 0xef5   : > { %v3965_v61 = vsel %vm3960_vm3, %v10475_v53, 0.0  ;;  %vm4937_vm3 = vcmp.eq.s32.totalorder %v10180_v49, %v11635_v6  ;;  %v11636_v53 = vld [vmem:[#allocation72_spill] sm:$0xff]  ;;  %v4756_v41 = vsel %vm4751_vm7, %v10011_v51, 0.0  ;;  %vm11651_vm7 = vcmask 523264  }
 0xef6   : > { %vm4608_vm0 = vcmp.eq.s32.totalorder %v10180_v49, %v11636_v53  ;;  %v11661_v53 = vld [vmem:[#allocation174_spill] sm:$0xff] }
 0xef7   : > { %v5338_v6 = vsel %vm5333_vm1, %v11661_v53, 0.0  ;;  %vm4660_vm1 = vcmp.eq.s32.totalorder %v10180_v49, %v11674_v33  ;;  %v11691_v53 = vld [vmem:[#allocation152_spill] sm:$0xff] }
 0xef8   : > { %v11701_v33 = vld [vmem:[#allocation112_spill] sm:$0xff] }
 0xef9   : > { %v4299_v63 = vpop.permute.xlu1 %4298 }
 0xefa   : > { %v4301_v16 = vsel %vm4296_vm4, %v4299_v63, 0.0  ;;  %v11632_v63 = vld [vmem:[#allocation73_spill] sm:$0xff]  ;;  %vm5343_vm4 = vcmp.eq.s32.totalorder %v10180_v49, %v11634_v57 }
 0xefb   : > { %vm5669_vm2 = vcmp.eq.s32.totalorder %v10180_v49, %v11632_v63  ;;  %v4302_v22 = vadd.f32 %v4301_v16, %v4292_v42  ;;  %v4736_v16 = vsel %vm4731_vm8, %v9987_v17, 0.0  ;;  %v4932_v17 = vsel %vm11642_vm5, %v10043_v39, 0.0 }
 0xefc   : > { %v5053_v42 = vadd.f32 %v5052_v43, %v5043_v21  ;;  %vm11643_vm8 = vcmp.eq.s32.totalorder %v10180_v49, %v11631_v44  ;;  %v4737_v31 = vadd.f32 %v4736_v16, %v4727_v47  ;;  %v5684_v39 = vsel %vm11646_vm10, %v10068_v45, 0.0  ;;  %v11650_v45 = vld [vmem:[#allocation108_spill] sm:$0xff]  ;;  %v11668_v21 = vld [vmem:[#allocation26_spill] sm:$0xff] }
 0xefd   : > { %v4933_v28 = vadd.f32 %v4932_v17, %v4923_v30  ;;  %vm5719_vm10 = vcmp.eq.s32.totalorder %v10180_v49, %v11652_v8  ;;  %vm11653_vm5 = vcmp.eq.s32.totalorder %v10180_v49, %v11633_v5  ;;  %v4613_v5 = vsel %vm4608_vm0, %v10090_v62, 0.0  ;;  %v11675_v30 = vld [vmem:[#allocation147_spill] sm:$0xff]  ;;  %v11693_v8 = vld [vmem:[#allocation193_spill] sm:$0xff] }
 0xefe   : > { %v3973_v29 = vpop.permute.xlu1 %3972  ;;  %v5063_v60 = vadd.f32 %v5062_v4, %v5053_v42  ;;  %v4747_v44 = vadd.f32 %v4746_v58, %v4737_v31  ;;  %v4603_v7 = vsel %vm11653_vm5, %v10023_v35, 0.0  ;;  %v11658_v35 = vld [vmem:[#allocation179_spill] sm:$0xff]  ;;  %v7601_v17 = vunpack.i.h.bf16 %v11671_v0  ;;  %v11673_v42 = vld [vmem:[#allocation156_spill] sm:$0xff] }
 0xeff   : > { %v3975_v10 = vsel %vm3970_vm13, %v3973_v29, 0.0  ;;  %v3966_v29 = vadd.f32 %v3965_v61, %v3956_v24  ;;  %vm5689_vm13 = vcmp.eq.s32.totalorder %v10180_v49, %v11640_v38  ;;  %v5348_v61 = vsel %vm5343_vm4, %v10061_v11, 0.0 }
 0xf00   : > { %v4942_v57 = vsel %vm4937_vm3, %v11658_v35, 0.0  ;;  %v4757_v11 = vadd.f32 %v4756_v41, %v4747_v44  ;;  %v5694_v43 = vsel %vm5689_vm13, %v11664_v1, 0.0  ;;  %v4614_v55 = vadd.f32 %v4613_v5, %v4603_v7  ;;  %v11681_v7 = vld [vmem:[#allocation185_spill] sm:$0xff]  ;;  %v11684_v5 = vld [vmem:[#allocation28_spill] sm:$0xff]  ;;  %v11685_v35 = vld [vmem:[#allocation27_spill] sm:$0xff] }
 0xf01   : > { %v3976_v19 = vadd.f32 %v3975_v10, %v3966_v29  ;;  %v5349_v46 = vadd.f32 %v5348_v61, %v5338_v6  ;;  %v11667_v29 = vld [vmem:[#allocation173_spill] sm:$0xff]  ;;  %v11692_v6 = vld [vmem:[#allocation180_spill] sm:$0xff] }
 0xf02   : > { %v4634_v47 = vsel %vm4629_vm12, %v11667_v29, 0.0  ;;  %vm11682_vm12 = vcmp.eq.s32.totalorder %v10180_v49, %v11648_v18  ;;  %v11688_v18 = vld [vmem:[#allocation186_spill] sm:$0xff]  ;;  %v11696_v29 = vld [vmem:[#allocation191_spill] sm:$0xff] }
 0xf03   : > { %v4309_v20 = vpop.permute.xlu1 %4308  ;;  %v5368_v61 = vsel %vm11682_vm12, %v11681_v7, 0.0 }
 0xf04   : > { %v4311_v50 = vsel %vm4306_vm9, %v4309_v20, 0.0  ;;  %vm5353_vm9 = vcmp.eq.s32.totalorder %v10180_v49, %v11639_v26  ;;  %v11655_v20 = vld [vmem:[#allocation23_spill] sm:$0xff]  ;;  %v11666_v26 = vld [vmem:[#allocation144_spill] sm:$0xff] }
 0xf05   : > { %v4312_v14 = vadd.f32 %v4311_v50, %v4302_v22  ;;  %v11654_v22 = vld [vmem:[#allocation24_spill] sm:$0xff]  ;;  %v5358_v10 = vsel %vm5353_vm9, %v11662_v3, 0.0  ;;  %vm4639_vm0 = vcmp.eq.s32.totalorder %v10180_v49, %v11666_v26  ;;  %vm5373_vm9 = vcmp.eq.s32.totalorder %v10180_v49, %v11675_v30 }
 0xf06   : > { %v11656_v23 = vpack.c.bf16 %v11654_v22, %v11655_v20  ;;  %v11660_v50 = vld [vmem:[#allocation172_spill] sm:$0xff]  ;;  %v5359_v58 = vadd.f32 %v5358_v10, %v5349_v46  ;;  %v4645_v31 = vsel %vm4639_vm0, %v11677_v12, 0.0  ;;  %v11683_v22 = vld [vmem:[#allocation178_spill] sm:$0xff]  ;;  %v4666_v3 = vsel %vm4660_vm1, %v11692_v6, 0.0  ;;  %v11715_v6 = vld [vmem:[#allocation15_spill] sm:$0xff] }
 0xf07   : > { %v4322_v34 = vadd.f32 %v4321_v9, %v4312_v14  ;;  %v4624_v62 = vsel %vm4618_vm14, %v11660_v50, 0.0  ;;  %v4943_v14 = vadd.f32 %v4942_v57, %v4933_v28  ;;  %v11686_v57 = vpack.c.bf16 %v11684_v5, %v11685_v35  ;;  %v11695_v46 = vld [vmem:[#allocation190_spill] sm:$0xff]  ;;  %v11702_v12 = vld [vmem:[#allocation16_spill] sm:$0xff]  ;;  %v11709_v35 = vld [vmem:[#allocation33_spill] sm:$0xff] }
 0xf08   : > { %v3983_v2 = vpop.permute.xlu1 %3982  ;;  %v5724_v50 = vsel %vm5719_vm10, %v11688_v18, 0.0  ;;  %v11708_v5 = vld [vmem:[#allocation154_spill] sm:$0xff]  ;;  %vm11721_vm1 = vcmask 130048  }
 0xf09   : > { %v3985_v54 = vsel %vm11643_vm8, %v3983_v2, 0.0  ;;  %7033 = vmatmul.mubr.msk.f32.vlgmr.msra.gmra.mrb[24].mxu0 %vm11644_vm15, %v4322_v34  ;;  %vm4947_vm8 = vcmp.eq.s32.totalorder %v10180_v49, %v11649_v36  ;;  %vm4650_vm15 = vcmp.eq.s32.totalorder %v10180_v49, %v11650_v45  ;;  %v11669_v34 = vld [vmem:[#allocation25_spill] sm:$0xff]  ;;  %v4625_v2 = vadd.f32 %v4624_v62, %v4614_v55  ;;  %v11690_v45 = vld [vmem:[#allocation151_spill] sm:$0xff]  ;;  %vm11724_vm12 = vmmov %vm11721_vm1 }
 0xf0a   : > { %v3986_v40 = vadd.f32 %v3985_v54, %v3976_v19  ;;  %7297 = vmatpush3.bf16.msra.mxu0 %v10465_v27  ;;  %7065 = vmatprep.mubr.msk.f32.mxu0 %vm11519_vm11, %v11299_v32  ;;  %v5674_v27 = vsel %vm5669_vm2, %v10107_v37, 0.0  ;;  %v10708_v37 = vpop.permute.xlu0 %5637  ;;  %vm11657_vm2 = vcmask 130048   ;;  %v4952_v24 = vsel %vm4947_vm8, %v11659_v56, 0.0  ;;  %v11672_v19 = vld [vmem:[#allocation145_spill] sm:$0xff] }
 0xf0b   : > { %7298 = vmatprep.subr.bf16.mxu0 %v11518_v48  ;;  %v5685_v63 = vadd.f32 %v5684_v39, %v5674_v27  ;;  %vm11665_vm3 = vmmov %vm11657_vm2  ;;  %v4953_v38 = vadd.f32 %v4952_v24, %v4943_v14  ;;  %v11670_v4 = vpack.c.bf16 %v11668_v21, %v11669_v34  ;;  %vm4957_vm14 = vcmp.eq.s32.totalorder %v10180_v49, %v11672_v19  ;;  %v11676_v54 = vld [vmem:[#allocation149_spill] sm:$0xff]  ;;  %v11698_v19 = vld [vmem:[#allocation31_spill] sm:$0xff] }
 0xf0c   : > { %v10695_v51 = vpop.permute.xlu1 %5301  ;;  %7007 = vmatmul.mubr.msk.f32.vlgmr.msra.gmra.mrb[40].mxu1 %vm11651_vm7, %v3986_v40  ;;  %vm5709_vm13 = vcmp.eq.s32.totalorder %v10180_v49, %v11676_v54  ;;  %v11678_v40 = vld [vmem:[#allocation187_spill] sm:$0xff]  ;;  %v4635_v36 = vadd.f32 %v4634_v47, %v4625_v2  ;;  %v11680_v27 = vld [vmem:[#allocation181_spill] sm:$0xff]  ;;  %v4655_v20 = vsel %vm4650_vm15, %v11683_v22, 0.0  ;;  %v5369_v24 = vadd.f32 %v5368_v61, %v5359_v58  ;;  %v11699_v2 = vld [vmem:[#allocation30_spill] sm:$0xff] }
 0xf0d   : > { %7282 = vmatpush3.bf16.msra.mxu1 %v11656_v23  ;;  %7066 = vmatmul.mubr.msk.f32.vlgmr.msra.gmra.mrb[26].mxu0 %vm11657_vm2, %v5063_v60  ;;  %v5695_v16 = vadd.f32 %v5694_v43, %v5685_v63  ;;  %v4962_v41 = vsel %vm4957_vm14, %v11678_v40, 0.0  ;;  %v11679_v60 = vld [vmem:[#allocation189_spill] sm:$0xff]  ;;  %v5714_v44 = vsel %vm5709_vm13, %v11680_v27, 0.0  ;;  %vm5383_vm5 = vcmp.eq.s32.totalorder %v10180_v49, %v11690_v45  ;;  %v11694_v43 = vld [vmem:[#allocation184_spill] sm:$0xff]  ;;  %v11706_v61 = vld [vmem:[#allocation46_spill] sm:$0xff] }
 0xf0e   : > { %7300 = vmatpush3.bf16.msra.mxu0 %v10469_v15  ;;  %7039 = vmatprep.mubr.msk.f32.mxu1 %vm11519_vm11, %v11299_v32  ;;  %v11663_v15 = vld [vmem:[#allocation114_spill] sm:$0xff]  ;;  %v10777_v39 = vpop.permute.xlu0 %5641  ;;  %v5704_v28 = vsel %vm5699_vm6, %v11679_v60, 0.0  ;;  %v4963_v63 = vadd.f32 %v4962_v41, %v4953_v38  ;;  %v4646_v56 = vadd.f32 %v4645_v31, %v4635_v36  ;;  %v11689_v62 = vld [vmem:[#allocation157_spill] sm:$0xff]  ;;  %vm4977_vm8 = vcmp.eq.s32.totalorder %v10180_v49, %v11691_v53  ;;  %v11703_v40 = vld [vmem:[#allocation188_spill] sm:$0xff] }
 0xf0f   : > { %7283 = vmatprep.subr.bf16.mxu1 %v11518_v48  ;;  %7301 = vmatprep.subr.bf16.mxu0 %v11518_v48  ;;  %vm5729_vm4 = vcmp.eq.s32.totalorder %v10180_v49, %v11663_v15  ;;  %v5705_v23 = vadd.f32 %v5704_v28, %v5695_v16  ;;  %v4982_v55 = vsel %vm4977_vm8, %v11694_v43, 0.0  ;;  %v5378_v47 = vsel %vm5373_vm9, %v11696_v29, 0.0  ;;  %v11697_v16 = vld [vmem:[#allocation183_spill] sm:$0xff]  ;;  %v11704_v28 = vld [vmem:[#allocation58_spill] sm:$0xff] }
 0xf10   : > { %v10749_v9 = vpop.permute.xlu1 %5305  ;;  %7040 = vmatmul.mubr.msk.f32.vlgmr.msra.gmra.mrb[42].mxu1 %vm11665_vm3, %v4757_v11  ;;  %7084 = vmatprep.mubr.msk.f32.mxu0 %vm11519_vm11, %v11299_v32  ;;  %v11687_v11 = vld [vmem:[#allocation148_spill] sm:$0xff]  ;;  %v4656_v1 = vadd.f32 %v4655_v20, %v4646_v56  ;;  %v5734_v26 = vsel %vm5729_vm4, %v11695_v46, 0.0  ;;  %v5388_v38 = vsel %vm5383_vm5, %v11697_v16, 0.0  ;;  %v11700_v58 = vpack.c.bf16 %v11698_v19, %v11699_v2  ;;  %v11714_v45 = vld [vmem:[#allocation194_spill] sm:$0xff]  ;;  %v11718_v43 = vld [vmem:[#allocation203_spill] sm:$0xff] }
 0xf11   : > { %7285 = vmatpush3.bf16.msra.mxu1 %v11670_v4  ;;  %7058 = vmatprep.mubr.msk.f32.mxu1 %vm11519_vm11, %v11299_v32  ;;  %vm4967_vm6 = vcmp.eq.s32.totalorder %v10180_v49, %v11687_v11  ;;  %v5715_v10 = vadd.f32 %v5714_v44, %v5705_v23  ;;  %v7600_v15 = vunpack.i.l.bf16 %v11671_v0  ;;  %vm5393_vm15 = vcmp.eq.s32.totalorder %v10180_v49, %v11701_v33  ;;  %v11705_v44 = vld [vmem:[#allocation150_spill] sm:$0xff]  ;;  %v11707_v20 = vld [vmem:[#allocation196_spill] sm:$0xff] }
 0xf12   : > { %7303 = vmatpush3.bf16.msra.mxu0 %v11673_v42  ;;  %7286 = vmatprep.subr.bf16.mxu1 %v11518_v48  ;;  %v4972_v14 = vsel %vm4967_vm6, %v11693_v8, 0.0  ;;  %v10827_v4 = vpop.permute.xlu0 %5657  ;;  %v4667_v54 = vadd.f32 %v4666_v3, %v4656_v1  ;;  %v5379_v30 = vadd.f32 %v5378_v47, %v5369_v24  ;;  %v5398_v41 = vsel %vm5393_vm15, %v11703_v40, 0.0  ;;  %v11713_v24 = vld [vmem:[#allocation200_spill] sm:$0xff]  ;;  %v11722_v47 = vld [vmem:[#allocation75_spill] sm:$0xff] }
 0xf13   : > { %7304 = vmatprep.subr.bf16.mxu0 %v11518_v48  ;;  %v4973_v21 = vadd.f32 %v4972_v14, %v4963_v63  ;;  %v5725_v34 = vadd.f32 %v5724_v50, %v5715_v10  ;;  %vm5599_vm7 = vcmp.eq.s32.totalorder %v10180_v49, %v10529_v13  ;;  %v7611_v36 = vunpack.i.h.bf16 %v11704_v28  ;;  %v11716_v10 = vld [vmem:[#allocation94_spill] sm:$0xff]  ;;  %v11717_v13 = vld [vmem:[#allocation153_spill] sm:$0xff] }
 0xf14   : > { %v7610_v27 = vunpack.i.l.bf16 %v11704_v28  ;;  %vm4671_vm10 = vcmp.eq.s32.totalorder %v10180_v49, %v11705_v44  ;;  %v5389_v7 = vadd.f32 %v5388_v38, %v5379_v30  ;;  %v7576_v63 = vunpack.i.h.bf16 %v11706_v61  ;;  %v11725_v28 = vld [vmem:[#allocation116_spill] sm:$0xff] }
 0xf15   : > { %7288 = vmatpush3.bf16.msra.mxu1 %v11686_v57  ;;  %v10797_v52 = vpop.permute.xlu1 %5311  ;;  %v4983_v31 = vadd.f32 %v4982_v55, %v4973_v21  ;;  %v5735_v60 = vadd.f32 %v5734_v26, %v5725_v34  ;;  %v7575_v22 = vunpack.i.l.bf16 %v11706_v61  ;;  %v4676_v23 = vsel %vm4671_vm10, %v11707_v20, 0.0  ;;  %v11710_v57 = vld [vmem:[#allocation32_spill] sm:$0xff]  ;;  %v11723_v34 = vld [vmem:[#allocation197_spill] sm:$0xff] }
 0xf16   : > { %7306 = vmatpush3.bf16.msra.mxu0 %v11689_v62  ;;  %7289 = vmatprep.subr.bf16.mxu1 %v11518_v48  ;;  %vm5739_vm2 = vcmp.eq.s32.totalorder %v10180_v49, %v11708_v5  ;;  %v11711_v11 = vpack.c.bf16 %v11709_v35, %v11710_v57  ;;  %vm11712_vm4 = vcmask 523264   ;;  %v4677_v50 = vadd.f32 %v4676_v23, %v4667_v54  ;;  %v7855_v14 = vpop.permute.xlu0 %7854  ;;  %v11729_v23 = vld [vmem:[#allocation96_spill] sm:$0xff]  ;;  %v11731_v35 = vld [vmem:[#allocation202_spill] sm:$0xff] }
 0xf17   : > { %7307 = vmatprep.subr.bf16.mxu0 %v11518_v48  ;;  %v5744_v18 = vsel %vm5739_vm2, %v11713_v24, 0.0  ;;  %v5399_v62 = vadd.f32 %v5398_v41, %v5389_v7  ;;  %v5604_v53 = vsel %vm5599_vm7, %v11714_v45, 0.0  ;;  %v7311_v3 = vpack.c.bf16 %v7601_v17, %v7600_v15  ;;  %vm11719_vm14 = vmmov %vm11712_vm4  ;;  %v11720_v17 = vld [vmem:[#allocation198_spill] sm:$0xff]  ;;  %v11727_v7 = vld [vmem:[#allocation92_spill] sm:$0xff] }
 0xf18   : > { %vm5589_vm3 = vcmp.eq.s32.totalorder %v10180_v49, %v11716_v10  ;;  %v5745_v8 = vadd.f32 %v5744_v18, %v5735_v60  ;;  %v7329_v1 = vpack.c.bf16 %v7611_v36, %v7610_v27  ;;  %vm5403_vm0 = vcmp.eq.s32.totalorder %v10180_v49, %v11717_v13  ;;  %v11726_v27 = vld [vmem:[#allocation99_spill] sm:$0xff]  ;;  %v11736_v10 = vld [vmem:[#allocation17_spill] sm:$0xff] }
 0xf19   : > { %7291 = vmatpush3.bf16.msra.mxu1 %v11700_v58  ;;  %v10832_v42 = vpop.permute.xlu1 %7834  ;;  %v5594_v55 = vsel %vm5589_vm3, %v11718_v43, 0.0  ;;  %v7314_v0 = vpack.c.bf16 %v7576_v63, %v7575_v22  ;;  %v5408_v46 = vsel %vm5403_vm0, %v11720_v17, 0.0  ;;  %vm5609_vm9 = vcmp.eq.s32.totalorder %v10180_v49, %v11722_v47  ;;  %v11728_v63 = vld [vmem:[#allocation192_spill] sm:$0xff] }
 0xf1a   : > { %7309 = vmatpush3.bf16.msra.mxu0 %v11702_v12  ;;  %7292 = vmatprep.subr.bf16.mxu1 %v11518_v48  ;;  %v5605_v26 = vadd.f32 %v5604_v53, %v5594_v55  ;;  %v5409_v16 = vadd.f32 %v5408_v46, %v5399_v62  ;;  %v5614_v19 = vsel %vm5609_vm9, %v11723_v34, 0.0  ;;  %vm5619_vm13 = vcmp.eq.s32.totalorder %v10180_v49, %v10590_v59  ;;  %v7865_v59 = vpop.permute.xlu0 %7864  ;;  %v11733_v62 = vld [vmem:[#allocation77_spill] sm:$0xff]  ;;  %v11734_v53 = vld [vmem:[#allocation118_spill] sm:$0xff]  ;;  %vm11739_vm9 = vmmov %vm11719_vm14 }
 0xf1b   : > { %7325 = vmatprep.subr.bf16.mxu0 %v11518_v48  ;;  %v7837_v2 = vunpack.i.h.bf16 %v10832_v42  ;;  %v7836_v58 = vunpack.i.l.bf16 %v10832_v42  ;;  %v5624_v15 = vsel %vm5619_vm13, %v10648_v25, 0.0  ;;  %v7857_v33 = vunpack.i.h.bf16 %v7855_v14 }
 0xf1c   : > { %v7856_v54 = vunpack.i.l.bf16 %v7855_v14  ;;  %v5615_v12 = vadd.f32 %v5614_v19, %v5605_v26  ;;  %v7867_v41 = vunpack.i.h.bf16 %v7865_v59  ;;  %v7866_v60 = vunpack.i.l.bf16 %v7865_v59 }
 0xf1d   : > { %7294 = vmatpush3.bf16.msra.mxu1 %v11711_v11  ;;  %7085 = vmatmul.mubr.msk.f32.vlgmr.msra.gmra.mrb[26].mxu0 %vm11712_vm4, %v4983_v31  ;;  %v10856_v56 = vpop.permute.xlu1 %5315  ;;  %v7317_v25 = vpack.c.bf16 %v7837_v2, %v7836_v58  ;;  %vm5629_vm6 = vcmp.eq.s32.totalorder %v10180_v49, %v11725_v28  ;;  %vm5639_vm5 = vcmp.eq.s32.totalorder %v10180_v49, %v10708_v37  ;;  %v11730_v37 = vld [vmem:[#allocation90_spill] sm:$0xff]  ;;  %v11732_v11 = vld [vmem:[#allocation195_spill] sm:$0xff]  ;;  %vm11741_vm13 = vcmask 64512  }
 0xf1e   : > { %7327 = vmatpush3.bf16.msra.mxu0 %v11715_v6  ;;  %7310 = vmatprep.subr.bf16.mxu1 %v11518_v48  ;;  %v5625_v42 = vadd.f32 %v5624_v15, %v5615_v12  ;;  %v7335_v40 = vpack.c.bf16 %v7857_v33, %v7856_v54  ;;  %v5644_v44 = vsel %vm5639_vm5, %v10777_v39, 0.0  ;;  %v7338_v20 = vpack.c.bf16 %v7867_v41, %v7866_v60  ;;  %v11735_v6 = vld [vmem:[#allocation199_spill] sm:$0xff]  ;;  %v5939_v41 = vld [vmem:[%s8211_s27 + $0x10] sm:$0xff] }
 0xf1f   : > { %7117 = vmatprep.mubr.msk.f32.mxu0 %vm11519_vm11, %v11299_v32  ;;  %7328 = vmatprep.subr.bf16.mxu0 %v11518_v48  ;;  %vm5273_vm8 = vcmp.eq.s32.totalorder %v10180_v49, %v11729_v23  ;;  %vm5253_vm15 = vcmp.eq.s32.totalorder %v10180_v49, %v11730_v37  ;;  %vm5283_vm7 = vcmp.eq.s32.totalorder %v10180_v49, %v11733_v62  ;;  %v5940_v28 = vld [vmem:[%s8211_s27 + $0x18] sm:$0xff]  ;;  %vm11743_vm5 = vcmask 261120  }
 0xf20   : > { %7059 = vmatmul.mubr.msk.f32.vlgmr.msra.gmra.mrb[42].mxu1 %vm11719_vm14, %v4677_v50  ;;  %v5258_v57 = vsel %vm5253_vm15, %v11731_v35, 0.0  ;;  %v5278_v24 = vsel %vm5273_vm8, %v11732_v11, 0.0  ;;  %vm5649_vm10 = vcmp.eq.s32.totalorder %v10180_v49, %v11734_v53  ;;  %vm5659_vm4 = vcmp.eq.s32.totalorder %v10180_v49, %v10827_v4  ;;  %vm11745_vm8 = vmmov %vm11724_vm12 }
 0xf21   : > { %7312 = vmatpush3.bf16.msra.mxu1 %v7311_v3  ;;  %7118 = vmatmul.mubr.msk.f32.vlgmr.msra.gmra.mrb[28].mxu0 %vm11721_vm1, %v5745_v8  ;;  %v7841_v29 = vpop.permute.xlu1 %7840  ;;  %v5288_v3 = vsel %vm5283_vm7, %v11735_v6, 0.0  ;;  %v5654_v8 = vsel %vm5649_vm10, %v11736_v10, 0.0  ;;  %vm5303_vm3 = vcmp.eq.s32.totalorder %v10180_v49, %v10695_v51  ;;  %vm5313_vm0 = vcmp.eq.s32.totalorder %v10180_v49, %v10797_v52  ;;  %vm11747_vm7 = vmmov %vm11743_vm5  ;;  %v11748_v6 = vld [vmem:[#allocation56_spill] sm:$0xff]  ;;  %v11749_v10 = vld [vmem:[#allocation57_spill] sm:$0xff] }
 0xf22   : > { %v7843_v38 = vunpack.i.h.bf16 %v7841_v29  ;;  %v7842_v21 = vunpack.i.l.bf16 %v7841_v29  ;;  %7330 = vmatpush3.bf16.msra.mxu0 %v7329_v1  ;;  %7091 = vmatprep.mubr.msk.f32.mxu1 %vm11519_vm11, %v11299_v32  ;;  %v11737_v1 = vld [vmem:[#allocation155_spill] sm:$0xff]  ;;  %v5308_v47 = vsel %vm5303_vm3, %v10749_v9, 0.0  ;;  %vm11750_vm10 = vmmov %vm11743_vm5 }
 0xf23   : > { %7313 = vmatprep.subr.bf16.mxu1 %v11518_v48  ;;  %7331 = vmatprep.subr.bf16.mxu0 %v11518_v48  ;;  %vm5293_vm2 = vcmp.eq.s32.totalorder %v10180_v49, %v11737_v1 }
 0xf24   : > { %v7332_v30 = vpack.c.bf16 %v7843_v38, %v7842_v21  ;;  %7092 = vmatmul.mubr.msk.f32.vlgmr.msra.gmra.mrb[44].mxu1 %vm11724_vm12, %v5409_v16  ;;  %7136 = vmatprep.mubr.msk.f32.mxu0 %vm11519_vm11, %v11299_v32  ;;  %v5318_v38 = vsel %vm5313_vm0, %v10856_v56, 0.0 }
 0xf25   : > { %7315 = vmatpush3.bf16.msra.mxu1 %v7314_v0  ;;  %v5322_v31 = vpop.permute.xlu1 %5321  ;;  %7110 = vmatprep.mubr.msk.f32.mxu1 %vm11519_vm11, %v11299_v32  ;;  %v5634_v32 = vsel %vm5629_vm6, %v11726_v27, 0.0  ;;  %vm5263_vm11 = vcmp.eq.s32.totalorder %v10180_v49, %v11727_v7  ;;  %v11738_v0 = vld [vmem:[#allocation201_spill] sm:$0xff]  ;;  %vm11742_vm6 = vcmask 195584  }
 0xf26   : > { %7333 = vmatpush3.bf16.msra.mxu0 %v7332_v30  ;;  %7316 = vmatprep.subr.bf16.mxu1 %v11518_v48  ;;  %v5635_v61 = vadd.f32 %v5634_v32, %v5625_v42  ;;  %v5268_v22 = vsel %vm5263_vm11, %v11728_v63, 0.0  ;;  %v5298_v17 = vsel %vm5293_vm2, %v11738_v0, 0.0  ;;  %vm5323_vm1 = vcmp.eq.s32.totalorder %v10180_v49, %v5322_v31  ;;  %vm11744_vm11 = vmmov %vm11741_vm13 }
 0xf27   : > { %7334 = vmatprep.subr.bf16.mxu0 %v11518_v48  ;;  %v5269_v45 = vadd.f32 %v5268_v22, %v5258_v57  ;;  %vm11746_vm15 = vmmov %vm11742_vm6 }
 0xf28   : > { %v5645_v5 = vadd.f32 %v5644_v44, %v5635_v61  ;;  %vm11751_vm2 = vmmov %vm11743_vm5 }
 0xf29   : > { %7318 = vmatpush3.bf16.msra.mxu1 %v7317_v25  ;;  %v5326_v36 = vpop.permute.xlu1 %5325  ;;  %v5279_v13 = vadd.f32 %v5278_v24, %v5269_v45  ;;  %v5937_v25 = vld [vmem:[%s8211_s27] sm:$0xff]  ;;  %vm11753_vm3 = vmmov %vm11751_vm2 }
 0xf2a   : > { %7336 = vmatpush3.bf16.msra.mxu0 %v7335_v40  ;;  %7319 = vmatprep.subr.bf16.mxu1 %v11518_v48  ;;  %v5655_v43 = vadd.f32 %v5654_v8, %v5645_v5  ;;  %v5328_v51 = vsel %vm5323_vm1, %v5326_v36, 0.0  ;;  %v5938_v40 = vld [vmem:[%s8211_s27 + $0x8] sm:$0xff]  ;;  %v7344_v36 = vpack.c.bf16 %v5940_v28, %v5939_v41  ;;  %vm11755_vm0 = vmmov %vm11751_vm2 }
 0xf2b   : > { %7337 = vmatprep.subr.bf16.mxu0 %v11518_v48  ;;  %v5289_v26 = vadd.f32 %v5288_v3, %v5279_v13  ;;  %v7340_v60 = vpack.c.bf16 %v5938_v40, %v5937_v25  ;;  %v11754_v25 = vld [vmem:[#allocation14_spill] sm:$0xff]  ;;  %vm11757_vm1 = vmmov %vm11739_vm9 }
 0xf2c   : > { %v6057_v40 = vsub.s32 2, %v11754_v25  ;;  %v6063_v41 = vsub.s32 3, %v11754_v25 }
 0xf2d   : > { %v7849_v39 = vpop.permute.xlu1 %7848  ;;  %v5299_v16 = vadd.f32 %v5298_v17, %v5289_v26 }
 0xf2e   : > { %v7851_v18 = vunpack.i.h.bf16 %v7849_v39  ;;  %v7850_v50 = vunpack.i.l.bf16 %v7849_v39  ;;  %7339 = vmatpush3.bf16.msra.mxu0 %v7338_v20 }
 0xf2f   : > { %v5309_v19 = vadd.f32 %v5308_v47, %v5299_v16 }
 0xf30   : > { %v7320_v14 = vpack.c.bf16 %v7851_v18, %v7850_v50  ;;  %v6556_v18 = vld [vmem:[%s8211_s27 + $0x20] ss:$0 sm:$0xff] }
 0xf31   : > { %v5662_v55 = vpop.permute.xlu1 %5661  ;;  %v5319_v58 = vadd.f32 %v5318_v38, %v5309_v19  ;;  %v6068_v38 = vld [vmem:[%s8216_s25 + $0x8] sm:$0xff]  ;;  %v6070_v19 = vld [vmem:[%s8216_s25 + $0x18] sm:$0xff] }
 0xf32   : > { %v5664_v46 = vsel %vm5659_vm4, %v5662_v55, 0.0  ;;  %7321 = vmatpush3.bf16.msra.mxu1 %v7320_v14  ;;  %vm11752_vm4 = vmmov %vm11751_vm2 }
 0xf33   : > { %v5665_v29 = vadd.f32 %v5664_v46, %v5655_v43  ;;  %7322 = vmatprep.subr.bf16.mxu1 %v11518_v48  ;;  %v5329_v48 = vadd.f32 %v5328_v51, %v5319_v58  ;;  %v6160_v58 = vld [vmem:[%s8221_s18 + $0x8] sm:$0xff] }
 0xf35   : > { %v7860_v4 = vpop.permute.xlu1 %7859  ;;  %7137 = vmatmul.mubr.msk.f32.vlgmr.msra.gmra.mrb[28].mxu0 %vm11719_vm14, %v5665_v29  ;;  %vm11756_vm14 = vmmov %vm11755_vm0 }
 0xf36   : > { %v7862_v21 = vunpack.i.h.bf16 %v7860_v4  ;;  %v7861_v34 = vunpack.i.l.bf16 %v7860_v4  ;;  %v6067_v4 = vld [vmem:[%s8216_s25] sm:$0xff] }
 0xf38   : > { %v7323_v2 = vpack.c.bf16 %v7862_v21, %v7861_v34  ;;  %v6069_v21 = vld [vmem:[%s8216_s25 + $0x10] sm:$0xff]  ;;  %v7348_v34 = vpack.c.bf16 %v6068_v38, %v6067_v4 }
 0xf39   : > { %v7352_v51 = vpack.c.bf16 %v6070_v19, %v6069_v21 }
 0xf3a   : > { %7324 = vmatpush3.bf16.msra.mxu1 %v7323_v2  ;;  %v6159_v2 = vld [vmem:[%s8221_s18] sm:$0xff] }
 0xf3b   : > { %7341 = vmatprep.subr.bf16.mxu1 %v7340_v60 }
 0xf3d   : > { %7111 = vmatmul.mubr.msk.f32.vlgmr.msra.gmra.mrb[44].mxu1 %vm11739_vm9, %v5329_v48  ;;  %v6161_v48 = vld [vmem:[%s8221_s18 + $0x10] sm:$0xff]  ;;  %vm11758_vm9 = vmmov %vm11757_vm1 }
 0xf3e   : > { %7343 = vmatpush3.bf16.msra.mxu1 %v7340_v60  ;;  %v10973_v60 = vld [vmem:[%s8186_s17] sm:$0x3f]  ;;  %s11763_s17 = sld [smem:[#allocation7_spill]] }
 0xf3f   : > { %7345 = vmatprep.subr.bf16.mxu1 %v7344_v36  ;;  %v6058_v28 = vrot.slane %v10973_v60, %v6057_v40 }
 0xf42   : > { %7347 = vmatpush3.bf16.msra.mxu1 %v7344_v36 }
 0xf43   : > { %7349 = vmatprep.subr.bf16.mxu1 %v7348_v34 }
 0xf5b   : > { %v3557_v9 = vpop.f32.mrb[20].mxu0 }
 0xf5c   : > { %v6956_v52 = vpop.f32.mrb[21].mxu0 }
 0xf5d   : > { %v6162_v52 = vld [vmem:[%s8221_s18 + $0x18] sm:$0xff] }
 0xf8e   : > { %v3903_v15 = vpop.f32.mrb[22].mxu0 }
 0xf8f   : > { %4580 = vrot.lane.b32.xlu1 %v3903_v15, %s11253_s19  ;;  %v6982_v56 = vpop.f32.mrb[23].mxu0  ;;  %v7360_v15 = vpack.c.bf16 %v6162_v52, %v6161_v48 }
 0xf90   : > { %v6163_v56 = vld [vmem:[%s8221_s18 + $0x20] sm:$0xff] }
 0xfdc   : > { %v4575_v33 = vpop.f32.mrb[24].mxu0 }
 0xfdd   : > { %v7034_v54 = vpop.f32.mrb[25].mxu0 }
 0xfdf   : > { %v4239_v49 = vpop.f32.mrb[40].mxu1 }
 0xfe0   : > { %4584 = vrot.lane.b32.xlu0 %v4239_v49, %s8029_s28  ;;  %v7008_v30 = vpop.f32.mrb[41].mxu1 }
 0xfe4   : > { %4588 = vrot.lane.b32.xlu0 %v4575_v33, %s11740_s6  ;;  %v6164_v33 = vld [vmem:[%s8221_s18 + $0x28] sm:$0xff] }
 0xfe5   : > { %v7364_v54 = vpack.c.bf16 %v6164_v33, %v6163_v56 }
 0xff0   : > { %v5246_v12 = vpop.f32.mrb[26].mxu0 }
 0xff1   : > { %5923 = vrot.lane.b32.xlu1 %v5246_v12, %s11253_s19  ;;  %v7086_v59 = vpop.f32.mrb[27].mxu0 }
 0xff3   : > { %v4900_v31 = vpop.f32.mrb[42].mxu1 }
 0xff4   : > { %v7060_v42 = vpop.f32.mrb[43].mxu1 }
0x1001   : > { %v4581_v61 = vpop.permute.xlu1 %4580 }
0x1002   : > { %v4591_v22 = vsel %vm11741_vm13, %v3557_v9, %v4581_v61  ;;  %v7356_v9 = vpack.c.bf16 %v6160_v58, %v6159_v2  ;;  %vm11759_vm13 = vmmov %vm11755_vm0  ;;  %v6283_v2 = vsub.s32 4, %v11754_v25  ;;  %v6289_v58 = vsub.s32 5, %v11754_v25 }
0x1004   : > { %7357 = vmatprep.subr.bf16.mxu0 %v7356_v9  ;;  %v6284_v48 = vrot.slane %v10973_v60, %v6283_v2  ;;  %v6290_v56 = vrot.slane %v10973_v60, %v6289_v58 }
0x1005   : > { %7359 = vmatpush3.bf16.msra.mxu0 %v7356_v9 }
0x1006   : > { %7361 = vmatprep.subr.bf16.mxu0 %v7360_v15 }
0x1008   : > { %v5918_v27 = vpop.f32.mrb[28].mxu0 }
0x1009   : > { %5931 = vrot.lane.b32.xlu0 %v5918_v27, %s11740_s6  ;;  %v7138_v32 = vpop.f32.mrb[29].mxu0  ;;  %7363 = vmatpush3.bf16.msra.mxu0 %v7360_v15 }
0x100a   : > { %7365 = vmatprep.subr.bf16.mxu0 %v7364_v54 }
0x100d   : > { %7367 = vmatpush3.bf16.msra.mxu0 %v7364_v54 }
0x1010   : > { %v5582_v44 = vpop.f32.mrb[44].mxu1 }
0x1011   : > { %v7112_v7 = vpop.f32.mrb[45].mxu1  ;;  %5927 = vrot.lane.b32.xlu1 %v5582_v44, %s8029_s28 }
0x1012   : > { %v6064_v7 = vrot.slane %v10973_v60, %v6063_v41 }
0x1052   : > { %v4585_v63 = vpop.permute.xlu0 %4584 }
0x1053   : > { %v4592_v20 = vsel %vm11724_vm12, %v4591_v22, %v4585_v63  ;;  %vm11760_vm12 = vmmov %vm11755_vm0 }
0x1056   : > { %v4589_v23 = vpop.permute.xlu0 %4588 }
0x1057   : > { %v4593_v37 = vsel %vm11742_vm6, %v4592_v20, %v4589_v23  ;;  %v6165_v23 = vld [vmem:[%s8221_s18 + $0x30] sm:$0xff]  ;;  %vm11761_vm6 = vmmov %vm11755_vm0 }
0x1058   : > { %7147 = vmatprep.mubr.msk.f32.mxu1 %vm11743_vm5, %v4593_v37  ;;  %v6166_v37 = vld [vmem:[%s8221_s18 + $0x38] sm:$0xff]  ;;  %vm11762_vm5 = vmmov %vm11755_vm0 }
0x1063   : > { %v5924_v5 = vpop.permute.xlu1 %5923 }
0x1064   : > { %v5934_v39 = vsel %vm11744_vm11, %v4900_v31, %v5924_v5  ;;  %v7368_v5 = vpack.c.bf16 %v6166_v37, %v6165_v23  ;;  %vm11766_vm11 = vmmov %vm11755_vm0 }
0x1066   : > { %7369 = vmatprep.subr.bf16.mxu0 %v7368_v5 }
0x1067   : > { %7371 = vmatpush3.bf16.msra.mxu0 %v7368_v5 }
0x107b   : > { %v5932_v57 = vpop.permute.xlu0 %5931 }
0x1083   : > { %v5928_v35 = vpop.permute.xlu1 %5927 }
0x1084   : > { %v5935_v11 = vsel %vm11745_vm8, %v5934_v39, %v5928_v35  ;;  %v6559_v39 = vld [vmem:[%s8216_s25 + $0x20] ss:$0 sm:$0xff]  ;;  %s6570_s25 = sshll.u32 %s8151_s29, 8  ;;  %vm11767_vm8 = vmmov %vm11755_vm0  ;;  %s11770_s29 = sand.u32 1, %s11763_s17  }
0x1085   : > { %v5936_v24 = vsel %vm11746_vm15, %v5935_v11, %v5932_v57  ;;  %s10998_s24 = scalar_lea.hbm %s11765_s14, %s6570_s25  ;;  %vm11768_vm15 = vmmov %vm11755_vm0  ;;  %s11010_s13 = scalar_lea.sflag [#allocation4], %s11770_s29 }
0x1086   : > { %7148 = vmatmul.mubr.msk.f32.vlgmr.msra.gmra.mrb[46].mxu1 %vm11747_vm7, %v5936_v24  ;;  %vm11769_vm7 = vmmov %vm11755_vm0 }
0x1087   : > { %7351 = vmatpush3.bf16.msra.mxu1 %v7348_v34 }
0x1088   : > { %7353 = vmatprep.subr.bf16.mxu1 %v7352_v51 }
0x108b   : > { %7355 = vmatpush3.bf16.msra.mxu1 %v7352_v51 }
0x1159   : > { %v7149_v50 = vpop.f32.mrb[46].mxu1 }
0x115a   : > { %v6024_v62 = vadd.f32 %v7149_v50, %v6556_v18  ;;  %v6018_v45 = vpop.f32.mrb[47].mxu1 }
0x115b   : > { %v6019_v53 = vadd.f32 %v6556_v18, %v6018_v45 }
0x115c   : > { %v6028_v3 = vadd.f32 %v6024_v62, %v11748_v6  ;;  %v6562_v62 = vld [vmem:[%s8221_s18 + $0x40] ss:$0 sm:$0xff]  ;;  %s6311_s18 = sshll.u32 %s8223_s20, 4  ;;  %s11000_s18 = int_to_ptr.vmem [resolvable:$true] %s6311_s18 }
0x115d   : > { %v6027_v8 = vadd.f32 %v6019_v53, %v11749_v10  ;;  %s7954_s16 = scalar_lea.vmem %s11000_s18, 256  ;;  %p7961_p1 = scmp.lt.s32.totalorder %s11000_s18, %s7959_s22 }
0x115e   : > { %v6032_v14 = vsel %vm11750_vm10, %v6028_v3, 0.0  ;;  %p7955_p12 = scmp.ne.s32.totalorder %s11000_s18, %s7954_s16  ;;  %p7962_p2 = scmp.lt.s32.totalorder %s7960_s26, %s7954_s16 }
0x115f   : > { %6033 = vadd.xlane.f32.xlu0 %v6032_v14  ;;  %v6029_v1 = vsel %vm11751_vm2, %v6027_v8, 0.0 }
0x1160   : > { %6030 = vadd.xlane.f32.xlu1 %v6029_v1  ;;  %p7956_p13 = pnand %p7955_p12, %p8168_p5  ;;  %p7963_p3 = por %p7962_p2, %p7961_p1 }
0x1162   : > { %p7957_p0 = pneg %p7956_p13 }
0x1164   : > { %p7964_p4 = pnand %p7963_p3, %p7957_p0 }
0x11ec   : > { %v6034_v13 = vpop.xlane.xlu0 %6033 }
0x11ed   : > { %v6036_v43 = vmul.f32 0.03125, %v6034_v13  ;;  %v6031_v55 = vpop.xlane.xlu1 %6030 }
0x11ee   : > { %v6035_v0 = vmul.f32 0.03125, %v6031_v55 }
0x11ef   : > { %v6038_v17 = vsub.f32 %v6028_v3, %v6036_v43 }
0x11f0   : > { %v6037_v46 = vsub.f32 %v6027_v8, %v6035_v0 }
0x11f1   : > { %v6040_v26 = vmul.f32 %v6038_v17, %v6038_v17 }
0x11f2   : > { %v6039_v29 = vmul.f32 %v6037_v46, %v6037_v46 }
0x11f3   : > { %v6044_v47 = vsel %vm11752_vm4, %v6040_v26, 0.0 }
0x11f4   : > { %6045 = vadd.xlane.f32.xlu1 %v6044_v47  ;;  %v6041_v16 = vsel %vm11753_vm3, %v6039_v29, 0.0 }
0x11f5   : > { %6042 = vadd.xlane.f32.xlu0 %v6041_v16 }
0x1281   : > { %v6046_v49 = vpop.xlane.xlu1 %6045 }
0x1282   : > { %v6048_v30 = vmul.f32 0.03125, %v6046_v49  ;;  %v6043_v12 = vpop.xlane.xlu0 %6042 }
0x1283   : > { %v6047_v59 = vmul.f32 0.03125, %v6043_v12 }
0x1284   : > { %v6050_v31 = vadd.f32 1e-05, %v6048_v30 }
0x1285   : > { %v6049_v42 = vadd.f32 1e-05, %v6047_v59 }
0x1286   : > { %7941 = vrsqrt.f32 %v6050_v31 }
0x1287   : > { %7943 = vrsqrt.f32 %v6049_v42 }
0x1290   : > { %v7942_v36 = vpop.eup %7941 }
0x1291   : > { %v7944_v27 = vpop.eup %7943  ;;  %v6054_v32 = vmul.f32 %v7942_v36, %v6038_v17 }
0x1292   : > { %v6053_v44 = vmul.f32 %v7944_v27, %v6037_v46 }
0x1293   : > { %v6060_v61 = vmul.f32 %v6058_v28, %v6054_v32 }
0x1294   : > { %v6059_v63 = vmul.f32 %v6058_v28, %v6053_v44 }
0x1295   : > { %v6066_v20 = vadd.f32 %v6064_v7, %v6060_v61 }
0x1296   : > { %v6065_v22 = vadd.f32 %v6064_v7, %v6059_v63 }
0x1298   : > { %7158 = vmatprep.mubr.msk.f32.mxu1 %vm11755_vm0, %v6065_v22 }
0x1299   : > { %7159 = vmatmul.mubr.msk.f32.vlgmr.msra.gmra.mrb[48].mxu1 %vm11756_vm14, %v6066_v20 }
0x136c   : > { %v7160_v35 = vpop.f32.mrb[48].mxu1 }
0x136d   : > { %v6154_v57 = vadd.f32 %v7160_v35, %v6559_v39  ;;  %v6148_v11 = vpop.f32.mrb[49].mxu1 }
0x136e   : > { %v6149_v24 = vadd.f32 %v6559_v39, %v6148_v11 }
0x136f   : > { %v6158_v50 = vmax.f32 %v6154_v57, 0.0 }
0x1370   : > { %v6157_v18 = vmax.f32 %v6149_v24, 0.0 }
0x1372   : > { %7177 = vmatprep.mubr.msk.f32.mxu0 %vm11757_vm1, %v6157_v18 }
0x1373   : > { %7178 = vmatmul.mubr.msk.f32.vlgmr.msra.gmra.mrb[30].mxu0 %vm11758_vm9, %v6158_v50 }
0x1446   : > { %v7179_v45 = vpop.f32.mrb[30].mxu0 }
0x1447   : > { %v6250_v53 = vadd.f32 %v7179_v45, %v6562_v62  ;;  %v6244_v6 = vpop.f32.mrb[31].mxu0 }
0x1448   : > { %v6245_v3 = vadd.f32 %v6562_v62, %v6244_v6 }
0x1449   : > { %v6254_v10 = vadd.f32 %v6250_v53, %v6066_v20 }
0x144a   : > { %v6253_v8 = vadd.f32 %v6245_v3, %v6065_v22 }
0x144b   : > { %v6258_v14 = vsel %vm11759_vm13, %v6254_v10, 0.0 }
0x144c   : > { %6259 = vadd.xlane.f32.xlu1 %v6258_v14  ;;  %v6255_v1 = vsel %vm11760_vm12, %v6253_v8, 0.0 }
0x144d   : > { %6256 = vadd.xlane.f32.xlu0 %v6255_v1 }
0x14d9   : > { %v6260_v13 = vpop.xlane.xlu1 %6259 }
0x14da   : > { %v6262_v43 = vmul.f32 0.03125, %v6260_v13  ;;  %v6257_v55 = vpop.xlane.xlu0 %6256 }
0x14db   : > { %v6261_v0 = vmul.f32 0.03125, %v6257_v55 }
0x14dc   : > { %v6264_v17 = vsub.f32 %v6254_v10, %v6262_v43 }
0x14dd   : > { %v6263_v46 = vsub.f32 %v6253_v8, %v6261_v0 }
0x14de   : > { %v6266_v26 = vmul.f32 %v6264_v17, %v6264_v17 }
0x14df   : > { %v6265_v29 = vmul.f32 %v6263_v46, %v6263_v46 }
0x14e0   : > { %v6270_v47 = vsel %vm11761_vm6, %v6266_v26, 0.0 }
0x14e1   : > { %6271 = vadd.xlane.f32.xlu1 %v6270_v47  ;;  %v6267_v16 = vsel %vm11762_vm5, %v6265_v29, 0.0 }
0x14e2   : > { %6268 = vadd.xlane.f32.xlu0 %v6267_v16 }
0x156e   : > { %v6272_v4 = vpop.xlane.xlu1 %6271 }
0x156f   : > { %v6274_v38 = vmul.f32 0.03125, %v6272_v4  ;;  %v6269_v21 = vpop.xlane.xlu0 %6268 }
0x1570   : > { %v6273_v34 = vmul.f32 0.03125, %v6269_v21 }
0x1571   : > { %v6276_v19 = vadd.f32 1e-05, %v6274_v38 }
0x1572   : > { %v6275_v51 = vadd.f32 1e-05, %v6273_v34 }
0x1573   : > { %7945 = vrsqrt.f32 %v6276_v19 }
0x1574   : > { %7947 = vrsqrt.f32 %v6275_v51 }
0x157d   : > { %v7946_v9 = vpop.eup %7945 }
0x157e   : > { %v7948_v52 = vpop.eup %7947  ;;  %v6280_v15 = vmul.f32 %v7946_v9, %v6264_v17 }
0x157f   : > { %v6279_v33 = vmul.f32 %v7948_v52, %v6263_v46 }
0x1580   : > { %v6286_v54 = vmul.f32 %v6284_v48, %v6280_v15 }
0x1581   : > { %v6285_v49 = vmul.f32 %v6284_v48, %v6279_v33 }
0x1582   : > { %v6292_v30 = vadd.f32 %v6290_v56, %v6286_v54 }
0x1583   : > { %v6291_v12 = vadd.f32 %v6290_v56, %v6285_v49 }
0x1584   : > { %6294 = vst.msk [vmem:[%s8223_s20 + $0x8] sm:$0xff] %vm11766_vm11, %v6292_v30 }
0x1585   : > { %6296 = vst.msk [vmem:[#allocation2 + $0x8] sm:$0xff] %vm11767_vm8, %v6292_v30 }
0x1586   : > { %6293 = vst.msk [vmem:[%s8223_s20] sm:$0xff] %vm11768_vm15, %v6291_v12 }
0x1587   : > { %6295 = vst.msk [vmem:[#allocation2] sm:$0xff] %vm11769_vm7, %v6291_v12 }
0x1588   : > { %7967 = shalt.err (!%p7964_p4)
}
0x1589   : > { %s7968_s20 = scalar_lea.hbm %s10998_s24, 256  ;;  %s7972_s2 = scalar_lea.hbm %s11765_s14, 512 }
0x158a   : > { %p7969_p7 = scmp.ne.s32.totalorder %s10998_s24, %s7968_s20  ;;  %p7973_p10 = scmp.lt.u32.totalorder %s10998_s24, %s11765_s14 }
0x158b   : > { %p7974_p11 = scmp.lt.u32.totalorder %s7972_s2, %s7968_s20  ;;  %p7976_p13 = scmp.lt.u32.totalorder %s7968_s20, %s10998_s24 }
0x158c   : > { %p7970_p8 = pnand %p7969_p7, %p8168_p5 }
0x158d   : > { %p7975_p12 = por %p7974_p11, %p7973_p10 }
0x158e   : > { %p7971_p9 = pneg %p7970_p8 }
0x158f   : > { %p7977_p0 = por %p7976_p13, %p7975_p12 }
0x1591   : > { %p7978_p1 = pnand %p7977_p0, %p7971_p9 }
0x1593   : > { %7981 = shalt.err (!%p7978_p1)
}
0x1594   : > { %s8059_s25 = smov 128  }
0x1595   : > { %7400 = dma.vmem_to_hbm [thread:$0]  (%p8168_p5), %s11000_s18, 256, %s10998_s24, %s11010_s13, %s8059_s25, %s8059_s25, %s11253_s19  }
0x1596 PF: > { %s11771_s28 = sld [smem:[#allocation9_spill]]  ;;  %s11772_s30 = sld [smem:[#allocation6_spill]] }
0x159c   : > { %p7406_p2 = scmp.ge.s32.totalorder %s11771_s28, 2  ;;  %s6326_s16 = sand.u32 1, %s11772_s30  }
0x159d   : > { %s6327_s5 = scalar_lea.sflag [#allocation4], %s6326_s16 }
0x159e   : > { %p7403_p3 = pnand %p7406_p2, %p8172_p6 }
0x15a0   : > { %7999 = dma.done.wait (!%p7403_p3), %s6327_s5, 256  }
0x15a1   : > { %8001 = vsyncadd (!%p7403_p3), %s6327_s5, 4294967040  ;;  %s11774_s28 = sld [smem:[#allocation10_spill]]  ;;  %s11775_s25 = sld [smem:[#allocation7_spill]] }
0x15a2   : > { %s11776_s26 = sld [smem:[#allocation8_spill]]  ;;  %s11777_s27 = sld [smem:[#allocation11_spill]] }
0x15a7   : > { %p23_p4 = scmp.ge.s32.totalorder %s11774_s28, 4  }
0x15a9   :  { %25 = sbr.rel (!%p23_p4) target bundleno = 8 (0x8), region = 132 }
0x15b0   :  { %6332 = vsyncpa [#allocation4], 1 }
0x15b1   :  { %6334 = vsyncpa [#allocation4 + $0x1], 1 }

</bundles_post_ra>
